<compile_context>
chip_gen: v5e
topology: v5e:2x2
jax: 0.10.0
libtpu: 0.0.40
codegen_flags: <defaults>
</compile_context>

<pallas_src>
import functools

import jax
import jax.numpy as jnp
from jax.experimental import pallas as pl
from jax.experimental.pallas import tpu as pltpu

EPS = 1e-5


# ------------------------------- sizing helpers -------------------------------

def _round_up(x, m):
    return (x + m - 1) // m * m


@functools.lru_cache(maxsize=None)
def _vmem_limit_bytes():
    """Generation-aware VMEM budget (v5e/v6e: 128 MiB phys -> 64 MiB; v7x: 64 -> 32)."""
    cap = 128 << 20
    try:
        cap = int(getattr(pltpu.get_tpu_info(), "vmem_capacity_bytes", cap))
    except Exception:
        pass
    return int(min(max(cap // 2, 16 << 20), 64 << 20))


def _conv_target_bytes():
    return min(4 << 20, _vmem_limit_bytes() // 8)


def _max_target_bytes():
    return min(8 << 20, _vmem_limit_bytes() // 4)


def _lane_bytes(c, itemsize):
    """Per-row VMEM bytes for a c-wide (lane-padded to 128) operand."""
    return _round_up(max(int(c), 1), 128) * itemsize


def _pad_points(n):
    """Padded point count: multiple of 16 (small N) / 512 (large N) so a clean tile divides it."""
    return _round_up(n, 16) if n <= 512 else _round_up(n, 512)


def _pad_rows(x, npad):
    n = x.shape[1]
    if npad == n:
        return x
    return jnp.pad(x, ((0, 0), (0, npad - n), (0, 0)))


def _conv_plan(npad, row_bytes, target_bytes, cap_rows):
    """(tile_rows, tiles_per_split, split): biggest 16-multiple tile dividing npad in budget."""
    assert npad % 16 == 0, "point axis must be padded to a multiple of 16"
    limit = max(16, min(cap_rows, npad, target_bytes // max(row_bytes, 1)))
    limit -= limit % 16
    tn = 16
    for t in range(limit, 15, -16):
        if npad % t == 0:
            tn = t
            break
    tiles = npad // tn
    split = 2 if (tiles >= 2 and tiles % 2 == 0) else 1  # keep both v7x TCs busy at small B
    return tn, tiles // split, split


# ------------------------------- Pallas kernels -------------------------------

def _pw_conv_kernel(*refs, has_in_bn, in_relu, tile_rows, valid_n, needs_mask):
    """y = [relu]([in_bn](x)) @ W + b (bf16 out); accumulate per-(batch,split) sum / sumsq."""
    if has_in_bn:
        x_ref, w_ref, b_ref, mean_ref, scale_ref, y_ref, sum_ref, sq_ref = refs
    else:
        x_ref, w_ref, b_ref, y_ref, sum_ref, sq_ref = refs

    t = pl.program_id(2)
    x = x_ref[0]                                               # (tn, Cin)
    if has_in_bn:
        x = (x.astype(jnp.float32) - mean_ref[...]) * scale_ref[...]
        if in_relu:
            x = jnp.maximum(x, 0.0)
    y = jnp.dot(x.astype(jnp.bfloat16), w_ref[0],
                preferred_element_type=jnp.float32) + b_ref[...]
    y_ref[0] = y.astype(y_ref.dtype)                           # bf16 pre-BN activation

    if needs_mask:                                             # zero padded rows for stats
        block = pl.program_id(1) * pl.num_programs(2) + t
        rows = jax.lax.broadcasted_iota(jnp.int32, (tile_rows, 1), 0) + block * tile_rows
        y = jnp.where(rows < valid_n, y, 0.0)

    @pl.when(t == 0)
    def _():
        sum_ref[...] = jnp.zeros_like(sum_ref)
        sq_ref[...] = jnp.zeros_like(sq_ref)

    sum_ref[0] += jnp.sum(y, axis=0, keepdims=True)
    sq_ref[0] += jnp.sum(y * y, axis=0, keepdims=True)


def _pw_conv_max_kernel(*refs, has_in_bn, in_relu, tile_rows, valid_n, needs_mask):
    """Same matmul; only a running per-(batch,split) channel max + stats survive."""
    if has_in_bn:
        x_ref, w_ref, b_ref, mean_ref, scale_ref, mx_ref, sum_ref, sq_ref = refs
    else:
        x_ref, w_ref, b_ref, mx_ref, sum_ref, sq_ref = refs

    t = pl.program_id(2)
    x = x_ref[0]
    if has_in_bn:
        x = (x.astype(jnp.float32) - mean_ref[...]) * scale_ref[...]
        if in_relu:
            x = jnp.maximum(x, 0.0)
    y = jnp.dot(x.astype(jnp.bfloat16), w_ref[0],
                preferred_element_type=jnp.float32) + b_ref[...]

    if needs_mask:
        block = pl.program_id(1) * pl.num_programs(2) + t
        rows = jax.lax.broadcasted_iota(jnp.int32, (tile_rows, 1), 0) + block * tile_rows
        valid = rows < valid_n
        y_mx = jnp.where(valid, y, -jnp.inf)
        y = jnp.where(valid, y, 0.0)
    else:
        y_mx = y

    @pl.when(t == 0)
    def _():
        mx_ref[...] = jnp.full_like(mx_ref, -jnp.inf)
        sum_ref[...] = jnp.zeros_like(sum_ref)
        sq_ref[...] = jnp.zeros_like(sq_ref)

    # TODO(synk): on v6e/v7x the plain channel sum could ride the MXU (ones-row trick)
    # to relieve VALU pressure; kept on the VPU for stat accuracy.
    mx_ref[0] = jnp.maximum(mx_ref[0], jnp.max(y_mx, axis=0, keepdims=True))
    sum_ref[0] += jnp.sum(y, axis=0, keepdims=True)
    sq_ref[0] += jnp.sum(y * y, axis=0, keepdims=True)


def _stn_head_kernel(g_ref, w1_ref, b1_ref, w2_ref, b2_ref, w3_ref, b3_ref, o_ref):
    """fc1 -> BN -> ReLU -> fc2 -> BN -> ReLU -> fc3 on (B, 1024) rows."""
    def bn_rows(h):
        mean = jnp.mean(h, axis=0, keepdims=True)
        var = jnp.mean((h - mean) ** 2, axis=0, keepdims=True)
        return (h - mean) * jax.lax.rsqrt(var + EPS)

    h = jnp.dot(g_ref[...].astype(jnp.bfloat16), w1_ref[...],
                preferred_element_type=jnp.float32) + b1_ref[...]
    h = jnp.maximum(bn_rows(h), 0.0)
    h = jnp.dot(h.astype(jnp.bfloat16), w2_ref[...],
                preferred_element_type=jnp.float32) + b2_ref[...]
    h = jnp.maximum(bn_rows(h), 0.0)
    o_ref[...] = jnp.dot(h.astype(jnp.bfloat16), w3_ref[...],
                         preferred_element_type=jnp.float32) + b3_ref[...]


# ------------------------------ kernel wrappers -------------------------------

def _conv_common(x, w, b, in_bn, out_row_bytes, target_bytes, cap_rows):
    B, npad, cin = x.shape
    if w.ndim == 2:
        w = w[None]                                            # (1, Cin, Cout) shared weight
    cout = w.shape[-1]
    per_batch_w = w.shape[0] != 1
    row_bytes = _lane_bytes(cin, x.dtype.itemsize) + out_row_bytes
    tn, tiles, split = _conv_plan(npad, row_bytes, target_bytes, cap_rows)

    inputs = [x, w.astype(jnp.bfloat16), b.reshape(1, cout).astype(jnp.float32)]
    w_idx = ((lambda bb, ss, tt: (bb, 0, 0)) if per_batch_w
             else (lambda bb, ss, tt: (0, 0, 0)))
    in_specs = [
        pl.BlockSpec((1, tn, cin), lambda bb, ss, tt, _t=tiles: (bb, ss * _t + tt, 0)),
        pl.BlockSpec((1, cin, cout), w_idx),
        pl.BlockSpec((1, cout), lambda bb, ss, tt: (0, 0)),
    ]
    if in_bn is not None:
        mean, scale = in_bn
        inputs += [mean.astype(jnp.float32), scale.astype(jnp.float32)]
        in_specs += [pl.BlockSpec((1, cin), lambda bb, ss, tt: (0, 0)),
                     pl.BlockSpec((1, cin), lambda bb, ss, tt: (0, 0))]
    return B, npad, cin, cout, tn, tiles, split, inputs, in_specs


def pointwise_conv(x, w, b, *, valid_n=None, in_bn=None, in_relu=False):
    """Fused [bn(+relu)] -> (x @ W + b).  Returns (y bf16, channel sum, channel sumsq)."""
    npad = x.shape[1]
    if valid_n is None:
        valid_n = npad
    cout = w.shape[-1]
    out_row = _lane_bytes(cout, 2) + _lane_bytes(cout, 4)      # bf16 out block + f32 temp
    B, npad, cin, cout, tn, tiles, split, inputs, in_specs = _conv_common(
        x, w, b, in_bn, out_row, _conv_target_bytes(), 4096)
    kernel = functools.partial(_pw_conv_kernel, has_in_bn=in_bn is not None,
                               in_relu=in_relu, tile_rows=tn, valid_n=valid_n,
                               needs_mask=npad != valid_n)
    y_spec = pl.BlockSpec((1, tn, cout), lambda bb, ss, tt, _t=tiles: (bb, ss * _t + tt, 0))
    stat_spec = pl.BlockSpec((1, 1, cout), lambda bb, ss, tt, _s=split: (bb * _s + ss, 0, 0))
    y, ssum, ssq = pl.pallas_call(
        kernel,
        out_shape=(jax.ShapeDtypeStruct((B, npad, cout), jnp.bfloat16),
                   jax.ShapeDtypeStruct((B * split, 1, cout), jnp.float32),
                   jax.ShapeDtypeStruct((B * split, 1, cout), jnp.float32)),
        grid=(B, split, tiles),
        in_specs=in_specs,
        out_specs=(y_spec, stat_spec, stat_spec),
        compiler_params=pltpu.CompilerParams(
            dimension_semantics=("parallel", "parallel", "arbitrary"),
            vmem_limit_bytes=_vmem_limit_bytes()),
    )(*inputs)
    return y, ssum, ssq


def pointwise_conv_max(x, w, b, *, valid_n=None, in_bn=None, in_relu=False):
    """Fused [bn(+relu)] -> matmul -> running max over points (pre-BN output max)."""
    npad = x.shape[1]
    if valid_n is None:
        valid_n = npad
    cout = w.shape[-1]
    out_row = 2 * _lane_bytes(cout, 4)                         # f32 y + y*y temporaries
    B, npad, cin, cout, tn, tiles, split, inputs, in_specs = _conv_common(
        x, w, b, in_bn, out_row, _max_target_bytes(), 2048)
    kernel = functools.partial(_pw_conv_max_kernel, has_in_bn=in_bn is not None,
                               in_relu=in_relu, tile_rows=tn, valid_n=valid_n,
                               needs_mask=npad != valid_n)
    stat_spec = pl.BlockSpec((1, 1, cout), lambda bb, ss, tt, _s=split: (bb * _s + ss, 0, 0))
    mx, ssum, ssq = pl.pallas_call(
        kernel,
        out_shape=(jax.ShapeDtypeStruct((B * split, 1, cout), jnp.float32),
                   jax.ShapeDtypeStruct((B * split, 1, cout), jnp.float32),
                   jax.ShapeDtypeStruct((B * split, 1, cout), jnp.float32)),
        grid=(B, split, tiles),
        in_specs=in_specs,
        out_specs=(stat_spec, stat_spec, stat_spec),
        compiler_params=pltpu.CompilerParams(
            dimension_semantics=("parallel", "parallel", "arbitrary"),
            vmem_limit_bytes=_vmem_limit_bytes()),
    )(*inputs)
    mx = jnp.max(mx.reshape(B, split, cout), axis=1)
    return mx, ssum, ssq


def stn_fc_head(g, fc1, fc2, fc3):
    """Tiny fc1->bn->relu->fc2->bn->relu->fc3 chain on (B, 1024) rows."""
    B = g.shape[0]
    kk = fc3["w"].shape[1]
    args = [g,
            fc1["w"].astype(jnp.bfloat16), fc1["b"].reshape(1, -1),
            fc2["w"].astype(jnp.bfloat16), fc2["b"].reshape(1, -1),
            fc3["w"].astype(jnp.bfloat16), fc3["b"].reshape(1, -1)]
    return pl.pallas_call(
        _stn_head_kernel,
        out_shape=jax.ShapeDtypeStruct((B, kk), jnp.float32),
        in_specs=[pl.BlockSpec(memory_space=pltpu.MemorySpace.VMEM)] * 7,
        out_specs=pl.BlockSpec(memory_space=pltpu.MemorySpace.VMEM),
        compiler_params=pltpu.CompilerParams(vmem_limit_bytes=_vmem_limit_bytes()),
    )(*args)


# ----------------------------- BatchNorm utilities -----------------------------

def stats_to_bn(ssum, ssq, count):
    """Per-(batch,split) sums -> global (mean, 1/sqrt(var+eps)); biased var, training mode."""
    c = ssum.shape[-1]
    s = jnp.sum(ssum.reshape(-1, c), axis=0, keepdims=True)    # (1, C)
    sq = jnp.sum(ssq.reshape(-1, c), axis=0, keepdims=True)    # (1, C)
    mean = s / count
    # Note: E[x^2]-E[x]^2 in f32 can lose precision at very large B*N vs PyTorch.
    var = jnp.maximum(sq / count - mean * mean, 0.0)
    return mean, jax.lax.rsqrt(var + EPS)


def apply_bn(x, bn):
    mean, scale = bn
    return (x - mean) * scale


# --------------------------------- parameters ----------------------------------

def init_params(key):
    keys = iter(jax.random.split(key, 32))

    def conv(cin, cout):
        # PyTorch Conv1d default init (uniform); stored channels-last (Cin, Cout).
        bound = 1.0 / (cin ** 0.5)
        w = jax.random.uniform(next(keys), (cin, cout), jnp.float32, -bound, bound)
        b = jax.random.uniform(next(keys), (cout,), jnp.float32, -bound, bound)
        return {"w": w, "b": b}

    def fc(cin, cout):
        # initialize_weights(): kaiming_normal_ weight, zero bias; stored (Cin, Cout).
        w = jax.random.normal(next(keys), (cin, cout), jnp.float32) * (2.0 / cin) ** 0.5
        b = jnp.zeros((cout,), jnp.float32)
        return {"w": w, "b": b}

    def stn(k_dim):
        return {"conv1": conv(k_dim, 64), "conv2": conv(64, 128),
                "conv3": conv(128, 1024), "fc1": fc(1024, 512),
                "fc2": fc(512, 256), "fc3": fc(256, k_dim * k_dim)}

    return {"stn": stn(3), "fstn": stn(64),
            "conv1": conv(3, 64), "conv2": conv(64, 128), "conv3": conv(128, 1024)}


# --------------------------------- forward pass ---------------------------------

def stn_forward(p, x, k_dim, valid_n, in_bn=None):
    """STN3d / STNkd.  x: (B, Npad, k) — raw if in_bn is None, else pre-BN activation."""
    B = x.shape[0]
    y1, s1, q1 = pointwise_conv(x, p["conv1"]["w"], p["conv1"]["b"],
                                valid_n=valid_n, in_bn=in_bn, in_relu=in_bn is not None)
    bn1 = stats_to_bn(s1, q1, B * valid_n)
    y2, s2, q2 = pointwise_conv(y1, p["conv2"]["w"], p["conv2"]["b"],
                                valid_n=valid_n, in_bn=bn1, in_relu=True)
    bn2 = stats_to_bn(s2, q2, B * valid_n)
    mx, s3, q3 = pointwise_conv_max(y2, p["conv3"]["w"], p["conv3"]["b"],
                                    valid_n=valid_n, in_bn=bn2, in_relu=True)
    bn3 = stats_to_bn(s3, q3, B * valid_n)
    g = jnp.maximum(apply_bn(mx, bn3), 0.0)        # == max_n relu(bn3(conv3(.)))
    out = stn_fc_head(g, p["fc1"], p["fc2"], p["fc3"])
    # identity-add is commented out in the original PyTorch source -> omitted.
    return out.reshape(B, k_dim, k_dim)


def pointnet_feature(params, x_bcn, *, global_feat=True, feature_transform=True):
    """x_bcn: (B, 3, N) float32 (PyTorch NCW). Returns (feat, trans, trans_feat)."""
    B, _, N = x_bcn.shape
    npad = _pad_points(N)
    # TODO(synk): keep x in (B,3,N) and compute conv1 as W^T @ x to avoid the lane-sparse
    # (N,3) layout + transpose (modest win, applies to main conv1 and its STN twin).
    x = jnp.transpose(x_bcn, (0, 2, 1))                                # (B, N, 3)
    x = _pad_rows(x, npad)                                             # (B, Npad, 3)

    trans = stn_forward(params["stn"], x, 3, valid_n=N)                # (B, 3, 3)

    # conv1 fused with bmm(x, trans): per-batch effective weight trans @ W1.
    w1_eff = jnp.einsum("bij,jo->bio", trans, params["conv1"]["w"])    # (B, 3, 64)
    y1, s1, q1 = pointwise_conv(x, w1_eff, params["conv1"]["b"], valid_n=N)
    bn1 = stats_to_bn(s1, q1, B * N)

    if feature_transform:
        trans_feat = stn_forward(params["fstn"], y1, 64, valid_n=N, in_bn=bn1)
    else:
        trans_feat = None

    if global_feat:
        if feature_transform:
            w2_eff = jnp.einsum("bij,jo->bio", trans_feat, params["conv2"]["w"])
        else:
            w2_eff = params["conv2"]["w"]
        # conv2 fused with bn1+relu (and the feature-transform bmm) on y1.
        y2, s2, q2 = pointwise_conv(y1, w2_eff, params["conv2"]["b"],
                                    valid_n=N, in_bn=bn1, in_relu=True)
        bn2 = stats_to_bn(s2, q2, B * N)
        # conv3 + bn3 + max fused: (B*N, 1024) never materialized in HBM.
        mx, s3, q3 = pointwise_conv_max(y2, params["conv3"]["w"], params["conv3"]["b"],
                                        valid_n=N, in_bn=bn2, in_relu=True)
        bn3 = stats_to_bn(s3, q3, B * N)
        g = apply_bn(mx, bn3)                                          # bn3(max) == max(bn3)
        return g, trans, trans_feat

    # non-global branch: per-point features are needed explicitly.
    if feature_transform:
        zb = jnp.zeros((64,), jnp.float32)
        pointfeat, _, _ = pointwise_conv(y1, trans_feat, zb, valid_n=N,
                                         in_bn=bn1, in_relu=True)      # relu(bn1(y1)) @ T
    else:
        mean1, scale1 = bn1
        pointfeat = jnp.maximum((y1.astype(jnp.float32) - mean1[None]) * scale1[None], 0.0)
    y2, s2, q2 = pointwise_conv(pointfeat, params["conv2"]["w"], params["conv2"]["b"],
                                valid_n=N)
    bn2 = stats_to_bn(s2, q2, B * N)
    mx, s3, q3 = pointwise_conv_max(y2, params["conv3"]["w"], params["conv3"]["b"],
                                    valid_n=N, in_bn=bn2, in_relu=True)
    bn3 = stats_to_bn(s3, q3, B * N)
    g = apply_bn(mx, bn3)                                              # (B, 1024)
    gexp = jnp.broadcast_to(g[:, None, :], (B, N, 1024))
    pf = pointfeat[:, :N, :].astype(jnp.float32)
    out = jnp.concatenate([gexp, pf], axis=2)                          # (B, N, 1088)
    return jnp.transpose(out, (0, 2, 1)), trans, trans_feat


# ------------------------------------- main -------------------------------------

def _assert_close(name, got, want, atol, rtol):
    got = jnp.asarray(got, jnp.float32)
    want = jnp.asarray(want, jnp.float32)
    excess = jnp.max(jnp.abs(got - want) - (atol + rtol * jnp.abs(want)))
    if not bool(excess <= 0):
        raise AssertionError(f"{name}: mismatch (excess error {float(excess):.5f})")


if __name__ == "__main__":
    key = jax.random.PRNGKey(0)
    pkey, xkey, ukey1, ukey2 = jax.random.split(key, 4)

    # ---- unit check 1: masked + core-split pointwise conv vs XLA reference ----
    k1, k2, k3 = jax.random.split(ukey1, 3)
    nu, cin_u, cout_u = 8200, 64, 64
    xu = jax.random.normal(k1, (1, nu, cin_u), jnp.float32)
    wu = jax.random.normal(k2, (cin_u, cout_u), jnp.float32) * (1.0 / cin_u ** 0.5)
    bu = jax.random.normal(k3, (cout_u,), jnp.float32) * 0.1
    y, s, q = pointwise_conv(_pad_rows(xu, _pad_points(nu)), wu, bu, valid_n=nu)
    y_ref = jnp.dot(xu[0].astype(jnp.bfloat16), wu.astype(jnp.bfloat16),
                    preferred_element_type=jnp.float32) + bu[None, :]
    _assert_close("conv.y", y[0, :nu], y_ref, atol=0.05, rtol=0.02)
    _assert_close("conv.sum", jnp.sum(s.reshape(-1, cout_u), 0), jnp.sum(y_ref, 0),
                  atol=0.5, rtol=0.01)
    _assert_close("conv.sumsq", jnp.sum(q.reshape(-1, cout_u), 0), jnp.sum(y_ref * y_ref, 0),
                  atol=2.0, rtol=0.01)

    # ---- unit check 2: masked fused bn+relu -> conv -> max vs XLA reference ----
    k1, k2, k3, k4, k5 = jax.random.split(ukey2, 5)
    nv, cin_v, cout_v = 203, 128, 256
    xv = jax.random.normal(k1, (2, nv, cin_v), jnp.float32)
    wv = jax.random.normal(k2, (cin_v, cout_v), jnp.float32) * (1.0 / cin_v ** 0.5)
    bv = jax.random.normal(k3, (cout_v,), jnp.float32) * 0.1
    mean_v = 0.1 * jax.random.normal(k4, (1, cin_v), jnp.float32)
    scale_v = jax.random.uniform(k5, (1, cin_v), jnp.float32, 0.5, 1.5)
    mxv, sv, qv = pointwise_conv_max(_pad_rows(xv, _pad_points(nv)), wv, bv, valid_n=nv,
                                     in_bn=(mean_v, scale_v), in_relu=True)
    xa = jnp.maximum((xv - mean_v[None]) * scale_v[None], 0.0)
    yv_ref = jnp.einsum("bnc,co->bno", xa.astype(jnp.bfloat16), wv.astype(jnp.bfloat16),
                        preferred_element_type=jnp.float32) + bv[None, None, :]
    _assert_close("max.mx", mxv, jnp.max(yv_ref, axis=1), atol=0.05, rtol=0.02)
    _assert_close("max.sum", jnp.sum(sv.reshape(2, -1, cout_v), 1), jnp.sum(yv_ref, 1),
                  atol=0.5, rtol=0.01)
    _assert_close("max.sumsq", jnp.sum(qv.reshape(2, -1, cout_v), 1),
                  jnp.sum(yv_ref * yv_ref, 1), atol=2.0, rtol=0.01)

    # ---- full PointNetfeature forward (global_feat=True, feature_transform=True) ----
    params = init_params(pkey)
    B, C, N = 2, 3, 500                                        # small cloud; exercises padding
    x = jax.random.normal(xkey, (B, C, N), jnp.float32)

    fwd = jax.jit(pointnet_feature, static_argnames=("global_feat", "feature_transform"))
    feat, trans, trans_feat = fwd(params, x, global_feat=True, feature_transform=True)
    jax.block_until_ready((feat, trans, trans_feat))

    assert feat.shape == (B, 1024)
    assert trans.shape == (B, 3, 3)
    assert trans_feat.shape == (B, 64, 64)
    assert bool(jnp.isfinite(feat).all())
    assert bool(jnp.isfinite(trans).all())
    assert bool(jnp.isfinite(trans_feat).all())
    print("KERNEL_OK")
</pallas_src>

<mosaic_0001>
module attributes {stable_mosaic.version = 11 : i64} {
  func.func @_pw_conv_kernel(%arg0: i32, %arg1: i32, %arg2: i32, %arg3: memref<1x2176x64xf32, #tpu.memory_space<vmem>>, %arg4: memref<1x64x64xbf16, #tpu.memory_space<vmem>>, %arg5: memref<1x64xf32, #tpu.memory_space<vmem>>, %arg6: memref<1x2176x64xbf16, #tpu.memory_space<vmem>>, %arg7: memref<1x1x64xf32, #tpu.memory_space<vmem>>, %arg8: memref<1x1x64xf32, #tpu.memory_space<vmem>>) attributes {dimension_semantics = [#tpu.dimension_semantics<parallel>, #tpu.dimension_semantics<parallel>, #tpu.dimension_semantics<arbitrary>], iteration_bounds = array<i64: 1, 2, 2>, scalar_prefetch = 0 : i64, scratch_operands = 0 : i64, tpu.core_type = #tpu.core_type<tc>, window_params = [{transform_indices = @transform_0, window_bounds = array<i64: 1, 2176, 64>}, {pipeline_mode = #tpu.pipeline_mode<synchronous>, transform_indices = @transform_1, window_bounds = array<i64: 1, 64, 64>}, {pipeline_mode = #tpu.pipeline_mode<synchronous>, transform_indices = @transform_2, window_bounds = array<i64: 1, 64>}, {transform_indices = @transform_3, window_bounds = array<i64: 1, 2176, 64>}, {transform_indices = @transform_4, window_bounds = array<i64: 1, 1, 64>}, {transform_indices = @transform_5, window_bounds = array<i64: 1, 1, 64>}]} {
    %c0 = arith.constant 0 : index
    %c0_0 = arith.constant 0 : index
    %c0_1 = arith.constant 0 : index
    %0 = vector.load %arg3[%c0, %c0_0, %c0_1] : memref<1x2176x64xf32, #tpu.memory_space<vmem>>, vector<1x2176x64xf32>
    %1 = vector.shape_cast %0 : vector<1x2176x64xf32> to vector<2176x64xf32>
    %2 = arith.truncf %1 : vector<2176x64xf32> to vector<2176x64xbf16>
    %c0_2 = arith.constant 0 : index
    %c0_3 = arith.constant 0 : index
    %c0_4 = arith.constant 0 : index
    %3 = vector.load %arg4[%c0_2, %c0_3, %c0_4] : memref<1x64x64xbf16, #tpu.memory_space<vmem>>, vector<1x64x64xbf16>
    %4 = vector.shape_cast %3 : vector<1x64x64xbf16> to vector<64x64xbf16>
    %cst = arith.constant dense<0.000000e+00> : vector<2176x64xf32>
    %5 = tpu.matmul %2, %4, %cst {dimension_numbers = #tpu.dot_dimension_numbers<[1], [0], [0], [1], [0, 0, 1, 1], [], []>} : vector<2176x64xbf16>, vector<64x64xbf16>, vector<2176x64xf32> -> vector<2176x64xf32>
    %c0_5 = arith.constant 0 : index
    %c0_6 = arith.constant 0 : index
    %6 = vector.load %arg5[%c0_5, %c0_6] : memref<1x64xf32, #tpu.memory_space<vmem>>, vector<1x64xf32>
    %7 = vector.broadcast %6 : vector<1x64xf32> to vector<2176x64xf32>
    %8 = arith.addf %5, %7 : vector<2176x64xf32>
    %9 = arith.truncf %8 : vector<2176x64xf32> to vector<2176x64xbf16>
    %c0_7 = arith.constant 0 : index
    %c0_8 = arith.constant 0 : index
    %c0_9 = arith.constant 0 : index
    %10 = vector.load %arg6[%c0_7, %c0_8, %c0_9] : memref<1x2176x64xbf16, #tpu.memory_space<vmem>>, vector<1x2176x64xbf16>
    %11 = vector.shape_cast %10 : vector<1x2176x64xbf16> to vector<2176x64xbf16>
    %12 = vector.shape_cast %9 : vector<2176x64xbf16> to vector<1x2176x64xbf16>
    tpu.vector_store %arg6[%c0_7, %c0_8, %c0_9], %12 {strides = array<i32>} : memref<1x2176x64xbf16, #tpu.memory_space<vmem>>, vector<1x2176x64xbf16>,
    %c2_i32 = arith.constant 2 : i32
    %13 = arith.muli %arg1, %c2_i32 : i32
    %14 = arith.addi %13, %arg2 : i32
    %15 = tpu.iota {dimensions = array<i32: 0>} : vector<2176x1xi32>
    %c2176_i32 = arith.constant 2176 : i32
    %16 = arith.muli %14, %c2176_i32 : i32
    %17 = vector.broadcast %16 : i32 to vector<2176x1xi32>
    %18 = arith.addi %15, %17 : vector<2176x1xi32>
    %c8200_i32 = arith.constant 8200 : i32
    %19 = vector.broadcast %c8200_i32 : i32 to vector<2176x1xi32>
    %20 = arith.cmpi slt, %18, %19 : vector<2176x1xi32>
    %cst_10 = arith.constant 0.000000e+00 : f32
    %21 = vector.shape_cast %20 : vector<2176x1xi1> to vector<2176x1xi1>
    %22 = vector.broadcast %21 : vector<2176x1xi1> to vector<2176x64xi1>
    %23 = vector.broadcast %cst_10 : f32 to vector<2176x64xf32>
    %24 = arith.select %22, %8, %23 : vector<2176x64xi1>, vector<2176x64xf32>
    %c0_i32 = arith.constant 0 : i32
    %25 = arith.cmpi eq, %arg2, %c0_i32 : i32
    %26 = arith.extui %25 : i1 to i32
    %c0_i32_11 = arith.constant 0 : i32
    %27 = arith.cmpi ne, %26, %c0_i32_11 : i32
    scf.if %27 {
      %cst_26 = arith.constant 0.000000e+00 : f32
      %45 = vector.broadcast %cst_26 : f32 to vector<1x1x64xf32>
      %c0_27 = arith.constant 0 : index
      %c0_28 = arith.constant 0 : index
      %c0_29 = arith.constant 0 : index
      %46 = vector.load %arg7[%c0_27, %c0_28, %c0_29] : memref<1x1x64xf32, #tpu.memory_space<vmem>>, vector<1x1x64xf32>
      tpu.vector_store %arg7[%c0_27, %c0_28, %c0_29], %45 {strides = array<i32>} : memref<1x1x64xf32, #tpu.memory_space<vmem>>, vector<1x1x64xf32>,
      %cst_30 = arith.constant 0.000000e+00 : f32
      %47 = vector.broadcast %cst_30 : f32 to vector<1x1x64xf32>
      %c0_31 = arith.constant 0 : index
      %c0_32 = arith.constant 0 : index
      %c0_33 = arith.constant 0 : index
      %48 = vector.load %arg8[%c0_31, %c0_32, %c0_33] : memref<1x1x64xf32, #tpu.memory_space<vmem>>, vector<1x1x64xf32>
      tpu.vector_store %arg8[%c0_31, %c0_32, %c0_33], %47 {strides = array<i32>} : memref<1x1x64xf32, #tpu.memory_space<vmem>>, vector<1x1x64xf32>,
    } else {
    }
    %c0_12 = arith.constant 0 : index
    %c0_13 = arith.constant 0 : index
    %c0_14 = arith.constant 0 : index
    %28 = vector.load %arg7[%c0_12, %c0_13, %c0_14] : memref<1x1x64xf32, #tpu.memory_space<vmem>>, vector<1x1x64xf32>
    %29 = vector.shape_cast %28 : vector<1x1x64xf32> to vector<1x64xf32>
    %cst_15 = arith.constant dense<0.000000e+00> : vector<64xf32>
    %30 = vector.multi_reduction <add>, %24, %cst_15 [0] : vector<2176x64xf32> to vector<64xf32>
    %31 = vector.shape_cast %30 : vector<64xf32> to vector<1x64xf32>
    %32 = arith.addf %29, %31 : vector<1x64xf32>
    %c0_16 = arith.constant 0 : index
    %c0_17 = arith.constant 0 : index
    %c0_18 = arith.constant 0 : index
    %33 = vector.load %arg7[%c0_16, %c0_17, %c0_18] : memref<1x1x64xf32, #tpu.memory_space<vmem>>, vector<1x1x64xf32>
    %34 = vector.shape_cast %33 : vector<1x1x64xf32> to vector<1x64xf32>
    %35 = vector.shape_cast %32 : vector<1x64xf32> to vector<1x1x64xf32>
    tpu.vector_store %arg7[%c0_16, %c0_17, %c0_18], %35 {strides = array<i32>} : memref<1x1x64xf32, #tpu.memory_space<vmem>>, vector<1x1x64xf32>,
    %c0_19 = arith.constant 0 : index
    %c0_20 = arith.constant 0 : index
    %c0_21 = arith.constant 0 : index
    %36 = vector.load %arg8[%c0_19, %c0_20, %c0_21] : memref<1x1x64xf32, #tpu.memory_space<vmem>>, vector<1x1x64xf32>
    %37 = vector.shape_cast %36 : vector<1x1x64xf32> to vector<1x64xf32>
    %38 = arith.mulf %24, %24 : vector<2176x64xf32>
    %cst_22 = arith.constant dense<0.000000e+00> : vector<64xf32>
    %39 = vector.multi_reduction <add>, %38, %cst_22 [0] : vector<2176x64xf32> to vector<64xf32>
    %40 = vector.shape_cast %39 : vector<64xf32> to vector<1x64xf32>
    %41 = arith.addf %37, %40 : vector<1x64xf32>
    %c0_23 = arith.constant 0 : index
    %c0_24 = arith.constant 0 : index
    %c0_25 = arith.constant 0 : index
    %42 = vector.load %arg8[%c0_23, %c0_24, %c0_25] : memref<1x1x64xf32, #tpu.memory_space<vmem>>, vector<1x1x64xf32>
    %43 = vector.shape_cast %42 : vector<1x1x64xf32> to vector<1x64xf32>
    %44 = vector.shape_cast %41 : vector<1x64xf32> to vector<1x1x64xf32>
    tpu.vector_store %arg8[%c0_23, %c0_24, %c0_25], %44 {strides = array<i32>} : memref<1x1x64xf32, #tpu.memory_space<vmem>>, vector<1x1x64xf32>,
    return
  }
  func.func @transform_0(%arg0: i32, %arg1: i32, %arg2: i32) -> (i32, i32, i32) {
    %c2_i32 = arith.constant 2 : i32
    %0 = arith.muli %arg1, %c2_i32 : i32
    %1 = arith.addi %0, %arg2 : i32
    %c0_i32 = arith.constant 0 : i32
    %c0_i32_0 = arith.constant 0 : i32
    return %arg0, %1, %c0_i32 : i32, i32, i32
  }
  func.func @transform_1(%arg0: i32, %arg1: i32, %arg2: i32) -> (i32, i32, i32) {
    %c0_i32 = arith.constant 0 : i32
    %c0_i32_0 = arith.constant 0 : i32
    %c0_i32_1 = arith.constant 0 : i32
    %c0_i32_2 = arith.constant 0 : i32
    return %c0_i32, %c0_i32_0, %c0_i32_1 : i32, i32, i32
  }
  func.func @transform_2(%arg0: i32, %arg1: i32, %arg2: i32) -> (i32, i32) {
    %c0_i32 = arith.constant 0 : i32
    %c0_i32_0 = arith.constant 0 : i32
    %c0_i32_1 = arith.constant 0 : i32
    return %c0_i32, %c0_i32_0 : i32, i32
  }
  func.func @transform_3(%arg0: i32, %arg1: i32, %arg2: i32) -> (i32, i32, i32) {
    %c2_i32 = arith.constant 2 : i32
    %0 = arith.muli %arg1, %c2_i32 : i32
    %1 = arith.addi %0, %arg2 : i32
    %c0_i32 = arith.constant 0 : i32
    %c0_i32_0 = arith.constant 0 : i32
    return %arg0, %1, %c0_i32 : i32, i32, i32
  }
  func.func @transform_4(%arg0: i32, %arg1: i32, %arg2: i32) -> (i32, i32, i32) {
    %c2_i32 = arith.constant 2 : i32
    %0 = arith.muli %arg0, %c2_i32 : i32
    %1 = arith.addi %0, %arg1 : i32
    %c0_i32 = arith.constant 0 : i32
    %c0_i32_0 = arith.constant 0 : i32
    %c0_i32_1 = arith.constant 0 : i32
    return %1, %c0_i32, %c0_i32_0 : i32, i32, i32
  }
  func.func @transform_5(%arg0: i32, %arg1: i32, %arg2: i32) -> (i32, i32, i32) {
    %c2_i32 = arith.constant 2 : i32
    %0 = arith.muli %arg0, %c2_i32 : i32
    %1 = arith.addi %0, %arg1 : i32
    %c0_i32 = arith.constant 0 : i32
    %c0_i32_0 = arith.constant 0 : i32
    %c0_i32_1 = arith.constant 0 : i32
    return %1, %c0_i32, %c0_i32_0 : i32, i32, i32
  }
}

</mosaic_0001>

<bundles_post_ra>
// kernel: tpu_custom_call.1
= control target key start
LH: loop header
LB: loop body
LE: loop exit
PB: predicated region body
PF: predicated region fallthrough
CT: control target
= control target key end

     0   :  { %11 = vsyncpa [#allocation3], 0  ;;  %s10200_s0 = inlined_call_operand.vmem [shape: f32[1,8704,64], index: 0, kind: input, shape index: {}]   ;;  %s10201_s1 = inlined_call_operand.vmem [shape: bf16[1,64,64], index: 1, kind: input, shape index: {}]   ;;  %s10202_s2 = inlined_call_operand.vmem [shape: f32[1,64], index: 2, kind: input, shape index: {}]   ;;  %s10203_s3 = inlined_call_operand.vmem [shape: bf16[1,8704,64], index: 3, kind: output, shape index: {0}]   ;;  %s10204_s4 = inlined_call_operand.hbm [shape: f32[2,1,64], index: 4, kind: output, shape index: {1}]   ;;  %s10205_s5 = inlined_call_operand.hbm [shape: f32[2,1,64], index: 5, kind: output, shape index: {2}]  }
   0x1   :  { %13 = vsyncpa [#allocation3 + $0x1], 0 }
   0x2   :  { %14 = vsyncpa [#allocation5], 0 }
   0x3   :  { %16 = vsyncpa [#allocation5 + $0x1], 0  ;;  %s6058_s18 = smov 0   ;;  %s6060_s19 = smov 0  }
   0x4   :  { %s6062_s20 = smov 0   ;;  %s6064_s21 = smov 0  }
   0x5   :  { %s6066_s22 = smov 0   ;;  %s6068_s23 = smov 0  }
   0x6   :  { %s6070_s24 = smov 0   ;;  %s6072_s25 = smov 0  }
   0x7 LB: > { %s5632_s26 = sadd.s32 4294967295, %s6025_s25   ;;  %s5633_s27 = sadd.s32 4294967294, %s6025_s25   ;;  %s6025_s25 = sphi %s6072_s25, %s22_s25   ;;  %s6021_s24 = sphi %s6070_s24, %s10883_s24   ;;  %s6017_s23 = sphi %s6068_s23, %s10882_s23   ;;  %s6013_s22 = sphi %s6066_s22, %s10881_s22   ;;  %s6009_s21 = sphi %s6064_s21, %s10880_s21   ;;  %s6005_s20 = sphi %s6062_s20, %s10879_s20   ;;  %s6001_s19 = sphi %s6060_s19, %s10878_s19   ;;  %s5997_s18 = sphi %s6058_s18, %s10877_s18  }
   0x8   : > { %s34_s28 = sadd.s32 1, %s6017_s23  ;;  %s37_s29 = sadd.s32 1, %s6021_s24 }
   0x9   : > { %p35_p0 = scmp.ge.s32.totalorder %s34_s28, 2  ;;  %p168_p1 = scmp.ne.s32.totalorder %s6005_s20, %s6001_s19 }
   0xa   : > { %p169_p2 = scmp.eq.s32.totalorder %s5632_s26, 3  ;;  %p174_p4 = scmp.ne.s32.totalorder %s6001_s19, %s5997_s18 }
   0xb   : > { %s10885_s28 = smov (%p35_p0, %s34_s28), 0  ;;  %s10887_s29 = smov (!%p35_p0, %s37_s29), %s6021_s24 }
   0xc   : > { %p6107_p3 = por %p169_p2, %p168_p1  ;;  %p39_p5 = scmp.ge.s32.totalorder %s10887_s29, 2 }
   0xd   : > { %p175_p6 = scmp.eq.s32.totalorder %s5633_s27, 3  ;;  %p5640_p7 = scmp.ge.s32.totalorder %s6025_s25, 1 }
   0xe   : > { %p246_p8 = scmp.lt.s32.totalorder %s6025_s25, 5  ;;  %s10889_s29 = smov (%p39_p5, %s10887_s29), 0 }
   0xf   : > { %p6117_p9 = por %p175_p6, %p174_p4  ;;  %s155_s7 = ssub.s32 %s6021_s24, %s10889_s29 }
  0x10   : > { %p247_p10 = pnand %p5640_p7, %p246_p8  ;;  %s158_s8 = sadd.s32 1, %s6005_s20 }
  0x11   : > { %p156_p11 = scmp.eq.s32.totalorder %s155_s7, 0 }
  0x12   : > { %250 = sbr.rel (%p247_p10) target bundleno = 1291 (0x50b), region = 32 }
  0x13   : > { %s6125_s9 = scalar_select %p156_p11, %s6005_s20, %s158_s8  }
  0x17   : > { %s6128_s10 = sand.u32 1, %s6001_s19   ;;  %v5804_v0 = vld [vmem:[%s10201_s1 + $0x18] sm:$0xff]  ;;  %s5641_s13 = sshll.u32 %s6013_s22, 1  ;;  %v5803_v1 = vld [vmem:[%s10201_s1 + $0x10] sm:$0xff]  ;;  %v5802_v2 = vld [vmem:[%s10201_s1 + $0x8] sm:$0xff]  ;;  %vm771_vm0 = vcmask 523264  }
  0x18   : > { %1184 = vmatpush.bf16.msra.mxu0 %v5804_v0  ;;  %5805 = vmatpush.bf16.msra.mxu1 %v5804_v0  ;;  %s6138_s16 = sadd.s32 %s6009_s21, %s5641_s13  ;;  %v5801_v3 = vld [vmem:[%s10201_s1] sm:$0xff]  ;;  %vm2141_vm1 = vcmask 519168   ;;  %s8769_s8 = scalar_lea.vmem [#allocation4], %s6128_s10 }
  0x19   : > { %5806 = vmatpush.bf16.msra.mxu2 %v5804_v0  ;;  %5807 = vmatpush.bf16.msra.mxu3 %v5804_v0  ;;  %s296_s17 = smul.u32 272, %s6138_s16  ;;  %p5798_p13 = scmp.ne.s32.totalorder %s6009_s21, 0 }
  0x1a   : > { %s2689_s15 = smul.u32 2176, %s6138_s16 }
  0x1b   : > { %p299_p12 = scmp.lt.s32.totalorder %s296_s17, 1087 }
  0x1c   : > { %1185 = vmatpush.bf16.msra.mxu0 %v5803_v1  ;;  %5808 = vmatpush.bf16.msra.mxu1 %v5803_v1 }
  0x1d   : > { %5809 = vmatpush.bf16.msra.mxu2 %v5803_v1  ;;  %5810 = vmatpush.bf16.msra.mxu3 %v5803_v1  ;;  %s10891_s17 = smov (!%p299_p12, %s296_s17), 1087 }
  0x1e   : > { %s5642_s7 = sshll.u32 %s10891_s17, 3  ;;  %s5644_s16 = sshll.u32 %s10891_s17, 2 }
  0x1f   : > { %s6153_s14 = scalar_lea.vmem %s10200_s0, %s5642_s7  ;;  %s6285_s17 = scalar_lea.vmem %s10203_s3, %s5644_s16 }
  0x20   : > { %1186 = vmatpush.bf16.msra.mxu0 %v5802_v2  ;;  %5811 = vmatpush.bf16.msra.mxu1 %v5802_v2  ;;  %v327_v4 = vld [vmem:[%s6153_s14] sm:$0xff]  ;;  %v328_v5 = vld [vmem:[%s6153_s14 + $0x8] sm:$0xff]  ;;  %v329_v16 = vld [vmem:[%s6153_s14 + $0x10] sm:$0xff]  ;;  %s8766_s7 = scalar_lea.vmem [#allocation2], %s6128_s10 }
  0x21   : > { %5812 = vmatpush.bf16.msra.mxu2 %v5802_v2  ;;  %5813 = vmatpush.bf16.msra.mxu3 %v5802_v2  ;;  %v395_v6 = vld [vmem:[%s6153_s14 + $0x220] sm:$0xff]  ;;  %v396_v7 = vld [vmem:[%s6153_s14 + $0x228] sm:$0xff]  ;;  %v599_v10 = vpack.c.bf16 %v328_v5, %v327_v4  ;;  %v330_v17 = vld [vmem:[%s6153_s14 + $0x18] sm:$0xff] }
  0x22   : > { %v463_v8 = vld [vmem:[%s6153_s14 + $0x440] sm:$0xff]  ;;  %v464_v9 = vld [vmem:[%s6153_s14 + $0x448] sm:$0xff]  ;;  %v633_v11 = vpack.c.bf16 %v396_v7, %v395_v6  ;;  %v397_v18 = vld [vmem:[%s6153_s14 + $0x230] sm:$0xff]  ;;  %v600_v24 = vpack.c.bf16 %v330_v17, %v329_v16 }
  0x23   : > { %v531_v12 = vld [vmem:[%s6153_s14 + $0x660] sm:$0xff]  ;;  %v532_v13 = vld [vmem:[%s6153_s14 + $0x668] sm:$0xff]  ;;  %v667_v14 = vpack.c.bf16 %v464_v9, %v463_v8  ;;  %v398_v19 = vld [vmem:[%s6153_s14 + $0x238] sm:$0xff] }
  0x24   : > { %1187 = vmatpush.bf16.msra.mxu0 %v5801_v3  ;;  %5814 = vmatpush.bf16.msra.mxu1 %v5801_v3  ;;  %v701_v15 = vpack.c.bf16 %v532_v13, %v531_v12  ;;  %v465_v20 = vld [vmem:[%s6153_s14 + $0x450] sm:$0xff]  ;;  %v466_v21 = vld [vmem:[%s6153_s14 + $0x458] sm:$0xff]  ;;  %v634_v25 = vpack.c.bf16 %v398_v19, %v397_v18  ;;  %v331_v28 = vld [vmem:[%s6153_s14 + $0x20] sm:$0xff] }
  0x25   : > { %5815 = vmatpush.bf16.msra.mxu2 %v5801_v3  ;;  %5816 = vmatpush.bf16.msra.mxu3 %v5801_v3  ;;  %v533_v22 = vld [vmem:[%s6153_s14 + $0x670] sm:$0xff]  ;;  %v534_v23 = vld [vmem:[%s6153_s14 + $0x678] sm:$0xff]  ;;  %v668_v26 = vpack.c.bf16 %v466_v21, %v465_v20  ;;  %v332_v29 = vld [vmem:[%s6153_s14 + $0x28] sm:$0xff] }
  0x26   : > { %v702_v27 = vpack.c.bf16 %v534_v23, %v533_v22  ;;  %v399_v30 = vld [vmem:[%s6153_s14 + $0x240] sm:$0xff]  ;;  %v400_v31 = vld [vmem:[%s6153_s14 + $0x248] sm:$0xff]  ;;  %v601_v36 = vpack.c.bf16 %v332_v29, %v331_v28  ;;  %v333_v40 = vld [vmem:[%s6153_s14 + $0x30] sm:$0xff] }
  0x27   : > { %5661 = vmatmul.msk.bf16.vlgmr.msra.gmra.mxu0 %vm771_vm0, %v599_v10  ;;  %5695 = vmatmul.msk.bf16.vlgmr.msra.gmra.mxu1 %vm771_vm0, %v633_v11  ;;  %v467_v32 = vld [vmem:[%s6153_s14 + $0x460] sm:$0xff]  ;;  %v468_v33 = vld [vmem:[%s6153_s14 + $0x468] sm:$0xff]  ;;  %v635_v37 = vpack.c.bf16 %v400_v31, %v399_v30  ;;  %v334_v41 = vld [vmem:[%s6153_s14 + $0x38] sm:$0xff] }
  0x28   : > { %5729 = vmatmul.msk.bf16.vlgmr.msra.gmra.mxu2 %vm771_vm0, %v667_v14  ;;  %5763 = vmatmul.msk.bf16.vlgmr.msra.gmra.mxu3 %vm771_vm0, %v701_v15  ;;  %v535_v34 = vld [vmem:[%s6153_s14 + $0x680] sm:$0xff]  ;;  %v536_v35 = vld [vmem:[%s6153_s14 + $0x688] sm:$0xff]  ;;  %v669_v38 = vpack.c.bf16 %v468_v33, %v467_v32  ;;  %v401_v42 = vld [vmem:[%s6153_s14 + $0x250] sm:$0xff]  ;;  %v602_v48 = vpack.c.bf16 %v334_v41, %v333_v40 }
  0x29   : > { %v703_v39 = vpack.c.bf16 %v536_v35, %v535_v34  ;;  %v402_v43 = vld [vmem:[%s6153_s14 + $0x258] sm:$0xff]  ;;  %v469_v44 = vld [vmem:[%s6153_s14 + $0x470] sm:$0xff]  ;;  %v335_v52 = vld [vmem:[%s6153_s14 + $0x40] sm:$0xff] }
  0x2a   : > { %v470_v45 = vld [vmem:[%s6153_s14 + $0x478] sm:$0xff]  ;;  %v537_v46 = vld [vmem:[%s6153_s14 + $0x690] sm:$0xff]  ;;  %v636_v49 = vpack.c.bf16 %v402_v43, %v401_v42  ;;  %v336_v53 = vld [vmem:[%s6153_s14 + $0x48] sm:$0xff] }
  0x2b   : > { %v538_v47 = vld [vmem:[%s6153_s14 + $0x698] sm:$0xff]  ;;  %v670_v50 = vpack.c.bf16 %v470_v45, %v469_v44  ;;  %v403_v54 = vld [vmem:[%s6153_s14 + $0x260] sm:$0xff]  ;;  %v404_v55 = vld [vmem:[%s6153_s14 + $0x268] sm:$0xff]  ;;  %v603_v60 = vpack.c.bf16 %v336_v53, %v335_v52 }
  0x2c   : > { %v704_v51 = vpack.c.bf16 %v538_v47, %v537_v46  ;;  %v471_v56 = vld [vmem:[%s6153_s14 + $0x480] sm:$0xff]  ;;  %v472_v57 = vld [vmem:[%s6153_s14 + $0x488] sm:$0xff]  ;;  %v637_v61 = vpack.c.bf16 %v404_v55, %v403_v54  ;;  %v337_v0 = vld [vmem:[%s6153_s14 + $0x50] sm:$0xff] }
  0x2d   : > { %v539_v58 = vld [vmem:[%s6153_s14 + $0x6a0] sm:$0xff]  ;;  %v540_v59 = vld [vmem:[%s6153_s14 + $0x6a8] sm:$0xff]  ;;  %v671_v62 = vpack.c.bf16 %v472_v57, %v471_v56  ;;  %v338_v1 = vld [vmem:[%s6153_s14 + $0x58] sm:$0xff] }
  0x2e   : > { %v705_v63 = vpack.c.bf16 %v540_v59, %v539_v58  ;;  %v405_v2 = vld [vmem:[%s6153_s14 + $0x270] sm:$0xff]  ;;  %v406_v3 = vld [vmem:[%s6153_s14 + $0x278] sm:$0xff]  ;;  %v604_v8 = vpack.c.bf16 %v338_v1, %v337_v0  ;;  %v339_v12 = vld [vmem:[%s6153_s14 + $0x60] sm:$0xff] }
  0x2f   : > { %v473_v4 = vld [vmem:[%s6153_s14 + $0x490] sm:$0xff]  ;;  %v474_v5 = vld [vmem:[%s6153_s14 + $0x498] sm:$0xff]  ;;  %v638_v9 = vpack.c.bf16 %v406_v3, %v405_v2  ;;  %v340_v13 = vld [vmem:[%s6153_s14 + $0x68] sm:$0xff] }
  0x30   : > { %v541_v6 = vld [vmem:[%s6153_s14 + $0x6b0] sm:$0xff]  ;;  %v542_v7 = vld [vmem:[%s6153_s14 + $0x6b8] sm:$0xff]  ;;  %v672_v10 = vpack.c.bf16 %v474_v5, %v473_v4  ;;  %v407_v14 = vld [vmem:[%s6153_s14 + $0x280] sm:$0xff]  ;;  %v605_v20 = vpack.c.bf16 %v340_v13, %v339_v12 }
  0x31   : > { %v706_v11 = vpack.c.bf16 %v542_v7, %v541_v6  ;;  %v408_v15 = vld [vmem:[%s6153_s14 + $0x288] sm:$0xff]  ;;  %v475_v16 = vld [vmem:[%s6153_s14 + $0x4a0] sm:$0xff]  ;;  %v477_v28 = vld [vmem:[%s6153_s14 + $0x4b0] sm:$0xff] }
  0x32   : > { %v476_v17 = vld [vmem:[%s6153_s14 + $0x4a8] sm:$0xff]  ;;  %v543_v18 = vld [vmem:[%s6153_s14 + $0x6c0] sm:$0xff]  ;;  %v639_v21 = vpack.c.bf16 %v408_v15, %v407_v14  ;;  %v478_v29 = vld [vmem:[%s6153_s14 + $0x4b8] sm:$0xff] }
  0x33   : > { %v544_v19 = vld [vmem:[%s6153_s14 + $0x6c8] sm:$0xff]  ;;  %v673_v22 = vpack.c.bf16 %v476_v17, %v475_v16  ;;  %v545_v30 = vld [vmem:[%s6153_s14 + $0x6d0] sm:$0xff]  ;;  %v546_v31 = vld [vmem:[%s6153_s14 + $0x6d8] sm:$0xff]  ;;  %v674_v34 = vpack.c.bf16 %v478_v29, %v477_v28 }
  0x34   : > { %v707_v23 = vpack.c.bf16 %v544_v19, %v543_v18  ;;  %v708_v35 = vpack.c.bf16 %v546_v31, %v545_v30  ;;  %v6260_v40 = vld [vmem:[%s10202_s2] ss:$0 sm:$0xff]  ;;  %v344_v42 = vld [vmem:[%s6153_s14 + $0x88] sm:$0xff]  ;;  %v413_v31 = vld [vmem:[%s6153_s14 + $0x2b0] sm:$0xff] }
  0x35   : > { %v343_v41 = vld [vmem:[%s6153_s14 + $0x80] sm:$0xff]  ;;  %v412_v46 = vld [vmem:[%s6153_s14 + $0x2a8] sm:$0xff] }
  0x36   : > { %v411_v45 = vld [vmem:[%s6153_s14 + $0x2a0] sm:$0xff]  ;;  %v607_v55 = vpack.c.bf16 %v344_v42, %v343_v41  ;;  %v482_v41 = vld [vmem:[%s6153_s14 + $0x4d8] sm:$0xff]  ;;  %v549_v42 = vld [vmem:[%s6153_s14 + $0x6f0] sm:$0xff] }
  0x37   : > { %5662 = vmatmul.msk.bf16.gmra.mxu0 %vm771_vm0, %v600_v24  ;;  %5696 = vmatmul.msk.bf16.gmra.mxu1 %vm771_vm0, %v634_v25  ;;  %v341_v24 = vld [vmem:[%s6153_s14 + $0x70] sm:$0xff]  ;;  %v342_v25 = vld [vmem:[%s6153_s14 + $0x78] sm:$0xff]  ;;  %v479_v47 = vld [vmem:[%s6153_s14 + $0x4c0] sm:$0xff]  ;;  %v641_v56 = vpack.c.bf16 %v412_v46, %v411_v45 }
  0x38   : > { %5730 = vmatmul.msk.bf16.gmra.mxu2 %vm771_vm0, %v668_v26  ;;  %5764 = vmatmul.msk.bf16.gmra.mxu3 %vm771_vm0, %v702_v27  ;;  %v409_v26 = vld [vmem:[%s6153_s14 + $0x290] sm:$0xff]  ;;  %v410_v27 = vld [vmem:[%s6153_s14 + $0x298] sm:$0xff]  ;;  %v606_v32 = vpack.c.bf16 %v342_v25, %v341_v24 }
  0x39   : > { %v640_v33 = vpack.c.bf16 %v410_v27, %v409_v26  ;;  %v345_v25 = vld [vmem:[%s6153_s14 + $0x90] sm:$0xff]  ;;  %v346_v26 = vld [vmem:[%s6153_s14 + $0x98] sm:$0xff] }
  0x3a   : > { %v608_v46 = vpack.c.bf16 %v346_v26, %v345_v25  ;;  %v347_v26 = vld [vmem:[%s6153_s14 + $0xa0] sm:$0xff] }
  0x47   : > { %5663 = vmatmul.msk.bf16.gmra.mxu0 %vm771_vm0, %v601_v36  ;;  %5697 = vmatmul.msk.bf16.gmra.mxu1 %vm771_vm0, %v635_v37  ;;  %v2416_v36 = vlaneseq }
  0x48   : > { %5731 = vmatmul.msk.bf16.gmra.mxu2 %vm771_vm0, %v669_v38  ;;  %5765 = vmatmul.msk.bf16.gmra.mxu3 %vm771_vm0, %v703_v39  ;;  %v6255_v39 = vstv %s2689_s15 }
  0x49   : > { %v6251_v37 = vshrl.u32 %v2416_v36, 7 }
  0x4b   : > { %v2485_v38 = vadd.s32 544, %v6251_v37  ;;  %v2691_v43 = vadd.s32 %v6255_v39, %v6251_v37  ;;  %v2621_v52 = vadd.s32 1632, %v6251_v37  ;;  %v2418_v53 = vadd.s32 8, %v6251_v37 }
  0x4c   : > { %v2486_v54 = vadd.s32 552, %v6251_v37  ;;  %v2554_v3 = vadd.s32 1096, %v6251_v37  ;;  %v2622_v4 = vadd.s32 1640, %v6251_v37  ;;  %v2555_v19 = vadd.s32 1104, %v6251_v37 }
  0x4d   : > { %v2759_v44 = vadd.s32 %v6255_v39, %v2485_v38  ;;  %vm2963_vm2 = vcmp.lt.s32.totalorder %v2691_v43, 8200  ;;  %v2895_v0 = vadd.s32 %v6255_v39, %v2621_v52  ;;  %v2692_v1 = vadd.s32 %v6255_v39, %v2418_v53  ;;  %v550_v43 = vld [vmem:[%s6153_s14 + $0x6f8] sm:$0xff] }
  0x4e   : > { %v2760_v2 = vadd.s32 %v6255_v39, %v2486_v54  ;;  %v2828_v13 = vadd.s32 %v6255_v39, %v2554_v3  ;;  %v2896_v14 = vadd.s32 %v6255_v39, %v2622_v4  ;;  %v2488_v45 = vadd.s32 568, %v6251_v37 }
  0x4f   : > { %vm3031_vm3 = vcmp.lt.s32.totalorder %v2759_v44, 8200  ;;  %vm3167_vm5 = vcmp.lt.s32.totalorder %v2895_v0, 8200  ;;  %vm2964_vm6 = vcmp.lt.s32.totalorder %v2692_v1, 8200  ;;  %v2420_v44 = vadd.s32 24, %v6251_v37 }
  0x50   : > { %vm3032_vm7 = vcmp.lt.s32.totalorder %v2760_v2, 8200  ;;  %vm3100_vm8 = vcmp.lt.s32.totalorder %v2828_v13, 8200  ;;  %vm3168_vm9 = vcmp.lt.s32.totalorder %v2896_v14, 8200  ;;  %v2829_v52 = vadd.s32 %v6255_v39, %v2555_v19 }
  0x52   : > { %vm3101_vm12 = vcmp.lt.s32.totalorder %v2829_v52, 8200 }
  0x57   : > { %5664 = vmatmul.msk.bf16.gmra.mxu0 %vm771_vm0, %v602_v48  ;;  %5698 = vmatmul.msk.bf16.gmra.mxu1 %vm771_vm0, %v636_v49  ;;  %v480_v48 = vld [vmem:[%s6153_s14 + $0x4c8] sm:$0xff]  ;;  %v547_v49 = vld [vmem:[%s6153_s14 + $0x6e0] sm:$0xff] }
  0x58   : > { %5732 = vmatmul.msk.bf16.gmra.mxu2 %vm771_vm0, %v670_v50  ;;  %5766 = vmatmul.msk.bf16.gmra.mxu3 %vm771_vm0, %v704_v51  ;;  %v548_v50 = vld [vmem:[%s6153_s14 + $0x6e8] sm:$0xff]  ;;  %v2553_v51 = vadd.s32 1088, %v6251_v37  ;;  %v675_v59 = vpack.c.bf16 %v480_v48, %v479_v47 }
  0x67   : > { %5665 = vmatmul.msk.bf16.gmra.mxu0 %vm771_vm0, %v603_v60  ;;  %5699 = vmatmul.msk.bf16.gmra.mxu1 %vm771_vm0, %v637_v61  ;;  %v709_v60 = vpack.c.bf16 %v548_v50, %v547_v49  ;;  %v710_v49 = vpack.c.bf16 %v550_v43, %v549_v42 }
  0x68   : > { %5733 = vmatmul.msk.bf16.gmra.mxu2 %vm771_vm0, %v671_v62  ;;  %5767 = vmatmul.msk.bf16.gmra.mxu3 %vm771_vm0, %v705_v63  ;;  %v2827_v63 = vadd.s32 %v6255_v39, %v2553_v51 }
  0x6a   : > { %vm3099_vm4 = vcmp.lt.s32.totalorder %v2827_v63, 8200  ;;  %v2624_v63 = vadd.s32 1656, %v6251_v37 }
  0x77   : > { %5666 = vmatmul.msk.bf16.gmra.mxu0 %vm771_vm0, %v604_v8  ;;  %5700 = vmatmul.msk.bf16.gmra.mxu1 %vm771_vm0, %v638_v9  ;;  %v2419_v9 = vadd.s32 16, %v6251_v37 }
  0x78   : > { %5734 = vmatmul.msk.bf16.gmra.mxu2 %vm771_vm0, %v672_v10  ;;  %5768 = vmatmul.msk.bf16.gmra.mxu3 %vm771_vm0, %v706_v11  ;;  %v2487_v10 = vadd.s32 560, %v6251_v37 }
  0x7a   : > { %v2761_v24 = vadd.s32 %v6255_v39, %v2487_v10  ;;  %v2421_v10 = vadd.s32 32, %v6251_v37 }
  0x7c   : > { %vm3033_vm11 = vcmp.lt.s32.totalorder %v2761_v24, 8200  ;;  %v2695_v24 = vadd.s32 %v6255_v39, %v2421_v10 }
  0x87   : > { %5667 = vmatmul.msk.bf16.gmra.mxu0 %vm771_vm0, %v605_v20  ;;  %5701 = vmatmul.msk.bf16.gmra.mxu1 %vm771_vm0, %v639_v21  ;;  %v2623_v20 = vadd.s32 1648, %v6251_v37 }
  0x88   : > { %5735 = vmatmul.msk.bf16.gmra.mxu2 %vm771_vm0, %v673_v22  ;;  %5769 = vmatmul.msk.bf16.gmra.mxu3 %vm771_vm0, %v707_v23  ;;  %v2693_v23 = vadd.s32 %v6255_v39, %v2419_v9 }
  0x89   : > { %v2897_v53 = vadd.s32 %v6255_v39, %v2623_v20  ;;  %v2557_v20 = vadd.s32 1120, %v6251_v37 }
  0x8a   : > { %vm2965_vm10 = vcmp.lt.s32.totalorder %v2693_v23, 8200 }
  0x8b   : > { %vm3169_vm13 = vcmp.lt.s32.totalorder %v2897_v53, 8200 }
  0x97   : > { %5668 = vmatmul.msk.bf16.gmra.mxu0 %vm771_vm0, %v606_v32  ;;  %5702 = vmatmul.msk.bf16.gmra.mxu1 %vm771_vm0, %v640_v33  ;;  %v414_v32 = vld [vmem:[%s6153_s14 + $0x2b8] sm:$0xff]  ;;  %v481_v33 = vld [vmem:[%s6153_s14 + $0x4d0] sm:$0xff] }
  0x98   : > { %5736 = vmatmul.msk.bf16.gmra.mxu2 %vm771_vm0, %v674_v34  ;;  %5770 = vmatmul.msk.bf16.gmra.mxu3 %vm771_vm0, %v708_v35  ;;  %v642_v47 = vpack.c.bf16 %v414_v32, %v413_v31  ;;  %v676_v48 = vpack.c.bf16 %v482_v41, %v481_v33  ;;  %v483_v41 = vld [vmem:[%s6153_s14 + $0x4e0] sm:$0xff] }
  0xa4   : > { %v1189_v57 = vpop.f32.mrf.mxu0  ;;  %v1359_v58 = vpop.f32.mrf.mxu1 }
  0xa5   : > { %v1190_v61 = vadd.f32 %v6260_v40, %v1189_v57  ;;  %v1360_v62 = vadd.f32 %v6260_v40, %v1359_v58  ;;  %v2694_v58 = vadd.s32 %v6255_v39, %v2420_v44 }
  0xa7   : > { %v1869_v5 = vpack.c.bf16 %v1190_v61, %v1190_v61  ;;  %v6291_v6 = vsel %vm2963_vm2, %v1190_v61, 0.0  ;;  %v1937_v7 = vpack.c.bf16 %v1360_v62, %v1360_v62  ;;  %v6293_v8 = vsel %vm3031_vm3, %v1360_v62, 0.0  ;;  %5669 = vmatmul.msk.bf16.gmra.mxu0 %vm771_vm0, %v607_v55  ;;  %5703 = vmatmul.msk.bf16.gmra.mxu1 %vm771_vm0, %v641_v56 }
  0xa8   : > { %10431 = vst [vmem:[#allocation8_spill] sm:$0xff] %v6293_v8  ;;  %5737 = vmatmul.msk.bf16.gmra.mxu2 %vm771_vm0, %v675_v59  ;;  %5771 = vmatmul.msk.bf16.gmra.mxu3 %vm771_vm0, %v709_v60  ;;  %v2762_v59 = vadd.s32 %v6255_v39, %v2488_v45  ;;  %v2556_v62 = vadd.s32 1112, %v6251_v37  ;;  %vm2966_vm14 = vcmp.lt.s32.totalorder %v2694_v58, 8200 }
  0xa9   : > { %2142 = vst.msk [vmem:[%s6285_s17] sm:$0xf] %vm2141_vm1, %v1869_v5 }
  0xaa   : > { %2210 = vst.msk [vmem:[%s6285_s17 + $0x110] sm:$0xf] %vm2141_vm1, %v1937_v7  ;;  %vm3034_vm15 = vcmp.lt.s32.totalorder %v2762_v59, 8200  ;;  %v2830_v14 = vadd.s32 %v6255_v39, %v2556_v62 }
  0xab   : > { %v1529_v11 = vpop.f32.mrf.mxu2  ;;  %v1699_v12 = vpop.f32.mrf.mxu3 }
  0xac   : > { %v1530_v15 = vadd.f32 %v6260_v40, %v1529_v11  ;;  %v1700_v16 = vadd.f32 %v6260_v40, %v1699_v12  ;;  %v1191_v17 = vpop.f32.mrf.mxu0  ;;  %v1361_v18 = vpop.f32.mrf.mxu1  ;;  %v2489_v11 = vadd.s32 576, %v6251_v37  ;;  %vm3102_vm2 = vcmp.lt.s32.totalorder %v2830_v14, 8200 }
  0xad   : > { %v1192_v21 = vadd.f32 %v6260_v40, %v1191_v17  ;;  %v1362_v22 = vadd.f32 %v6260_v40, %v1361_v18  ;;  %v2423_v14 = vadd.s32 48, %v6251_v37 }
  0xae   : > { %v2005_v27 = vpack.c.bf16 %v1530_v15, %v1530_v15  ;;  %v6318_v28 = vsel %vm3099_vm4, %v1530_v15, 0.0  ;;  %v2073_v29 = vpack.c.bf16 %v1700_v16, %v1700_v16  ;;  %v6321_v30 = vsel %vm3167_vm5, %v1700_v16, 0.0 }
  0xaf   : > { %10432 = vst [vmem:[#allocation9_spill] sm:$0xff] %v6318_v28  ;;  %v1870_v34 = vpack.c.bf16 %v1192_v21, %v1192_v21  ;;  %v6327_v35 = vsel %vm2964_vm6, %v1192_v21, 0.0  ;;  %v1938_v36 = vpack.c.bf16 %v1362_v22, %v1362_v22  ;;  %v6330_v38 = vsel %vm3032_vm7, %v1362_v22, 0.0 }
  0xb0   : > { %10433 = vst [vmem:[#allocation10_spill] sm:$0xff] %v6321_v30  ;;  %v2898_v15 = vadd.s32 %v6255_v39, %v2624_v63  ;;  %v2625_v21 = vadd.s32 1664, %v6251_v37  ;;  %v2763_v25 = vadd.s32 %v6255_v39, %v2489_v11  ;;  %vm2967_vm4 = vcmp.lt.s32.totalorder %v2695_v24, 8200 }
  0xb1   : > { %10434 = vst [vmem:[#allocation11_spill] sm:$0xff] %v6330_v38  ;;  %v2558_v63 = vadd.s32 1128, %v6251_v37 }
  0xb2   : > { %2278 = vst.msk [vmem:[%s6285_s17 + $0x220] sm:$0xf] %vm2141_vm1, %v2005_v27  ;;  %v348_v27 = vld [vmem:[%s6153_s14 + $0xa8] sm:$0xff]  ;;  %vm3170_vm3 = vcmp.lt.s32.totalorder %v2898_v15, 8200  ;;  %vm3035_vm5 = vcmp.lt.s32.totalorder %v2763_v25, 8200  ;;  %v2899_v58 = vadd.s32 %v6255_v39, %v2625_v21  ;;  %v2491_v15 = vadd.s32 592, %v6251_v37 }
  0xb3   : > { %2346 = vst.msk [vmem:[%s6285_s17 + $0x330] sm:$0xf] %vm2141_vm1, %v2073_v29  ;;  %v1531_v50 = vpop.f32.mrf.mxu2  ;;  %v1701_v51 = vpop.f32.mrf.mxu3 }
  0xb4   : > { %2143 = vst.msk [vmem:[%s6285_s17 + $0x4] sm:$0xf] %vm2141_vm1, %v1870_v34  ;;  %v1532_v54 = vadd.f32 %v6260_v40, %v1531_v50  ;;  %v1702_v55 = vadd.f32 %v6260_v40, %v1701_v51  ;;  %v1194_v56 = vpop.f32.mrf.mxu0  ;;  %v1364_v57 = vpop.f32.mrf.mxu1  ;;  %v415_v34 = vld [vmem:[%s6153_s14 + $0x2c0] sm:$0xff]  ;;  %v2490_v50 = vadd.s32 584, %v6251_v37  ;;  %v609_v51 = vpack.c.bf16 %v348_v27, %v347_v26 }
  0xb5   : > { %2211 = vst.msk [vmem:[%s6285_s17 + $0x114] sm:$0xf] %vm2141_vm1, %v1938_v36  ;;  %v1195_v60 = vadd.f32 %v6260_v40, %v1194_v56  ;;  %v1365_v61 = vadd.f32 %v6260_v40, %v1364_v57  ;;  %v416_v36 = vld [vmem:[%s6153_s14 + $0x2c8] sm:$0xff]  ;;  %v2831_v57 = vadd.s32 %v6255_v39, %v2557_v20  ;;  %vm3171_vm7 = vcmp.lt.s32.totalorder %v2899_v58, 8200 }
  0xb6   : > { %v2006_v0 = vpack.c.bf16 %v1532_v54, %v1532_v54  ;;  %v6356_v1 = vsel %vm3100_vm8, %v1532_v54, 0.0  ;;  %v2074_v2 = vpack.c.bf16 %v1702_v55, %v1702_v55  ;;  %v6359_v3 = vsel %vm3168_vm9, %v1702_v55, 0.0 }
  0xb7   : > { %10435 = vst [vmem:[#allocation12_spill] sm:$0xff] %v6356_v1  ;;  %v1871_v4 = vpack.c.bf16 %v1195_v60, %v1195_v60  ;;  %v6362_v5 = vsel %vm2965_vm10, %v1195_v60, 0.0  ;;  %v1939_v7 = vpack.c.bf16 %v1365_v61, %v1365_v61  ;;  %v6365_v9 = vsel %vm3033_vm11, %v1365_v61, 0.0  ;;  %5670 = vmatmul.msk.bf16.gmra.mxu0 %vm771_vm0, %v608_v46  ;;  %5704 = vmatmul.msk.bf16.gmra.mxu1 %vm771_vm0, %v642_v47  ;;  %v484_v46 = vld [vmem:[%s6153_s14 + $0x4e8] sm:$0xff]  ;;  %v551_v47 = vld [vmem:[%s6153_s14 + $0x700] sm:$0xff] }
  0xb8   : > { %10436 = vst [vmem:[#allocation13_spill] sm:$0xff] %v6359_v3  ;;  %5738 = vmatmul.msk.bf16.gmra.mxu2 %vm771_vm0, %v676_v48  ;;  %5772 = vmatmul.msk.bf16.gmra.mxu3 %vm771_vm0, %v710_v49  ;;  %v552_v48 = vld [vmem:[%s6153_s14 + $0x708] sm:$0xff]  ;;  %v2422_v49 = vadd.s32 40, %v6251_v37  ;;  %v643_v52 = vpack.c.bf16 %v416_v36, %v415_v34  ;;  %v677_v53 = vpack.c.bf16 %v484_v46, %v483_v41  ;;  %vm3103_vm6 = vcmp.lt.s32.totalorder %v2831_v57, 8200  ;;  %v349_v46 = vld [vmem:[%s6153_s14 + $0xb0] sm:$0xff]  ;;  %v486_v57 = vld [vmem:[%s6153_s14 + $0x4f8] sm:$0xff] }
  0xb9   : > { %10437 = vst [vmem:[#allocation14_spill] sm:$0xff] %v6365_v9  ;;  %v711_v54 = vpack.c.bf16 %v552_v48, %v551_v47  ;;  %v2764_v10 = vadd.s32 %v6255_v39, %v2490_v50  ;;  %v2627_v34 = vadd.s32 1680, %v6251_v37  ;;  %v350_v47 = vld [vmem:[%s6153_s14 + $0xb8] sm:$0xff]  ;;  %v2424_v58 = vadd.s32 56, %v6251_v37  ;;  %v560_v3 = vld [vmem:[%s6153_s14 + $0x748] sm:$0xff] }
  0xba   : > { %2279 = vst.msk [vmem:[%s6285_s17 + $0x224] sm:$0xf] %vm2141_vm1, %v2006_v0  ;;  %v2626_v0 = vadd.s32 1672, %v6251_v37 }
  0xbb   : > { %2347 = vst.msk [vmem:[%s6285_s17 + $0x334] sm:$0xf] %vm2141_vm1, %v2074_v2  ;;  %v1534_v12 = vpop.f32.mrf.mxu2  ;;  %v1704_v13 = vpop.f32.mrf.mxu3  ;;  %vm3036_vm9 = vcmp.lt.s32.totalorder %v2764_v10, 8200 }
  0xbc   : > { %2144 = vst.msk [vmem:[%s6285_s17 + $0x8] sm:$0xf] %vm2141_vm1, %v1871_v4  ;;  %v1535_v16 = vadd.f32 %v6260_v40, %v1534_v12  ;;  %v1705_v17 = vadd.f32 %v6260_v40, %v1704_v13  ;;  %v1196_v18 = vpop.f32.mrf.mxu0  ;;  %v1366_v19 = vpop.f32.mrf.mxu1  ;;  %v2900_v24 = vadd.s32 %v6255_v39, %v2626_v0  ;;  %v610_v0 = vpack.c.bf16 %v350_v47, %v349_v46 }
  0xbd   : > { %2212 = vst.msk [vmem:[%s6285_s17 + $0x118] sm:$0xf] %vm2141_vm1, %v1939_v7  ;;  %v1197_v22 = vadd.f32 %v6260_v40, %v1196_v18  ;;  %v1367_v23 = vadd.f32 %v6260_v40, %v1366_v19  ;;  %v2696_v7 = vadd.s32 %v6255_v39, %v2422_v49 }
  0xbe   : > { %v2007_v29 = vpack.c.bf16 %v1535_v16, %v1535_v16  ;;  %v6394_v31 = vsel %vm3101_vm12, %v1535_v16, 0.0  ;;  %v2075_v32 = vpack.c.bf16 %v1705_v17, %v1705_v17  ;;  %v6397_v33 = vsel %vm3169_vm13, %v1705_v17, 0.0 }
  0xbf   : > { %10438 = vst [vmem:[#allocation15_spill] sm:$0xff] %v6394_v31  ;;  %v1872_v42 = vpack.c.bf16 %v1197_v22, %v1197_v22  ;;  %v6403_v43 = vsel %vm2966_vm14, %v1197_v22, 0.0  ;;  %v1940_v44 = vpack.c.bf16 %v1367_v23, %v1367_v23  ;;  %v6406_v45 = vsel %vm3034_vm15, %v1367_v23, 0.0 }
  0xc0   : > { %10439 = vst [vmem:[#allocation16_spill] sm:$0xff] %v6397_v33  ;;  %vm2968_vm8 = vcmp.lt.s32.totalorder %v2696_v7, 8200  ;;  %v2832_v23 = vadd.s32 %v6255_v39, %v2558_v63  ;;  %vm3172_vm11 = vcmp.lt.s32.totalorder %v2900_v24, 8200  ;;  %v2492_v63 = vadd.s32 600, %v6251_v37 }
  0xc1   : > { %10440 = vst [vmem:[#allocation17_spill] sm:$0xff] %v6406_v45  ;;  %v2493_v24 = vadd.s32 608, %v6251_v37 }
  0xc2   : > { %2280 = vst.msk [vmem:[%s6285_s17 + $0x228] sm:$0xf] %vm2141_vm1, %v2007_v29  ;;  %vm3104_vm10 = vcmp.lt.s32.totalorder %v2832_v23, 8200  ;;  %v2425_v23 = vadd.s32 64, %v6251_v37 }
  0xc3   : > { %2348 = vst.msk [vmem:[%s6285_s17 + $0x338] sm:$0xf] %vm2141_vm1, %v2075_v32  ;;  %v1536_v55 = vpop.f32.mrf.mxu2  ;;  %v1706_v56 = vpop.f32.mrf.mxu3  ;;  %v2559_v32 = vadd.s32 1136, %v6251_v37 }
  0xc4   : > { %2145 = vst.msk [vmem:[%s6285_s17 + $0xc] sm:$0xf] %vm2141_vm1, %v1872_v42  ;;  %v1537_v59 = vadd.f32 %v6260_v40, %v1536_v55  ;;  %v1707_v60 = vadd.f32 %v6260_v40, %v1706_v56  ;;  %v1199_v61 = vpop.f32.mrf.mxu0  ;;  %v1369_v62 = vpop.f32.mrf.mxu1  ;;  %v2697_v42 = vadd.s32 %v6255_v39, %v2423_v14 }
  0xc5   : > { %2213 = vst.msk [vmem:[%s6285_s17 + $0x11c] sm:$0xf] %vm2141_vm1, %v1940_v44  ;;  %v1200_v2 = vadd.f32 %v6260_v40, %v1199_v61  ;;  %v1370_v4 = vadd.f32 %v6260_v40, %v1369_v62  ;;  %v2765_v44 = vadd.s32 %v6255_v39, %v2491_v15  ;;  %v553_v61 = vld [vmem:[%s6153_s14 + $0x710] sm:$0xff]  ;;  %v554_v62 = vld [vmem:[%s6153_s14 + $0x718] sm:$0xff] }
  0xc6   : > { %v2008_v11 = vpack.c.bf16 %v1537_v59, %v1537_v59  ;;  %v6432_v12 = vsel %vm3102_vm2, %v1537_v59, 0.0  ;;  %v2076_v13 = vpack.c.bf16 %v1707_v60, %v1707_v60  ;;  %v6435_v16 = vsel %vm3170_vm3, %v1707_v60, 0.0 }
  0xc7   : > { %10441 = vst [vmem:[#allocation18_spill] sm:$0xff] %v6432_v12  ;;  %v1873_v17 = vpack.c.bf16 %v1200_v2, %v1200_v2  ;;  %v6438_v18 = vsel %vm2967_vm4, %v1200_v2, 0.0  ;;  %v1941_v19 = vpack.c.bf16 %v1370_v4, %v1370_v4  ;;  %v6441_v20 = vsel %vm3035_vm5, %v1370_v4, 0.0  ;;  %5671 = vmatmul.msk.bf16.gmra.mxu0 %vm771_vm0, %v609_v51  ;;  %5705 = vmatmul.msk.bf16.gmra.mxu1 %vm771_vm0, %v643_v52  ;;  %v417_v52 = vld [vmem:[%s6153_s14 + $0x2d0] sm:$0xff] }
  0xc8   : > { %10442 = vst [vmem:[#allocation19_spill] sm:$0xff] %v6435_v16  ;;  %5739 = vmatmul.msk.bf16.gmra.mxu2 %vm771_vm0, %v677_v53  ;;  %5773 = vmatmul.msk.bf16.gmra.mxu3 %vm771_vm0, %v711_v54  ;;  %v418_v53 = vld [vmem:[%s6153_s14 + $0x2d8] sm:$0xff]  ;;  %v485_v54 = vld [vmem:[%s6153_s14 + $0x4f0] sm:$0xff]  ;;  %v712_v7 = vpack.c.bf16 %v554_v62, %v553_v61  ;;  %vm2969_vm12 = vcmp.lt.s32.totalorder %v2697_v42, 8200  ;;  %vm3037_vm13 = vcmp.lt.s32.totalorder %v2765_v44, 8200  ;;  %v2561_v62 = vadd.s32 1152, %v6251_v37 }
  0xc9   : > { %10443 = vst [vmem:[#allocation20_spill] sm:$0xff] %v6441_v20  ;;  %v644_v2 = vpack.c.bf16 %v418_v53, %v417_v52  ;;  %v678_v4 = vpack.c.bf16 %v486_v57, %v485_v54 }
  0xca   : > { %2281 = vst.msk [vmem:[%s6285_s17 + $0x22c] sm:$0xf] %vm2141_vm1, %v2008_v11 }
  0xcb   : > { %2349 = vst.msk [vmem:[%s6285_s17 + $0x33c] sm:$0xf] %vm2141_vm1, %v2076_v13  ;;  %v1539_v21 = vpop.f32.mrf.mxu2  ;;  %v1709_v22 = vpop.f32.mrf.mxu3  ;;  %v2833_v13 = vadd.s32 %v6255_v39, %v2559_v32  ;;  %v2766_v32 = vadd.s32 %v6255_v39, %v2492_v63 }
  0xcc   : > { %2146 = vst.msk [vmem:[%s6285_s17 + $0x10] sm:$0xf] %vm2141_vm1, %v1873_v17  ;;  %v1540_v25 = vadd.f32 %v6260_v40, %v1539_v21  ;;  %v1710_v26 = vadd.f32 %v6260_v40, %v1709_v22  ;;  %v1201_v27 = vpop.f32.mrf.mxu0  ;;  %v1371_v29 = vpop.f32.mrf.mxu1  ;;  %v2901_v17 = vadd.s32 %v6255_v39, %v2627_v34  ;;  %v2560_v22 = vadd.s32 1144, %v6251_v37 }
  0xcd   : > { %2214 = vst.msk [vmem:[%s6285_s17 + $0x120] sm:$0xf] %vm2141_vm1, %v1941_v19  ;;  %v1202_v36 = vadd.f32 %v6260_v40, %v1201_v27  ;;  %v1372_v41 = vadd.f32 %v6260_v40, %v1371_v29  ;;  %v2698_v29 = vadd.s32 %v6255_v39, %v2424_v58  ;;  %vm3105_vm14 = vcmp.lt.s32.totalorder %v2833_v13, 8200  ;;  %v488_v13 = vld [vmem:[%s6153_s14 + $0x508] sm:$0xff] }
  0xce   : > { %v2009_v48 = vpack.c.bf16 %v1540_v25, %v1540_v25  ;;  %v6470_v49 = vsel %vm3103_vm6, %v1540_v25, 0.0  ;;  %v2077_v50 = vpack.c.bf16 %v1710_v26, %v1710_v26  ;;  %v6473_v51 = vsel %vm3171_vm7, %v1710_v26, 0.0 }
  0xcf   : > { %10444 = vst [vmem:[#allocation21_spill] sm:$0xff] %v6470_v49  ;;  %v1874_v55 = vpack.c.bf16 %v1202_v36, %v1202_v36  ;;  %v6479_v56 = vsel %vm2968_vm8, %v1202_v36, 0.0  ;;  %v1942_v59 = vpack.c.bf16 %v1372_v41, %v1372_v41  ;;  %v6482_v60 = vsel %vm3036_vm9, %v1372_v41, 0.0 }
  0xd0   : > { %10445 = vst [vmem:[#allocation22_spill] sm:$0xff] %v6473_v51  ;;  %v2628_v25 = vadd.s32 1688, %v6251_v37  ;;  %vm3173_vm15 = vcmp.lt.s32.totalorder %v2901_v17, 8200  ;;  %vm2970_vm2 = vcmp.lt.s32.totalorder %v2698_v29, 8200  ;;  %vm3038_vm3 = vcmp.lt.s32.totalorder %v2766_v32, 8200 }
  0xd1   : > { %10446 = vst [vmem:[#allocation23_spill] sm:$0xff] %v6482_v60  ;;  %v2834_v53 = vadd.s32 %v6255_v39, %v2560_v22  ;;  %v2629_v58 = vadd.s32 1696, %v6251_v37  ;;  %v420_v22 = vld [vmem:[%s6153_s14 + $0x2e8] sm:$0xff]  ;;  %v2426_v17 = vadd.s32 72, %v6251_v37  ;;  %v2494_v29 = vadd.s32 616, %v6251_v37 }
  0xd2   : > { %2282 = vst.msk [vmem:[%s6285_s17 + $0x230] sm:$0xf] %vm2141_vm1, %v2009_v48  ;;  %v2902_v54 = vadd.s32 %v6255_v39, %v2628_v25  ;;  %v487_v25 = vld [vmem:[%s6153_s14 + $0x500] sm:$0xff] }
  0xd3   : > { %2350 = vst.msk [vmem:[%s6285_s17 + $0x340] sm:$0xf] %vm2141_vm1, %v2077_v50  ;;  %v1541_v10 = vpop.f32.mrf.mxu2  ;;  %v1711_v11 = vpop.f32.mrf.mxu3  ;;  %vm3106_vm4 = vcmp.lt.s32.totalorder %v2834_v53, 8200  ;;  %v2427_v53 = vadd.s32 80, %v6251_v37 }
  0xd4   : > { %2147 = vst.msk [vmem:[%s6285_s17 + $0x14] sm:$0xf] %vm2141_vm1, %v1874_v55  ;;  %v1542_v19 = vadd.f32 %v6260_v40, %v1541_v10  ;;  %v1712_v14 = vadd.f32 %v6260_v40, %v1711_v11  ;;  %v1204_v15 = vpop.f32.mrf.mxu0  ;;  %v1374_v21 = vpop.f32.mrf.mxu1  ;;  %v352_v10 = vld [vmem:[%s6153_s14 + $0xc8] sm:$0xff]  ;;  %vm3174_vm5 = vcmp.lt.s32.totalorder %v2902_v54, 8200  ;;  %v2495_v54 = vadd.s32 624, %v6251_v37 }
  0xd5   : > { %2215 = vst.msk [vmem:[%s6285_s17 + $0x124] sm:$0xf] %vm2141_vm1, %v1942_v59  ;;  %v1205_v26 = vadd.f32 %v6260_v40, %v1204_v15  ;;  %v1375_v27 = vadd.f32 %v6260_v40, %v1374_v21  ;;  %v419_v21 = vld [vmem:[%s6153_s14 + $0x2e0] sm:$0xff] }
  0xd6   : > { %v2010_v34 = vpack.c.bf16 %v1542_v19, %v1542_v19  ;;  %v6508_v36 = vsel %vm3104_vm10, %v1542_v19, 0.0  ;;  %v2078_v41 = vpack.c.bf16 %v1712_v14, %v1712_v14  ;;  %v6511_v46 = vsel %vm3172_vm11, %v1712_v14, 0.0 }
  0xd7   : > { %10447 = vst [vmem:[#allocation24_spill] sm:$0xff] %v6508_v36  ;;  %v1875_v47 = vpack.c.bf16 %v1205_v26, %v1205_v26  ;;  %v6514_v48 = vsel %vm2969_vm12, %v1205_v26, 0.0  ;;  %v1943_v50 = vpack.c.bf16 %v1375_v27, %v1375_v27  ;;  %v6517_v52 = vsel %vm3037_vm13, %v1375_v27, 0.0  ;;  %5672 = vmatmul.msk.bf16.gmra.mxu0 %vm771_vm0, %v610_v0  ;;  %5706 = vmatmul.msk.bf16.gmra.mxu1 %vm771_vm0, %v644_v2 }
  0xd8   : > { %10448 = vst [vmem:[#allocation25_spill] sm:$0xff] %v6511_v46  ;;  %5740 = vmatmul.msk.bf16.gmra.mxu2 %vm771_vm0, %v678_v4  ;;  %5774 = vmatmul.msk.bf16.gmra.mxu3 %vm771_vm0, %v712_v7  ;;  %v2699_v2 = vadd.s32 %v6255_v39, %v2425_v23  ;;  %v2767_v4 = vadd.s32 %v6255_v39, %v2493_v24  ;;  %v351_v7 = vld [vmem:[%s6153_s14 + $0xc0] sm:$0xff] }
  0xd9   : > { %10449 = vst [vmem:[#allocation26_spill] sm:$0xff] %v6517_v52  ;;  %v611_v23 = vpack.c.bf16 %v352_v10, %v351_v7  ;;  %v645_v32 = vpack.c.bf16 %v420_v22, %v419_v21  ;;  %v679_v24 = vpack.c.bf16 %v488_v13, %v487_v25  ;;  %v2562_v7 = vadd.s32 1160, %v6251_v37 }
  0xda   : > { %2283 = vst.msk [vmem:[%s6285_s17 + $0x234] sm:$0xf] %vm2141_vm1, %v2010_v34  ;;  %vm2971_vm6 = vcmp.lt.s32.totalorder %v2699_v2, 8200  ;;  %vm3039_vm7 = vcmp.lt.s32.totalorder %v2767_v4, 8200  ;;  %v2630_v10 = vadd.s32 1704, %v6251_v37 }
  0xdb   : > { %2351 = vst.msk [vmem:[%s6285_s17 + $0x344] sm:$0xf] %vm2141_vm1, %v2078_v41  ;;  %v1544_v42 = vpop.f32.mrf.mxu2  ;;  %v1714_v44 = vpop.f32.mrf.mxu3 }
  0xdc   : > { %2148 = vst.msk [vmem:[%s6285_s17 + $0x18] sm:$0xf] %vm2141_vm1, %v1875_v47  ;;  %v1545_v55 = vadd.f32 %v6260_v40, %v1544_v42  ;;  %v1715_v59 = vadd.f32 %v6260_v40, %v1714_v44  ;;  %v1206_v57 = vpop.f32.mrf.mxu0  ;;  %v1376_v61 = vpop.f32.mrf.mxu1  ;;  %v555_v47 = vld [vmem:[%s6153_s14 + $0x720] sm:$0xff] }
  0xdd   : > { %2216 = vst.msk [vmem:[%s6285_s17 + $0x128] sm:$0xf] %vm2141_vm1, %v1943_v50  ;;  %v1207_v63 = vadd.f32 %v6260_v40, %v1206_v57  ;;  %v1377_v0 = vadd.f32 %v6260_v40, %v1376_v61  ;;  %v556_v50 = vld [vmem:[%s6153_s14 + $0x728] sm:$0xff]  ;;  %v2903_v57 = vadd.s32 %v6255_v39, %v2629_v58  ;;  %v2768_v58 = vadd.s32 %v6255_v39, %v2494_v29 }
  0xde   : > { %v2011_v11 = vpack.c.bf16 %v1545_v55, %v1545_v55  ;;  %v6546_v19 = vsel %vm3105_vm14, %v1545_v55, 0.0  ;;  %v2079_v14 = vpack.c.bf16 %v1715_v59, %v1715_v59  ;;  %v6549_v15 = vsel %vm3173_vm15, %v1715_v59, 0.0 }
  0xdf   : > { %10450 = vst [vmem:[#allocation27_spill] sm:$0xff] %v6546_v19  ;;  %v1876_v26 = vpack.c.bf16 %v1207_v63, %v1207_v63  ;;  %v6555_v27 = vsel %vm2970_vm2, %v1207_v63, 0.0  ;;  %v1944_v34 = vpack.c.bf16 %v1377_v0, %v1377_v0  ;;  %v6558_v41 = vsel %vm3038_vm3, %v1377_v0, 0.0 }
  0xe0   : > { %10451 = vst [vmem:[#allocation28_spill] sm:$0xff] %v6549_v15  ;;  %v713_v42 = vpack.c.bf16 %v556_v50, %v555_v47  ;;  %v2835_v59 = vadd.s32 %v6255_v39, %v2561_v62  ;;  %v2700_v62 = vadd.s32 %v6255_v39, %v2426_v17  ;;  %vm3175_vm9 = vcmp.lt.s32.totalorder %v2903_v57, 8200 }
  0xe1   : > { %10452 = vst [vmem:[#allocation29_spill] sm:$0xff] %v6558_v41  ;;  %vm3040_vm11 = vcmp.lt.s32.totalorder %v2768_v58, 8200  ;;  %v2836_v17 = vadd.s32 %v6255_v39, %v2562_v7  ;;  %v2904_v29 = vadd.s32 %v6255_v39, %v2630_v10  ;;  %v2769_v7 = vadd.s32 %v6255_v39, %v2495_v54  ;;  %v353_v10 = vld [vmem:[%s6153_s14 + $0xd0] sm:$0xff] }
  0xe2   : > { %2284 = vst.msk [vmem:[%s6285_s17 + $0x238] sm:$0xf] %vm2141_vm1, %v2011_v11  ;;  %vm3107_vm8 = vcmp.lt.s32.totalorder %v2835_v59, 8200  ;;  %vm2972_vm10 = vcmp.lt.s32.totalorder %v2700_v62, 8200  ;;  %v490_v59 = vld [vmem:[%s6153_s14 + $0x518] sm:$0xff]  ;;  %v2428_v57 = vadd.s32 88, %v6251_v37 }
  0xe3   : > { %2352 = vst.msk [vmem:[%s6285_s17 + $0x348] sm:$0xf] %vm2141_vm1, %v2079_v14  ;;  %v1546_v44 = vpop.f32.mrf.mxu2  ;;  %v1716_v55 = vpop.f32.mrf.mxu3  ;;  %vm3108_vm12 = vcmp.lt.s32.totalorder %v2836_v17, 8200  ;;  %vm3176_vm13 = vcmp.lt.s32.totalorder %v2904_v29, 8200  ;;  %v2496_v62 = vadd.s32 632, %v6251_v37  ;;  %vm3041_vm15 = vcmp.lt.s32.totalorder %v2769_v7, 8200 }
  0xe4   : > { %2149 = vst.msk [vmem:[%s6285_s17 + $0x1c] sm:$0xf] %vm2141_vm1, %v1876_v26  ;;  %v1547_v61 = vadd.f32 %v6260_v40, %v1546_v44  ;;  %v1717_v63 = vadd.f32 %v6260_v40, %v1716_v55  ;;  %v1209_v0 = vpop.f32.mrf.mxu0  ;;  %v1379_v11 = vpop.f32.mrf.mxu1  ;;  %v2563_v55 = vadd.s32 1168, %v6251_v37 }
  0xe5   : > { %2217 = vst.msk [vmem:[%s6285_s17 + $0x12c] sm:$0xf] %vm2141_vm1, %v1944_v34  ;;  %v1210_v14 = vadd.f32 %v6260_v40, %v1209_v0  ;;  %v1380_v21 = vadd.f32 %v6260_v40, %v1379_v11  ;;  %v2701_v11 = vadd.s32 %v6255_v39, %v2427_v53  ;;  %v489_v53 = vld [vmem:[%s6153_s14 + $0x510] sm:$0xff] }
  0xe6   : > { %v2012_v22 = vpack.c.bf16 %v1547_v61, %v1547_v61  ;;  %v6584_v25 = vsel %vm3106_vm4, %v1547_v61, 0.0  ;;  %v2080_v26 = vpack.c.bf16 %v1717_v63, %v1717_v63  ;;  %v6587_v34 = vsel %vm3174_vm5, %v1717_v63, 0.0 }
  0xe7   : > { %10453 = vst [vmem:[#allocation30_spill] sm:$0xff] %v6584_v25  ;;  %v1877_v13 = vpack.c.bf16 %v1210_v14, %v1210_v14  ;;  %v6590_v47 = vsel %vm2971_vm6, %v1210_v14, 0.0  ;;  %v1945_v50 = vpack.c.bf16 %v1380_v21, %v1380_v21  ;;  %v6593_v44 = vsel %vm3039_vm7, %v1380_v21, 0.0  ;;  %5673 = vmatmul.msk.bf16.gmra.mxu0 %vm771_vm0, %v611_v23  ;;  %5707 = vmatmul.msk.bf16.gmra.mxu1 %vm771_vm0, %v645_v32  ;;  %v354_v14 = vld [vmem:[%s6153_s14 + $0xd8] sm:$0xff] }
  0xe8   : > { %10454 = vst [vmem:[#allocation31_spill] sm:$0xff] %v6587_v34  ;;  %5741 = vmatmul.msk.bf16.gmra.mxu2 %vm771_vm0, %v679_v24  ;;  %5775 = vmatmul.msk.bf16.gmra.mxu3 %vm771_vm0, %v713_v42  ;;  %v2631_v61 = vadd.s32 1712, %v6251_v37  ;;  %v558_v34 = vld [vmem:[%s6153_s14 + $0x738] sm:$0xff]  ;;  %vm2973_vm14 = vcmp.lt.s32.totalorder %v2701_v11, 8200 }
  0xe9   : > { %10455 = vst [vmem:[#allocation32_spill] sm:$0xff] %v6593_v44 }
  0xea   : > { %2285 = vst.msk [vmem:[%s6285_s17 + $0x23c] sm:$0xf] %vm2141_vm1, %v2012_v22 }
  0xeb   : > { %2353 = vst.msk [vmem:[%s6285_s17 + $0x34c] sm:$0xf] %vm2141_vm1, %v2080_v26  ;;  %v1549_v2 = vpop.f32.mrf.mxu2  ;;  %v1719_v4 = vpop.f32.mrf.mxu3 }
  0xec   : > { %2150 = vst.msk [vmem:[%s6285_s17 + $0x20] sm:$0xf] %vm2141_vm1, %v1877_v13  ;;  %v1550_v23 = vadd.f32 %v6260_v40, %v1549_v2  ;;  %v1720_v32 = vadd.f32 %v6260_v40, %v1719_v4  ;;  %v1211_v24 = vpop.f32.mrf.mxu0  ;;  %v1381_v42 = vpop.f32.mrf.mxu1  ;;  %v422_v2 = vld [vmem:[%s6153_s14 + $0x2f8] sm:$0xff] }
  0xed   : > { %2218 = vst.msk [vmem:[%s6285_s17 + $0x130] sm:$0xf] %vm2141_vm1, %v1945_v50  ;;  %v1212_v63 = vadd.f32 %v6260_v40, %v1211_v24  ;;  %v1382_v0 = vadd.f32 %v6260_v40, %v1381_v42  ;;  %v421_v50 = vld [vmem:[%s6153_s14 + $0x2f0] sm:$0xff] }
  0xee   : > { %v2013_v21 = vpack.c.bf16 %v1550_v23, %v1550_v23  ;;  %v6622_v22 = vsel %vm3107_vm8, %v1550_v23, 0.0  ;;  %v2081_v26 = vpack.c.bf16 %v1720_v32, %v1720_v32  ;;  %v6625_v13 = vsel %vm3175_vm9, %v1720_v32, 0.0  ;;  %v557_v23 = vld [vmem:[%s6153_s14 + $0x730] sm:$0xff] }
  0xef   : > { %10456 = vst [vmem:[#allocation33_spill] sm:$0xff] %v6622_v22  ;;  %v1878_v4 = vpack.c.bf16 %v1212_v63, %v1212_v63  ;;  %v6631_v54 = vsel %vm2972_vm10, %v1212_v63, 0.0  ;;  %v1946_v24 = vpack.c.bf16 %v1382_v0, %v1382_v0  ;;  %v6634_v42 = vsel %vm3040_vm11, %v1382_v0, 0.0 }
  0xf0   : > { %10457 = vst [vmem:[#allocation34_spill] sm:$0xff] %v6625_v13  ;;  %v612_v32 = vpack.c.bf16 %v354_v14, %v353_v10  ;;  %v646_v58 = vpack.c.bf16 %v422_v2, %v421_v50  ;;  %v680_v63 = vpack.c.bf16 %v490_v59, %v489_v53  ;;  %v714_v0 = vpack.c.bf16 %v558_v34, %v557_v23 }
  0xf1   : > { %10458 = vst [vmem:[#allocation35_spill] sm:$0xff] %v6634_v42  ;;  %v2564_v10 = vadd.s32 1176, %v6251_v37  ;;  %v2632_v34 = vadd.s32 1720, %v6251_v37 }
  0xf2   : > { %2286 = vst.msk [vmem:[%s6285_s17 + $0x240] sm:$0xf] %vm2141_vm1, %v2013_v21  ;;  %v2837_v21 = vadd.s32 %v6255_v39, %v2563_v55  ;;  %v2702_v55 = vadd.s32 %v6255_v39, %v2428_v57 }
  0xf3   : > { %2354 = vst.msk [vmem:[%s6285_s17 + $0x350] sm:$0xf] %vm2141_vm1, %v2081_v26  ;;  %v1551_v13 = vpop.f32.mrf.mxu2  ;;  %v1721_v15 = vpop.f32.mrf.mxu3  ;;  %v2905_v26 = vadd.s32 %v6255_v39, %v2631_v61  ;;  %v2770_v61 = vadd.s32 %v6255_v39, %v2496_v62  ;;  %v2838_v11 = vadd.s32 %v6255_v39, %v2564_v10  ;;  %v2906_v7 = vadd.s32 %v6255_v39, %v2632_v34 }
  0xf4   : > { %2151 = vst.msk [vmem:[%s6285_s17 + $0x24] sm:$0xf] %vm2141_vm1, %v1878_v4  ;;  %v1552_v46 = vadd.f32 %v6260_v40, %v1551_v13  ;;  %v1722_v51 = vadd.f32 %v6260_v40, %v1721_v15  ;;  %v1214_v16 = vpop.f32.mrf.mxu0  ;;  %v1384_v4 = vpop.f32.mrf.mxu1  ;;  %vm3109_vm2 = vcmp.lt.s32.totalorder %v2837_v21, 8200  ;;  %vm2974_vm4 = vcmp.lt.s32.totalorder %v2702_v55, 8200  ;;  %v492_v21 = vld [vmem:[%s6153_s14 + $0x528] sm:$0xff] }
  0xf5   : > { %2219 = vst.msk [vmem:[%s6285_s17 + $0x134] sm:$0xf] %vm2141_vm1, %v1946_v24  ;;  %v1215_v14 = vadd.f32 %v6260_v40, %v1214_v16  ;;  %v1385_v50 = vadd.f32 %v6260_v40, %v1384_v4  ;;  %vm3177_vm3 = vcmp.lt.s32.totalorder %v2905_v26, 8200  ;;  %vm3042_vm5 = vcmp.lt.s32.totalorder %v2770_v61, 8200 }
  0xf6   : > { %v2014_v2 = vpack.c.bf16 %v1552_v46, %v1552_v46  ;;  %v6660_v15 = vsel %vm3108_vm12, %v1552_v46, 0.0  ;;  %v2082_v13 = vpack.c.bf16 %v1722_v51, %v1722_v51  ;;  %v6663_v53 = vsel %vm3176_vm13, %v1722_v51, 0.0 }
  0xf7   : > { %10459 = vst [vmem:[#allocation36_spill] sm:$0xff] %v6660_v15  ;;  %v1879_v24 = vpack.c.bf16 %v1215_v14, %v1215_v14  ;;  %v6666_v16 = vsel %vm2973_vm14, %v1215_v14, 0.0  ;;  %v1947_v59 = vpack.c.bf16 %v1385_v50, %v1385_v50  ;;  %v6669_v23 = vsel %vm3041_vm15, %v1385_v50, 0.0  ;;  %5674 = vmatmul.msk.bf16.gmra.mxu0 %vm771_vm0, %v612_v32  ;;  %5708 = vmatmul.msk.bf16.gmra.mxu1 %vm771_vm0, %v646_v58  ;;  %v355_v50 = vld [vmem:[%s6153_s14 + $0xe0] sm:$0xff] }
  0xf8   : > { %10460 = vst [vmem:[#allocation37_spill] sm:$0xff] %v6663_v53  ;;  %5742 = vmatmul.msk.bf16.gmra.mxu2 %vm771_vm0, %v680_v63  ;;  %5776 = vmatmul.msk.bf16.gmra.mxu3 %vm771_vm0, %v714_v0  ;;  %v2429_v51 = vadd.s32 96, %v6251_v37  ;;  %v2497_v46 = vadd.s32 640, %v6251_v37  ;;  %v2565_v63 = vadd.s32 1184, %v6251_v37  ;;  %v2633_v0 = vadd.s32 1728, %v6251_v37 }
  0xf9   : > { %10461 = vst [vmem:[#allocation38_spill] sm:$0xff] %v6669_v23  ;;  %vm3110_vm6 = vcmp.lt.s32.totalorder %v2838_v11, 8200  ;;  %vm3178_vm7 = vcmp.lt.s32.totalorder %v2906_v7, 8200  ;;  %v2430_v26 = vadd.s32 104, %v6251_v37  ;;  %v2498_v55 = vadd.s32 648, %v6251_v37 }
  0xfa   : > { %2287 = vst.msk [vmem:[%s6285_s17 + $0x244] sm:$0xf] %vm2141_vm1, %v2014_v2  ;;  %v2703_v10 = vadd.s32 %v6255_v39, %v2429_v51  ;;  %v2771_v34 = vadd.s32 %v6255_v39, %v2497_v46  ;;  %v356_v2 = vld [vmem:[%s6153_s14 + $0xe8] sm:$0xff]  ;;  %v491_v51 = vld [vmem:[%s6153_s14 + $0x520] sm:$0xff]  ;;  %v2499_v11 = vadd.s32 656, %v6251_v37 }
  0xfb   : > { %2355 = vst.msk [vmem:[%s6285_s17 + $0x354] sm:$0xf] %vm2141_vm1, %v2082_v13  ;;  %v1554_v17 = vpop.f32.mrf.mxu2  ;;  %v1724_v29 = vpop.f32.mrf.mxu3 }
  0xfc   : > { %2152 = vst.msk [vmem:[%s6285_s17 + $0x28] sm:$0xf] %vm2141_vm1, %v1879_v24  ;;  %v1555_v57 = vadd.f32 %v6260_v40, %v1554_v17  ;;  %v1725_v62 = vadd.f32 %v6260_v40, %v1724_v29  ;;  %v1216_v32 = vpop.f32.mrf.mxu0  ;;  %v1386_v58 = vpop.f32.mrf.mxu1  ;;  %v423_v29 = vld [vmem:[%s6153_s14 + $0x300] sm:$0xff]  ;;  %vm2975_vm8 = vcmp.lt.s32.totalorder %v2703_v10, 8200  ;;  %vm3043_vm9 = vcmp.lt.s32.totalorder %v2771_v34, 8200 }
  0xfd   : > { %2220 = vst.msk [vmem:[%s6285_s17 + $0x138] sm:$0xf] %vm2141_vm1, %v1947_v59  ;;  %v1217_v4 = vadd.f32 %v6260_v40, %v1216_v32  ;;  %v1387_v14 = vadd.f32 %v6260_v40, %v1386_v58  ;;  %v424_v32 = vld [vmem:[%s6153_s14 + $0x308] sm:$0xff] }
  0xfe   : > { %v2015_v13 = vpack.c.bf16 %v1555_v57, %v1555_v57  ;;  %v6698_v24 = vsel %vm3109_vm2, %v1555_v57, 0.0  ;;  %v2083_v59 = vpack.c.bf16 %v1725_v62, %v1725_v62  ;;  %v6701_v17 = vsel %vm3177_vm3, %v1725_v62, 0.0  ;;  %v559_v57 = vld [vmem:[%s6153_s14 + $0x740] sm:$0xff] }
  0xff   : > { %10462 = vst [vmem:[#allocation39_spill] sm:$0xff] %v6698_v24  ;;  %v1880_v58 = vpack.c.bf16 %v1217_v4, %v1217_v4  ;;  %v6707_v46 = vsel %vm2974_vm4, %v1217_v4, 0.0  ;;  %v1948_v53 = vpack.c.bf16 %v1387_v14, %v1387_v14  ;;  %v6710_v33 = vsel %vm3042_vm5, %v1387_v14, 0.0 }
 0x100   : > { %10463 = vst [vmem:[#allocation40_spill] sm:$0xff] %v6701_v17  ;;  %v613_v62 = vpack.c.bf16 %v356_v2, %v355_v50  ;;  %v647_v61 = vpack.c.bf16 %v424_v32, %v423_v29  ;;  %v681_v4 = vpack.c.bf16 %v492_v21, %v491_v51  ;;  %v715_v14 = vpack.c.bf16 %v560_v3, %v559_v57  ;;  %v6766_v57 = vld [vmem:[%s10202_s2] ss:$0 sm:$0xff] }
 0x101   : > { %10464 = vst [vmem:[#allocation41_spill] sm:$0xff] %v6710_v33  ;;  %v2566_v50 = vadd.s32 1192, %v6251_v37  ;;  %v2634_v3 = vadd.s32 1736, %v6251_v37 }
 0x102   : > { %2288 = vst.msk [vmem:[%s6285_s17 + $0x248] sm:$0xf] %vm2141_vm1, %v2015_v13  ;;  %v2839_v13 = vadd.s32 %v6255_v39, %v2565_v63  ;;  %v2704_v63 = vadd.s32 %v6255_v39, %v2430_v26 }
 0x103   : > { %2356 = vst.msk [vmem:[%s6285_s17 + $0x358] sm:$0xf] %vm2141_vm1, %v2083_v59  ;;  %v1556_v17 = vpop.f32.mrf.mxu2  ;;  %v1726_v30 = vpop.f32.mrf.mxu3  ;;  %v2907_v59 = vadd.s32 %v6255_v39, %v2633_v0  ;;  %v2772_v0 = vadd.s32 %v6255_v39, %v2498_v55  ;;  %v2840_v34 = vadd.s32 %v6255_v39, %v2566_v50 }
 0x104   : > { %2153 = vst.msk [vmem:[%s6285_s17 + $0x2c] sm:$0xf] %vm2141_vm1, %v1880_v58  ;;  %v1557_v24 = vadd.f32 %v6260_v40, %v1556_v17  ;;  %v1727_v15 = vadd.f32 %v6260_v40, %v1726_v30  ;;  %v1219_v22 = vpop.f32.mrf.mxu0  ;;  %v1389_v58 = vpop.f32.mrf.mxu1  ;;  %vm3111_vm10 = vcmp.lt.s32.totalorder %v2839_v13, 8200  ;;  %vm2976_vm12 = vcmp.lt.s32.totalorder %v2704_v63, 8200  ;;  %v494_v13 = vld [vmem:[%s6153_s14 + $0x538] sm:$0xff] }
 0x105   : > { %2221 = vst.msk [vmem:[%s6285_s17 + $0x13c] sm:$0xf] %vm2141_vm1, %v1948_v53  ;;  %v1220_v53 = vadd.f32 %v6260_v40, %v1219_v22  ;;  %v1390_v2 = vadd.f32 %v6260_v40, %v1389_v58  ;;  %vm3179_vm11 = vcmp.lt.s32.totalorder %v2907_v59, 8200  ;;  %vm3044_vm13 = vcmp.lt.s32.totalorder %v2772_v0, 8200 }
 0x106   : > { %v2016_v29 = vpack.c.bf16 %v1557_v24, %v1557_v24  ;;  %v6736_v30 = vsel %vm3110_vm6, %v1557_v24, 0.0  ;;  %v2084_v17 = vpack.c.bf16 %v1727_v15, %v1727_v15  ;;  %v6739_v32 = vsel %vm3178_vm7, %v1727_v15, 0.0 }
 0x107   : > { %10465 = vst [vmem:[#allocation42_spill] sm:$0xff] %v6736_v30  ;;  %v1881_v51 = vpack.c.bf16 %v1220_v53, %v1220_v53  ;;  %v6742_v22 = vsel %vm2975_vm8, %v1220_v53, 0.0  ;;  %v1949_v40 = vpack.c.bf16 %v1390_v2, %v1390_v2  ;;  %v6745_v21 = vsel %vm3043_vm9, %v1390_v2, 0.0  ;;  %5675 = vmatmul.msk.bf16.gmra.mxu0 %vm771_vm0, %v613_v62  ;;  %5709 = vmatmul.msk.bf16.gmra.mxu1 %vm771_vm0, %v647_v61  ;;  %v357_v2 = vld [vmem:[%s6153_s14 + $0xf0] sm:$0xff] }
 0x108   : > { %10466 = vst [vmem:[#allocation43_spill] sm:$0xff] %v6739_v32  ;;  %5743 = vmatmul.msk.bf16.gmra.mxu2 %vm771_vm0, %v681_v4  ;;  %5777 = vmatmul.msk.bf16.gmra.mxu3 %vm771_vm0, %v715_v14  ;;  %v2431_v15 = vadd.s32 112, %v6251_v37  ;;  %v2908_v24 = vadd.s32 %v6255_v39, %v2634_v3  ;;  %v2567_v4 = vadd.s32 1200, %v6251_v37  ;;  %v2635_v14 = vadd.s32 1744, %v6251_v37 }
 0x109   : > { %10467 = vst [vmem:[#allocation44_spill] sm:$0xff] %v6745_v21  ;;  %v2773_v53 = vadd.s32 %v6255_v39, %v2499_v11  ;;  %vm3112_vm14 = vcmp.lt.s32.totalorder %v2840_v34, 8200  ;;  %v2432_v59 = vadd.s32 120, %v6251_v37  ;;  %v2500_v63 = vadd.s32 664, %v6251_v37 }
 0x10a   : > { %2289 = vst.msk [vmem:[%s6285_s17 + $0x24c] sm:$0xf] %vm2141_vm1, %v2016_v29  ;;  %v2705_v3 = vadd.s32 %v6255_v39, %v2431_v15  ;;  %v358_v29 = vld [vmem:[%s6153_s14 + $0xf8] sm:$0xff]  ;;  %v493_v15 = vld [vmem:[%s6153_s14 + $0x530] sm:$0xff]  ;;  %vm3180_vm15 = vcmp.lt.s32.totalorder %v2908_v24, 8200 }
 0x10b   : > { %2357 = vst.msk [vmem:[%s6285_s17 + $0x35c] sm:$0xf] %vm2141_vm1, %v2084_v17  ;;  %v1559_v7 = vpop.f32.mrf.mxu2  ;;  %v1729_v10 = vpop.f32.mrf.mxu3  ;;  %vm3045_vm3 = vcmp.lt.s32.totalorder %v2773_v53, 8200 }
 0x10c   : > { %2154 = vst.msk [vmem:[%s6285_s17 + $0x30] sm:$0xf] %vm2141_vm1, %v1881_v51  ;;  %v1560_v26 = vadd.f32 %v6766_v57, %v1559_v7  ;;  %v1730_v55 = vadd.f32 %v6766_v57, %v1729_v10  ;;  %v1221_v62 = vpop.f32.mrf.mxu0  ;;  %v1391_v61 = vpop.f32.mrf.mxu1  ;;  %v425_v10 = vld [vmem:[%s6153_s14 + $0x310] sm:$0xff]  ;;  %vm2977_vm2 = vcmp.lt.s32.totalorder %v2705_v3, 8200 }
 0x10d   : > { %2222 = vst.msk [vmem:[%s6285_s17 + $0x140] sm:$0xf] %vm2141_vm1, %v1949_v40  ;;  %v1222_v58 = vadd.f32 %v6766_v57, %v1221_v62  ;;  %v1392_v50 = vadd.f32 %v6766_v57, %v1391_v61  ;;  %v426_v62 = vld [vmem:[%s6153_s14 + $0x318] sm:$0xff] }
 0x10e   : > { %v2017_v17 = vpack.c.bf16 %v1560_v26, %v1560_v26  ;;  %v6779_v51 = vsel %vm3111_vm10, %v1560_v26, 0.0  ;;  %v2085_v40 = vpack.c.bf16 %v1730_v55, %v1730_v55  ;;  %v6782_v7 = vsel %vm3179_vm11, %v1730_v55, 0.0  ;;  %v561_v26 = vld [vmem:[%s6153_s14 + $0x750] sm:$0xff] }
 0x10f   : > { %10468 = vst [vmem:[#allocation45_spill] sm:$0xff] %v6779_v51  ;;  %v1882_v61 = vpack.c.bf16 %v1222_v58, %v1222_v58  ;;  %v6788_v11 = vsel %vm2976_vm12, %v1222_v58, 0.0  ;;  %v1950_v32 = vpack.c.bf16 %v1392_v50, %v1392_v50  ;;  %v6791_v30 = vsel %vm3044_vm13, %v1392_v50, 0.0  ;;  %v562_v51 = vld [vmem:[%s6153_s14 + $0x758] sm:$0xff] }
 0x110   : > { %10469 = vst [vmem:[#allocation46_spill] sm:$0xff] %v6782_v7  ;;  %v614_v55 = vpack.c.bf16 %v358_v29, %v357_v2  ;;  %v648_v0 = vpack.c.bf16 %v426_v62, %v425_v10  ;;  %v682_v58 = vpack.c.bf16 %v494_v13, %v493_v15  ;;  %v716_v50 = vpack.c.bf16 %v562_v51, %v561_v26 }
 0x111   : > { %10470 = vst [vmem:[#allocation47_spill] sm:$0xff] %v6791_v30  ;;  %v2568_v2 = vadd.s32 1208, %v6251_v37  ;;  %v2636_v29 = vadd.s32 1752, %v6251_v37 }
 0x112   : > { %2290 = vst.msk [vmem:[%s6285_s17 + $0x250] sm:$0xf] %vm2141_vm1, %v2017_v17  ;;  %v2841_v17 = vadd.s32 %v6255_v39, %v2567_v4  ;;  %v2706_v4 = vadd.s32 %v6255_v39, %v2432_v59 }
 0x113   : > { %2358 = vst.msk [vmem:[%s6285_s17 + $0x360] sm:$0xf] %vm2141_vm1, %v2085_v40  ;;  %v1561_v7 = vpop.f32.mrf.mxu2  ;;  %v1731_v25 = vpop.f32.mrf.mxu3  ;;  %v2909_v40 = vadd.s32 %v6255_v39, %v2635_v14  ;;  %v2774_v14 = vadd.s32 %v6255_v39, %v2500_v63  ;;  %v2842_v3 = vadd.s32 %v6255_v39, %v2568_v2  ;;  %v2910_v53 = vadd.s32 %v6255_v39, %v2636_v29 }
 0x114   : > { %2155 = vst.msk [vmem:[%s6285_s17 + $0x34] sm:$0xf] %vm2141_vm1, %v1882_v61  ;;  %v1562_v19 = vadd.f32 %v6766_v57, %v1561_v7  ;;  %v1732_v36 = vadd.f32 %v6766_v57, %v1731_v25  ;;  %v1224_v49 = vpop.f32.mrf.mxu0  ;;  %v1394_v61 = vpop.f32.mrf.mxu1  ;;  %vm3113_vm4 = vcmp.lt.s32.totalorder %v2841_v17, 8200  ;;  %vm2978_vm6 = vcmp.lt.s32.totalorder %v2706_v4, 8200  ;;  %v496_v17 = vld [vmem:[%s6153_s14 + $0x548] sm:$0xff] }
 0x115   : > { %2223 = vst.msk [vmem:[%s6285_s17 + $0x144] sm:$0xf] %vm2141_vm1, %v1950_v32  ;;  %v1225_v32 = vadd.f32 %v6766_v57, %v1224_v49  ;;  %v1395_v51 = vadd.f32 %v6766_v57, %v1394_v61  ;;  %vm3181_vm5 = vcmp.lt.s32.totalorder %v2909_v40, 8200  ;;  %vm3046_vm7 = vcmp.lt.s32.totalorder %v2774_v14, 8200 }
 0x116   : > { %v2018_v10 = vpack.c.bf16 %v1562_v19, %v1562_v19  ;;  %v6817_v25 = vsel %vm3112_vm14, %v1562_v19, 0.0  ;;  %v2086_v7 = vpack.c.bf16 %v1732_v36, %v1732_v36  ;;  %v6820_v62 = vsel %vm3180_vm15, %v1732_v36, 0.0 }
 0x117   : > { %10471 = vst [vmem:[#allocation48_spill] sm:$0xff] %v6817_v25  ;;  %v1883_v15 = vpack.c.bf16 %v1225_v32, %v1225_v32  ;;  %v6823_v49 = vsel %vm2977_vm2, %v1225_v32, 0.0  ;;  %v1951_v13 = vpack.c.bf16 %v1395_v51, %v1395_v51  ;;  %v6826_v26 = vsel %vm3045_vm3, %v1395_v51, 0.0  ;;  %5676 = vmatmul.msk.bf16.gmra.mxu0 %vm771_vm0, %v614_v55  ;;  %5710 = vmatmul.msk.bf16.gmra.mxu1 %vm771_vm0, %v648_v0  ;;  %v359_v51 = vld [vmem:[%s6153_s14 + $0x100] sm:$0xff] }
 0x118   : > { %10472 = vst [vmem:[#allocation49_spill] sm:$0xff] %v6820_v62  ;;  %5744 = vmatmul.msk.bf16.gmra.mxu2 %vm771_vm0, %v682_v58  ;;  %5778 = vmatmul.msk.bf16.gmra.mxu3 %vm771_vm0, %v716_v50  ;;  %v2433_v36 = vadd.s32 128, %v6251_v37  ;;  %v2501_v19 = vadd.s32 672, %v6251_v37  ;;  %v2569_v58 = vadd.s32 1216, %v6251_v37  ;;  %v2637_v50 = vadd.s32 1760, %v6251_v37 }
 0x119   : > { %10473 = vst [vmem:[#allocation50_spill] sm:$0xff] %v6826_v26  ;;  %vm3114_vm8 = vcmp.lt.s32.totalorder %v2842_v3, 8200  ;;  %vm3182_vm9 = vcmp.lt.s32.totalorder %v2910_v53, 8200  ;;  %v2434_v40 = vadd.s32 136, %v6251_v37  ;;  %v2502_v4 = vadd.s32 680, %v6251_v37 }
 0x11a   : > { %2291 = vst.msk [vmem:[%s6285_s17 + $0x254] sm:$0xf] %vm2141_vm1, %v2018_v10  ;;  %v2707_v2 = vadd.s32 %v6255_v39, %v2433_v36  ;;  %v2775_v29 = vadd.s32 %v6255_v39, %v2501_v19  ;;  %v360_v10 = vld [vmem:[%s6153_s14 + $0x108] sm:$0xff]  ;;  %v495_v36 = vld [vmem:[%s6153_s14 + $0x540] sm:$0xff] }
 0x11b   : > { %2359 = vst.msk [vmem:[%s6285_s17 + $0x364] sm:$0xf] %vm2141_vm1, %v2086_v7  ;;  %v1564_v34 = vpop.f32.mrf.mxu2  ;;  %v1734_v24 = vpop.f32.mrf.mxu3 }
 0x11c   : > { %2156 = vst.msk [vmem:[%s6285_s17 + $0x38] sm:$0xf] %vm2141_vm1, %v1883_v15  ;;  %v1565_v59 = vadd.f32 %v6766_v57, %v1564_v34  ;;  %v1735_v63 = vadd.f32 %v6766_v57, %v1734_v24  ;;  %v1226_v55 = vpop.f32.mrf.mxu0  ;;  %v1396_v0 = vpop.f32.mrf.mxu1  ;;  %v427_v24 = vld [vmem:[%s6153_s14 + $0x320] sm:$0xff]  ;;  %vm2979_vm10 = vcmp.lt.s32.totalorder %v2707_v2, 8200  ;;  %vm3047_vm11 = vcmp.lt.s32.totalorder %v2775_v29, 8200 }
 0x11d   : > { %2224 = vst.msk [vmem:[%s6285_s17 + $0x148] sm:$0xf] %vm2141_vm1, %v1951_v13  ;;  %v1227_v61 = vadd.f32 %v6766_v57, %v1226_v55  ;;  %v1397_v32 = vadd.f32 %v6766_v57, %v1396_v0  ;;  %v428_v55 = vld [vmem:[%s6153_s14 + $0x328] sm:$0xff] }
 0x11e   : > { %v2019_v7 = vpack.c.bf16 %v1565_v59, %v1565_v59  ;;  %v6855_v15 = vsel %vm3113_vm4, %v1565_v59, 0.0  ;;  %v2087_v13 = vpack.c.bf16 %v1735_v63, %v1735_v63  ;;  %v6858_v34 = vsel %vm3181_vm5, %v1735_v63, 0.0  ;;  %v563_v59 = vld [vmem:[%s6153_s14 + $0x760] sm:$0xff] }
 0x11f   : > { %10474 = vst [vmem:[#allocation51_spill] sm:$0xff] %v6855_v15  ;;  %v1884_v0 = vpack.c.bf16 %v1227_v61, %v1227_v61  ;;  %v6864_v19 = vsel %vm2978_vm6, %v1227_v61, 0.0  ;;  %v1952_v62 = vpack.c.bf16 %v1397_v32, %v1397_v32  ;;  %v6867_v25 = vsel %vm3046_vm7, %v1397_v32, 0.0  ;;  %v564_v15 = vld [vmem:[%s6153_s14 + $0x768] sm:$0xff] }
 0x120   : > { %10475 = vst [vmem:[#allocation52_spill] sm:$0xff] %v6858_v34  ;;  %v615_v63 = vpack.c.bf16 %v360_v10, %v359_v51  ;;  %v649_v14 = vpack.c.bf16 %v428_v55, %v427_v24  ;;  %v683_v61 = vpack.c.bf16 %v496_v17, %v495_v36  ;;  %v717_v32 = vpack.c.bf16 %v564_v15, %v563_v59 }
 0x121   : > { %10476 = vst [vmem:[#allocation53_spill] sm:$0xff] %v6867_v25  ;;  %v2570_v51 = vadd.s32 1224, %v6251_v37  ;;  %v2638_v10 = vadd.s32 1768, %v6251_v37 }
 0x122   : > { %2292 = vst.msk [vmem:[%s6285_s17 + $0x258] sm:$0xf] %vm2141_vm1, %v2019_v7  ;;  %v2843_v7 = vadd.s32 %v6255_v39, %v2569_v58  ;;  %v2708_v58 = vadd.s32 %v6255_v39, %v2434_v40 }
 0x123   : > { %2360 = vst.msk [vmem:[%s6285_s17 + $0x368] sm:$0xf] %vm2141_vm1, %v2087_v13  ;;  %v1566_v34 = vpop.f32.mrf.mxu2  ;;  %v1736_v12 = vpop.f32.mrf.mxu3  ;;  %v2911_v13 = vadd.s32 %v6255_v39, %v2637_v50  ;;  %v2776_v50 = vadd.s32 %v6255_v39, %v2502_v4  ;;  %v2844_v2 = vadd.s32 %v6255_v39, %v2570_v51  ;;  %v2912_v29 = vadd.s32 %v6255_v39, %v2638_v10 }
 0x124   : > { %2157 = vst.msk [vmem:[%s6285_s17 + $0x3c] sm:$0xf] %vm2141_vm1, %v1884_v0  ;;  %v1567_v31 = vadd.f32 %v6766_v57, %v1566_v34  ;;  %v1737_v1 = vadd.f32 %v6766_v57, %v1736_v12  ;;  %v1229_v28 = vpop.f32.mrf.mxu0  ;;  %v1399_v0 = vpop.f32.mrf.mxu1  ;;  %vm3115_vm12 = vcmp.lt.s32.totalorder %v2843_v7, 8200  ;;  %vm2980_vm14 = vcmp.lt.s32.totalorder %v2708_v58, 8200  ;;  %v498_v7 = vld [vmem:[%s6153_s14 + $0x558] sm:$0xff] }
 0x125   : > { %2225 = vst.msk [vmem:[%s6285_s17 + $0x14c] sm:$0xf] %vm2141_vm1, %v1952_v62  ;;  %v1230_v62 = vadd.f32 %v6766_v57, %v1229_v28  ;;  %v1400_v15 = vadd.f32 %v6766_v57, %v1399_v0  ;;  %vm3183_vm13 = vcmp.lt.s32.totalorder %v2911_v13, 8200  ;;  %vm3048_vm15 = vcmp.lt.s32.totalorder %v2776_v50, 8200 }
 0x126   : > { %v2020_v24 = vpack.c.bf16 %v1567_v31, %v1567_v31  ;;  %v6893_v12 = vsel %vm3114_vm8, %v1567_v31, 0.0  ;;  %v2088_v34 = vpack.c.bf16 %v1737_v1, %v1737_v1  ;;  %v6896_v55 = vsel %vm3182_vm9, %v1737_v1, 0.0 }
 0x127   : > { %10477 = vst [vmem:[#allocation54_spill] sm:$0xff] %v6893_v12  ;;  %v1885_v36 = vpack.c.bf16 %v1230_v62, %v1230_v62  ;;  %v6899_v28 = vsel %vm2979_vm10, %v1230_v62, 0.0  ;;  %v1953_v17 = vpack.c.bf16 %v1400_v15, %v1400_v15  ;;  %v6902_v59 = vsel %vm3047_vm11, %v1400_v15, 0.0  ;;  %5677 = vmatmul.msk.bf16.gmra.mxu0 %vm771_vm0, %v615_v63  ;;  %5711 = vmatmul.msk.bf16.gmra.mxu1 %vm771_vm0, %v649_v14  ;;  %v361_v15 = vld [vmem:[%s6153_s14 + $0x110] sm:$0xff] }
 0x128   : > { %10478 = vst [vmem:[#allocation55_spill] sm:$0xff] %v6896_v55  ;;  %5745 = vmatmul.msk.bf16.gmra.mxu2 %vm771_vm0, %v683_v61  ;;  %5779 = vmatmul.msk.bf16.gmra.mxu3 %vm771_vm0, %v717_v32  ;;  %v2435_v1 = vadd.s32 144, %v6251_v37  ;;  %v2503_v31 = vadd.s32 688, %v6251_v37  ;;  %v2571_v61 = vadd.s32 1232, %v6251_v37  ;;  %v2639_v32 = vadd.s32 1776, %v6251_v37 }
 0x129   : > { %10479 = vst [vmem:[#allocation56_spill] sm:$0xff] %v6902_v59  ;;  %vm3116_vm2 = vcmp.lt.s32.totalorder %v2844_v2, 8200  ;;  %vm3184_vm3 = vcmp.lt.s32.totalorder %v2912_v29, 8200  ;;  %v2436_v13 = vadd.s32 152, %v6251_v37  ;;  %v2504_v58 = vadd.s32 696, %v6251_v37 }
 0x12a   : > { %2293 = vst.msk [vmem:[%s6285_s17 + $0x25c] sm:$0xf] %vm2141_vm1, %v2020_v24  ;;  %v2709_v51 = vadd.s32 %v6255_v39, %v2435_v1  ;;  %v2777_v10 = vadd.s32 %v6255_v39, %v2503_v31  ;;  %v362_v24 = vld [vmem:[%s6153_s14 + $0x118] sm:$0xff]  ;;  %v497_v1 = vld [vmem:[%s6153_s14 + $0x550] sm:$0xff] }
 0x12b   : > { %2361 = vst.msk [vmem:[%s6285_s17 + $0x36c] sm:$0xf] %vm2141_vm1, %v2088_v34  ;;  %v1569_v3 = vpop.f32.mrf.mxu2  ;;  %v1739_v53 = vpop.f32.mrf.mxu3 }
 0x12c   : > { %2158 = vst.msk [vmem:[%s6285_s17 + $0x40] sm:$0xf] %vm2141_vm1, %v1885_v36  ;;  %v1570_v40 = vadd.f32 %v6766_v57, %v1569_v3  ;;  %v1740_v4 = vadd.f32 %v6766_v57, %v1739_v53  ;;  %v1231_v63 = vpop.f32.mrf.mxu0  ;;  %v1401_v14 = vpop.f32.mrf.mxu1  ;;  %v429_v53 = vld [vmem:[%s6153_s14 + $0x330] sm:$0xff]  ;;  %vm2981_vm4 = vcmp.lt.s32.totalorder %v2709_v51, 8200  ;;  %vm3049_vm5 = vcmp.lt.s32.totalorder %v2777_v10, 8200 }
 0x12d   : > { %2226 = vst.msk [vmem:[%s6285_s17 + $0x150] sm:$0xf] %vm2141_vm1, %v1953_v17  ;;  %v1232_v0 = vadd.f32 %v6766_v57, %v1231_v63  ;;  %v1402_v62 = vadd.f32 %v6766_v57, %v1401_v14  ;;  %v430_v63 = vld [vmem:[%s6153_s14 + $0x338] sm:$0xff] }
 0x12e   : > { %v2021_v34 = vpack.c.bf16 %v1570_v40, %v1570_v40  ;;  %v6931_v36 = vsel %vm3115_vm12, %v1570_v40, 0.0  ;;  %v2089_v17 = vpack.c.bf16 %v1740_v4, %v1740_v4  ;;  %v6934_v3 = vsel %vm3183_vm13, %v1740_v4, 0.0  ;;  %v565_v40 = vld [vmem:[%s6153_s14 + $0x770] sm:$0xff] }
 0x12f   : > { %10480 = vst [vmem:[#allocation57_spill] sm:$0xff] %v6931_v36  ;;  %v1886_v14 = vpack.c.bf16 %v1232_v0, %v1232_v0  ;;  %v6940_v31 = vsel %vm2980_vm14, %v1232_v0, 0.0  ;;  %v1954_v55 = vpack.c.bf16 %v1402_v62, %v1402_v62  ;;  %v6943_v12 = vsel %vm3048_vm15, %v1402_v62, 0.0  ;;  %v566_v36 = vld [vmem:[%s6153_s14 + $0x778] sm:$0xff] }
 0x130   : > { %10481 = vst [vmem:[#allocation58_spill] sm:$0xff] %v6934_v3  ;;  %v616_v4 = vpack.c.bf16 %v362_v24, %v361_v15  ;;  %v650_v50 = vpack.c.bf16 %v430_v63, %v429_v53  ;;  %v684_v0 = vpack.c.bf16 %v498_v7, %v497_v1  ;;  %v718_v62 = vpack.c.bf16 %v566_v36, %v565_v40 }
 0x131   : > { %10482 = vst [vmem:[#allocation59_spill] sm:$0xff] %v6943_v12  ;;  %v2572_v15 = vadd.s32 1240, %v6251_v37  ;;  %v2640_v24 = vadd.s32 1784, %v6251_v37 }
 0x132   : > { %2294 = vst.msk [vmem:[%s6285_s17 + $0x260] sm:$0xf] %vm2141_vm1, %v2021_v34  ;;  %v2845_v34 = vadd.s32 %v6255_v39, %v2571_v61  ;;  %v2710_v61 = vadd.s32 %v6255_v39, %v2436_v13 }
 0x133   : > { %2362 = vst.msk [vmem:[%s6285_s17 + $0x370] sm:$0xf] %vm2141_vm1, %v2089_v17  ;;  %v1571_v3 = vpop.f32.mrf.mxu2  ;;  %v1741_v12 = vpop.f32.mrf.mxu3  ;;  %v2913_v17 = vadd.s32 %v6255_v39, %v2639_v32  ;;  %v2778_v32 = vadd.s32 %v6255_v39, %v2504_v58  ;;  %v2846_v51 = vadd.s32 %v6255_v39, %v2572_v15  ;;  %v2914_v10 = vadd.s32 %v6255_v39, %v2640_v24 }
 0x134   : > { %2159 = vst.msk [vmem:[%s6285_s17 + $0x44] sm:$0xf] %vm2141_vm1, %v1886_v14  ;;  %v1572_v59 = vadd.f32 %v6766_v57, %v1571_v3  ;;  %v1742_v25 = vadd.f32 %v6766_v57, %v1741_v12  ;;  %v1234_v26 = vpop.f32.mrf.mxu0  ;;  %v1404_v14 = vpop.f32.mrf.mxu1  ;;  %vm3117_vm6 = vcmp.lt.s32.totalorder %v2845_v34, 8200  ;;  %vm2982_vm8 = vcmp.lt.s32.totalorder %v2710_v61, 8200  ;;  %v500_v34 = vld [vmem:[%s6153_s14 + $0x568] sm:$0xff] }
 0x135   : > { %2227 = vst.msk [vmem:[%s6285_s17 + $0x154] sm:$0xf] %vm2141_vm1, %v1954_v55  ;;  %v1235_v55 = vadd.f32 %v6766_v57, %v1234_v26  ;;  %v1405_v36 = vadd.f32 %v6766_v57, %v1404_v14  ;;  %vm3185_vm7 = vcmp.lt.s32.totalorder %v2913_v17, 8200  ;;  %vm3050_vm9 = vcmp.lt.s32.totalorder %v2778_v32, 8200 }
 0x136   : > { %v2022_v53 = vpack.c.bf16 %v1572_v59, %v1572_v59  ;;  %v6969_v12 = vsel %vm3116_vm2, %v1572_v59, 0.0  ;;  %v2090_v3 = vpack.c.bf16 %v1742_v25, %v1742_v25  ;;  %v6972_v63 = vsel %vm3184_vm3, %v1742_v25, 0.0 }
 0x137   : > { %10483 = vst [vmem:[#allocation60_spill] sm:$0xff] %v6969_v12  ;;  %v1887_v1 = vpack.c.bf16 %v1235_v55, %v1235_v55  ;;  %v6975_v26 = vsel %vm2981_vm4, %v1235_v55, 0.0  ;;  %v1955_v7 = vpack.c.bf16 %v1405_v36, %v1405_v36  ;;  %v6978_v40 = vsel %vm3049_vm5, %v1405_v36, 0.0  ;;  %5678 = vmatmul.msk.bf16.gmra.mxu0 %vm771_vm0, %v616_v4  ;;  %5712 = vmatmul.msk.bf16.gmra.mxu1 %vm771_vm0, %v650_v50  ;;  %v363_v36 = vld [vmem:[%s6153_s14 + $0x120] sm:$0xff] }
 0x138   : > { %10484 = vst [vmem:[#allocation61_spill] sm:$0xff] %v6972_v63  ;;  %5746 = vmatmul.msk.bf16.gmra.mxu2 %vm771_vm0, %v684_v0  ;;  %5780 = vmatmul.msk.bf16.gmra.mxu3 %vm771_vm0, %v718_v62  ;;  %v2437_v25 = vadd.s32 160, %v6251_v37  ;;  %v2505_v59 = vadd.s32 704, %v6251_v37  ;;  %v2573_v0 = vadd.s32 1248, %v6251_v37  ;;  %v2641_v62 = vadd.s32 1792, %v6251_v37 }
 0x139   : > { %10485 = vst [vmem:[#allocation62_spill] sm:$0xff] %v6978_v40  ;;  %vm3118_vm10 = vcmp.lt.s32.totalorder %v2846_v51, 8200  ;;  %vm3186_vm11 = vcmp.lt.s32.totalorder %v2914_v10, 8200  ;;  %v2438_v17 = vadd.s32 168, %v6251_v37  ;;  %v2506_v61 = vadd.s32 712, %v6251_v37 }
 0x13a   : > { %2295 = vst.msk [vmem:[%s6285_s17 + $0x264] sm:$0xf] %vm2141_vm1, %v2022_v53  ;;  %v2711_v15 = vadd.s32 %v6255_v39, %v2437_v25  ;;  %v2779_v24 = vadd.s32 %v6255_v39, %v2505_v59  ;;  %v364_v53 = vld [vmem:[%s6153_s14 + $0x128] sm:$0xff]  ;;  %v499_v25 = vld [vmem:[%s6153_s14 + $0x560] sm:$0xff] }
 0x13b   : > { %2363 = vst.msk [vmem:[%s6285_s17 + $0x374] sm:$0xf] %vm2141_vm1, %v2090_v3  ;;  %v1574_v2 = vpop.f32.mrf.mxu2  ;;  %v1744_v29 = vpop.f32.mrf.mxu3 }
 0x13c   : > { %2160 = vst.msk [vmem:[%s6285_s17 + $0x48] sm:$0xf] %vm2141_vm1, %v1887_v1  ;;  %v1575_v13 = vadd.f32 %v6766_v57, %v1574_v2  ;;  %v1745_v58 = vadd.f32 %v6766_v57, %v1744_v29  ;;  %v1236_v4 = vpop.f32.mrf.mxu0  ;;  %v1406_v50 = vpop.f32.mrf.mxu1  ;;  %v431_v29 = vld [vmem:[%s6153_s14 + $0x340] sm:$0xff]  ;;  %vm2983_vm12 = vcmp.lt.s32.totalorder %v2711_v15, 8200  ;;  %vm3051_vm13 = vcmp.lt.s32.totalorder %v2779_v24, 8200 }
 0x13d   : > { %2228 = vst.msk [vmem:[%s6285_s17 + $0x158] sm:$0xf] %vm2141_vm1, %v1955_v7  ;;  %v1237_v14 = vadd.f32 %v6766_v57, %v1236_v4  ;;  %v1407_v55 = vadd.f32 %v6766_v57, %v1406_v50  ;;  %v432_v4 = vld [vmem:[%s6153_s14 + $0x348] sm:$0xff] }
 0x13e   : > { %v2023_v3 = vpack.c.bf16 %v1575_v13, %v1575_v13  ;;  %v7007_v1 = vsel %vm3117_vm6, %v1575_v13, 0.0  ;;  %v2091_v7 = vpack.c.bf16 %v1745_v58, %v1745_v58  ;;  %v7010_v2 = vsel %vm3185_vm7, %v1745_v58, 0.0  ;;  %v567_v13 = vld [vmem:[%s6153_s14 + $0x780] sm:$0xff] }
 0x13f   : > { %10486 = vst [vmem:[#allocation63_spill] sm:$0xff] %v7007_v1  ;;  %v1888_v50 = vpack.c.bf16 %v1237_v14, %v1237_v14  ;;  %v7016_v59 = vsel %vm2982_vm8, %v1237_v14, 0.0  ;;  %v1956_v63 = vpack.c.bf16 %v1407_v55, %v1407_v55  ;;  %v7019_v12 = vsel %vm3050_vm9, %v1407_v55, 0.0  ;;  %v568_v1 = vld [vmem:[%s6153_s14 + $0x788] sm:$0xff] }
 0x140   : > { %10487 = vst [vmem:[#allocation64_spill] sm:$0xff] %v7010_v2  ;;  %v617_v58 = vpack.c.bf16 %v364_v53, %v363_v36  ;;  %v651_v32 = vpack.c.bf16 %v432_v4, %v431_v29  ;;  %v685_v14 = vpack.c.bf16 %v500_v34, %v499_v25  ;;  %v719_v55 = vpack.c.bf16 %v568_v1, %v567_v13 }
 0x141   : > { %10488 = vst [vmem:[#allocation65_spill] sm:$0xff] %v7019_v12  ;;  %v2574_v36 = vadd.s32 1256, %v6251_v37  ;;  %v2642_v53 = vadd.s32 1800, %v6251_v37 }
 0x142   : > { %2296 = vst.msk [vmem:[%s6285_s17 + $0x268] sm:$0xf] %vm2141_vm1, %v2023_v3  ;;  %v2847_v3 = vadd.s32 %v6255_v39, %v2573_v0  ;;  %v2712_v0 = vadd.s32 %v6255_v39, %v2438_v17 }
 0x143   : > { %2364 = vst.msk [vmem:[%s6285_s17 + $0x378] sm:$0xf] %vm2141_vm1, %v2091_v7  ;;  %v1576_v2 = vpop.f32.mrf.mxu2  ;;  %v1746_v12 = vpop.f32.mrf.mxu3  ;;  %v2915_v7 = vadd.s32 %v6255_v39, %v2641_v62  ;;  %v2780_v62 = vadd.s32 %v6255_v39, %v2506_v61  ;;  %v2848_v15 = vadd.s32 %v6255_v39, %v2574_v36  ;;  %v2916_v24 = vadd.s32 %v6255_v39, %v2642_v53 }
 0x144   : > { %2161 = vst.msk [vmem:[%s6285_s17 + $0x4c] sm:$0xf] %vm2141_vm1, %v1888_v50  ;;  %v1577_v40 = vadd.f32 %v6766_v57, %v1576_v2  ;;  %v1747_v30 = vadd.f32 %v6766_v57, %v1746_v12  ;;  %v1239_v21 = vpop.f32.mrf.mxu0  ;;  %v1409_v50 = vpop.f32.mrf.mxu1  ;;  %vm3119_vm14 = vcmp.lt.s32.totalorder %v2847_v3, 8200  ;;  %vm2984_vm2 = vcmp.lt.s32.totalorder %v2712_v0, 8200  ;;  %v502_v3 = vld [vmem:[%s6153_s14 + $0x578] sm:$0xff] }
 0x145   : > { %2229 = vst.msk [vmem:[%s6285_s17 + $0x15c] sm:$0xf] %vm2141_vm1, %v1956_v63  ;;  %v1240_v63 = vadd.f32 %v6766_v57, %v1239_v21  ;;  %v1410_v1 = vadd.f32 %v6766_v57, %v1409_v50  ;;  %vm3187_vm15 = vcmp.lt.s32.totalorder %v2915_v7, 8200  ;;  %vm3052_vm3 = vcmp.lt.s32.totalorder %v2780_v62, 8200 }
 0x146   : > { %v2024_v29 = vpack.c.bf16 %v1577_v40, %v1577_v40  ;;  %v7045_v12 = vsel %vm3118_vm10, %v1577_v40, 0.0  ;;  %v2092_v2 = vpack.c.bf16 %v1747_v30, %v1747_v30  ;;  %v7048_v4 = vsel %vm3186_vm11, %v1747_v30, 0.0 }
 0x147   : > { %10489 = vst [vmem:[#allocation66_spill] sm:$0xff] %v7045_v12  ;;  %v1889_v25 = vpack.c.bf16 %v1240_v63, %v1240_v63  ;;  %v7051_v21 = vsel %vm2983_vm12, %v1240_v63, 0.0  ;;  %v1957_v34 = vpack.c.bf16 %v1410_v1, %v1410_v1  ;;  %v7054_v13 = vsel %vm3051_vm13, %v1410_v1, 0.0  ;;  %5679 = vmatmul.msk.bf16.gmra.mxu0 %vm771_vm0, %v617_v58  ;;  %5713 = vmatmul.msk.bf16.gmra.mxu1 %vm771_vm0, %v651_v32  ;;  %v365_v1 = vld [vmem:[%s6153_s14 + $0x130] sm:$0xff] }
 0x148   : > { %10490 = vst [vmem:[#allocation67_spill] sm:$0xff] %v7048_v4  ;;  %5747 = vmatmul.msk.bf16.gmra.mxu2 %vm771_vm0, %v685_v14  ;;  %5781 = vmatmul.msk.bf16.gmra.mxu3 %vm771_vm0, %v719_v55  ;;  %v2439_v30 = vadd.s32 176, %v6251_v37  ;;  %v2507_v40 = vadd.s32 720, %v6251_v37  ;;  %v2575_v14 = vadd.s32 1264, %v6251_v37  ;;  %v2643_v55 = vadd.s32 1808, %v6251_v37 }
 0x149   : > { %10491 = vst [vmem:[#allocation68_spill] sm:$0xff] %v7054_v13  ;;  %vm3120_vm4 = vcmp.lt.s32.totalorder %v2848_v15, 8200  ;;  %vm3188_vm5 = vcmp.lt.s32.totalorder %v2916_v24, 8200  ;;  %v2440_v7 = vadd.s32 184, %v6251_v37  ;;  %v2508_v0 = vadd.s32 728, %v6251_v37 }
 0x14a   : > { %2297 = vst.msk [vmem:[%s6285_s17 + $0x26c] sm:$0xf] %vm2141_vm1, %v2024_v29  ;;  %v2713_v36 = vadd.s32 %v6255_v39, %v2439_v30  ;;  %v2781_v53 = vadd.s32 %v6255_v39, %v2507_v40  ;;  %v366_v29 = vld [vmem:[%s6153_s14 + $0x138] sm:$0xff]  ;;  %v501_v30 = vld [vmem:[%s6153_s14 + $0x570] sm:$0xff] }
 0x14b   : > { %2365 = vst.msk [vmem:[%s6285_s17 + $0x37c] sm:$0xf] %vm2141_vm1, %v2092_v2  ;;  %v1579_v51 = vpop.f32.mrf.mxu2  ;;  %v1749_v10 = vpop.f32.mrf.mxu3 }
 0x14c   : > { %2162 = vst.msk [vmem:[%s6285_s17 + $0x50] sm:$0xf] %vm2141_vm1, %v1889_v25  ;;  %v1580_v17 = vadd.f32 %v6766_v57, %v1579_v51  ;;  %v1750_v61 = vadd.f32 %v6766_v57, %v1749_v10  ;;  %v1241_v58 = vpop.f32.mrf.mxu0  ;;  %v1411_v32 = vpop.f32.mrf.mxu1  ;;  %v433_v10 = vld [vmem:[%s6153_s14 + $0x350] sm:$0xff]  ;;  %vm2985_vm6 = vcmp.lt.s32.totalorder %v2713_v36, 8200  ;;  %vm3053_vm7 = vcmp.lt.s32.totalorder %v2781_v53, 8200 }
 0x14d   : > { %2230 = vst.msk [vmem:[%s6285_s17 + $0x160] sm:$0xf] %vm2141_vm1, %v1957_v34  ;;  %v1242_v50 = vadd.f32 %v6766_v57, %v1241_v58  ;;  %v1412_v63 = vadd.f32 %v6766_v57, %v1411_v32  ;;  %v434_v58 = vld [vmem:[%s6153_s14 + $0x358] sm:$0xff] }
 0x14e   : > { %v2025_v2 = vpack.c.bf16 %v1580_v17, %v1580_v17  ;;  %v7083_v25 = vsel %vm3119_vm14, %v1580_v17, 0.0  ;;  %v2093_v34 = vpack.c.bf16 %v1750_v61, %v1750_v61  ;;  %v7086_v51 = vsel %vm3187_vm15, %v1750_v61, 0.0  ;;  %v569_v17 = vld [vmem:[%s6153_s14 + $0x790] sm:$0xff] }
 0x14f   : > { %10492 = vst [vmem:[#allocation69_spill] sm:$0xff] %v7083_v25  ;;  %v1890_v32 = vpack.c.bf16 %v1242_v50, %v1242_v50  ;;  %v7092_v40 = vsel %vm2984_vm2, %v1242_v50, 0.0  ;;  %v1958_v4 = vpack.c.bf16 %v1412_v63, %v1412_v63  ;;  %v7095_v12 = vsel %vm3052_vm3, %v1412_v63, 0.0  ;;  %v570_v25 = vld [vmem:[%s6153_s14 + $0x798] sm:$0xff] }
 0x150   : > { %10493 = vst [vmem:[#allocation70_spill] sm:$0xff] %v7086_v51  ;;  %v618_v61 = vpack.c.bf16 %v366_v29, %v365_v1  ;;  %v652_v62 = vpack.c.bf16 %v434_v58, %v433_v10  ;;  %v686_v50 = vpack.c.bf16 %v502_v3, %v501_v30  ;;  %v720_v63 = vpack.c.bf16 %v570_v25, %v569_v17 }
 0x151   : > { %10494 = vst [vmem:[#allocation71_spill] sm:$0xff] %v7095_v12  ;;  %v2576_v1 = vadd.s32 1272, %v6251_v37  ;;  %v2644_v29 = vadd.s32 1816, %v6251_v37 }
 0x152   : > { %2298 = vst.msk [vmem:[%s6285_s17 + $0x270] sm:$0xf] %vm2141_vm1, %v2025_v2  ;;  %v2849_v2 = vadd.s32 %v6255_v39, %v2575_v14  ;;  %v2714_v14 = vadd.s32 %v6255_v39, %v2440_v7 }
 0x153   : > { %2366 = vst.msk [vmem:[%s6285_s17 + $0x380] sm:$0xf] %vm2141_vm1, %v2093_v34  ;;  %v1581_v51 = vpop.f32.mrf.mxu2  ;;  %v1751_v12 = vpop.f32.mrf.mxu3  ;;  %v2917_v34 = vadd.s32 %v6255_v39, %v2643_v55  ;;  %v2782_v55 = vadd.s32 %v6255_v39, %v2508_v0  ;;  %v2850_v36 = vadd.s32 %v6255_v39, %v2576_v1  ;;  %v2918_v53 = vadd.s32 %v6255_v39, %v2644_v29 }
 0x154   : > { %2163 = vst.msk [vmem:[%s6285_s17 + $0x54] sm:$0xf] %vm2141_vm1, %v1890_v32  ;;  %v1582_v13 = vadd.f32 %v6766_v57, %v1581_v51  ;;  %v1752_v33 = vadd.f32 %v6766_v57, %v1751_v12  ;;  %v1244_v23 = vpop.f32.mrf.mxu0  ;;  %v1414_v32 = vpop.f32.mrf.mxu1  ;;  %vm3121_vm8 = vcmp.lt.s32.totalorder %v2849_v2, 8200  ;;  %vm2986_vm10 = vcmp.lt.s32.totalorder %v2714_v14, 8200  ;;  %v504_v2 = vld [vmem:[%s6153_s14 + $0x588] sm:$0xff] }
 0x155   : > { %2231 = vst.msk [vmem:[%s6285_s17 + $0x164] sm:$0xf] %vm2141_vm1, %v1958_v4  ;;  %v1245_v4 = vadd.f32 %v6766_v57, %v1244_v23  ;;  %v1415_v25 = vadd.f32 %v6766_v57, %v1414_v32  ;;  %vm3189_vm9 = vcmp.lt.s32.totalorder %v2917_v34, 8200  ;;  %vm3054_vm11 = vcmp.lt.s32.totalorder %v2782_v55, 8200 }
 0x156   : > { %v2026_v10 = vpack.c.bf16 %v1582_v13, %v1582_v13  ;;  %v7121_v12 = vsel %vm3120_vm4, %v1582_v13, 0.0  ;;  %v2094_v51 = vpack.c.bf16 %v1752_v33, %v1752_v33  ;;  %v7124_v58 = vsel %vm3188_vm5, %v1752_v33, 0.0 }
 0x157   : > { %10495 = vst [vmem:[#allocation72_spill] sm:$0xff] %v7121_v12  ;;  %v1891_v30 = vpack.c.bf16 %v1245_v4, %v1245_v4  ;;  %v7127_v23 = vsel %vm2985_vm6, %v1245_v4, 0.0  ;;  %v1959_v3 = vpack.c.bf16 %v1415_v25, %v1415_v25  ;;  %v7130_v17 = vsel %vm3053_vm7, %v1415_v25, 0.0  ;;  %5680 = vmatmul.msk.bf16.gmra.mxu0 %vm771_vm0, %v618_v61  ;;  %5714 = vmatmul.msk.bf16.gmra.mxu1 %vm771_vm0, %v652_v62  ;;  %v367_v25 = vld [vmem:[%s6153_s14 + $0x140] sm:$0xff] }
 0x158   : > { %10496 = vst [vmem:[#allocation73_spill] sm:$0xff] %v7124_v58  ;;  %5748 = vmatmul.msk.bf16.gmra.mxu2 %vm771_vm0, %v686_v50  ;;  %5782 = vmatmul.msk.bf16.gmra.mxu3 %vm771_vm0, %v720_v63  ;;  %v2441_v33 = vadd.s32 192, %v6251_v37  ;;  %v2509_v13 = vadd.s32 736, %v6251_v37  ;;  %v2577_v50 = vadd.s32 1280, %v6251_v37  ;;  %v2645_v63 = vadd.s32 1824, %v6251_v37 }
 0x159   : > { %10497 = vst [vmem:[#allocation74_spill] sm:$0xff] %v7130_v17  ;;  %vm3122_vm12 = vcmp.lt.s32.totalorder %v2850_v36, 8200  ;;  %vm3190_vm13 = vcmp.lt.s32.totalorder %v2918_v53, 8200  ;;  %v2442_v34 = vadd.s32 200, %v6251_v37  ;;  %v2510_v14 = vadd.s32 744, %v6251_v37 }
 0x15a   : > { %2299 = vst.msk [vmem:[%s6285_s17 + $0x274] sm:$0xf] %vm2141_vm1, %v2026_v10  ;;  %v2715_v1 = vadd.s32 %v6255_v39, %v2441_v33  ;;  %v2783_v29 = vadd.s32 %v6255_v39, %v2509_v13  ;;  %v368_v10 = vld [vmem:[%s6153_s14 + $0x148] sm:$0xff]  ;;  %v503_v33 = vld [vmem:[%s6153_s14 + $0x580] sm:$0xff] }
 0x15b   : > { %2367 = vst.msk [vmem:[%s6285_s17 + $0x384] sm:$0xf] %vm2141_vm1, %v2094_v51  ;;  %v1584_v15 = vpop.f32.mrf.mxu2  ;;  %v1754_v24 = vpop.f32.mrf.mxu3 }
 0x15c   : > { %2164 = vst.msk [vmem:[%s6285_s17 + $0x58] sm:$0xf] %vm2141_vm1, %v1891_v30  ;;  %v1585_v7 = vadd.f32 %v6766_v57, %v1584_v15  ;;  %v1755_v0 = vadd.f32 %v6766_v57, %v1754_v24  ;;  %v1246_v61 = vpop.f32.mrf.mxu0  ;;  %v1416_v62 = vpop.f32.mrf.mxu1  ;;  %v435_v24 = vld [vmem:[%s6153_s14 + $0x360] sm:$0xff]  ;;  %vm2987_vm14 = vcmp.lt.s32.totalorder %v2715_v1, 8200  ;;  %vm3055_vm15 = vcmp.lt.s32.totalorder %v2783_v29, 8200 }
 0x15d   : > { %2232 = vst.msk [vmem:[%s6285_s17 + $0x168] sm:$0xf] %vm2141_vm1, %v1959_v3  ;;  %v1247_v32 = vadd.f32 %v6766_v57, %v1246_v61  ;;  %v1417_v4 = vadd.f32 %v6766_v57, %v1416_v62  ;;  %v436_v61 = vld [vmem:[%s6153_s14 + $0x368] sm:$0xff] }
 0x15e   : > { %v2027_v51 = vpack.c.bf16 %v1585_v7, %v1585_v7  ;;  %v7159_v30 = vsel %vm3121_vm8, %v1585_v7, 0.0  ;;  %v2095_v3 = vpack.c.bf16 %v1755_v0, %v1755_v0  ;;  %v7162_v15 = vsel %vm3189_vm9, %v1755_v0, 0.0  ;;  %v571_v7 = vld [vmem:[%s6153_s14 + $0x7a0] sm:$0xff] }
 0x15f   : > { %10498 = vst [vmem:[#allocation75_spill] sm:$0xff] %v7159_v30  ;;  %v1892_v62 = vpack.c.bf16 %v1247_v32, %v1247_v32  ;;  %v7168_v13 = vsel %vm2986_vm10, %v1247_v32, 0.0  ;;  %v1960_v58 = vpack.c.bf16 %v1417_v4, %v1417_v4  ;;  %v7171_v12 = vsel %vm3054_vm11, %v1417_v4, 0.0  ;;  %v572_v30 = vld [vmem:[%s6153_s14 + $0x7a8] sm:$0xff] }
 0x160   : > { %10499 = vst [vmem:[#allocation76_spill] sm:$0xff] %v7162_v15  ;;  %v619_v0 = vpack.c.bf16 %v368_v10, %v367_v25  ;;  %v653_v55 = vpack.c.bf16 %v436_v61, %v435_v24  ;;  %v687_v32 = vpack.c.bf16 %v504_v2, %v503_v33  ;;  %v721_v4 = vpack.c.bf16 %v572_v30, %v571_v7 }
 0x161   : > { %10500 = vst [vmem:[#allocation77_spill] sm:$0xff] %v7171_v12  ;;  %v2578_v25 = vadd.s32 1288, %v6251_v37  ;;  %v2646_v10 = vadd.s32 1832, %v6251_v37 }
 0x162   : > { %2300 = vst.msk [vmem:[%s6285_s17 + $0x278] sm:$0xf] %vm2141_vm1, %v2027_v51  ;;  %v2851_v51 = vadd.s32 %v6255_v39, %v2577_v50  ;;  %v2716_v50 = vadd.s32 %v6255_v39, %v2442_v34 }
 0x163   : > { %2368 = vst.msk [vmem:[%s6285_s17 + $0x388] sm:$0xf] %vm2141_vm1, %v2095_v3  ;;  %v1586_v15 = vpop.f32.mrf.mxu2  ;;  %v1756_v12 = vpop.f32.mrf.mxu3  ;;  %v2919_v3 = vadd.s32 %v6255_v39, %v2645_v63  ;;  %v2784_v63 = vadd.s32 %v6255_v39, %v2510_v14  ;;  %v2852_v1 = vadd.s32 %v6255_v39, %v2578_v25  ;;  %v2920_v29 = vadd.s32 %v6255_v39, %v2646_v10 }
 0x164   : > { %2165 = vst.msk [vmem:[%s6285_s17 + $0x5c] sm:$0xf] %vm2141_vm1, %v1892_v62  ;;  %v1587_v17 = vadd.f32 %v6766_v57, %v1586_v15  ;;  %v1757_v42 = vadd.f32 %v6766_v57, %v1756_v12  ;;  %v1249_v44 = vpop.f32.mrf.mxu0  ;;  %v1419_v62 = vpop.f32.mrf.mxu1  ;;  %vm3123_vm2 = vcmp.lt.s32.totalorder %v2851_v51, 8200  ;;  %vm2988_vm4 = vcmp.lt.s32.totalorder %v2716_v50, 8200  ;;  %v506_v51 = vld [vmem:[%s6153_s14 + $0x598] sm:$0xff] }
 0x165   : > { %2233 = vst.msk [vmem:[%s6285_s17 + $0x16c] sm:$0xf] %vm2141_vm1, %v1960_v58  ;;  %v1250_v58 = vadd.f32 %v6766_v57, %v1249_v44  ;;  %v1420_v30 = vadd.f32 %v6766_v57, %v1419_v62  ;;  %vm3191_vm3 = vcmp.lt.s32.totalorder %v2919_v3, 8200  ;;  %vm3056_vm5 = vcmp.lt.s32.totalorder %v2784_v63, 8200 }
 0x166   : > { %v2028_v24 = vpack.c.bf16 %v1587_v17, %v1587_v17  ;;  %v7197_v12 = vsel %vm3122_vm12, %v1587_v17, 0.0  ;;  %v2096_v15 = vpack.c.bf16 %v1757_v42, %v1757_v42  ;;  %v7200_v61 = vsel %vm3190_vm13, %v1757_v42, 0.0 }
 0x167   : > { %10501 = vst [vmem:[#allocation78_spill] sm:$0xff] %v7197_v12  ;;  %v1893_v33 = vpack.c.bf16 %v1250_v58, %v1250_v58  ;;  %v7203_v44 = vsel %vm2987_vm14, %v1250_v58, 0.0  ;;  %v1961_v2 = vpack.c.bf16 %v1420_v30, %v1420_v30  ;;  %v7206_v7 = vsel %vm3055_vm15, %v1420_v30, 0.0  ;;  %5681 = vmatmul.msk.bf16.gmra.mxu0 %vm771_vm0, %v619_v0  ;;  %5715 = vmatmul.msk.bf16.gmra.mxu1 %vm771_vm0, %v653_v55  ;;  %v369_v30 = vld [vmem:[%s6153_s14 + $0x150] sm:$0xff] }
 0x168   : > { %10502 = vst [vmem:[#allocation79_spill] sm:$0xff] %v7200_v61  ;;  %5749 = vmatmul.msk.bf16.gmra.mxu2 %vm771_vm0, %v687_v32  ;;  %5783 = vmatmul.msk.bf16.gmra.mxu3 %vm771_vm0, %v721_v4  ;;  %v2443_v42 = vadd.s32 208, %v6251_v37  ;;  %v2511_v17 = vadd.s32 752, %v6251_v37  ;;  %v2579_v32 = vadd.s32 1296, %v6251_v37  ;;  %v2647_v4 = vadd.s32 1840, %v6251_v37 }
 0x169   : > { %10503 = vst [vmem:[#allocation80_spill] sm:$0xff] %v7206_v7  ;;  %vm3124_vm6 = vcmp.lt.s32.totalorder %v2852_v1, 8200  ;;  %vm3192_vm7 = vcmp.lt.s32.totalorder %v2920_v29, 8200  ;;  %v2444_v3 = vadd.s32 216, %v6251_v37  ;;  %v2512_v50 = vadd.s32 760, %v6251_v37 }
 0x16a   : > { %2301 = vst.msk [vmem:[%s6285_s17 + $0x27c] sm:$0xf] %vm2141_vm1, %v2028_v24  ;;  %v2717_v25 = vadd.s32 %v6255_v39, %v2443_v42  ;;  %v2785_v10 = vadd.s32 %v6255_v39, %v2511_v17  ;;  %v370_v24 = vld [vmem:[%s6153_s14 + $0x158] sm:$0xff]  ;;  %v505_v42 = vld [vmem:[%s6153_s14 + $0x590] sm:$0xff]  ;;  %v2445_v1 = vadd.s32 224, %v6251_v37  ;;  %v2513_v29 = vadd.s32 768, %v6251_v37 }
 0x16b   : > { %2369 = vst.msk [vmem:[%s6285_s17 + $0x38c] sm:$0xf] %vm2141_vm1, %v2096_v15  ;;  %v1589_v36 = vpop.f32.mrf.mxu2  ;;  %v1759_v53 = vpop.f32.mrf.mxu3 }
 0x16c   : > { %2166 = vst.msk [vmem:[%s6285_s17 + $0x60] sm:$0xf] %vm2141_vm1, %v1893_v33  ;;  %v1590_v34 = vadd.f32 %v6766_v57, %v1589_v36  ;;  %v1760_v14 = vadd.f32 %v6766_v57, %v1759_v53  ;;  %v1251_v0 = vpop.f32.mrf.mxu0  ;;  %v1421_v55 = vpop.f32.mrf.mxu1  ;;  %v438_v53 = vld [vmem:[%s6153_s14 + $0x378] sm:$0xff]  ;;  %vm2989_vm8 = vcmp.lt.s32.totalorder %v2717_v25, 8200  ;;  %vm3057_vm9 = vcmp.lt.s32.totalorder %v2785_v10, 8200 }
 0x16d   : > { %2234 = vst.msk [vmem:[%s6285_s17 + $0x170] sm:$0xf] %vm2141_vm1, %v1961_v2  ;;  %v1252_v62 = vadd.f32 %v6766_v57, %v1251_v0  ;;  %v1422_v58 = vadd.f32 %v6766_v57, %v1421_v55  ;;  %v437_v57 = vld [vmem:[%s6153_s14 + $0x370] sm:$0xff] }
 0x16e   : > { %v2029_v15 = vpack.c.bf16 %v1590_v34, %v1590_v34  ;;  %v7235_v33 = vsel %vm3123_vm2, %v1590_v34, 0.0  ;;  %v2097_v2 = vpack.c.bf16 %v1760_v14, %v1760_v14  ;;  %v7238_v36 = vsel %vm3191_vm3, %v1760_v14, 0.0  ;;  %v573_v34 = vld [vmem:[%s6153_s14 + $0x7b0] sm:$0xff] }
 0x16f   : > { %10504 = vst [vmem:[#allocation81_spill] sm:$0xff] %v7235_v33  ;;  %v1894_v0 = vpack.c.bf16 %v1252_v62, %v1252_v62  ;;  %v7244_v17 = vsel %vm2988_vm4, %v1252_v62, 0.0  ;;  %v1962_v55 = vpack.c.bf16 %v1422_v58, %v1422_v58  ;;  %v7247_v61 = vsel %vm3056_vm5, %v1422_v58, 0.0  ;;  %v574_v33 = vld [vmem:[%s6153_s14 + $0x7b8] sm:$0xff] }
 0x170   : > { %10505 = vst [vmem:[#allocation82_spill] sm:$0xff] %v7238_v36  ;;  %v620_v14 = vpack.c.bf16 %v370_v24, %v369_v30  ;;  %v654_v63 = vpack.c.bf16 %v438_v53, %v437_v57  ;;  %v688_v62 = vpack.c.bf16 %v506_v51, %v505_v42  ;;  %v722_v58 = vpack.c.bf16 %v574_v33, %v573_v34 }
 0x171   : > { %10506 = vst [vmem:[#allocation83_spill] sm:$0xff] %v7247_v61  ;;  %v7267_v61 = vld [vmem:[%s10202_s2] ss:$0 sm:$0xff]  ;;  %v2580_v53 = vadd.s32 1304, %v6251_v37  ;;  %v2648_v42 = vadd.s32 1848, %v6251_v37 }
 0x172   : > { %2302 = vst.msk [vmem:[%s6285_s17 + $0x280] sm:$0xf] %vm2141_vm1, %v2029_v15  ;;  %v2853_v15 = vadd.s32 %v6255_v39, %v2579_v32 }
 0x173   : > { %2370 = vst.msk [vmem:[%s6285_s17 + $0x390] sm:$0xf] %vm2141_vm1, %v2097_v2  ;;  %v1591_v36 = vpop.f32.mrf.mxu2  ;;  %v1761_v12 = vpop.f32.mrf.mxu3  ;;  %v2921_v2 = vadd.s32 %v6255_v39, %v2647_v4 }
 0x174   : > { %2167 = vst.msk [vmem:[%s6285_s17 + $0x64] sm:$0xf] %vm2141_vm1, %v1894_v0  ;;  %v1592_v30 = vadd.f32 %v7267_v61, %v1591_v36  ;;  %v1762_v24 = vadd.f32 %v7267_v61, %v1761_v12  ;;  %v1254_v33 = vpop.f32.mrf.mxu0  ;;  %v1424_v57 = vpop.f32.mrf.mxu1  ;;  %v2718_v0 = vadd.s32 %v6255_v39, %v2444_v3  ;;  %vm3125_vm10 = vcmp.lt.s32.totalorder %v2853_v15, 8200  ;;  %v508_v15 = vld [vmem:[%s6153_s14 + $0x5a8] sm:$0xff] }
 0x175   : > { %2235 = vst.msk [vmem:[%s6285_s17 + $0x174] sm:$0xf] %vm2141_vm1, %v1962_v55  ;;  %v1255_v32 = vadd.f32 %v7267_v61, %v1254_v33  ;;  %v1425_v4 = vadd.f32 %v7267_v61, %v1424_v57  ;;  %v2786_v55 = vadd.s32 %v6255_v39, %v2512_v50  ;;  %vm3193_vm11 = vcmp.lt.s32.totalorder %v2921_v2, 8200 }
 0x176   : > { %v2030_v51 = vpack.c.bf16 %v1592_v30, %v1592_v30  ;;  %v7278_v12 = vsel %vm3124_vm6, %v1592_v30, 0.0  ;;  %v2098_v36 = vpack.c.bf16 %v1762_v24, %v1762_v24  ;;  %v7281_v34 = vsel %vm3192_vm7, %v1762_v24, 0.0 }
 0x177   : > { %10507 = vst [vmem:[#allocation84_spill] sm:$0xff] %v7278_v12  ;;  %v1895_v7 = vpack.c.bf16 %v1255_v32, %v1255_v32  ;;  %v7284_v33 = vsel %vm2989_vm8, %v1255_v32, 0.0  ;;  %v1963_v57 = vpack.c.bf16 %v1425_v4, %v1425_v4  ;;  %v7287_v41 = vsel %vm3057_vm9, %v1425_v4, 0.0  ;;  %5682 = vmatmul.msk.bf16.gmra.mxu0 %vm771_vm0, %v620_v14  ;;  %5716 = vmatmul.msk.bf16.gmra.mxu1 %vm771_vm0, %v654_v63  ;;  %v371_v4 = vld [vmem:[%s6153_s14 + $0x160] sm:$0xff] }
 0x178   : > { %10508 = vst [vmem:[#allocation85_spill] sm:$0xff] %v7281_v34  ;;  %5750 = vmatmul.msk.bf16.gmra.mxu2 %vm771_vm0, %v688_v62  ;;  %5784 = vmatmul.msk.bf16.gmra.mxu3 %vm771_vm0, %v722_v58  ;;  %vm2990_vm12 = vcmp.lt.s32.totalorder %v2718_v0, 8200  ;;  %vm3058_vm13 = vcmp.lt.s32.totalorder %v2786_v55, 8200  ;;  %v2854_v3 = vadd.s32 %v6255_v39, %v2580_v53  ;;  %v2922_v50 = vadd.s32 %v6255_v39, %v2648_v42 }
 0x179   : > { %10509 = vst [vmem:[#allocation86_spill] sm:$0xff] %v7287_v41  ;;  %v2581_v58 = vadd.s32 1312, %v6251_v37  ;;  %v2649_v30 = vadd.s32 1856, %v6251_v37  ;;  %v2719_v53 = vadd.s32 %v6255_v39, %v2445_v1  ;;  %v2787_v42 = vadd.s32 %v6255_v39, %v2513_v29  ;;  %v507_v1 = vld [vmem:[%s6153_s14 + $0x5a0] sm:$0xff] }
 0x17a   : > { %2303 = vst.msk [vmem:[%s6285_s17 + $0x284] sm:$0xf] %vm2141_vm1, %v2030_v51  ;;  %v372_v51 = vld [vmem:[%s6153_s14 + $0x168] sm:$0xff]  ;;  %vm3126_vm14 = vcmp.lt.s32.totalorder %v2854_v3, 8200  ;;  %vm3194_vm15 = vcmp.lt.s32.totalorder %v2922_v50, 8200  ;;  %v2446_v2 = vadd.s32 232, %v6251_v37 }
 0x17b   : > { %2371 = vst.msk [vmem:[%s6285_s17 + $0x394] sm:$0xf] %vm2141_vm1, %v2098_v36  ;;  %v1594_v25 = vpop.f32.mrf.mxu2  ;;  %v1764_v10 = vpop.f32.mrf.mxu3  ;;  %v2514_v0 = vadd.s32 776, %v6251_v37  ;;  %vm2991_vm2 = vcmp.lt.s32.totalorder %v2719_v53, 8200  ;;  %vm3059_vm3 = vcmp.lt.s32.totalorder %v2787_v42, 8200 }
 0x17c   : > { %2168 = vst.msk [vmem:[%s6285_s17 + $0x68] sm:$0xf] %vm2141_vm1, %v1895_v7  ;;  %v1595_v14 = vadd.f32 %v7267_v61, %v1594_v25  ;;  %v1765_v63 = vadd.f32 %v7267_v61, %v1764_v10  ;;  %v1256_v7 = vpop.f32.mrf.mxu0  ;;  %v1426_v62 = vpop.f32.mrf.mxu1 }
 0x17d   : > { %2236 = vst.msk [vmem:[%s6285_s17 + $0x178] sm:$0xf] %vm2141_vm1, %v1963_v57  ;;  %v1257_v24 = vadd.f32 %v7267_v61, %v1256_v7  ;;  %v1427_v32 = vadd.f32 %v7267_v61, %v1426_v62  ;;  %v439_v7 = vld [vmem:[%s6153_s14 + $0x380] sm:$0xff]  ;;  %v440_v62 = vld [vmem:[%s6153_s14 + $0x388] sm:$0xff] }
 0x17e   : > { %v2031_v36 = vpack.c.bf16 %v1595_v14, %v1595_v14  ;;  %v7316_v57 = vsel %vm3125_vm10, %v1595_v14, 0.0  ;;  %v2099_v25 = vpack.c.bf16 %v1765_v63, %v1765_v63  ;;  %v7319_v10 = vsel %vm3193_vm11, %v1765_v63, 0.0  ;;  %v575_v14 = vld [vmem:[%s6153_s14 + $0x7c0] sm:$0xff] }
 0x17f   : > { %10510 = vst [vmem:[#allocation87_spill] sm:$0xff] %v7316_v57  ;;  %v1896_v34 = vpack.c.bf16 %v1257_v24, %v1257_v24  ;;  %v7325_v29 = vsel %vm2990_vm12, %v1257_v24, 0.0  ;;  %v1964_v12 = vpack.c.bf16 %v1427_v32, %v1427_v32  ;;  %v7328_v41 = vsel %vm3058_vm13, %v1427_v32, 0.0  ;;  %v576_v57 = vld [vmem:[%s6153_s14 + $0x7c8] sm:$0xff] }
 0x180   : > { %10511 = vst [vmem:[#allocation88_spill] sm:$0xff] %v7319_v10  ;;  %v621_v63 = vpack.c.bf16 %v372_v51, %v371_v4  ;;  %v655_v55 = vpack.c.bf16 %v440_v62, %v439_v7  ;;  %v689_v24 = vpack.c.bf16 %v508_v15, %v507_v1  ;;  %v723_v32 = vpack.c.bf16 %v576_v57, %v575_v14 }
 0x181   : > { %10512 = vst [vmem:[#allocation89_spill] sm:$0xff] %v7328_v41  ;;  %v2582_v4 = vadd.s32 1320, %v6251_v37  ;;  %v2650_v51 = vadd.s32 1864, %v6251_v37 }
 0x182   : > { %2304 = vst.msk [vmem:[%s6285_s17 + $0x288] sm:$0xf] %vm2141_vm1, %v2031_v36  ;;  %v2855_v36 = vadd.s32 %v6255_v39, %v2581_v58  ;;  %v2720_v58 = vadd.s32 %v6255_v39, %v2446_v2 }
 0x183   : > { %2372 = vst.msk [vmem:[%s6285_s17 + $0x398] sm:$0xf] %vm2141_vm1, %v2099_v25  ;;  %v1596_v10 = vpop.f32.mrf.mxu2  ;;  %v1766_v41 = vpop.f32.mrf.mxu3  ;;  %v2923_v25 = vadd.s32 %v6255_v39, %v2649_v30  ;;  %v2788_v30 = vadd.s32 %v6255_v39, %v2514_v0  ;;  %v2856_v53 = vadd.s32 %v6255_v39, %v2582_v4  ;;  %v2924_v42 = vadd.s32 %v6255_v39, %v2650_v51 }
 0x184   : > { %2169 = vst.msk [vmem:[%s6285_s17 + $0x6c] sm:$0xf] %vm2141_vm1, %v1896_v34  ;;  %v1597_v52 = vadd.f32 %v7267_v61, %v1596_v10  ;;  %v1767_v60 = vadd.f32 %v7267_v61, %v1766_v41  ;;  %v1259_v20 = vpop.f32.mrf.mxu0  ;;  %v1429_v34 = vpop.f32.mrf.mxu1  ;;  %vm3127_vm4 = vcmp.lt.s32.totalorder %v2855_v36, 8200  ;;  %vm2992_vm6 = vcmp.lt.s32.totalorder %v2720_v58, 8200  ;;  %v510_v36 = vld [vmem:[%s6153_s14 + $0x5b8] sm:$0xff] }
 0x185   : > { %2237 = vst.msk [vmem:[%s6285_s17 + $0x17c] sm:$0xf] %vm2141_vm1, %v1964_v12  ;;  %v1260_v12 = vadd.f32 %v7267_v61, %v1259_v20  ;;  %v1430_v57 = vadd.f32 %v7267_v61, %v1429_v34  ;;  %vm3195_vm5 = vcmp.lt.s32.totalorder %v2923_v25, 8200  ;;  %vm3060_vm7 = vcmp.lt.s32.totalorder %v2788_v30, 8200 }
 0x186   : > { %v2032_v7 = vpack.c.bf16 %v1597_v52, %v1597_v52  ;;  %v7354_v41 = vsel %vm3126_vm14, %v1597_v52, 0.0  ;;  %v2100_v10 = vpack.c.bf16 %v1767_v60, %v1767_v60  ;;  %v7357_v62 = vsel %vm3194_vm15, %v1767_v60, 0.0 }
 0x187   : > { %10513 = vst [vmem:[#allocation90_spill] sm:$0xff] %v7354_v41  ;;  %v1897_v1 = vpack.c.bf16 %v1260_v12, %v1260_v12  ;;  %v7360_v20 = vsel %vm2991_vm2, %v1260_v12, 0.0  ;;  %v1965_v15 = vpack.c.bf16 %v1430_v57, %v1430_v57  ;;  %v7363_v14 = vsel %vm3059_vm3, %v1430_v57, 0.0  ;;  %5683 = vmatmul.msk.bf16.gmra.mxu0 %vm771_vm0, %v621_v63  ;;  %5717 = vmatmul.msk.bf16.gmra.mxu1 %vm771_vm0, %v655_v55  ;;  %v373_v57 = vld [vmem:[%s6153_s14 + $0x170] sm:$0xff] }
 0x188   : > { %10514 = vst [vmem:[#allocation91_spill] sm:$0xff] %v7357_v62  ;;  %5751 = vmatmul.msk.bf16.gmra.mxu2 %vm771_vm0, %v689_v24  ;;  %5785 = vmatmul.msk.bf16.gmra.mxu3 %vm771_vm0, %v723_v32  ;;  %v2447_v60 = vadd.s32 240, %v6251_v37  ;;  %v2515_v52 = vadd.s32 784, %v6251_v37  ;;  %v2583_v24 = vadd.s32 1328, %v6251_v37  ;;  %v2651_v32 = vadd.s32 1872, %v6251_v37 }
 0x189   : > { %10515 = vst [vmem:[#allocation92_spill] sm:$0xff] %v7363_v14  ;;  %vm3128_vm8 = vcmp.lt.s32.totalorder %v2856_v53, 8200  ;;  %vm3196_vm9 = vcmp.lt.s32.totalorder %v2924_v42, 8200  ;;  %v2448_v25 = vadd.s32 248, %v6251_v37  ;;  %v2516_v58 = vadd.s32 792, %v6251_v37 }
 0x18a   : > { %2305 = vst.msk [vmem:[%s6285_s17 + $0x28c] sm:$0xf] %vm2141_vm1, %v2032_v7  ;;  %v2721_v4 = vadd.s32 %v6255_v39, %v2447_v60  ;;  %v2789_v51 = vadd.s32 %v6255_v39, %v2515_v52  ;;  %v374_v7 = vld [vmem:[%s6153_s14 + $0x178] sm:$0xff]  ;;  %v509_v60 = vld [vmem:[%s6153_s14 + $0x5b0] sm:$0xff] }
 0x18b   : > { %2373 = vst.msk [vmem:[%s6285_s17 + $0x39c] sm:$0xf] %vm2141_vm1, %v2100_v10  ;;  %v1599_v3 = vpop.f32.mrf.mxu2  ;;  %v1769_v50 = vpop.f32.mrf.mxu3 }
 0x18c   : > { %2170 = vst.msk [vmem:[%s6285_s17 + $0x70] sm:$0xf] %vm2141_vm1, %v1897_v1  ;;  %v1600_v2 = vadd.f32 %v7267_v61, %v1599_v3  ;;  %v1770_v0 = vadd.f32 %v7267_v61, %v1769_v50  ;;  %v1261_v63 = vpop.f32.mrf.mxu0  ;;  %v1431_v55 = vpop.f32.mrf.mxu1  ;;  %v441_v50 = vld [vmem:[%s6153_s14 + $0x390] sm:$0xff]  ;;  %vm2993_vm10 = vcmp.lt.s32.totalorder %v2721_v4, 8200  ;;  %vm3061_vm11 = vcmp.lt.s32.totalorder %v2789_v51, 8200 }
 0x18d   : > { %2238 = vst.msk [vmem:[%s6285_s17 + $0x180] sm:$0xf] %vm2141_vm1, %v1965_v15  ;;  %v1262_v34 = vadd.f32 %v7267_v61, %v1261_v63  ;;  %v1432_v12 = vadd.f32 %v7267_v61, %v1431_v55  ;;  %v442_v63 = vld [vmem:[%s6153_s14 + $0x398] sm:$0xff] }
 0x18e   : > { %v2033_v10 = vpack.c.bf16 %v1600_v2, %v1600_v2  ;;  %v7392_v1 = vsel %vm3127_vm4, %v1600_v2, 0.0  ;;  %v2101_v15 = vpack.c.bf16 %v1770_v0, %v1770_v0  ;;  %v7395_v3 = vsel %vm3195_vm5, %v1770_v0, 0.0  ;;  %v577_v2 = vld [vmem:[%s6153_s14 + $0x7d0] sm:$0xff] }
 0x18f   : > { %10516 = vst [vmem:[#allocation93_spill] sm:$0xff] %v7392_v1  ;;  %v1898_v55 = vpack.c.bf16 %v1262_v34, %v1262_v34  ;;  %v7401_v52 = vsel %vm2992_vm6, %v1262_v34, 0.0  ;;  %v1966_v62 = vpack.c.bf16 %v1432_v12, %v1432_v12  ;;  %v7404_v41 = vsel %vm3060_vm7, %v1432_v12, 0.0  ;;  %v578_v1 = vld [vmem:[%s6153_s14 + $0x7d8] sm:$0xff] }
 0x190   : > { %10517 = vst [vmem:[#allocation94_spill] sm:$0xff] %v7395_v3  ;;  %v622_v0 = vpack.c.bf16 %v374_v7, %v373_v57  ;;  %v656_v30 = vpack.c.bf16 %v442_v63, %v441_v50  ;;  %v690_v34 = vpack.c.bf16 %v510_v36, %v509_v60  ;;  %v724_v12 = vpack.c.bf16 %v578_v1, %v577_v2 }
 0x191   : > { %10518 = vst [vmem:[#allocation95_spill] sm:$0xff] %v7404_v41  ;;  %v2584_v57 = vadd.s32 1336, %v6251_v37  ;;  %v2652_v7 = vadd.s32 1880, %v6251_v37 }
 0x192   : > { %2306 = vst.msk [vmem:[%s6285_s17 + $0x290] sm:$0xf] %vm2141_vm1, %v2033_v10  ;;  %v2857_v10 = vadd.s32 %v6255_v39, %v2583_v24  ;;  %v2722_v24 = vadd.s32 %v6255_v39, %v2448_v25 }
 0x193   : > { %2374 = vst.msk [vmem:[%s6285_s17 + $0x3a0] sm:$0xf] %vm2141_vm1, %v2101_v15  ;;  %v1601_v3 = vpop.f32.mrf.mxu2  ;;  %v1771_v41 = vpop.f32.mrf.mxu3  ;;  %v2925_v15 = vadd.s32 %v6255_v39, %v2651_v32  ;;  %v2790_v32 = vadd.s32 %v6255_v39, %v2516_v58  ;;  %v2858_v4 = vadd.s32 %v6255_v39, %v2584_v57  ;;  %v2926_v51 = vadd.s32 %v6255_v39, %v2652_v7 }
 0x194   : > { %2171 = vst.msk [vmem:[%s6285_s17 + $0x74] sm:$0xf] %vm2141_vm1, %v1898_v55  ;;  %v1602_v14 = vadd.f32 %v7267_v61, %v1601_v3  ;;  %v1772_v45 = vadd.f32 %v7267_v61, %v1771_v41  ;;  %v1264_v9 = vpop.f32.mrf.mxu0  ;;  %v1434_v55 = vpop.f32.mrf.mxu1  ;;  %vm3129_vm12 = vcmp.lt.s32.totalorder %v2857_v10, 8200  ;;  %vm2994_vm14 = vcmp.lt.s32.totalorder %v2722_v24, 8200  ;;  %v512_v10 = vld [vmem:[%s6153_s14 + $0x5c8] sm:$0xff] }
 0x195   : > { %2239 = vst.msk [vmem:[%s6285_s17 + $0x184] sm:$0xf] %vm2141_vm1, %v1966_v62  ;;  %v1265_v62 = vadd.f32 %v7267_v61, %v1264_v9  ;;  %v1435_v1 = vadd.f32 %v7267_v61, %v1434_v55  ;;  %vm3197_vm13 = vcmp.lt.s32.totalorder %v2925_v15, 8200  ;;  %vm3062_vm15 = vcmp.lt.s32.totalorder %v2790_v32, 8200 }
 0x196   : > { %v2034_v50 = vpack.c.bf16 %v1602_v14, %v1602_v14  ;;  %v7430_v41 = vsel %vm3128_vm8, %v1602_v14, 0.0  ;;  %v2102_v3 = vpack.c.bf16 %v1772_v45, %v1772_v45  ;;  %v7433_v63 = vsel %vm3196_vm9, %v1772_v45, 0.0 }
 0x197   : > { %10519 = vst [vmem:[#allocation96_spill] sm:$0xff] %v7430_v41  ;;  %v1899_v60 = vpack.c.bf16 %v1265_v62, %v1265_v62  ;;  %v7436_v9 = vsel %vm2993_vm10, %v1265_v62, 0.0  ;;  %v1967_v36 = vpack.c.bf16 %v1435_v1, %v1435_v1  ;;  %v7439_v2 = vsel %vm3061_vm11, %v1435_v1, 0.0  ;;  %5684 = vmatmul.msk.bf16.gmra.mxu0 %vm771_vm0, %v622_v0  ;;  %5718 = vmatmul.msk.bf16.gmra.mxu1 %vm771_vm0, %v656_v30  ;;  %v375_v1 = vld [vmem:[%s6153_s14 + $0x180] sm:$0xff] }
 0x198   : > { %10520 = vst [vmem:[#allocation97_spill] sm:$0xff] %v7433_v63  ;;  %5752 = vmatmul.msk.bf16.gmra.mxu2 %vm771_vm0, %v690_v34  ;;  %5786 = vmatmul.msk.bf16.gmra.mxu3 %vm771_vm0, %v724_v12  ;;  %v2449_v45 = vadd.s32 256, %v6251_v37  ;;  %v2517_v14 = vadd.s32 800, %v6251_v37  ;;  %v2585_v34 = vadd.s32 1344, %v6251_v37  ;;  %v2653_v12 = vadd.s32 1888, %v6251_v37 }
 0x199   : > { %10521 = vst [vmem:[#allocation98_spill] sm:$0xff] %v7439_v2  ;;  %vm3130_vm2 = vcmp.lt.s32.totalorder %v2858_v4, 8200  ;;  %vm3198_vm3 = vcmp.lt.s32.totalorder %v2926_v51, 8200  ;;  %v2450_v15 = vadd.s32 264, %v6251_v37  ;;  %v2518_v24 = vadd.s32 808, %v6251_v37 }
 0x19a   : > { %2307 = vst.msk [vmem:[%s6285_s17 + $0x294] sm:$0xf] %vm2141_vm1, %v2034_v50  ;;  %v2723_v57 = vadd.s32 %v6255_v39, %v2449_v45  ;;  %v2791_v7 = vadd.s32 %v6255_v39, %v2517_v14  ;;  %v376_v50 = vld [vmem:[%s6153_s14 + $0x188] sm:$0xff]  ;;  %v511_v45 = vld [vmem:[%s6153_s14 + $0x5c0] sm:$0xff] }
 0x19b   : > { %2375 = vst.msk [vmem:[%s6285_s17 + $0x3a4] sm:$0xf] %vm2141_vm1, %v2102_v3  ;;  %v1604_v53 = vpop.f32.mrf.mxu2  ;;  %v1774_v42 = vpop.f32.mrf.mxu3 }
 0x19c   : > { %2172 = vst.msk [vmem:[%s6285_s17 + $0x78] sm:$0xf] %vm2141_vm1, %v1899_v60  ;;  %v1605_v25 = vadd.f32 %v7267_v61, %v1604_v53  ;;  %v1775_v58 = vadd.f32 %v7267_v61, %v1774_v42  ;;  %v1266_v0 = vpop.f32.mrf.mxu0  ;;  %v1436_v30 = vpop.f32.mrf.mxu1  ;;  %v443_v42 = vld [vmem:[%s6153_s14 + $0x3a0] sm:$0xff]  ;;  %vm2995_vm4 = vcmp.lt.s32.totalorder %v2723_v57, 8200  ;;  %vm3063_vm5 = vcmp.lt.s32.totalorder %v2791_v7, 8200 }
 0x19d   : > { %2240 = vst.msk [vmem:[%s6285_s17 + $0x188] sm:$0xf] %vm2141_vm1, %v1967_v36  ;;  %v1267_v55 = vadd.f32 %v7267_v61, %v1266_v0  ;;  %v1437_v62 = vadd.f32 %v7267_v61, %v1436_v30  ;;  %v444_v0 = vld [vmem:[%s6153_s14 + $0x3a8] sm:$0xff] }
 0x19e   : > { %v2035_v3 = vpack.c.bf16 %v1605_v25, %v1605_v25  ;;  %v7468_v60 = vsel %vm3129_vm12, %v1605_v25, 0.0  ;;  %v2103_v36 = vpack.c.bf16 %v1775_v58, %v1775_v58  ;;  %v7471_v53 = vsel %vm3197_vm13, %v1775_v58, 0.0  ;;  %v579_v25 = vld [vmem:[%s6153_s14 + $0x7e0] sm:$0xff] }
 0x19f   : > { %10522 = vst [vmem:[#allocation99_spill] sm:$0xff] %v7468_v60  ;;  %v1900_v30 = vpack.c.bf16 %v1267_v55, %v1267_v55  ;;  %v7477_v14 = vsel %vm2994_vm14, %v1267_v55, 0.0  ;;  %v1968_v63 = vpack.c.bf16 %v1437_v62, %v1437_v62  ;;  %v7480_v41 = vsel %vm3062_vm15, %v1437_v62, 0.0  ;;  %v580_v60 = vld [vmem:[%s6153_s14 + $0x7e8] sm:$0xff] }
 0x1a0   : > { %10523 = vst [vmem:[#allocation100_spill] sm:$0xff] %v7471_v53  ;;  %v623_v58 = vpack.c.bf16 %v376_v50, %v375_v1  ;;  %v657_v32 = vpack.c.bf16 %v444_v0, %v443_v42  ;;  %v691_v55 = vpack.c.bf16 %v512_v10, %v511_v45  ;;  %v725_v62 = vpack.c.bf16 %v580_v60, %v579_v25 }
 0x1a1   : > { %10524 = vst [vmem:[#allocation101_spill] sm:$0xff] %v7480_v41  ;;  %v2586_v1 = vadd.s32 1352, %v6251_v37  ;;  %v2654_v50 = vadd.s32 1896, %v6251_v37 }
 0x1a2   : > { %2308 = vst.msk [vmem:[%s6285_s17 + $0x298] sm:$0xf] %vm2141_vm1, %v2035_v3  ;;  %v2859_v3 = vadd.s32 %v6255_v39, %v2585_v34  ;;  %v2724_v34 = vadd.s32 %v6255_v39, %v2450_v15 }
 0x1a3   : > { %2376 = vst.msk [vmem:[%s6285_s17 + $0x3a8] sm:$0xf] %vm2141_vm1, %v2103_v36  ;;  %v1606_v53 = vpop.f32.mrf.mxu2  ;;  %v1776_v41 = vpop.f32.mrf.mxu3  ;;  %v2927_v36 = vadd.s32 %v6255_v39, %v2653_v12  ;;  %v2792_v12 = vadd.s32 %v6255_v39, %v2518_v24  ;;  %v2860_v57 = vadd.s32 %v6255_v39, %v2586_v1  ;;  %v2928_v7 = vadd.s32 %v6255_v39, %v2654_v50 }
 0x1a4   : > { %2173 = vst.msk [vmem:[%s6285_s17 + $0x7c] sm:$0xf] %vm2141_vm1, %v1900_v30  ;;  %v1607_v2 = vadd.f32 %v7267_v61, %v1606_v53  ;;  %v1777_v38 = vadd.f32 %v7267_v61, %v1776_v41  ;;  %v1269_v8 = vpop.f32.mrf.mxu0  ;;  %v1439_v30 = vpop.f32.mrf.mxu1  ;;  %vm3131_vm6 = vcmp.lt.s32.totalorder %v2859_v3, 8200  ;;  %vm2996_vm8 = vcmp.lt.s32.totalorder %v2724_v34, 8200  ;;  %v514_v3 = vld [vmem:[%s6153_s14 + $0x5d8] sm:$0xff] }
 0x1a5   : > { %2241 = vst.msk [vmem:[%s6285_s17 + $0x18c] sm:$0xf] %vm2141_vm1, %v1968_v63  ;;  %v1270_v63 = vadd.f32 %v7267_v61, %v1269_v8  ;;  %v1440_v60 = vadd.f32 %v7267_v61, %v1439_v30  ;;  %vm3199_vm7 = vcmp.lt.s32.totalorder %v2927_v36, 8200  ;;  %vm3064_vm9 = vcmp.lt.s32.totalorder %v2792_v12, 8200 }
 0x1a6   : > { %v2036_v42 = vpack.c.bf16 %v1607_v2, %v1607_v2  ;;  %v7506_v41 = vsel %vm3130_vm2, %v1607_v2, 0.0  ;;  %v2104_v53 = vpack.c.bf16 %v1777_v38, %v1777_v38  ;;  %v7509_v0 = vsel %vm3198_vm3, %v1777_v38, 0.0 }
 0x1a7   : > { %10525 = vst [vmem:[#allocation102_spill] sm:$0xff] %v7506_v41  ;;  %v1901_v45 = vpack.c.bf16 %v1270_v63, %v1270_v63  ;;  %v7512_v8 = vsel %vm2995_vm4, %v1270_v63, 0.0  ;;  %v1969_v10 = vpack.c.bf16 %v1440_v60, %v1440_v60  ;;  %v7515_v25 = vsel %vm3063_vm5, %v1440_v60, 0.0  ;;  %5685 = vmatmul.msk.bf16.gmra.mxu0 %vm771_vm0, %v623_v58  ;;  %5719 = vmatmul.msk.bf16.gmra.mxu1 %vm771_vm0, %v657_v32  ;;  %v377_v60 = vld [vmem:[%s6153_s14 + $0x190] sm:$0xff] }
 0x1a8   : > { %10526 = vst [vmem:[#allocation103_spill] sm:$0xff] %v7509_v0  ;;  %5753 = vmatmul.msk.bf16.gmra.mxu2 %vm771_vm0, %v691_v55  ;;  %5787 = vmatmul.msk.bf16.gmra.mxu3 %vm771_vm0, %v725_v62  ;;  %v2451_v38 = vadd.s32 272, %v6251_v37  ;;  %v2519_v2 = vadd.s32 816, %v6251_v37  ;;  %v2587_v55 = vadd.s32 1360, %v6251_v37  ;;  %v2655_v62 = vadd.s32 1904, %v6251_v37 }
 0x1a9   : > { %10527 = vst [vmem:[#allocation104_spill] sm:$0xff] %v7512_v8  ;;  %vm3132_vm10 = vcmp.lt.s32.totalorder %v2860_v57, 8200  ;;  %vm3200_vm11 = vcmp.lt.s32.totalorder %v2928_v7, 8200  ;;  %v2452_v36 = vadd.s32 280, %v6251_v37  ;;  %v2520_v34 = vadd.s32 824, %v6251_v37 }
 0x1aa   : > { %10528 = vst [vmem:[#allocation105_spill] sm:$0xff] %v7515_v25  ;;  %v2725_v1 = vadd.s32 %v6255_v39, %v2451_v38  ;;  %v2793_v50 = vadd.s32 %v6255_v39, %v2519_v2  ;;  %v513_v38 = vld [vmem:[%s6153_s14 + $0x5d0] sm:$0xff]  ;;  %v2521_v57 = vadd.s32 832, %v6251_v37 }
 0x1ab   : > { %2309 = vst.msk [vmem:[%s6285_s17 + $0x29c] sm:$0xf] %vm2141_vm1, %v2036_v42  ;;  %v1609_v4 = vpop.f32.mrf.mxu2  ;;  %v1779_v51 = vpop.f32.mrf.mxu3  ;;  %v378_v42 = vld [vmem:[%s6153_s14 + $0x198] sm:$0xff] }
 0x1ac   : > { %2377 = vst.msk [vmem:[%s6285_s17 + $0x3ac] sm:$0xf] %vm2141_vm1, %v2104_v53  ;;  %v1610_v15 = vadd.f32 %v7267_v61, %v1609_v4  ;;  %v1780_v24 = vadd.f32 %v7267_v61, %v1779_v51  ;;  %v1271_v58 = vpop.f32.mrf.mxu0  ;;  %v1441_v32 = vpop.f32.mrf.mxu1  ;;  %v445_v51 = vld [vmem:[%s6153_s14 + $0x3b0] sm:$0xff]  ;;  %vm2997_vm12 = vcmp.lt.s32.totalorder %v2725_v1, 8200  ;;  %vm3065_vm13 = vcmp.lt.s32.totalorder %v2793_v50, 8200 }
 0x1ad   : > { %2174 = vst.msk [vmem:[%s6285_s17 + $0x80] sm:$0xf] %vm2141_vm1, %v1901_v45  ;;  %v1272_v30 = vadd.f32 %v7267_v61, %v1271_v58  ;;  %v1442_v63 = vadd.f32 %v7267_v61, %v1441_v32  ;;  %v446_v58 = vld [vmem:[%s6153_s14 + $0x3b8] sm:$0xff] }
 0x1ae   : > { %2242 = vst.msk [vmem:[%s6285_s17 + $0x190] sm:$0xf] %vm2141_vm1, %v1969_v10  ;;  %v2037_v53 = vpack.c.bf16 %v1610_v15, %v1610_v15  ;;  %v7544_v45 = vsel %vm3131_vm6, %v1610_v15, 0.0  ;;  %v2105_v10 = vpack.c.bf16 %v1780_v24, %v1780_v24  ;;  %v7547_v4 = vsel %vm3199_vm7, %v1780_v24, 0.0  ;;  %v581_v15 = vld [vmem:[%s6153_s14 + $0x7f0] sm:$0xff] }
 0x1af   : > { %10529 = vst [vmem:[#allocation106_spill] sm:$0xff] %v7544_v45  ;;  %v1902_v32 = vpack.c.bf16 %v1272_v30, %v1272_v30  ;;  %v7553_v2 = vsel %vm2996_vm8, %v1272_v30, 0.0  ;;  %v1970_v0 = vpack.c.bf16 %v1442_v63, %v1442_v63  ;;  %v7556_v41 = vsel %vm3064_vm9, %v1442_v63, 0.0  ;;  %v582_v45 = vld [vmem:[%s6153_s14 + $0x7f8] sm:$0xff] }
 0x1b0   : > { %10530 = vst [vmem:[#allocation107_spill] sm:$0xff] %v7547_v4  ;;  %v624_v24 = vpack.c.bf16 %v378_v42, %v377_v60  ;;  %v658_v12 = vpack.c.bf16 %v446_v58, %v445_v51  ;;  %v692_v30 = vpack.c.bf16 %v514_v3, %v513_v38  ;;  %v726_v63 = vpack.c.bf16 %v582_v45, %v581_v15 }
 0x1b1   : > { %10531 = vst [vmem:[#allocation108_spill] sm:$0xff] %v7553_v2  ;;  %v2588_v60 = vadd.s32 1368, %v6251_v37  ;;  %v2656_v42 = vadd.s32 1912, %v6251_v37 }
 0x1b2   : > { %10532 = vst [vmem:[#allocation109_spill] sm:$0xff] %v7556_v41 }
 0x1b3   : > { %2310 = vst.msk [vmem:[%s6285_s17 + $0x2a0] sm:$0xf] %vm2141_vm1, %v2037_v53  ;;  %v1611_v4 = vpop.f32.mrf.mxu2  ;;  %v1781_v41 = vpop.f32.mrf.mxu3  ;;  %v2861_v53 = vadd.s32 %v6255_v39, %v2587_v55  ;;  %v2726_v55 = vadd.s32 %v6255_v39, %v2452_v36  ;;  %v2862_v50 = vadd.s32 %v6255_v39, %v2588_v60 }
 0x1b4   : > { %2378 = vst.msk [vmem:[%s6285_s17 + $0x3b0] sm:$0xf] %vm2141_vm1, %v2105_v10  ;;  %v2929_v10 = vadd.s32 %v6255_v39, %v2655_v62  ;;  %v1612_v25 = vadd.f32 %v7267_v61, %v1611_v4  ;;  %v1782_v2 = vadd.f32 %v7267_v61, %v1781_v41  ;;  %v1274_v8 = vpop.f32.mrf.mxu0  ;;  %v2794_v62 = vadd.s32 %v6255_v39, %v2520_v34 }
 0x1b5   : > { %2175 = vst.msk [vmem:[%s6285_s17 + $0x84] sm:$0xf] %vm2141_vm1, %v1902_v32  ;;  %v1444_v32 = vpop.f32.mrf.mxu1  ;;  %vm3133_vm14 = vcmp.lt.s32.totalorder %v2861_v53, 8200  ;;  %vm2998_vm2 = vcmp.lt.s32.totalorder %v2726_v55, 8200  ;;  %v516_v53 = vld [vmem:[%s6153_s14 + $0x5e8] sm:$0xff]  ;;  %vm3134_vm4 = vcmp.lt.s32.totalorder %v2862_v50, 8200 }
 0x1b6   : > { %2243 = vst.msk [vmem:[%s6285_s17 + $0x194] sm:$0xf] %vm2141_vm1, %v1970_v0  ;;  %v1275_v0 = vadd.f32 %v7267_v61, %v1274_v8  ;;  %v1445_v45 = vadd.f32 %v7267_v61, %v1444_v32  ;;  %v2038_v51 = vpack.c.bf16 %v1612_v25, %v1612_v25  ;;  %v7582_v41 = vsel %vm3132_vm10, %v1612_v25, 0.0 }
 0x1b7   : > { %10533 = vst [vmem:[#allocation110_spill] sm:$0xff] %v7582_v41  ;;  %v2106_v4 = vpack.c.bf16 %v1782_v2, %v1782_v2  ;;  %v7585_v58 = vsel %vm3200_vm11, %v1782_v2, 0.0  ;;  %5686 = vmatmul.msk.bf16.gmra.mxu0 %vm771_vm0, %v624_v24  ;;  %5720 = vmatmul.msk.bf16.gmra.mxu1 %vm771_vm0, %v658_v12  ;;  %v2453_v25 = vadd.s32 288, %v6251_v37  ;;  %vm3201_vm15 = vcmp.lt.s32.totalorder %v2929_v10, 8200 }
 0x1b8   : > { %10534 = vst [vmem:[#allocation111_spill] sm:$0xff] %v7585_v58  ;;  %v1903_v38 = vpack.c.bf16 %v1275_v0, %v1275_v0  ;;  %v7588_v8 = vsel %vm2997_vm12, %v1275_v0, 0.0  ;;  %v1971_v3 = vpack.c.bf16 %v1445_v45, %v1445_v45  ;;  %v7591_v15 = vsel %vm3065_vm13, %v1445_v45, 0.0  ;;  %5754 = vmatmul.msk.bf16.gmra.mxu2 %vm771_vm0, %v692_v30  ;;  %5788 = vmatmul.msk.bf16.gmra.mxu3 %vm771_vm0, %v726_v63  ;;  %v379_v45 = vld [vmem:[%s6153_s14 + $0x1a0] sm:$0xff] }
 0x1b9   : > { %10535 = vst [vmem:[#allocation112_spill] sm:$0xff] %v7588_v8  ;;  %vm3066_vm3 = vcmp.lt.s32.totalorder %v2794_v62, 8200  ;;  %v2930_v2 = vadd.s32 %v6255_v39, %v2656_v42  ;;  %v2589_v30 = vadd.s32 1376, %v6251_v37  ;;  %v2657_v63 = vadd.s32 1920, %v6251_v37 }
 0x1ba   : > { %10536 = vst [vmem:[#allocation113_spill] sm:$0xff] %v7591_v15  ;;  %v2727_v60 = vadd.s32 %v6255_v39, %v2453_v25  ;;  %v2795_v42 = vadd.s32 %v6255_v39, %v2521_v57  ;;  %v515_v25 = vld [vmem:[%s6153_s14 + $0x5e0] sm:$0xff]  ;;  %v2454_v10 = vadd.s32 296, %v6251_v37  ;;  %v2522_v55 = vadd.s32 840, %v6251_v37 }
 0x1bb   : > { %2311 = vst.msk [vmem:[%s6285_s17 + $0x2a4] sm:$0xf] %vm2141_vm1, %v2038_v51  ;;  %v1614_v7 = vpop.f32.mrf.mxu2  ;;  %v1784_v1 = vpop.f32.mrf.mxu3  ;;  %v380_v51 = vld [vmem:[%s6153_s14 + $0x1a8] sm:$0xff]  ;;  %vm3202_vm5 = vcmp.lt.s32.totalorder %v2930_v2, 8200  ;;  %v2523_v50 = vadd.s32 848, %v6251_v37 }
 0x1bc   : > { %2379 = vst.msk [vmem:[%s6285_s17 + $0x3b4] sm:$0xf] %vm2141_vm1, %v2106_v4  ;;  %v1615_v36 = vadd.f32 %v7267_v61, %v1614_v7  ;;  %v1785_v34 = vadd.f32 %v7267_v61, %v1784_v1  ;;  %v1276_v24 = vpop.f32.mrf.mxu0  ;;  %v447_v1 = vld [vmem:[%s6153_s14 + $0x3c0] sm:$0xff]  ;;  %vm2999_vm6 = vcmp.lt.s32.totalorder %v2727_v60, 8200  ;;  %vm3067_vm7 = vcmp.lt.s32.totalorder %v2795_v42, 8200 }
 0x1bd   : > { %2176 = vst.msk [vmem:[%s6285_s17 + $0x88] sm:$0xf] %vm2141_vm1, %v1903_v38  ;;  %v1446_v12 = vpop.f32.mrf.mxu1  ;;  %v1277_v32 = vadd.f32 %v7267_v61, %v1276_v24  ;;  %v448_v24 = vld [vmem:[%s6153_s14 + $0x3c8] sm:$0xff] }
 0x1be   : > { %2244 = vst.msk [vmem:[%s6285_s17 + $0x198] sm:$0xf] %vm2141_vm1, %v1971_v3  ;;  %v1447_v0 = vadd.f32 %v7267_v61, %v1446_v12  ;;  %v2039_v4 = vpack.c.bf16 %v1615_v36, %v1615_v36  ;;  %v7620_v38 = vsel %vm3133_vm14, %v1615_v36, 0.0  ;;  %v2107_v3 = vpack.c.bf16 %v1785_v34, %v1785_v34  ;;  %v583_v36 = vld [vmem:[%s6153_s14 + $0x800] sm:$0xff] }
 0x1bf   : > { %10537 = vst [vmem:[#allocation114_spill] sm:$0xff] %v7620_v38  ;;  %v7623_v7 = vsel %vm3201_vm15, %v1785_v34, 0.0  ;;  %v1904_v12 = vpack.c.bf16 %v1277_v32, %v1277_v32  ;;  %v7629_v57 = vsel %vm2998_vm2, %v1277_v32, 0.0  ;;  %v584_v38 = vld [vmem:[%s6153_s14 + $0x808] sm:$0xff]  ;;  %v625_v34 = vpack.c.bf16 %v380_v51, %v379_v45 }
 0x1c0   : > { %10538 = vst [vmem:[#allocation115_spill] sm:$0xff] %v7623_v7  ;;  %v1972_v58 = vpack.c.bf16 %v1447_v0, %v1447_v0  ;;  %v7632_v41 = vsel %vm3066_vm3, %v1447_v0, 0.0  ;;  %v659_v62 = vpack.c.bf16 %v448_v24, %v447_v1  ;;  %v693_v32 = vpack.c.bf16 %v516_v53, %v515_v25 }
 0x1c1   : > { %10539 = vst [vmem:[#allocation116_spill] sm:$0xff] %v7629_v57  ;;  %v727_v0 = vpack.c.bf16 %v584_v38, %v583_v36  ;;  %v2590_v45 = vadd.s32 1384, %v6251_v37  ;;  %v2658_v51 = vadd.s32 1928, %v6251_v37 }
 0x1c2   : > { %10540 = vst [vmem:[#allocation117_spill] sm:$0xff] %v7632_v41 }
 0x1c3   : > { %2312 = vst.msk [vmem:[%s6285_s17 + $0x2a8] sm:$0xf] %vm2141_vm1, %v2039_v4  ;;  %v1616_v7 = vpop.f32.mrf.mxu2  ;;  %v1786_v41 = vpop.f32.mrf.mxu3  ;;  %v2863_v4 = vadd.s32 %v6255_v39, %v2589_v30  ;;  %v2728_v30 = vadd.s32 %v6255_v39, %v2454_v10  ;;  %v2864_v42 = vadd.s32 %v6255_v39, %v2590_v45 }
 0x1c4   : > { %2380 = vst.msk [vmem:[%s6285_s17 + $0x3b8] sm:$0xf] %vm2141_vm1, %v2107_v3  ;;  %v2931_v3 = vadd.s32 %v6255_v39, %v2657_v63  ;;  %v1617_v15 = vadd.f32 %v7267_v61, %v1616_v7  ;;  %v1787_v57 = vadd.f32 %v7267_v61, %v1786_v41  ;;  %v1279_v8 = vpop.f32.mrf.mxu0  ;;  %v2796_v63 = vadd.s32 %v6255_v39, %v2522_v55 }
 0x1c5   : > { %2177 = vst.msk [vmem:[%s6285_s17 + $0x8c] sm:$0xf] %vm2141_vm1, %v1904_v12  ;;  %v1449_v12 = vpop.f32.mrf.mxu1  ;;  %vm3135_vm8 = vcmp.lt.s32.totalorder %v2863_v4, 8200  ;;  %vm3000_vm10 = vcmp.lt.s32.totalorder %v2728_v30, 8200  ;;  %v518_v4 = vld [vmem:[%s6153_s14 + $0x5f8] sm:$0xff]  ;;  %vm3136_vm12 = vcmp.lt.s32.totalorder %v2864_v42, 8200 }
 0x1c6   : > { %2245 = vst.msk [vmem:[%s6285_s17 + $0x19c] sm:$0xf] %vm2141_vm1, %v1972_v58  ;;  %v1280_v58 = vadd.f32 %v7267_v61, %v1279_v8  ;;  %v1450_v38 = vadd.f32 %v7267_v61, %v1449_v12  ;;  %v2040_v1 = vpack.c.bf16 %v1617_v15, %v1617_v15  ;;  %v7658_v41 = vsel %vm3134_vm4, %v1617_v15, 0.0 }
 0x1c7   : > { %10541 = vst [vmem:[#allocation118_spill] sm:$0xff] %v7658_v41  ;;  %v2108_v7 = vpack.c.bf16 %v1787_v57, %v1787_v57  ;;  %v7661_v24 = vsel %vm3202_vm5, %v1787_v57, 0.0  ;;  %5687 = vmatmul.msk.bf16.gmra.mxu0 %vm771_vm0, %v625_v34  ;;  %5721 = vmatmul.msk.bf16.gmra.mxu1 %vm771_vm0, %v659_v62  ;;  %v2455_v15 = vadd.s32 304, %v6251_v37  ;;  %vm3203_vm9 = vcmp.lt.s32.totalorder %v2931_v3, 8200 }
 0x1c8   : > { %10542 = vst [vmem:[#allocation119_spill] sm:$0xff] %v7661_v24  ;;  %v1905_v25 = vpack.c.bf16 %v1280_v58, %v1280_v58  ;;  %v7664_v8 = vsel %vm2999_vm6, %v1280_v58, 0.0  ;;  %v1973_v53 = vpack.c.bf16 %v1450_v38, %v1450_v38  ;;  %v7667_v36 = vsel %vm3067_vm7, %v1450_v38, 0.0  ;;  %5755 = vmatmul.msk.bf16.gmra.mxu2 %vm771_vm0, %v693_v32  ;;  %5789 = vmatmul.msk.bf16.gmra.mxu3 %vm771_vm0, %v727_v0  ;;  %v381_v38 = vld [vmem:[%s6153_s14 + $0x1b0] sm:$0xff] }
 0x1c9   : > { %10543 = vst [vmem:[#allocation120_spill] sm:$0xff] %v7664_v8  ;;  %vm3068_vm11 = vcmp.lt.s32.totalorder %v2796_v63, 8200  ;;  %v2932_v57 = vadd.s32 %v6255_v39, %v2658_v51  ;;  %v2591_v32 = vadd.s32 1392, %v6251_v37  ;;  %v2659_v0 = vadd.s32 1936, %v6251_v37 }
 0x1ca   : > { %10544 = vst [vmem:[#allocation121_spill] sm:$0xff] %v7667_v36  ;;  %v2729_v45 = vadd.s32 %v6255_v39, %v2455_v15  ;;  %v2797_v51 = vadd.s32 %v6255_v39, %v2523_v50  ;;  %v517_v15 = vld [vmem:[%s6153_s14 + $0x5f0] sm:$0xff]  ;;  %v2456_v3 = vadd.s32 312, %v6251_v37  ;;  %v2524_v30 = vadd.s32 856, %v6251_v37 }
 0x1cb   : > { %2313 = vst.msk [vmem:[%s6285_s17 + $0x2ac] sm:$0xf] %vm2141_vm1, %v2040_v1  ;;  %v1619_v2 = vpop.f32.mrf.mxu2  ;;  %v1789_v60 = vpop.f32.mrf.mxu3  ;;  %v382_v1 = vld [vmem:[%s6153_s14 + $0x1b8] sm:$0xff]  ;;  %vm3204_vm13 = vcmp.lt.s32.totalorder %v2932_v57, 8200  ;;  %v2525_v42 = vadd.s32 864, %v6251_v37 }
 0x1cc   : > { %2381 = vst.msk [vmem:[%s6285_s17 + $0x3bc] sm:$0xf] %vm2141_vm1, %v2108_v7  ;;  %v1620_v10 = vadd.f32 %v7267_v61, %v1619_v2  ;;  %v1790_v55 = vadd.f32 %v7267_v61, %v1789_v60  ;;  %v1281_v34 = vpop.f32.mrf.mxu0  ;;  %v449_v60 = vld [vmem:[%s6153_s14 + $0x3d0] sm:$0xff]  ;;  %vm3001_vm14 = vcmp.lt.s32.totalorder %v2729_v45, 8200  ;;  %vm3069_vm15 = vcmp.lt.s32.totalorder %v2797_v51, 8200 }
 0x1cd   : > { %2178 = vst.msk [vmem:[%s6285_s17 + $0x90] sm:$0xf] %vm2141_vm1, %v1905_v25  ;;  %v1451_v62 = vpop.f32.mrf.mxu1  ;;  %v1282_v12 = vadd.f32 %v7267_v61, %v1281_v34  ;;  %v450_v34 = vld [vmem:[%s6153_s14 + $0x3d8] sm:$0xff] }
 0x1ce   : > { %2246 = vst.msk [vmem:[%s6285_s17 + $0x1a0] sm:$0xf] %vm2141_vm1, %v1973_v53  ;;  %v1452_v58 = vadd.f32 %v7267_v61, %v1451_v62  ;;  %v2041_v7 = vpack.c.bf16 %v1620_v10, %v1620_v10  ;;  %v7696_v25 = vsel %vm3135_vm8, %v1620_v10, 0.0  ;;  %v2109_v53 = vpack.c.bf16 %v1790_v55, %v1790_v55  ;;  %v585_v10 = vld [vmem:[%s6153_s14 + $0x810] sm:$0xff] }
 0x1cf   : > { %10545 = vst [vmem:[#allocation122_spill] sm:$0xff] %v7696_v25  ;;  %v7699_v2 = vsel %vm3203_vm9, %v1790_v55, 0.0  ;;  %v1906_v62 = vpack.c.bf16 %v1282_v12, %v1282_v12  ;;  %v7705_v50 = vsel %vm3000_vm10, %v1282_v12, 0.0  ;;  %v586_v25 = vld [vmem:[%s6153_s14 + $0x818] sm:$0xff]  ;;  %v626_v55 = vpack.c.bf16 %v382_v1, %v381_v38 }
 0x1d0   : > { %10546 = vst [vmem:[#allocation123_spill] sm:$0xff] %v7699_v2  ;;  %v1974_v24 = vpack.c.bf16 %v1452_v58, %v1452_v58  ;;  %v7708_v41 = vsel %vm3068_vm11, %v1452_v58, 0.0  ;;  %v660_v63 = vpack.c.bf16 %v450_v34, %v449_v60  ;;  %v694_v12 = vpack.c.bf16 %v518_v4, %v517_v15 }
 0x1d1   : > { %10547 = vst [vmem:[#allocation124_spill] sm:$0xff] %v7705_v50  ;;  %v728_v58 = vpack.c.bf16 %v586_v25, %v585_v10  ;;  %v2592_v38 = vadd.s32 1400, %v6251_v37  ;;  %v2660_v1 = vadd.s32 1944, %v6251_v37  ;;  %v7764_v10 = vld [vmem:[%s10202_s2] ss:$0 sm:$0xff] }
 0x1d2   : > { %10548 = vst [vmem:[#allocation125_spill] sm:$0xff] %v7708_v41 }
 0x1d3   : > { %2314 = vst.msk [vmem:[%s6285_s17 + $0x2b0] sm:$0xf] %vm2141_vm1, %v2041_v7  ;;  %v1621_v2 = vpop.f32.mrf.mxu2  ;;  %v1791_v41 = vpop.f32.mrf.mxu3  ;;  %v2865_v7 = vadd.s32 %v6255_v39, %v2591_v32  ;;  %v2730_v32 = vadd.s32 %v6255_v39, %v2456_v3  ;;  %v2866_v51 = vadd.s32 %v6255_v39, %v2592_v38 }
 0x1d4   : > { %2382 = vst.msk [vmem:[%s6285_s17 + $0x3c0] sm:$0xf] %vm2141_vm1, %v2109_v53  ;;  %v2933_v53 = vadd.s32 %v6255_v39, %v2659_v0  ;;  %v1622_v36 = vadd.f32 %v7267_v61, %v1621_v2  ;;  %v1792_v50 = vadd.f32 %v7267_v61, %v1791_v41  ;;  %v1284_v8 = vpop.f32.mrf.mxu0  ;;  %v2798_v0 = vadd.s32 %v6255_v39, %v2524_v30 }
 0x1d5   : > { %2179 = vst.msk [vmem:[%s6285_s17 + $0x94] sm:$0xf] %vm2141_vm1, %v1906_v62  ;;  %v1454_v62 = vpop.f32.mrf.mxu1  ;;  %vm3137_vm2 = vcmp.lt.s32.totalorder %v2865_v7, 8200  ;;  %vm3002_vm4 = vcmp.lt.s32.totalorder %v2730_v32, 8200  ;;  %v520_v7 = vld [vmem:[%s6153_s14 + $0x608] sm:$0xff]  ;;  %vm3138_vm6 = vcmp.lt.s32.totalorder %v2866_v51, 8200 }
 0x1d6   : > { %2247 = vst.msk [vmem:[%s6285_s17 + $0x1a4] sm:$0xf] %vm2141_vm1, %v1974_v24  ;;  %v1285_v24 = vadd.f32 %v7267_v61, %v1284_v8  ;;  %v1455_v25 = vadd.f32 %v7267_v61, %v1454_v62  ;;  %v2042_v60 = vpack.c.bf16 %v1622_v36, %v1622_v36  ;;  %v7734_v41 = vsel %vm3136_vm12, %v1622_v36, 0.0 }
 0x1d7   : > { %10549 = vst [vmem:[#allocation126_spill] sm:$0xff] %v7734_v41  ;;  %v2110_v2 = vpack.c.bf16 %v1792_v50, %v1792_v50  ;;  %v7737_v34 = vsel %vm3204_vm13, %v1792_v50, 0.0  ;;  %5688 = vmatmul.msk.bf16.gmra.mxu0 %vm771_vm0, %v626_v55  ;;  %5722 = vmatmul.msk.bf16.gmra.mxu1 %vm771_vm0, %v660_v63  ;;  %v2457_v36 = vadd.s32 320, %v6251_v37  ;;  %vm3205_vm3 = vcmp.lt.s32.totalorder %v2933_v53, 8200 }
 0x1d8   : > { %10550 = vst [vmem:[#allocation127_spill] sm:$0xff] %v7737_v34  ;;  %v1907_v15 = vpack.c.bf16 %v1285_v24, %v1285_v24  ;;  %v7740_v8 = vsel %vm3001_vm14, %v1285_v24, 0.0  ;;  %v1975_v61 = vpack.c.bf16 %v1455_v25, %v1455_v25  ;;  %v7743_v4 = vsel %vm3069_vm15, %v1455_v25, 0.0  ;;  %5756 = vmatmul.msk.bf16.gmra.mxu2 %vm771_vm0, %v694_v12  ;;  %5790 = vmatmul.msk.bf16.gmra.mxu3 %vm771_vm0, %v728_v58  ;;  %v383_v25 = vld [vmem:[%s6153_s14 + $0x1c0] sm:$0xff] }
 0x1d9   : > { %10551 = vst [vmem:[#allocation128_spill] sm:$0xff] %v7740_v8  ;;  %vm3070_vm5 = vcmp.lt.s32.totalorder %v2798_v0, 8200  ;;  %v2934_v50 = vadd.s32 %v6255_v39, %v2660_v1  ;;  %v2593_v12 = vadd.s32 1408, %v6251_v37  ;;  %v2661_v58 = vadd.s32 1952, %v6251_v37 }
 0x1da   : > { %10552 = vst [vmem:[#allocation129_spill] sm:$0xff] %v7743_v4  ;;  %v2731_v1 = vadd.s32 %v6255_v39, %v2457_v36  ;;  %v2799_v24 = vadd.s32 %v6255_v39, %v2525_v42  ;;  %v519_v36 = vld [vmem:[%s6153_s14 + $0x600] sm:$0xff]  ;;  %v2458_v53 = vadd.s32 328, %v6251_v37  ;;  %v2526_v32 = vadd.s32 872, %v6251_v37 }
 0x1db   : > { %2315 = vst.msk [vmem:[%s6285_s17 + $0x2b4] sm:$0xf] %vm2141_vm1, %v2042_v60  ;;  %v1624_v57 = vpop.f32.mrf.mxu2  ;;  %v1794_v45 = vpop.f32.mrf.mxu3  ;;  %v384_v60 = vld [vmem:[%s6153_s14 + $0x1c8] sm:$0xff]  ;;  %vm3206_vm7 = vcmp.lt.s32.totalorder %v2934_v50, 8200  ;;  %v2527_v51 = vadd.s32 880, %v6251_v37 }
 0x1dc   : > { %2383 = vst.msk [vmem:[%s6285_s17 + $0x3c4] sm:$0xf] %vm2141_vm1, %v2110_v2  ;;  %v1625_v3 = vadd.f32 %v7764_v10, %v1624_v57  ;;  %v1795_v30 = vadd.f32 %v7764_v10, %v1794_v45  ;;  %v1286_v55 = vpop.f32.mrf.mxu0  ;;  %v451_v45 = vld [vmem:[%s6153_s14 + $0x3e0] sm:$0xff]  ;;  %vm3003_vm8 = vcmp.lt.s32.totalorder %v2731_v1, 8200  ;;  %vm3071_vm9 = vcmp.lt.s32.totalorder %v2799_v24, 8200 }
 0x1dd   : > { %2180 = vst.msk [vmem:[%s6285_s17 + $0x98] sm:$0xf] %vm2141_vm1, %v1907_v15  ;;  %v1456_v63 = vpop.f32.mrf.mxu1  ;;  %v1287_v62 = vadd.f32 %v7764_v10, %v1286_v55  ;;  %v452_v55 = vld [vmem:[%s6153_s14 + $0x3e8] sm:$0xff] }
 0x1de   : > { %2248 = vst.msk [vmem:[%s6285_s17 + $0x1a8] sm:$0xf] %vm2141_vm1, %v1975_v61  ;;  %v1457_v38 = vadd.f32 %v7764_v10, %v1456_v63  ;;  %v2043_v2 = vpack.c.bf16 %v1625_v3, %v1625_v3  ;;  %v7777_v15 = vsel %vm3137_vm2, %v1625_v3, 0.0  ;;  %v2111_v61 = vpack.c.bf16 %v1795_v30, %v1795_v30  ;;  %v587_v3 = vld [vmem:[%s6153_s14 + $0x820] sm:$0xff] }
 0x1df   : > { %10553 = vst [vmem:[#allocation130_spill] sm:$0xff] %v7777_v15  ;;  %v7780_v57 = vsel %vm3205_vm3, %v1795_v30, 0.0  ;;  %v1908_v63 = vpack.c.bf16 %v1287_v62, %v1287_v62  ;;  %v7786_v42 = vsel %vm3002_vm4, %v1287_v62, 0.0  ;;  %v588_v15 = vld [vmem:[%s6153_s14 + $0x828] sm:$0xff]  ;;  %v627_v30 = vpack.c.bf16 %v384_v60, %v383_v25 }
 0x1e0   : > { %10554 = vst [vmem:[#allocation131_spill] sm:$0xff] %v7780_v57  ;;  %v1976_v34 = vpack.c.bf16 %v1457_v38, %v1457_v38  ;;  %v7789_v41 = vsel %vm3070_vm5, %v1457_v38, 0.0  ;;  %v661_v0 = vpack.c.bf16 %v452_v55, %v451_v45  ;;  %v695_v62 = vpack.c.bf16 %v520_v7, %v519_v36 }
 0x1e1   : > { %10555 = vst [vmem:[#allocation132_spill] sm:$0xff] %v7786_v42  ;;  %v729_v38 = vpack.c.bf16 %v588_v15, %v587_v3  ;;  %v2594_v25 = vadd.s32 1416, %v6251_v37  ;;  %v2662_v60 = vadd.s32 1960, %v6251_v37 }
 0x1e2   : > { %10556 = vst [vmem:[#allocation133_spill] sm:$0xff] %v7789_v41 }
 0x1e3   : > { %2316 = vst.msk [vmem:[%s6285_s17 + $0x2b8] sm:$0xf] %vm2141_vm1, %v2043_v2  ;;  %v1626_v57 = vpop.f32.mrf.mxu2  ;;  %v1796_v41 = vpop.f32.mrf.mxu3  ;;  %v2867_v2 = vadd.s32 %v6255_v39, %v2593_v12  ;;  %v2732_v12 = vadd.s32 %v6255_v39, %v2458_v53  ;;  %v2868_v24 = vadd.s32 %v6255_v39, %v2594_v25 }
 0x1e4   : > { %2384 = vst.msk [vmem:[%s6285_s17 + $0x3c8] sm:$0xf] %vm2141_vm1, %v2111_v61  ;;  %v2935_v61 = vadd.s32 %v6255_v39, %v2661_v58  ;;  %v1627_v4 = vadd.f32 %v7764_v10, %v1626_v57  ;;  %v1797_v42 = vadd.f32 %v7764_v10, %v1796_v41  ;;  %v1289_v8 = vpop.f32.mrf.mxu0  ;;  %v2800_v58 = vadd.s32 %v6255_v39, %v2526_v32 }
 0x1e5   : > { %2181 = vst.msk [vmem:[%s6285_s17 + $0x9c] sm:$0xf] %vm2141_vm1, %v1908_v63  ;;  %v1459_v63 = vpop.f32.mrf.mxu1  ;;  %vm3139_vm10 = vcmp.lt.s32.totalorder %v2867_v2, 8200  ;;  %vm3004_vm12 = vcmp.lt.s32.totalorder %v2732_v12, 8200  ;;  %v522_v2 = vld [vmem:[%s6153_s14 + $0x618] sm:$0xff]  ;;  %vm3140_vm14 = vcmp.lt.s32.totalorder %v2868_v24, 8200 }
 0x1e6   : > { %2249 = vst.msk [vmem:[%s6285_s17 + $0x1ac] sm:$0xf] %vm2141_vm1, %v1976_v34  ;;  %v1290_v34 = vadd.f32 %v7764_v10, %v1289_v8  ;;  %v1460_v15 = vadd.f32 %v7764_v10, %v1459_v63  ;;  %v2044_v45 = vpack.c.bf16 %v1627_v4, %v1627_v4  ;;  %v7815_v41 = vsel %vm3138_vm6, %v1627_v4, 0.0 }
 0x1e7   : > { %10557 = vst [vmem:[#allocation134_spill] sm:$0xff] %v7815_v41  ;;  %v2112_v57 = vpack.c.bf16 %v1797_v42, %v1797_v42  ;;  %v7818_v55 = vsel %vm3206_vm7, %v1797_v42, 0.0  ;;  %5689 = vmatmul.msk.bf16.gmra.mxu0 %vm771_vm0, %v627_v30  ;;  %5723 = vmatmul.msk.bf16.gmra.mxu1 %vm771_vm0, %v661_v0  ;;  %v2459_v4 = vadd.s32 336, %v6251_v37  ;;  %vm3207_vm11 = vcmp.lt.s32.totalorder %v2935_v61, 8200 }
 0x1e8   : > { %10558 = vst [vmem:[#allocation135_spill] sm:$0xff] %v7818_v55  ;;  %v1909_v36 = vpack.c.bf16 %v1290_v34, %v1290_v34  ;;  %v7821_v8 = vsel %vm3003_vm8, %v1290_v34, 0.0  ;;  %v1977_v7 = vpack.c.bf16 %v1460_v15, %v1460_v15  ;;  %v7824_v3 = vsel %vm3071_vm9, %v1460_v15, 0.0  ;;  %5757 = vmatmul.msk.bf16.gmra.mxu2 %vm771_vm0, %v695_v62  ;;  %5791 = vmatmul.msk.bf16.gmra.mxu3 %vm771_vm0, %v729_v38  ;;  %v385_v15 = vld [vmem:[%s6153_s14 + $0x1d0] sm:$0xff] }
 0x1e9   : > { %10559 = vst [vmem:[#allocation136_spill] sm:$0xff] %v7821_v8  ;;  %vm3072_vm13 = vcmp.lt.s32.totalorder %v2800_v58, 8200  ;;  %v2936_v42 = vadd.s32 %v6255_v39, %v2662_v60  ;;  %v2595_v62 = vadd.s32 1424, %v6251_v37  ;;  %v2663_v38 = vadd.s32 1968, %v6251_v37 }
 0x1ea   : > { %10560 = vst [vmem:[#allocation137_spill] sm:$0xff] %v7824_v3  ;;  %v2733_v25 = vadd.s32 %v6255_v39, %v2459_v4  ;;  %v2801_v60 = vadd.s32 %v6255_v39, %v2527_v51  ;;  %v521_v4 = vld [vmem:[%s6153_s14 + $0x610] sm:$0xff]  ;;  %v2460_v61 = vadd.s32 344, %v6251_v37  ;;  %v2528_v12 = vadd.s32 888, %v6251_v37 }
 0x1eb   : > { %2317 = vst.msk [vmem:[%s6285_s17 + $0x2bc] sm:$0xf] %vm2141_vm1, %v2044_v45  ;;  %v1629_v50 = vpop.f32.mrf.mxu2  ;;  %v1799_v1 = vpop.f32.mrf.mxu3  ;;  %v386_v45 = vld [vmem:[%s6153_s14 + $0x1d8] sm:$0xff]  ;;  %vm3208_vm15 = vcmp.lt.s32.totalorder %v2936_v42, 8200  ;;  %v2529_v24 = vadd.s32 896, %v6251_v37 }
 0x1ec   : > { %2385 = vst.msk [vmem:[%s6285_s17 + $0x3cc] sm:$0xf] %vm2141_vm1, %v2112_v57  ;;  %v1630_v53 = vadd.f32 %v7764_v10, %v1629_v50  ;;  %v1800_v32 = vadd.f32 %v7764_v10, %v1799_v1  ;;  %v1291_v30 = vpop.f32.mrf.mxu0  ;;  %v453_v1 = vld [vmem:[%s6153_s14 + $0x3f0] sm:$0xff]  ;;  %vm3005_vm2 = vcmp.lt.s32.totalorder %v2733_v25, 8200  ;;  %vm3073_vm3 = vcmp.lt.s32.totalorder %v2801_v60, 8200 }
 0x1ed   : > { %2182 = vst.msk [vmem:[%s6285_s17 + $0xa0] sm:$0xf] %vm2141_vm1, %v1909_v36  ;;  %v1461_v0 = vpop.f32.mrf.mxu1  ;;  %v1292_v63 = vadd.f32 %v7764_v10, %v1291_v30  ;;  %v454_v30 = vld [vmem:[%s6153_s14 + $0x3f8] sm:$0xff] }
 0x1ee   : > { %2250 = vst.msk [vmem:[%s6285_s17 + $0x1b0] sm:$0xf] %vm2141_vm1, %v1977_v7  ;;  %v1462_v34 = vadd.f32 %v7764_v10, %v1461_v0  ;;  %v2045_v57 = vpack.c.bf16 %v1630_v53, %v1630_v53  ;;  %v7853_v36 = vsel %vm3139_vm10, %v1630_v53, 0.0  ;;  %v2113_v7 = vpack.c.bf16 %v1800_v32, %v1800_v32  ;;  %v589_v53 = vld [vmem:[%s6153_s14 + $0x830] sm:$0xff] }
 0x1ef   : > { %10561 = vst [vmem:[#allocation138_spill] sm:$0xff] %v7853_v36  ;;  %v7856_v50 = vsel %vm3207_vm11, %v1800_v32, 0.0  ;;  %v1910_v0 = vpack.c.bf16 %v1292_v63, %v1292_v63  ;;  %v7862_v51 = vsel %vm3004_vm12, %v1292_v63, 0.0  ;;  %v590_v36 = vld [vmem:[%s6153_s14 + $0x838] sm:$0xff]  ;;  %v628_v32 = vpack.c.bf16 %v386_v45, %v385_v15 }
 0x1f0   : > { %10562 = vst [vmem:[#allocation139_spill] sm:$0xff] %v7856_v50  ;;  %v1978_v55 = vpack.c.bf16 %v1462_v34, %v1462_v34  ;;  %v7865_v41 = vsel %vm3072_vm13, %v1462_v34, 0.0  ;;  %v662_v58 = vpack.c.bf16 %v454_v30, %v453_v1  ;;  %v696_v63 = vpack.c.bf16 %v522_v2, %v521_v4 }
 0x1f1   : > { %10563 = vst [vmem:[#allocation140_spill] sm:$0xff] %v7862_v51  ;;  %v730_v34 = vpack.c.bf16 %v590_v36, %v589_v53  ;;  %v2596_v15 = vadd.s32 1432, %v6251_v37  ;;  %v2664_v45 = vadd.s32 1976, %v6251_v37 }
 0x1f2   : > { %10564 = vst [vmem:[#allocation141_spill] sm:$0xff] %v7865_v41 }
 0x1f3   : > { %2318 = vst.msk [vmem:[%s6285_s17 + $0x2c0] sm:$0xf] %vm2141_vm1, %v2045_v57  ;;  %v1631_v50 = vpop.f32.mrf.mxu2  ;;  %v1801_v41 = vpop.f32.mrf.mxu3  ;;  %v2869_v57 = vadd.s32 %v6255_v39, %v2595_v62  ;;  %v2734_v62 = vadd.s32 %v6255_v39, %v2460_v61  ;;  %v2870_v60 = vadd.s32 %v6255_v39, %v2596_v15 }
 0x1f4   : > { %2386 = vst.msk [vmem:[%s6285_s17 + $0x3d0] sm:$0xf] %vm2141_vm1, %v2113_v7  ;;  %v2937_v7 = vadd.s32 %v6255_v39, %v2663_v38  ;;  %v1632_v3 = vadd.f32 %v7764_v10, %v1631_v50  ;;  %v1802_v51 = vadd.f32 %v7764_v10, %v1801_v41  ;;  %v1294_v8 = vpop.f32.mrf.mxu0  ;;  %v2802_v38 = vadd.s32 %v6255_v39, %v2528_v12 }
 0x1f5   : > { %2183 = vst.msk [vmem:[%s6285_s17 + $0xa4] sm:$0xf] %vm2141_vm1, %v1910_v0  ;;  %v1464_v0 = vpop.f32.mrf.mxu1  ;;  %vm3141_vm4 = vcmp.lt.s32.totalorder %v2869_v57, 8200  ;;  %vm3006_vm6 = vcmp.lt.s32.totalorder %v2734_v62, 8200  ;;  %v524_v57 = vld [vmem:[%s6153_s14 + $0x628] sm:$0xff]  ;;  %vm3142_vm8 = vcmp.lt.s32.totalorder %v2870_v60, 8200 }
 0x1f6   : > { %2251 = vst.msk [vmem:[%s6285_s17 + $0x1b4] sm:$0xf] %vm2141_vm1, %v1978_v55  ;;  %v1295_v55 = vadd.f32 %v7764_v10, %v1294_v8  ;;  %v1465_v36 = vadd.f32 %v7764_v10, %v1464_v0  ;;  %v2046_v1 = vpack.c.bf16 %v1632_v3, %v1632_v3  ;;  %v7891_v41 = vsel %vm3140_vm14, %v1632_v3, 0.0 }
 0x1f7   : > { %10565 = vst [vmem:[#allocation142_spill] sm:$0xff] %v7891_v41  ;;  %v2114_v50 = vpack.c.bf16 %v1802_v51, %v1802_v51  ;;  %v7894_v30 = vsel %vm3208_vm15, %v1802_v51, 0.0  ;;  %5690 = vmatmul.msk.bf16.gmra.mxu0 %vm771_vm0, %v628_v32  ;;  %5724 = vmatmul.msk.bf16.gmra.mxu1 %vm771_vm0, %v662_v58  ;;  %v2461_v3 = vadd.s32 352, %v6251_v37  ;;  %vm3209_vm5 = vcmp.lt.s32.totalorder %v2937_v7, 8200 }
 0x1f8   : > { %10566 = vst [vmem:[#allocation143_spill] sm:$0xff] %v7894_v30  ;;  %v1911_v4 = vpack.c.bf16 %v1295_v55, %v1295_v55  ;;  %v7897_v8 = vsel %vm3005_vm2, %v1295_v55, 0.0  ;;  %v1979_v2 = vpack.c.bf16 %v1465_v36, %v1465_v36  ;;  %v7900_v53 = vsel %vm3073_vm3, %v1465_v36, 0.0  ;;  %5758 = vmatmul.msk.bf16.gmra.mxu2 %vm771_vm0, %v696_v63  ;;  %5792 = vmatmul.msk.bf16.gmra.mxu3 %vm771_vm0, %v730_v34  ;;  %v387_v36 = vld [vmem:[%s6153_s14 + $0x1e0] sm:$0xff] }
 0x1f9   : > { %10567 = vst [vmem:[#allocation144_spill] sm:$0xff] %v7897_v8  ;;  %vm3074_vm7 = vcmp.lt.s32.totalorder %v2802_v38, 8200  ;;  %v2938_v51 = vadd.s32 %v6255_v39, %v2664_v45  ;;  %v2597_v63 = vadd.s32 1440, %v6251_v37  ;;  %v2665_v34 = vadd.s32 1984, %v6251_v37 }
 0x1fa   : > { %10568 = vst [vmem:[#allocation145_spill] sm:$0xff] %v7900_v53  ;;  %v2735_v15 = vadd.s32 %v6255_v39, %v2461_v3  ;;  %v2803_v45 = vadd.s32 %v6255_v39, %v2529_v24  ;;  %v523_v3 = vld [vmem:[%s6153_s14 + $0x620] sm:$0xff]  ;;  %v2462_v7 = vadd.s32 360, %v6251_v37  ;;  %v2530_v62 = vadd.s32 904, %v6251_v37 }
 0x1fb   : > { %2319 = vst.msk [vmem:[%s6285_s17 + $0x2c4] sm:$0xf] %vm2141_vm1, %v2046_v1  ;;  %v1634_v42 = vpop.f32.mrf.mxu2  ;;  %v1804_v25 = vpop.f32.mrf.mxu3  ;;  %v388_v1 = vld [vmem:[%s6153_s14 + $0x1e8] sm:$0xff]  ;;  %vm3210_vm9 = vcmp.lt.s32.totalorder %v2938_v51, 8200  ;;  %v2531_v60 = vadd.s32 912, %v6251_v37 }
 0x1fc   : > { %2387 = vst.msk [vmem:[%s6285_s17 + $0x3d4] sm:$0xf] %vm2141_vm1, %v2114_v50  ;;  %v1635_v61 = vadd.f32 %v7764_v10, %v1634_v42  ;;  %v1805_v12 = vadd.f32 %v7764_v10, %v1804_v25  ;;  %v1296_v32 = vpop.f32.mrf.mxu0  ;;  %v455_v25 = vld [vmem:[%s6153_s14 + $0x400] sm:$0xff]  ;;  %vm3007_vm10 = vcmp.lt.s32.totalorder %v2735_v15, 8200  ;;  %vm3075_vm11 = vcmp.lt.s32.totalorder %v2803_v45, 8200 }
 0x1fd   : > { %2184 = vst.msk [vmem:[%s6285_s17 + $0xa8] sm:$0xf] %vm2141_vm1, %v1911_v4  ;;  %v1466_v58 = vpop.f32.mrf.mxu1  ;;  %v1297_v0 = vadd.f32 %v7764_v10, %v1296_v32  ;;  %v456_v32 = vld [vmem:[%s6153_s14 + $0x408] sm:$0xff] }
 0x1fe   : > { %2252 = vst.msk [vmem:[%s6285_s17 + $0x1b8] sm:$0xf] %vm2141_vm1, %v1979_v2  ;;  %v1467_v55 = vadd.f32 %v7764_v10, %v1466_v58  ;;  %v2047_v50 = vpack.c.bf16 %v1635_v61, %v1635_v61  ;;  %v7929_v4 = vsel %vm3141_vm4, %v1635_v61, 0.0  ;;  %v2115_v2 = vpack.c.bf16 %v1805_v12, %v1805_v12  ;;  %v591_v61 = vld [vmem:[%s6153_s14 + $0x840] sm:$0xff] }
 0x1ff   : > { %10569 = vst [vmem:[#allocation146_spill] sm:$0xff] %v7929_v4  ;;  %v7932_v42 = vsel %vm3209_vm5, %v1805_v12, 0.0  ;;  %v1912_v58 = vpack.c.bf16 %v1297_v0, %v1297_v0  ;;  %v7938_v24 = vsel %vm3006_vm6, %v1297_v0, 0.0  ;;  %v592_v4 = vld [vmem:[%s6153_s14 + $0x848] sm:$0xff]  ;;  %v629_v12 = vpack.c.bf16 %v388_v1, %v387_v36 }
 0x200   : > { %10570 = vst [vmem:[#allocation147_spill] sm:$0xff] %v7932_v42  ;;  %v1980_v30 = vpack.c.bf16 %v1467_v55, %v1467_v55  ;;  %v7941_v41 = vsel %vm3074_vm7, %v1467_v55, 0.0  ;;  %v663_v38 = vpack.c.bf16 %v456_v32, %v455_v25  ;;  %v697_v0 = vpack.c.bf16 %v524_v57, %v523_v3 }
 0x201   : > { %10571 = vst [vmem:[#allocation148_spill] sm:$0xff] %v7938_v24  ;;  %v731_v55 = vpack.c.bf16 %v592_v4, %v591_v61  ;;  %v2598_v36 = vadd.s32 1448, %v6251_v37  ;;  %v2666_v1 = vadd.s32 1992, %v6251_v37 }
 0x202   : > { %10572 = vst [vmem:[#allocation149_spill] sm:$0xff] %v7941_v41 }
 0x203   : > { %2320 = vst.msk [vmem:[%s6285_s17 + $0x2c8] sm:$0xf] %vm2141_vm1, %v2047_v50  ;;  %v1636_v42 = vpop.f32.mrf.mxu2  ;;  %v1806_v41 = vpop.f32.mrf.mxu3  ;;  %v2871_v50 = vadd.s32 %v6255_v39, %v2597_v63  ;;  %v2736_v63 = vadd.s32 %v6255_v39, %v2462_v7  ;;  %v2872_v45 = vadd.s32 %v6255_v39, %v2598_v36 }
 0x204   : > { %2388 = vst.msk [vmem:[%s6285_s17 + $0x3d8] sm:$0xf] %vm2141_vm1, %v2115_v2  ;;  %v2939_v2 = vadd.s32 %v6255_v39, %v2665_v34  ;;  %v1637_v53 = vadd.f32 %v7764_v10, %v1636_v42  ;;  %v1807_v24 = vadd.f32 %v7764_v10, %v1806_v41  ;;  %v1299_v8 = vpop.f32.mrf.mxu0  ;;  %v2804_v34 = vadd.s32 %v6255_v39, %v2530_v62 }
 0x205   : > { %2185 = vst.msk [vmem:[%s6285_s17 + $0xac] sm:$0xf] %vm2141_vm1, %v1912_v58  ;;  %v1469_v58 = vpop.f32.mrf.mxu1  ;;  %vm3143_vm12 = vcmp.lt.s32.totalorder %v2871_v50, 8200  ;;  %vm3008_vm14 = vcmp.lt.s32.totalorder %v2736_v63, 8200  ;;  %v526_v50 = vld [vmem:[%s6153_s14 + $0x638] sm:$0xff]  ;;  %vm3144_vm2 = vcmp.lt.s32.totalorder %v2872_v45, 8200 }
 0x206   : > { %2253 = vst.msk [vmem:[%s6285_s17 + $0x1bc] sm:$0xf] %vm2141_vm1, %v1980_v30  ;;  %v1300_v30 = vadd.f32 %v7764_v10, %v1299_v8  ;;  %v1470_v4 = vadd.f32 %v7764_v10, %v1469_v58  ;;  %v2048_v25 = vpack.c.bf16 %v1637_v53, %v1637_v53  ;;  %v7967_v41 = vsel %vm3142_vm8, %v1637_v53, 0.0 }
 0x207   : > { %10573 = vst [vmem:[#allocation150_spill] sm:$0xff] %v7967_v41  ;;  %v2116_v42 = vpack.c.bf16 %v1807_v24, %v1807_v24  ;;  %v7970_v32 = vsel %vm3210_vm9, %v1807_v24, 0.0  ;;  %5691 = vmatmul.msk.bf16.gmra.mxu0 %vm771_vm0, %v629_v12  ;;  %5725 = vmatmul.msk.bf16.gmra.mxu1 %vm771_vm0, %v663_v38  ;;  %v2463_v53 = vadd.s32 368, %v6251_v37  ;;  %vm3211_vm13 = vcmp.lt.s32.totalorder %v2939_v2, 8200 }
 0x208   : > { %10574 = vst [vmem:[#allocation151_spill] sm:$0xff] %v7970_v32  ;;  %v1913_v3 = vpack.c.bf16 %v1300_v30, %v1300_v30  ;;  %v7973_v8 = vsel %vm3007_vm10, %v1300_v30, 0.0  ;;  %v1981_v57 = vpack.c.bf16 %v1470_v4, %v1470_v4  ;;  %v7976_v61 = vsel %vm3075_vm11, %v1470_v4, 0.0  ;;  %5759 = vmatmul.msk.bf16.gmra.mxu2 %vm771_vm0, %v697_v0  ;;  %5793 = vmatmul.msk.bf16.gmra.mxu3 %vm771_vm0, %v731_v55  ;;  %v389_v4 = vld [vmem:[%s6153_s14 + $0x1f0] sm:$0xff] }
 0x209   : > { %10575 = vst [vmem:[#allocation152_spill] sm:$0xff] %v7973_v8  ;;  %vm3076_vm15 = vcmp.lt.s32.totalorder %v2804_v34, 8200  ;;  %v2940_v24 = vadd.s32 %v6255_v39, %v2666_v1  ;;  %v2599_v0 = vadd.s32 1456, %v6251_v37  ;;  %v2667_v55 = vadd.s32 2000, %v6251_v37 }
 0x20a   : > { %10576 = vst [vmem:[#allocation153_spill] sm:$0xff] %v7976_v61  ;;  %v2737_v36 = vadd.s32 %v6255_v39, %v2463_v53  ;;  %v2805_v1 = vadd.s32 %v6255_v39, %v2531_v60  ;;  %v525_v53 = vld [vmem:[%s6153_s14 + $0x630] sm:$0xff]  ;;  %v2464_v2 = vadd.s32 376, %v6251_v37  ;;  %v2532_v63 = vadd.s32 920, %v6251_v37 }
 0x20b   : > { %2321 = vst.msk [vmem:[%s6285_s17 + $0x2cc] sm:$0xf] %vm2141_vm1, %v2048_v25  ;;  %v1639_v51 = vpop.f32.mrf.mxu2  ;;  %v1809_v15 = vpop.f32.mrf.mxu3  ;;  %v390_v25 = vld [vmem:[%s6153_s14 + $0x1f8] sm:$0xff]  ;;  %vm3212_vm3 = vcmp.lt.s32.totalorder %v2940_v24, 8200  ;;  %v2533_v45 = vadd.s32 928, %v6251_v37 }
 0x20c   : > { %2389 = vst.msk [vmem:[%s6285_s17 + $0x3dc] sm:$0xf] %vm2141_vm1, %v2116_v42  ;;  %v1640_v7 = vadd.f32 %v7764_v10, %v1639_v51  ;;  %v1810_v62 = vadd.f32 %v7764_v10, %v1809_v15  ;;  %v1301_v12 = vpop.f32.mrf.mxu0  ;;  %v457_v15 = vld [vmem:[%s6153_s14 + $0x410] sm:$0xff]  ;;  %vm3009_vm4 = vcmp.lt.s32.totalorder %v2737_v36, 8200  ;;  %vm3077_vm5 = vcmp.lt.s32.totalorder %v2805_v1, 8200 }
 0x20d   : > { %2186 = vst.msk [vmem:[%s6285_s17 + $0xb0] sm:$0xf] %vm2141_vm1, %v1913_v3  ;;  %v1471_v38 = vpop.f32.mrf.mxu1  ;;  %v1302_v58 = vadd.f32 %v7764_v10, %v1301_v12  ;;  %v458_v12 = vld [vmem:[%s6153_s14 + $0x418] sm:$0xff] }
 0x20e   : > { %2254 = vst.msk [vmem:[%s6285_s17 + $0x1c0] sm:$0xf] %vm2141_vm1, %v1981_v57  ;;  %v1472_v30 = vadd.f32 %v7764_v10, %v1471_v38  ;;  %v2049_v42 = vpack.c.bf16 %v1640_v7, %v1640_v7  ;;  %v8005_v3 = vsel %vm3143_vm12, %v1640_v7, 0.0  ;;  %v2117_v57 = vpack.c.bf16 %v1810_v62, %v1810_v62  ;;  %v593_v7 = vld [vmem:[%s6153_s14 + $0x850] sm:$0xff] }
 0x20f   : > { %10577 = vst [vmem:[#allocation154_spill] sm:$0xff] %v8005_v3  ;;  %v8008_v51 = vsel %vm3211_vm13, %v1810_v62, 0.0  ;;  %v1914_v38 = vpack.c.bf16 %v1302_v58, %v1302_v58  ;;  %v8014_v60 = vsel %vm3008_vm14, %v1302_v58, 0.0  ;;  %v594_v3 = vld [vmem:[%s6153_s14 + $0x858] sm:$0xff]  ;;  %v630_v62 = vpack.c.bf16 %v390_v25, %v389_v4 }
 0x210   : > { %10578 = vst [vmem:[#allocation155_spill] sm:$0xff] %v8008_v51  ;;  %v1982_v32 = vpack.c.bf16 %v1472_v30, %v1472_v30  ;;  %v8017_v41 = vsel %vm3076_vm15, %v1472_v30, 0.0  ;;  %v664_v34 = vpack.c.bf16 %v458_v12, %v457_v15  ;;  %v698_v58 = vpack.c.bf16 %v526_v50, %v525_v53 }
 0x211   : > { %10579 = vst [vmem:[#allocation156_spill] sm:$0xff] %v8014_v60  ;;  %v732_v30 = vpack.c.bf16 %v594_v3, %v593_v7  ;;  %v2600_v4 = vadd.s32 1464, %v6251_v37  ;;  %v2668_v25 = vadd.s32 2008, %v6251_v37 }
 0x212   : > { %10580 = vst [vmem:[#allocation157_spill] sm:$0xff] %v8017_v41 }
 0x213   : > { %2322 = vst.msk [vmem:[%s6285_s17 + $0x2d0] sm:$0xf] %vm2141_vm1, %v2049_v42  ;;  %v1641_v51 = vpop.f32.mrf.mxu2  ;;  %v1811_v41 = vpop.f32.mrf.mxu3  ;;  %v2873_v42 = vadd.s32 %v6255_v39, %v2599_v0  ;;  %v2738_v0 = vadd.s32 %v6255_v39, %v2464_v2  ;;  %v2874_v1 = vadd.s32 %v6255_v39, %v2600_v4 }
 0x214   : > { %2390 = vst.msk [vmem:[%s6285_s17 + $0x3e0] sm:$0xf] %vm2141_vm1, %v2117_v57  ;;  %v2941_v57 = vadd.s32 %v6255_v39, %v2667_v55  ;;  %v1642_v61 = vadd.f32 %v7764_v10, %v1641_v51  ;;  %v1812_v60 = vadd.f32 %v7764_v10, %v1811_v41  ;;  %v1304_v8 = vpop.f32.mrf.mxu0  ;;  %v2806_v55 = vadd.s32 %v6255_v39, %v2532_v63 }
 0x215   : > { %2187 = vst.msk [vmem:[%s6285_s17 + $0xb4] sm:$0xf] %vm2141_vm1, %v1914_v38  ;;  %v1474_v38 = vpop.f32.mrf.mxu1  ;;  %vm3145_vm6 = vcmp.lt.s32.totalorder %v2873_v42, 8200  ;;  %vm3010_vm8 = vcmp.lt.s32.totalorder %v2738_v0, 8200  ;;  %v528_v42 = vld [vmem:[%s6153_s14 + $0x648] sm:$0xff]  ;;  %vm3146_vm10 = vcmp.lt.s32.totalorder %v2874_v1, 8200 }
 0x216   : > { %2255 = vst.msk [vmem:[%s6285_s17 + $0x1c4] sm:$0xf] %vm2141_vm1, %v1982_v32  ;;  %v1305_v32 = vadd.f32 %v7764_v10, %v1304_v8  ;;  %v1475_v3 = vadd.f32 %v7764_v10, %v1474_v38  ;;  %v2050_v15 = vpack.c.bf16 %v1642_v61, %v1642_v61  ;;  %v8043_v41 = vsel %vm3144_vm2, %v1642_v61, 0.0 }
 0x217   : > { %10581 = vst [vmem:[#allocation158_spill] sm:$0xff] %v8043_v41  ;;  %v2118_v51 = vpack.c.bf16 %v1812_v60, %v1812_v60  ;;  %v8046_v12 = vsel %vm3212_vm3, %v1812_v60, 0.0  ;;  %5692 = vmatmul.msk.bf16.gmra.mxu0 %vm771_vm0, %v630_v62  ;;  %5726 = vmatmul.msk.bf16.gmra.mxu1 %vm771_vm0, %v664_v34  ;;  %v2465_v61 = vadd.s32 384, %v6251_v37  ;;  %vm3213_vm7 = vcmp.lt.s32.totalorder %v2941_v57, 8200 }
 0x218   : > { %10582 = vst [vmem:[#allocation159_spill] sm:$0xff] %v8046_v12  ;;  %v1915_v53 = vpack.c.bf16 %v1305_v32, %v1305_v32  ;;  %v8049_v8 = vsel %vm3009_vm4, %v1305_v32, 0.0  ;;  %v1983_v50 = vpack.c.bf16 %v1475_v3, %v1475_v3  ;;  %v8052_v7 = vsel %vm3077_vm5, %v1475_v3, 0.0  ;;  %5760 = vmatmul.msk.bf16.gmra.mxu2 %vm771_vm0, %v698_v58  ;;  %5794 = vmatmul.msk.bf16.gmra.mxu3 %vm771_vm0, %v732_v30  ;;  %v391_v3 = vld [vmem:[%s6153_s14 + $0x200] sm:$0xff] }
 0x219   : > { %10583 = vst [vmem:[#allocation160_spill] sm:$0xff] %v8049_v8  ;;  %vm3078_vm9 = vcmp.lt.s32.totalorder %v2806_v55, 8200  ;;  %v2942_v60 = vadd.s32 %v6255_v39, %v2668_v25  ;;  %v2601_v58 = vadd.s32 1472, %v6251_v37  ;;  %v2669_v30 = vadd.s32 2016, %v6251_v37 }
 0x21a   : > { %10584 = vst [vmem:[#allocation161_spill] sm:$0xff] %v8052_v7  ;;  %v2739_v4 = vadd.s32 %v6255_v39, %v2465_v61  ;;  %v2807_v25 = vadd.s32 %v6255_v39, %v2533_v45  ;;  %v527_v61 = vld [vmem:[%s6153_s14 + $0x640] sm:$0xff]  ;;  %v2466_v57 = vadd.s32 392, %v6251_v37  ;;  %v2534_v0 = vadd.s32 936, %v6251_v37 }
 0x21b   : > { %2323 = vst.msk [vmem:[%s6285_s17 + $0x2d4] sm:$0xf] %vm2141_vm1, %v2050_v15  ;;  %v1644_v24 = vpop.f32.mrf.mxu2  ;;  %v1814_v36 = vpop.f32.mrf.mxu3  ;;  %v392_v15 = vld [vmem:[%s6153_s14 + $0x208] sm:$0xff]  ;;  %vm3214_vm11 = vcmp.lt.s32.totalorder %v2942_v60, 8200  ;;  %v2535_v1 = vadd.s32 944, %v6251_v37 }
 0x21c   : > { %2391 = vst.msk [vmem:[%s6285_s17 + $0x3e4] sm:$0xf] %vm2141_vm1, %v2118_v51  ;;  %v1645_v2 = vadd.f32 %v7764_v10, %v1644_v24  ;;  %v1815_v63 = vadd.f32 %v7764_v10, %v1814_v36  ;;  %v1306_v62 = vpop.f32.mrf.mxu0  ;;  %v459_v36 = vld [vmem:[%s6153_s14 + $0x420] sm:$0xff]  ;;  %vm3011_vm12 = vcmp.lt.s32.totalorder %v2739_v4, 8200  ;;  %vm3079_vm13 = vcmp.lt.s32.totalorder %v2807_v25, 8200 }
 0x21d   : > { %2188 = vst.msk [vmem:[%s6285_s17 + $0xb8] sm:$0xf] %vm2141_vm1, %v1915_v53  ;;  %v1476_v34 = vpop.f32.mrf.mxu1  ;;  %v1307_v38 = vadd.f32 %v7764_v10, %v1306_v62  ;;  %v460_v62 = vld [vmem:[%s6153_s14 + $0x428] sm:$0xff] }
 0x21e   : > { %2256 = vst.msk [vmem:[%s6285_s17 + $0x1c8] sm:$0xf] %vm2141_vm1, %v1983_v50  ;;  %v1477_v32 = vadd.f32 %v7764_v10, %v1476_v34  ;;  %v2051_v51 = vpack.c.bf16 %v1645_v2, %v1645_v2  ;;  %v8081_v53 = vsel %vm3145_vm6, %v1645_v2, 0.0  ;;  %v2119_v50 = vpack.c.bf16 %v1815_v63, %v1815_v63  ;;  %v595_v2 = vld [vmem:[%s6153_s14 + $0x860] sm:$0xff] }
 0x21f   : > { %10585 = vst [vmem:[#allocation162_spill] sm:$0xff] %v8081_v53  ;;  %v8084_v24 = vsel %vm3213_vm7, %v1815_v63, 0.0  ;;  %v1916_v34 = vpack.c.bf16 %v1307_v38, %v1307_v38  ;;  %v8090_v45 = vsel %vm3010_vm8, %v1307_v38, 0.0  ;;  %v596_v53 = vld [vmem:[%s6153_s14 + $0x868] sm:$0xff]  ;;  %v631_v63 = vpack.c.bf16 %v392_v15, %v391_v3 }
 0x220   : > { %10586 = vst [vmem:[#allocation163_spill] sm:$0xff] %v8084_v24  ;;  %v1984_v12 = vpack.c.bf16 %v1477_v32, %v1477_v32  ;;  %v8093_v41 = vsel %vm3078_vm9, %v1477_v32, 0.0  ;;  %v665_v55 = vpack.c.bf16 %v460_v62, %v459_v36  ;;  %v699_v38 = vpack.c.bf16 %v528_v42, %v527_v61 }
 0x221   : > { %10587 = vst [vmem:[#allocation164_spill] sm:$0xff] %v8090_v45  ;;  %v733_v32 = vpack.c.bf16 %v596_v53, %v595_v2  ;;  %v2602_v3 = vadd.s32 1480, %v6251_v37  ;;  %v2670_v15 = vadd.s32 2024, %v6251_v37 }
 0x222   : > { %10588 = vst [vmem:[#allocation165_spill] sm:$0xff] %v8093_v41 }
 0x223   : > { %2324 = vst.msk [vmem:[%s6285_s17 + $0x2d8] sm:$0xf] %vm2141_vm1, %v2051_v51  ;;  %v1646_v24 = vpop.f32.mrf.mxu2  ;;  %v1816_v41 = vpop.f32.mrf.mxu3  ;;  %v2875_v51 = vadd.s32 %v6255_v39, %v2601_v58  ;;  %v2740_v58 = vadd.s32 %v6255_v39, %v2466_v57  ;;  %v2876_v25 = vadd.s32 %v6255_v39, %v2602_v3 }
 0x224   : > { %2392 = vst.msk [vmem:[%s6285_s17 + $0x3e8] sm:$0xf] %vm2141_vm1, %v2119_v50  ;;  %v2943_v50 = vadd.s32 %v6255_v39, %v2669_v30  ;;  %v1647_v7 = vadd.f32 %v7764_v10, %v1646_v24  ;;  %v1817_v45 = vadd.f32 %v7764_v10, %v1816_v41  ;;  %v1309_v8 = vpop.f32.mrf.mxu0  ;;  %v2808_v30 = vadd.s32 %v6255_v39, %v2534_v0 }
 0x225   : > { %2189 = vst.msk [vmem:[%s6285_s17 + $0xbc] sm:$0xf] %vm2141_vm1, %v1916_v34  ;;  %v1479_v34 = vpop.f32.mrf.mxu1  ;;  %vm3147_vm14 = vcmp.lt.s32.totalorder %v2875_v51, 8200  ;;  %vm3012_vm2 = vcmp.lt.s32.totalorder %v2740_v58, 8200  ;;  %v530_v51 = vld [vmem:[%s6153_s14 + $0x658] sm:$0xff]  ;;  %vm3148_vm4 = vcmp.lt.s32.totalorder %v2876_v25, 8200 }
 0x226   : > { %2257 = vst.msk [vmem:[%s6285_s17 + $0x1cc] sm:$0xf] %vm2141_vm1, %v1984_v12  ;;  %v1310_v12 = vadd.f32 %v7764_v10, %v1309_v8  ;;  %v1480_v53 = vadd.f32 %v7764_v10, %v1479_v34  ;;  %v2052_v36 = vpack.c.bf16 %v1647_v7, %v1647_v7  ;;  %v8119_v41 = vsel %vm3146_vm10, %v1647_v7, 0.0 }
 0x227   : > { %10589 = vst [vmem:[#allocation166_spill] sm:$0xff] %v8119_v41  ;;  %v2120_v24 = vpack.c.bf16 %v1817_v45, %v1817_v45  ;;  %v8122_v62 = vsel %vm3214_vm11, %v1817_v45, 0.0  ;;  %5693 = vmatmul.msk.bf16.gmra.mxu0 %vm771_vm0, %v631_v63  ;;  %5727 = vmatmul.msk.bf16.gmra.mxu1 %vm771_vm0, %v665_v55  ;;  %v2467_v7 = vadd.s32 400, %v6251_v37  ;;  %vm3215_vm15 = vcmp.lt.s32.totalorder %v2943_v50, 8200 }
 0x228   : > { %10590 = vst [vmem:[#allocation167_spill] sm:$0xff] %v8122_v62  ;;  %v1917_v61 = vpack.c.bf16 %v1310_v12, %v1310_v12  ;;  %v8125_v8 = vsel %vm3011_vm12, %v1310_v12, 0.0  ;;  %v1985_v42 = vpack.c.bf16 %v1480_v53, %v1480_v53  ;;  %v8128_v2 = vsel %vm3079_vm13, %v1480_v53, 0.0  ;;  %5761 = vmatmul.msk.bf16.gmra.mxu2 %vm771_vm0, %v699_v38  ;;  %5795 = vmatmul.msk.bf16.gmra.mxu3 %vm771_vm0, %v733_v32  ;;  %v393_v53 = vld [vmem:[%s6153_s14 + $0x210] sm:$0xff] }
 0x229   : > { %10591 = vst [vmem:[#allocation168_spill] sm:$0xff] %v8125_v8  ;;  %vm3080_vm3 = vcmp.lt.s32.totalorder %v2808_v30, 8200  ;;  %v2944_v45 = vadd.s32 %v6255_v39, %v2670_v15  ;;  %v2603_v38 = vadd.s32 1488, %v6251_v37  ;;  %v2671_v32 = vadd.s32 2032, %v6251_v37 }
 0x22a   : > { %10592 = vst [vmem:[#allocation169_spill] sm:$0xff] %v8128_v2  ;;  %v2741_v3 = vadd.s32 %v6255_v39, %v2467_v7  ;;  %v2809_v15 = vadd.s32 %v6255_v39, %v2535_v1  ;;  %v529_v7 = vld [vmem:[%s6153_s14 + $0x650] sm:$0xff]  ;;  %v2468_v50 = vadd.s32 408, %v6251_v37  ;;  %v2536_v58 = vadd.s32 952, %v6251_v37 }
 0x22b   : > { %2325 = vst.msk [vmem:[%s6285_s17 + $0x2dc] sm:$0xf] %vm2141_vm1, %v2052_v36  ;;  %v1649_v60 = vpop.f32.mrf.mxu2  ;;  %v1819_v4 = vpop.f32.mrf.mxu3  ;;  %v394_v36 = vld [vmem:[%s6153_s14 + $0x218] sm:$0xff]  ;;  %vm3216_vm5 = vcmp.lt.s32.totalorder %v2944_v45, 8200  ;;  %v2537_v25 = vadd.s32 960, %v6251_v37 }
 0x22c   : > { %2393 = vst.msk [vmem:[%s6285_s17 + $0x3ec] sm:$0xf] %vm2141_vm1, %v2120_v24  ;;  %v1650_v57 = vadd.f32 %v7764_v10, %v1649_v60  ;;  %v1820_v0 = vadd.f32 %v7764_v10, %v1819_v4  ;;  %v1311_v63 = vpop.f32.mrf.mxu0  ;;  %v461_v4 = vld [vmem:[%s6153_s14 + $0x430] sm:$0xff]  ;;  %vm3013_vm6 = vcmp.lt.s32.totalorder %v2741_v3, 8200  ;;  %vm3081_vm7 = vcmp.lt.s32.totalorder %v2809_v15, 8200 }
 0x22d   : > { %2190 = vst.msk [vmem:[%s6285_s17 + $0xc0] sm:$0xf] %vm2141_vm1, %v1917_v61  ;;  %v1481_v55 = vpop.f32.mrf.mxu1  ;;  %v1312_v34 = vadd.f32 %v7764_v10, %v1311_v63  ;;  %v462_v63 = vld [vmem:[%s6153_s14 + $0x438] sm:$0xff] }
 0x22e   : > { %2258 = vst.msk [vmem:[%s6285_s17 + $0x1d0] sm:$0xf] %vm2141_vm1, %v1985_v42  ;;  %v1482_v12 = vadd.f32 %v7764_v10, %v1481_v55  ;;  %v2053_v24 = vpack.c.bf16 %v1650_v57, %v1650_v57  ;;  %v8157_v61 = vsel %vm3147_vm14, %v1650_v57, 0.0  ;;  %v2121_v42 = vpack.c.bf16 %v1820_v0, %v1820_v0  ;;  %v597_v57 = vld [vmem:[%s6153_s14 + $0x870] sm:$0xff] }
 0x22f   : > { %10593 = vst [vmem:[#allocation170_spill] sm:$0xff] %v8157_v61  ;;  %v8160_v60 = vsel %vm3215_vm15, %v1820_v0, 0.0  ;;  %v1918_v55 = vpack.c.bf16 %v1312_v34, %v1312_v34  ;;  %v8166_v1 = vsel %vm3012_vm2, %v1312_v34, 0.0  ;;  %v598_v61 = vld [vmem:[%s6153_s14 + $0x878] sm:$0xff]  ;;  %v632_v0 = vpack.c.bf16 %v394_v36, %v393_v53 }
 0x230   : > { %10594 = vst [vmem:[#allocation171_spill] sm:$0xff] %v8160_v60  ;;  %v1986_v62 = vpack.c.bf16 %v1482_v12, %v1482_v12  ;;  %v8169_v41 = vsel %vm3080_vm3, %v1482_v12, 0.0  ;;  %v666_v30 = vpack.c.bf16 %v462_v63, %v461_v4  ;;  %v700_v34 = vpack.c.bf16 %v530_v51, %v529_v7 }
 0x231   : > { %10595 = vst [vmem:[#allocation172_spill] sm:$0xff] %v8166_v1  ;;  %v734_v12 = vpack.c.bf16 %v598_v61, %v597_v57  ;;  %v2604_v53 = vadd.s32 1496, %v6251_v37  ;;  %v2672_v36 = vadd.s32 2040, %v6251_v37 }
 0x232   : > { %10596 = vst [vmem:[#allocation173_spill] sm:$0xff] %v8169_v41 }
 0x233   : > { %2326 = vst.msk [vmem:[%s6285_s17 + $0x2e0] sm:$0xf] %vm2141_vm1, %v2053_v24  ;;  %v1651_v60 = vpop.f32.mrf.mxu2  ;;  %v1821_v41 = vpop.f32.mrf.mxu3  ;;  %v2877_v24 = vadd.s32 %v6255_v39, %v2603_v38  ;;  %v2742_v38 = vadd.s32 %v6255_v39, %v2468_v50  ;;  %v2878_v15 = vadd.s32 %v6255_v39, %v2604_v53 }
 0x234   : > { %2394 = vst.msk [vmem:[%s6285_s17 + $0x3f0] sm:$0xf] %vm2141_vm1, %v2121_v42  ;;  %v2945_v42 = vadd.s32 %v6255_v39, %v2671_v32  ;;  %v1652_v2 = vadd.f32 %v7764_v10, %v1651_v60  ;;  %v1822_v1 = vadd.f32 %v7764_v10, %v1821_v41  ;;  %v1314_v8 = vpop.f32.mrf.mxu0  ;;  %v2810_v32 = vadd.s32 %v6255_v39, %v2536_v58 }
 0x235   : > { %2191 = vst.msk [vmem:[%s6285_s17 + $0xc4] sm:$0xf] %vm2141_vm1, %v1918_v55  ;;  %v1484_v55 = vpop.f32.mrf.mxu1  ;;  %vm3149_vm8 = vcmp.lt.s32.totalorder %v2877_v24, 8200  ;;  %vm3014_vm10 = vcmp.lt.s32.totalorder %v2742_v38, 8200  ;;  %v2470_v24 = vadd.s32 424, %v6251_v37  ;;  %vm3150_vm12 = vcmp.lt.s32.totalorder %v2878_v15, 8200 }
 0x236   : > { %2259 = vst.msk [vmem:[%s6285_s17 + $0x1d4] sm:$0xf] %vm2141_vm1, %v1986_v62  ;;  %v1315_v62 = vadd.f32 %v7764_v10, %v1314_v8  ;;  %v1485_v61 = vadd.f32 %v7764_v10, %v1484_v55  ;;  %v2054_v4 = vpack.c.bf16 %v1652_v2, %v1652_v2  ;;  %v8195_v41 = vsel %vm3148_vm4, %v1652_v2, 0.0 }
 0x237   : > { %10597 = vst [vmem:[#allocation174_spill] sm:$0xff] %v8195_v41  ;;  %v2122_v60 = vpack.c.bf16 %v1822_v1, %v1822_v1  ;;  %v8198_v63 = vsel %vm3216_vm5, %v1822_v1, 0.0  ;;  %5694 = vmatmul.msk.bf16.gmra.mxu0 %vm771_vm0, %v632_v0  ;;  %5728 = vmatmul.msk.bf16.gmra.mxu1 %vm771_vm0, %v666_v30  ;;  %v2469_v2 = vadd.s32 416, %v6251_v37  ;;  %vm3217_vm9 = vcmp.lt.s32.totalorder %v2945_v42, 8200 }
 0x238   : > { %10598 = vst [vmem:[#allocation175_spill] sm:$0xff] %v8198_v63  ;;  %v1919_v7 = vpack.c.bf16 %v1315_v62, %v1315_v62  ;;  %v8201_v8 = vsel %vm3013_vm6, %v1315_v62, 0.0  ;;  %v1987_v51 = vpack.c.bf16 %v1485_v61, %v1485_v61  ;;  %v8204_v57 = vsel %vm3081_vm7, %v1485_v61, 0.0  ;;  %5762 = vmatmul.msk.bf16.gmra.mxu2 %vm771_vm0, %v700_v34  ;;  %5796 = vmatmul.msk.bf16.gmra.mxu3 %vm771_vm0, %v734_v12 }
 0x239   : > { %10599 = vst [vmem:[#allocation176_spill] sm:$0xff] %v8204_v57  ;;  %vm3082_vm11 = vcmp.lt.s32.totalorder %v2810_v32, 8200  ;;  %v2946_v1 = vadd.s32 %v6255_v39, %v2672_v36  ;;  %v2605_v34 = vadd.s32 1504, %v6251_v37  ;;  %v2673_v12 = vadd.s32 2048, %v6251_v37 }
 0x23a   : > { %2327 = vst.msk [vmem:[%s6285_s17 + $0x2e4] sm:$0xf] %vm2141_vm1, %v2054_v4  ;;  %v2743_v53 = vadd.s32 %v6255_v39, %v2469_v2  ;;  %v2811_v36 = vadd.s32 %v6255_v39, %v2537_v25  ;;  %v2538_v2 = vadd.s32 968, %v6251_v37  ;;  %v2471_v15 = vadd.s32 432, %v6251_v37 }
 0x23b   : > { %2395 = vst.msk [vmem:[%s6285_s17 + $0x3f4] sm:$0xf] %vm2141_vm1, %v2122_v60  ;;  %v1654_v45 = vpop.f32.mrf.mxu2  ;;  %v1824_v3 = vpop.f32.mrf.mxu3  ;;  %vm3218_vm13 = vcmp.lt.s32.totalorder %v2946_v1, 8200  ;;  %v2879_v32 = vadd.s32 %v6255_v39, %v2605_v34  ;;  %v2947_v25 = vadd.s32 %v6255_v39, %v2673_v12 }
 0x23c   : > { %2192 = vst.msk [vmem:[%s6285_s17 + $0xc8] sm:$0xf] %vm2141_vm1, %v1919_v7  ;;  %v1655_v50 = vadd.f32 %v7764_v10, %v1654_v45  ;;  %v1825_v58 = vadd.f32 %v7764_v10, %v1824_v3  ;;  %v1316_v0 = vpop.f32.mrf.mxu0  ;;  %vm3015_vm14 = vcmp.lt.s32.totalorder %v2743_v53, 8200  ;;  %vm3083_vm15 = vcmp.lt.s32.totalorder %v2811_v36, 8200 }
 0x23d   : > { %2260 = vst.msk [vmem:[%s6285_s17 + $0x1d8] sm:$0xf] %vm2141_vm1, %v1987_v51  ;;  %v1486_v30 = vpop.f32.mrf.mxu1  ;;  %v1317_v55 = vadd.f32 %v7764_v10, %v1316_v0  ;;  %vm3151_vm2 = vcmp.lt.s32.totalorder %v2879_v32, 8200  ;;  %vm3219_vm3 = vcmp.lt.s32.totalorder %v2947_v25, 8200  ;;  %v2472_v32 = vadd.s32 440, %v6251_v37 }
 0x23e   : > { %v1487_v62 = vadd.f32 %v7764_v10, %v1486_v30  ;;  %v2055_v61 = vpack.c.bf16 %v1655_v50, %v1655_v50  ;;  %v8231_v4 = vsel %vm3149_vm8, %v1655_v50, 0.0  ;;  %v2123_v60 = vpack.c.bf16 %v1825_v58, %v1825_v58  ;;  %v8257_v50 = vld [vmem:[%s10202_s2] ss:$0 sm:$0xff] }
 0x23f   : > { %10600 = vst [vmem:[#allocation177_spill] sm:$0xff] %v8231_v4  ;;  %v8234_v7 = vsel %vm3217_vm9, %v1825_v58, 0.0  ;;  %v1920_v51 = vpack.c.bf16 %v1317_v55, %v1317_v55  ;;  %v8237_v45 = vsel %vm3014_vm10, %v1317_v55, 0.0 }
 0x240   : > { %10601 = vst [vmem:[#allocation178_spill] sm:$0xff] %v8234_v7  ;;  %v1988_v3 = vpack.c.bf16 %v1487_v62, %v1487_v62  ;;  %v8240_v10 = vsel %vm3082_vm11, %v1487_v62, 0.0  ;;  %v2606_v62 = vadd.s32 1512, %v6251_v37 }
 0x241   : > { %10602 = vst [vmem:[#allocation179_spill] sm:$0xff] %v8240_v10 }
 0x242   : > { %2328 = vst.msk [vmem:[%s6285_s17 + $0x2e8] sm:$0xf] %vm2141_vm1, %v2055_v61  ;;  %v2674_v61 = vadd.s32 2056, %v6251_v37  ;;  %v2880_v36 = vadd.s32 %v6255_v39, %v2606_v62  ;;  %v2745_v62 = vadd.s32 %v6255_v39, %v2471_v15  ;;  %v2540_v15 = vadd.s32 984, %v6251_v37 }
 0x243   : > { %2396 = vst.msk [vmem:[%s6285_s17 + $0x3f8] sm:$0xf] %vm2141_vm1, %v2123_v60  ;;  %v1656_v42 = vpop.f32.mrf.mxu2  ;;  %v1826_v38 = vpop.f32.mrf.mxu3  ;;  %v2744_v60 = vadd.s32 %v6255_v39, %v2470_v24  ;;  %v2539_v24 = vadd.s32 976, %v6251_v37 }
 0x244   : > { %2193 = vst.msk [vmem:[%s6285_s17 + $0xcc] sm:$0xf] %vm2141_vm1, %v1920_v51  ;;  %v1657_v58 = vadd.f32 %v8257_v50, %v1656_v42  ;;  %v1827_v0 = vadd.f32 %v8257_v50, %v1826_v38  ;;  %v1319_v30 = vpop.f32.mrf.mxu0  ;;  %v2812_v51 = vadd.s32 %v6255_v39, %v2538_v2  ;;  %v2948_v2 = vadd.s32 %v6255_v39, %v2674_v61 }
 0x245   : > { %2261 = vst.msk [vmem:[%s6285_s17 + $0x1dc] sm:$0xf] %vm2141_vm1, %v1988_v3  ;;  %v1489_v55 = vpop.f32.mrf.mxu1  ;;  %v1320_v34 = vadd.f32 %v8257_v50, %v1319_v30  ;;  %vm3016_vm4 = vcmp.lt.s32.totalorder %v2744_v60, 8200  ;;  %v2813_v61 = vadd.s32 %v6255_v39, %v2539_v24  ;;  %vm3152_vm6 = vcmp.lt.s32.totalorder %v2880_v36, 8200 }
 0x246   : > { %v1490_v12 = vadd.f32 %v8257_v50, %v1489_v55  ;;  %v2056_v3 = vpack.c.bf16 %v1657_v58, %v1657_v58  ;;  %v8268_v42 = vsel %vm3150_vm12, %v1657_v58, 0.0  ;;  %v2124_v38 = vpack.c.bf16 %v1827_v0, %v1827_v0 }
 0x247   : > { %10603 = vst [vmem:[#allocation180_spill] sm:$0xff] %v8268_v42  ;;  %v8271_v7 = vsel %vm3218_vm13, %v1827_v0, 0.0  ;;  %v1921_v63 = vpack.c.bf16 %v1320_v34, %v1320_v34  ;;  %v8274_v4 = vsel %vm3015_vm14, %v1320_v34, 0.0  ;;  %vm3084_vm5 = vcmp.lt.s32.totalorder %v2812_v51, 8200 }
 0x248   : > { %10604 = vst [vmem:[#allocation181_spill] sm:$0xff] %v8271_v7  ;;  %v1989_v30 = vpack.c.bf16 %v1490_v12, %v1490_v12  ;;  %v8277_v55 = vsel %vm3083_vm15, %v1490_v12, 0.0  ;;  %vm3220_vm7 = vcmp.lt.s32.totalorder %v2948_v2, 8200  ;;  %vm3017_vm8 = vcmp.lt.s32.totalorder %v2745_v62, 8200 }
 0x249   : > { %10605 = vst [vmem:[#allocation182_spill] sm:$0xff] %v8277_v55  ;;  %vm3085_vm9 = vcmp.lt.s32.totalorder %v2813_v61, 8200  ;;  %v2473_v36 = vadd.s32 448, %v6251_v37 }
 0x24a   : > { %2329 = vst.msk [vmem:[%s6285_s17 + $0x2ec] sm:$0xf] %vm2141_vm1, %v2056_v3  ;;  %v2675_v3 = vadd.s32 2064, %v6251_v37 }
 0x24b   : > { %2397 = vst.msk [vmem:[%s6285_s17 + $0x3fc] sm:$0xf] %vm2141_vm1, %v2124_v38  ;;  %v1659_v1 = vpop.f32.mrf.mxu2  ;;  %v1829_v53 = vpop.f32.mrf.mxu3 }
 0x24c   : > { %2194 = vst.msk [vmem:[%s6285_s17 + $0xd0] sm:$0xf] %vm2141_vm1, %v1921_v63  ;;  %v1660_v58 = vadd.f32 %v8257_v50, %v1659_v1  ;;  %v1830_v0 = vadd.f32 %v8257_v50, %v1829_v53  ;;  %v1321_v34 = vpop.f32.mrf.mxu0  ;;  %v2607_v63 = vadd.s32 1520, %v6251_v37  ;;  %v2949_v24 = vadd.s32 %v6255_v39, %v2675_v3 }
 0x24d   : > { %2262 = vst.msk [vmem:[%s6285_s17 + $0x1e0] sm:$0xf] %vm2141_vm1, %v1989_v30  ;;  %v1491_v12 = vpop.f32.mrf.mxu1  ;;  %v1322_v38 = vadd.f32 %v8257_v50, %v1321_v34  ;;  %v2814_v3 = vadd.s32 %v6255_v39, %v2540_v15 }
 0x24e   : > { %v1492_v30 = vadd.f32 %v8257_v50, %v1491_v12  ;;  %v2057_v1 = vpack.c.bf16 %v1660_v58, %v1660_v58  ;;  %v8300_v53 = vsel %vm3151_vm2, %v1660_v58, 0.0  ;;  %v2125_v7 = vpack.c.bf16 %v1830_v0, %v1830_v0 }
 0x24f   : > { %10606 = vst [vmem:[#allocation183_spill] sm:$0xff] %v8300_v53  ;;  %v8303_v42 = vsel %vm3219_vm3, %v1830_v0, 0.0  ;;  %v1922_v41 = vpack.c.bf16 %v1322_v38, %v1322_v38  ;;  %v8306_v55 = vsel %vm3016_vm4, %v1322_v38, 0.0  ;;  %v2881_v51 = vadd.s32 %v6255_v39, %v2607_v63 }
 0x250   : > { %10607 = vst [vmem:[#allocation184_spill] sm:$0xff] %v8303_v42  ;;  %v1990_v34 = vpack.c.bf16 %v1492_v30, %v1492_v30  ;;  %v8309_v12 = vsel %vm3084_vm5, %v1492_v30, 0.0  ;;  %v2676_v30 = vadd.s32 2072, %v6251_v37  ;;  %v2746_v63 = vadd.s32 %v6255_v39, %v2472_v32 }
 0x251   : > { %10608 = vst [vmem:[#allocation185_spill] sm:$0xff] %v8309_v12  ;;  %v2541_v32 = vadd.s32 992, %v6251_v37  ;;  %vm3153_vm10 = vcmp.lt.s32.totalorder %v2881_v51, 8200  ;;  %vm3221_vm11 = vcmp.lt.s32.totalorder %v2949_v24, 8200  ;;  %vm3086_vm13 = vcmp.lt.s32.totalorder %v2814_v3, 8200 }
 0x252   : > { %2330 = vst.msk [vmem:[%s6285_s17 + $0x2f0] sm:$0xf] %vm2141_vm1, %v2057_v1  ;;  %vm3018_vm12 = vcmp.lt.s32.totalorder %v2746_v63, 8200  ;;  %v2950_v15 = vadd.s32 %v6255_v39, %v2676_v30  ;;  %v2474_v51 = vadd.s32 456, %v6251_v37 }
 0x253   : > { %2398 = vst.msk [vmem:[%s6285_s17 + $0x400] sm:$0xf] %vm2141_vm1, %v2125_v7  ;;  %v1661_v25 = vpop.f32.mrf.mxu2  ;;  %v1831_v60 = vpop.f32.mrf.mxu3  ;;  %v2815_v30 = vadd.s32 %v6255_v39, %v2541_v32 }
 0x254   : > { %2195 = vst.msk [vmem:[%s6285_s17 + $0xd4] sm:$0xf] %vm2141_vm1, %v1922_v41  ;;  %v1662_v7 = vadd.f32 %v8257_v50, %v1661_v25  ;;  %v1832_v58 = vadd.f32 %v8257_v50, %v1831_v60  ;;  %v1324_v0 = vpop.f32.mrf.mxu0  ;;  %v2608_v41 = vadd.s32 1528, %v6251_v37  ;;  %vm3222_vm15 = vcmp.lt.s32.totalorder %v2950_v15, 8200 }
 0x255   : > { %2263 = vst.msk [vmem:[%s6285_s17 + $0x1e4] sm:$0xf] %vm2141_vm1, %v1990_v34  ;;  %v1494_v38 = vpop.f32.mrf.mxu1  ;;  %v1325_v1 = vadd.f32 %v8257_v50, %v1324_v0  ;;  %vm3087_vm3 = vcmp.lt.s32.totalorder %v2815_v30, 8200 }
 0x256   : > { %v1495_v34 = vadd.f32 %v8257_v50, %v1494_v38  ;;  %v2058_v25 = vpack.c.bf16 %v1662_v7, %v1662_v7  ;;  %v8332_v60 = vsel %vm3152_vm6, %v1662_v7, 0.0  ;;  %v2126_v42 = vpack.c.bf16 %v1832_v58, %v1832_v58 }
 0x257   : > { %10609 = vst [vmem:[#allocation186_spill] sm:$0xff] %v8332_v60  ;;  %v8335_v53 = vsel %vm3220_vm7, %v1832_v58, 0.0  ;;  %v1923_v12 = vpack.c.bf16 %v1325_v1, %v1325_v1  ;;  %v8338_v10 = vsel %vm3017_vm8, %v1325_v1, 0.0  ;;  %v2882_v61 = vadd.s32 %v6255_v39, %v2608_v41 }
 0x258   : > { %10610 = vst [vmem:[#allocation187_spill] sm:$0xff] %v8335_v53  ;;  %v1991_v0 = vpack.c.bf16 %v1495_v34, %v1495_v34  ;;  %v8341_v38 = vsel %vm3085_vm9, %v1495_v34, 0.0  ;;  %v2677_v34 = vadd.s32 2080, %v6251_v37  ;;  %v2747_v41 = vadd.s32 %v6255_v39, %v2473_v36 }
 0x259   : > { %10611 = vst [vmem:[#allocation188_spill] sm:$0xff] %v8341_v38  ;;  %v2542_v36 = vadd.s32 1000, %v6251_v37  ;;  %vm3154_vm14 = vcmp.lt.s32.totalorder %v2882_v61, 8200  ;;  %v2475_v61 = vadd.s32 464, %v6251_v37 }
 0x25a   : > { %2331 = vst.msk [vmem:[%s6285_s17 + $0x2f4] sm:$0xf] %vm2141_vm1, %v2058_v25  ;;  %vm3019_vm2 = vcmp.lt.s32.totalorder %v2747_v41, 8200  ;;  %v2951_v32 = vadd.s32 %v6255_v39, %v2677_v34 }
 0x25b   : > { %2399 = vst.msk [vmem:[%s6285_s17 + $0x404] sm:$0xf] %vm2141_vm1, %v2126_v42  ;;  %v1664_v2 = vpop.f32.mrf.mxu2  ;;  %v1834_v62 = vpop.f32.mrf.mxu3  ;;  %v2816_v34 = vadd.s32 %v6255_v39, %v2542_v36 }
 0x25c   : > { %2196 = vst.msk [vmem:[%s6285_s17 + $0xd8] sm:$0xf] %vm2141_vm1, %v1923_v12  ;;  %v1665_v42 = vadd.f32 %v8257_v50, %v1664_v2  ;;  %v1835_v7 = vadd.f32 %v8257_v50, %v1834_v62  ;;  %v1326_v58 = vpop.f32.mrf.mxu0  ;;  %v2609_v12 = vadd.s32 1536, %v6251_v37  ;;  %vm3223_vm5 = vcmp.lt.s32.totalorder %v2951_v32, 8200 }
 0x25d   : > { %2264 = vst.msk [vmem:[%s6285_s17 + $0x1e8] sm:$0xf] %vm2141_vm1, %v1991_v0  ;;  %v1496_v1 = vpop.f32.mrf.mxu1  ;;  %v1327_v25 = vadd.f32 %v8257_v50, %v1326_v58  ;;  %vm3088_vm7 = vcmp.lt.s32.totalorder %v2816_v34, 8200 }
 0x25e   : > { %v1497_v0 = vadd.f32 %v8257_v50, %v1496_v1  ;;  %v2059_v2 = vpack.c.bf16 %v1665_v42, %v1665_v42  ;;  %v8364_v62 = vsel %vm3153_vm10, %v1665_v42, 0.0  ;;  %v2127_v53 = vpack.c.bf16 %v1835_v7, %v1835_v7 }
 0x25f   : > { %10612 = vst [vmem:[#allocation189_spill] sm:$0xff] %v8364_v62  ;;  %v8367_v60 = vsel %vm3221_vm11, %v1835_v7, 0.0  ;;  %v1924_v38 = vpack.c.bf16 %v1327_v25, %v1327_v25  ;;  %v8370_v57 = vsel %vm3018_vm12, %v1327_v25, 0.0  ;;  %v2883_v3 = vadd.s32 %v6255_v39, %v2609_v12 }
 0x260   : > { %10613 = vst [vmem:[#allocation190_spill] sm:$0xff] %v8367_v60  ;;  %v1992_v58 = vpack.c.bf16 %v1497_v0, %v1497_v0  ;;  %v8373_v1 = vsel %vm3086_vm13, %v1497_v0, 0.0  ;;  %v2678_v0 = vadd.s32 2088, %v6251_v37  ;;  %v2748_v12 = vadd.s32 %v6255_v39, %v2474_v51 }
 0x261   : > { %10614 = vst [vmem:[#allocation191_spill] sm:$0xff] %v8370_v57  ;;  %v2543_v51 = vadd.s32 1008, %v6251_v37  ;;  %vm3155_vm4 = vcmp.lt.s32.totalorder %v2883_v3, 8200  ;;  %v2476_v3 = vadd.s32 472, %v6251_v37 }
 0x262   : > { %10615 = vst [vmem:[#allocation192_spill] sm:$0xff] %v8373_v1  ;;  %vm3020_vm6 = vcmp.lt.s32.totalorder %v2748_v12, 8200  ;;  %v2952_v36 = vadd.s32 %v6255_v39, %v2678_v0 }
 0x263   : > { %2332 = vst.msk [vmem:[%s6285_s17 + $0x2f8] sm:$0xf] %vm2141_vm1, %v2059_v2  ;;  %v1666_v24 = vpop.f32.mrf.mxu2  ;;  %v1836_v63 = vpop.f32.mrf.mxu3  ;;  %v2817_v0 = vadd.s32 %v6255_v39, %v2543_v51 }
 0x264   : > { %2400 = vst.msk [vmem:[%s6285_s17 + $0x408] sm:$0xf] %vm2141_vm1, %v2127_v53  ;;  %v1667_v53 = vadd.f32 %v8257_v50, %v1666_v24  ;;  %v1837_v42 = vadd.f32 %v8257_v50, %v1836_v63  ;;  %v1329_v7 = vpop.f32.mrf.mxu0  ;;  %vm3224_vm9 = vcmp.lt.s32.totalorder %v2952_v36, 8200 }
 0x265   : > { %2197 = vst.msk [vmem:[%s6285_s17 + $0xdc] sm:$0xf] %vm2141_vm1, %v1924_v38  ;;  %v1499_v25 = vpop.f32.mrf.mxu1  ;;  %v2610_v38 = vadd.s32 1544, %v6251_v37  ;;  %v1330_v2 = vadd.f32 %v8257_v50, %v1329_v7  ;;  %vm3089_vm11 = vcmp.lt.s32.totalorder %v2817_v0, 8200 }
 0x266   : > { %2265 = vst.msk [vmem:[%s6285_s17 + $0x1ec] sm:$0xf] %vm2141_vm1, %v1992_v58  ;;  %v1500_v58 = vadd.f32 %v8257_v50, %v1499_v25  ;;  %v2060_v24 = vpack.c.bf16 %v1667_v53, %v1667_v53  ;;  %v8396_v63 = vsel %vm3154_vm14, %v1667_v53, 0.0  ;;  %v2128_v60 = vpack.c.bf16 %v1837_v42, %v1837_v42 }
 0x267   : > { %10616 = vst [vmem:[#allocation193_spill] sm:$0xff] %v8396_v63  ;;  %v8399_v62 = vsel %vm3222_vm15, %v1837_v42, 0.0  ;;  %v1925_v1 = vpack.c.bf16 %v1330_v2, %v1330_v2  ;;  %v8402_v57 = vsel %vm3019_vm2, %v1330_v2, 0.0  ;;  %v2884_v30 = vadd.s32 %v6255_v39, %v2610_v38 }
 0x268   : > { %10617 = vst [vmem:[#allocation194_spill] sm:$0xff] %v8399_v62  ;;  %v1993_v7 = vpack.c.bf16 %v1500_v58, %v1500_v58  ;;  %v8405_v25 = vsel %vm3087_vm3, %v1500_v58, 0.0  ;;  %v2679_v58 = vadd.s32 2096, %v6251_v37  ;;  %v2749_v38 = vadd.s32 %v6255_v39, %v2475_v61 }
 0x269   : > { %10618 = vst [vmem:[#allocation195_spill] sm:$0xff] %v8402_v57  ;;  %v2544_v61 = vadd.s32 1016, %v6251_v37  ;;  %vm3156_vm8 = vcmp.lt.s32.totalorder %v2884_v30, 8200  ;;  %v2477_v30 = vadd.s32 480, %v6251_v37 }
 0x26a   : > { %10619 = vst [vmem:[#allocation196_spill] sm:$0xff] %v8405_v25  ;;  %vm3021_vm10 = vcmp.lt.s32.totalorder %v2749_v38, 8200  ;;  %v2953_v51 = vadd.s32 %v6255_v39, %v2679_v58 }
 0x26b   : > { %2333 = vst.msk [vmem:[%s6285_s17 + $0x2fc] sm:$0xf] %vm2141_vm1, %v2060_v24  ;;  %v1669_v15 = vpop.f32.mrf.mxu2  ;;  %v1839_v41 = vpop.f32.mrf.mxu3  ;;  %v2818_v58 = vadd.s32 %v6255_v39, %v2544_v61 }
 0x26c   : > { %2401 = vst.msk [vmem:[%s6285_s17 + $0x40c] sm:$0xf] %vm2141_vm1, %v2128_v60  ;;  %v1670_v60 = vadd.f32 %v8257_v50, %v1669_v15  ;;  %v1840_v53 = vadd.f32 %v8257_v50, %v1839_v41  ;;  %v1331_v42 = vpop.f32.mrf.mxu0  ;;  %vm3225_vm13 = vcmp.lt.s32.totalorder %v2953_v51, 8200 }
 0x26d   : > { %2198 = vst.msk [vmem:[%s6285_s17 + $0xe0] sm:$0xf] %vm2141_vm1, %v1925_v1  ;;  %v1501_v2 = vpop.f32.mrf.mxu1  ;;  %v2611_v1 = vadd.s32 1552, %v6251_v37  ;;  %v1332_v24 = vadd.f32 %v8257_v50, %v1331_v42  ;;  %vm3090_vm15 = vcmp.lt.s32.totalorder %v2818_v58, 8200 }
 0x26e   : > { %2266 = vst.msk [vmem:[%s6285_s17 + $0x1f0] sm:$0xf] %vm2141_vm1, %v1993_v7  ;;  %v1502_v7 = vadd.f32 %v8257_v50, %v1501_v2  ;;  %v2061_v15 = vpack.c.bf16 %v1670_v60, %v1670_v60  ;;  %v8428_v41 = vsel %vm3155_vm4, %v1670_v60, 0.0  ;;  %v2129_v62 = vpack.c.bf16 %v1840_v53, %v1840_v53 }
 0x26f   : > { %10620 = vst [vmem:[#allocation197_spill] sm:$0xff] %v8428_v41  ;;  %v8431_v63 = vsel %vm3223_vm5, %v1840_v53, 0.0  ;;  %v1926_v25 = vpack.c.bf16 %v1332_v24, %v1332_v24  ;;  %v8434_v57 = vsel %vm3020_vm6, %v1332_v24, 0.0  ;;  %v2885_v34 = vadd.s32 %v6255_v39, %v2611_v1 }
 0x270   : > { %10621 = vst [vmem:[#allocation198_spill] sm:$0xff] %v8431_v63  ;;  %v1994_v42 = vpack.c.bf16 %v1502_v7, %v1502_v7  ;;  %v8437_v2 = vsel %vm3088_vm7, %v1502_v7, 0.0  ;;  %v2680_v7 = vadd.s32 2104, %v6251_v37  ;;  %v2750_v1 = vadd.s32 %v6255_v39, %v2476_v3 }
 0x271   : > { %10622 = vst [vmem:[#allocation199_spill] sm:$0xff] %v8434_v57  ;;  %v2545_v3 = vadd.s32 1024, %v6251_v37  ;;  %vm3157_vm12 = vcmp.lt.s32.totalorder %v2885_v34, 8200  ;;  %v2478_v34 = vadd.s32 488, %v6251_v37 }
 0x272   : > { %10623 = vst [vmem:[#allocation200_spill] sm:$0xff] %v8437_v2  ;;  %vm3022_vm14 = vcmp.lt.s32.totalorder %v2750_v1, 8200  ;;  %v2954_v61 = vadd.s32 %v6255_v39, %v2680_v7 }
 0x273   : > { %2334 = vst.msk [vmem:[%s6285_s17 + $0x300] sm:$0xf] %vm2141_vm1, %v2061_v15  ;;  %v1671_v32 = vpop.f32.mrf.mxu2  ;;  %v1841_v12 = vpop.f32.mrf.mxu3  ;;  %v2819_v7 = vadd.s32 %v6255_v39, %v2545_v3 }
 0x274   : > { %2402 = vst.msk [vmem:[%s6285_s17 + $0x410] sm:$0xf] %vm2141_vm1, %v2129_v62  ;;  %v1672_v62 = vadd.f32 %v8257_v50, %v1671_v32  ;;  %v1842_v60 = vadd.f32 %v8257_v50, %v1841_v12  ;;  %v1334_v53 = vpop.f32.mrf.mxu0  ;;  %vm3226_vm3 = vcmp.lt.s32.totalorder %v2954_v61, 8200 }
 0x275   : > { %2199 = vst.msk [vmem:[%s6285_s17 + $0xe4] sm:$0xf] %vm2141_vm1, %v1926_v25  ;;  %v1504_v24 = vpop.f32.mrf.mxu1  ;;  %v2612_v25 = vadd.s32 1560, %v6251_v37  ;;  %v1335_v15 = vadd.f32 %v8257_v50, %v1334_v53  ;;  %vm3091_vm5 = vcmp.lt.s32.totalorder %v2819_v7, 8200 }
 0x276   : > { %2267 = vst.msk [vmem:[%s6285_s17 + $0x1f4] sm:$0xf] %vm2141_vm1, %v1994_v42  ;;  %v1505_v42 = vadd.f32 %v8257_v50, %v1504_v24  ;;  %v2062_v32 = vpack.c.bf16 %v1672_v62, %v1672_v62  ;;  %v8460_v12 = vsel %vm3156_vm8, %v1672_v62, 0.0  ;;  %v2130_v63 = vpack.c.bf16 %v1842_v60, %v1842_v60 }
 0x277   : > { %10624 = vst [vmem:[#allocation201_spill] sm:$0xff] %v8460_v12  ;;  %v8463_v41 = vsel %vm3224_vm9, %v1842_v60, 0.0  ;;  %v1927_v2 = vpack.c.bf16 %v1335_v15, %v1335_v15  ;;  %v8466_v57 = vsel %vm3021_vm10, %v1335_v15, 0.0  ;;  %v2886_v0 = vadd.s32 %v6255_v39, %v2612_v25 }
 0x278   : > { %10625 = vst [vmem:[#allocation202_spill] sm:$0xff] %v8463_v41  ;;  %v1995_v53 = vpack.c.bf16 %v1505_v42, %v1505_v42  ;;  %v8469_v24 = vsel %vm3089_vm11, %v1505_v42, 0.0  ;;  %v2681_v42 = vadd.s32 2112, %v6251_v37  ;;  %v2751_v25 = vadd.s32 %v6255_v39, %v2477_v30 }
 0x279   : > { %10626 = vst [vmem:[#allocation203_spill] sm:$0xff] %v8466_v57  ;;  %v2546_v30 = vadd.s32 1032, %v6251_v37  ;;  %vm3158_vm2 = vcmp.lt.s32.totalorder %v2886_v0, 8200  ;;  %v2479_v0 = vadd.s32 496, %v6251_v37 }
 0x27a   : > { %10627 = vst [vmem:[#allocation204_spill] sm:$0xff] %v8469_v24  ;;  %vm3023_vm4 = vcmp.lt.s32.totalorder %v2751_v25, 8200  ;;  %v2955_v3 = vadd.s32 %v6255_v39, %v2681_v42 }
 0x27b   : > { %2335 = vst.msk [vmem:[%s6285_s17 + $0x304] sm:$0xf] %vm2141_vm1, %v2062_v32  ;;  %v1674_v36 = vpop.f32.mrf.mxu2  ;;  %v1844_v38 = vpop.f32.mrf.mxu3  ;;  %v2820_v42 = vadd.s32 %v6255_v39, %v2546_v30 }
 0x27c   : > { %2403 = vst.msk [vmem:[%s6285_s17 + $0x414] sm:$0xf] %vm2141_vm1, %v2130_v63  ;;  %v1675_v63 = vadd.f32 %v8257_v50, %v1674_v36  ;;  %v1845_v62 = vadd.f32 %v8257_v50, %v1844_v38  ;;  %v1336_v60 = vpop.f32.mrf.mxu0  ;;  %vm3227_vm7 = vcmp.lt.s32.totalorder %v2955_v3, 8200 }
 0x27d   : > { %2200 = vst.msk [vmem:[%s6285_s17 + $0xe8] sm:$0xf] %vm2141_vm1, %v1927_v2  ;;  %v1506_v15 = vpop.f32.mrf.mxu1  ;;  %v2613_v2 = vadd.s32 1568, %v6251_v37  ;;  %v1337_v32 = vadd.f32 %v8257_v50, %v1336_v60  ;;  %vm3092_vm9 = vcmp.lt.s32.totalorder %v2820_v42, 8200 }
 0x27e   : > { %2268 = vst.msk [vmem:[%s6285_s17 + $0x1f8] sm:$0xf] %vm2141_vm1, %v1995_v53  ;;  %v1507_v53 = vadd.f32 %v8257_v50, %v1506_v15  ;;  %v2063_v36 = vpack.c.bf16 %v1675_v63, %v1675_v63  ;;  %v8492_v38 = vsel %vm3157_vm12, %v1675_v63, 0.0  ;;  %v2131_v41 = vpack.c.bf16 %v1845_v62, %v1845_v62 }
 0x27f   : > { %10628 = vst [vmem:[#allocation205_spill] sm:$0xff] %v8492_v38  ;;  %v8495_v12 = vsel %vm3225_vm13, %v1845_v62, 0.0  ;;  %v1928_v24 = vpack.c.bf16 %v1337_v32, %v1337_v32  ;;  %v8498_v57 = vsel %vm3022_vm14, %v1337_v32, 0.0  ;;  %v2887_v58 = vadd.s32 %v6255_v39, %v2613_v2 }
 0x280   : > { %10629 = vst [vmem:[#allocation206_spill] sm:$0xff] %v8495_v12  ;;  %v1996_v60 = vpack.c.bf16 %v1507_v53, %v1507_v53  ;;  %v8501_v15 = vsel %vm3090_vm15, %v1507_v53, 0.0  ;;  %v2682_v53 = vadd.s32 2120, %v6251_v37  ;;  %v2752_v2 = vadd.s32 %v6255_v39, %v2478_v34 }
 0x281   : > { %10630 = vst [vmem:[#allocation207_spill] sm:$0xff] %v8498_v57  ;;  %v2547_v34 = vadd.s32 1040, %v6251_v37  ;;  %vm3159_vm6 = vcmp.lt.s32.totalorder %v2887_v58, 8200  ;;  %v2480_v58 = vadd.s32 504, %v6251_v37 }
 0x282   : > { %10631 = vst [vmem:[#allocation208_spill] sm:$0xff] %v8501_v15  ;;  %vm3024_vm8 = vcmp.lt.s32.totalorder %v2752_v2, 8200  ;;  %v2956_v30 = vadd.s32 %v6255_v39, %v2682_v53 }
 0x283   : > { %2336 = vst.msk [vmem:[%s6285_s17 + $0x308] sm:$0xf] %vm2141_vm1, %v2063_v36  ;;  %v1676_v51 = vpop.f32.mrf.mxu2  ;;  %v1846_v1 = vpop.f32.mrf.mxu3  ;;  %v2821_v53 = vadd.s32 %v6255_v39, %v2547_v34 }
 0x284   : > { %2404 = vst.msk [vmem:[%s6285_s17 + $0x418] sm:$0xf] %vm2141_vm1, %v2131_v41  ;;  %v1677_v41 = vadd.f32 %v8257_v50, %v1676_v51  ;;  %v1847_v63 = vadd.f32 %v8257_v50, %v1846_v1  ;;  %v1339_v62 = vpop.f32.mrf.mxu0  ;;  %vm3228_vm11 = vcmp.lt.s32.totalorder %v2956_v30, 8200 }
 0x285   : > { %2201 = vst.msk [vmem:[%s6285_s17 + $0xec] sm:$0xf] %vm2141_vm1, %v1928_v24  ;;  %v1509_v32 = vpop.f32.mrf.mxu1  ;;  %v2614_v24 = vadd.s32 1576, %v6251_v37  ;;  %v1340_v36 = vadd.f32 %v8257_v50, %v1339_v62  ;;  %vm3093_vm13 = vcmp.lt.s32.totalorder %v2821_v53, 8200 }
 0x286   : > { %2269 = vst.msk [vmem:[%s6285_s17 + $0x1fc] sm:$0xf] %vm2141_vm1, %v1996_v60  ;;  %v1510_v60 = vadd.f32 %v8257_v50, %v1509_v32  ;;  %v2064_v51 = vpack.c.bf16 %v1677_v41, %v1677_v41  ;;  %v8524_v1 = vsel %vm3158_vm2, %v1677_v41, 0.0  ;;  %v2132_v12 = vpack.c.bf16 %v1847_v63, %v1847_v63 }
 0x287   : > { %10632 = vst [vmem:[#allocation209_spill] sm:$0xff] %v8524_v1  ;;  %v8527_v38 = vsel %vm3226_vm3, %v1847_v63, 0.0  ;;  %v1929_v15 = vpack.c.bf16 %v1340_v36, %v1340_v36  ;;  %v8530_v57 = vsel %vm3023_vm4, %v1340_v36, 0.0  ;;  %v2888_v7 = vadd.s32 %v6255_v39, %v2614_v24 }
 0x288   : > { %10633 = vst [vmem:[#allocation210_spill] sm:$0xff] %v8527_v38  ;;  %v1997_v62 = vpack.c.bf16 %v1510_v60, %v1510_v60  ;;  %v8533_v32 = vsel %vm3091_vm5, %v1510_v60, 0.0  ;;  %v2683_v60 = vadd.s32 2128, %v6251_v37  ;;  %v2753_v24 = vadd.s32 %v6255_v39, %v2479_v0 }
 0x289   : > { %10634 = vst [vmem:[#allocation211_spill] sm:$0xff] %v8530_v57  ;;  %v2548_v0 = vadd.s32 1048, %v6251_v37  ;;  %vm3160_vm10 = vcmp.lt.s32.totalorder %v2888_v7, 8200  ;;  %v2481_v7 = vadd.s32 512, %v6251_v37 }
 0x28a   : > { %10635 = vst [vmem:[#allocation212_spill] sm:$0xff] %v8533_v32  ;;  %vm3025_vm12 = vcmp.lt.s32.totalorder %v2753_v24, 8200  ;;  %v2957_v34 = vadd.s32 %v6255_v39, %v2683_v60 }
 0x28b   : > { %2337 = vst.msk [vmem:[%s6285_s17 + $0x30c] sm:$0xf] %vm2141_vm1, %v2064_v51  ;;  %v1679_v61 = vpop.f32.mrf.mxu2  ;;  %v1849_v25 = vpop.f32.mrf.mxu3  ;;  %v2822_v60 = vadd.s32 %v6255_v39, %v2548_v0 }
 0x28c   : > { %2405 = vst.msk [vmem:[%s6285_s17 + $0x41c] sm:$0xf] %vm2141_vm1, %v2132_v12  ;;  %v1680_v12 = vadd.f32 %v8257_v50, %v1679_v61  ;;  %v1850_v41 = vadd.f32 %v8257_v50, %v1849_v25  ;;  %v1341_v63 = vpop.f32.mrf.mxu0  ;;  %vm3229_vm15 = vcmp.lt.s32.totalorder %v2957_v34, 8200 }
 0x28d   : > { %2202 = vst.msk [vmem:[%s6285_s17 + $0xf0] sm:$0xf] %vm2141_vm1, %v1929_v15  ;;  %v1511_v36 = vpop.f32.mrf.mxu1  ;;  %v2615_v15 = vadd.s32 1584, %v6251_v37  ;;  %v1342_v51 = vadd.f32 %v8257_v50, %v1341_v63  ;;  %vm3094_vm3 = vcmp.lt.s32.totalorder %v2822_v60, 8200 }
 0x28e   : > { %2270 = vst.msk [vmem:[%s6285_s17 + $0x200] sm:$0xf] %vm2141_vm1, %v1997_v62  ;;  %v1512_v62 = vadd.f32 %v8257_v50, %v1511_v36  ;;  %v2065_v61 = vpack.c.bf16 %v1680_v12, %v1680_v12  ;;  %v8556_v25 = vsel %vm3159_vm6, %v1680_v12, 0.0  ;;  %v2133_v38 = vpack.c.bf16 %v1850_v41, %v1850_v41 }
 0x28f   : > { %10636 = vst [vmem:[#allocation213_spill] sm:$0xff] %v8556_v25  ;;  %v8559_v1 = vsel %vm3227_vm7, %v1850_v41, 0.0  ;;  %v1930_v32 = vpack.c.bf16 %v1342_v51, %v1342_v51  ;;  %v8562_v57 = vsel %vm3024_vm8, %v1342_v51, 0.0  ;;  %v2889_v42 = vadd.s32 %v6255_v39, %v2615_v15 }
 0x290   : > { %10637 = vst [vmem:[#allocation214_spill] sm:$0xff] %v8559_v1  ;;  %v1998_v63 = vpack.c.bf16 %v1512_v62, %v1512_v62  ;;  %v8565_v36 = vsel %vm3092_vm9, %v1512_v62, 0.0  ;;  %v2684_v62 = vadd.s32 2136, %v6251_v37  ;;  %v2754_v15 = vadd.s32 %v6255_v39, %v2480_v58 }
 0x291   : > { %10638 = vst [vmem:[#allocation215_spill] sm:$0xff] %v8562_v57  ;;  %v2549_v58 = vadd.s32 1056, %v6251_v37  ;;  %vm3161_vm14 = vcmp.lt.s32.totalorder %v2889_v42, 8200 }
 0x292   : > { %10639 = vst [vmem:[#allocation216_spill] sm:$0xff] %v8565_v36  ;;  %vm3026_vm2 = vcmp.lt.s32.totalorder %v2754_v15, 8200  ;;  %v2958_v0 = vadd.s32 %v6255_v39, %v2684_v62 }
 0x293   : > { %2338 = vst.msk [vmem:[%s6285_s17 + $0x310] sm:$0xf] %vm2141_vm1, %v2065_v61  ;;  %v1681_v3 = vpop.f32.mrf.mxu2  ;;  %v1851_v2 = vpop.f32.mrf.mxu3  ;;  %v2823_v62 = vadd.s32 %v6255_v39, %v2549_v58 }
 0x294   : > { %2406 = vst.msk [vmem:[%s6285_s17 + $0x420] sm:$0xf] %vm2141_vm1, %v2133_v38  ;;  %v1682_v38 = vadd.f32 %v8257_v50, %v1681_v3  ;;  %v1852_v12 = vadd.f32 %v8257_v50, %v1851_v2  ;;  %v1344_v41 = vpop.f32.mrf.mxu0  ;;  %vm3230_vm5 = vcmp.lt.s32.totalorder %v2958_v0, 8200  ;;  %v2483_v0 = vadd.s32 528, %v6251_v37 }
 0x295   : > { %2203 = vst.msk [vmem:[%s6285_s17 + $0xf4] sm:$0xf] %vm2141_vm1, %v1930_v32  ;;  %v1514_v51 = vpop.f32.mrf.mxu1  ;;  %v2616_v32 = vadd.s32 1592, %v6251_v37  ;;  %v1345_v61 = vadd.f32 %v8257_v50, %v1344_v41  ;;  %vm3095_vm7 = vcmp.lt.s32.totalorder %v2823_v62, 8200 }
 0x296   : > { %2271 = vst.msk [vmem:[%s6285_s17 + $0x204] sm:$0xf] %vm2141_vm1, %v1998_v63  ;;  %v1515_v63 = vadd.f32 %v8257_v50, %v1514_v51  ;;  %v2066_v3 = vpack.c.bf16 %v1682_v38, %v1682_v38  ;;  %v8588_v2 = vsel %vm3160_vm10, %v1682_v38, 0.0  ;;  %v2134_v1 = vpack.c.bf16 %v1852_v12, %v1852_v12 }
 0x297   : > { %10640 = vst [vmem:[#allocation217_spill] sm:$0xff] %v8588_v2  ;;  %v8591_v25 = vsel %vm3228_vm11, %v1852_v12, 0.0  ;;  %v1931_v36 = vpack.c.bf16 %v1345_v61, %v1345_v61  ;;  %v8594_v57 = vsel %vm3025_vm12, %v1345_v61, 0.0  ;;  %v2890_v53 = vadd.s32 %v6255_v39, %v2616_v32 }
 0x298   : > { %10641 = vst [vmem:[#allocation218_spill] sm:$0xff] %v8591_v25  ;;  %v1999_v41 = vpack.c.bf16 %v1515_v63, %v1515_v63  ;;  %v8597_v51 = vsel %vm3093_vm13, %v1515_v63, 0.0  ;;  %v2685_v63 = vadd.s32 2144, %v6251_v37  ;;  %v2755_v32 = vadd.s32 %v6255_v39, %v2481_v7 }
 0x299   : > { %10642 = vst [vmem:[#allocation219_spill] sm:$0xff] %v8594_v57  ;;  %vm3162_vm4 = vcmp.lt.s32.totalorder %v2890_v53, 8200 }
 0x29a   : > { %10643 = vst [vmem:[#allocation220_spill] sm:$0xff] %v8597_v51  ;;  %vm3027_vm6 = vcmp.lt.s32.totalorder %v2755_v32, 8200  ;;  %v2959_v60 = vadd.s32 %v6255_v39, %v2685_v63  ;;  %v2686_v63 = vadd.s32 2152, %v6251_v37 }
 0x29b   : > { %2339 = vst.msk [vmem:[%s6285_s17 + $0x314] sm:$0xf] %vm2141_vm1, %v2066_v3  ;;  %v1684_v30 = vpop.f32.mrf.mxu2  ;;  %v1854_v24 = vpop.f32.mrf.mxu3 }
 0x29c   : > { %2407 = vst.msk [vmem:[%s6285_s17 + $0x424] sm:$0xf] %vm2141_vm1, %v2134_v1  ;;  %v1685_v1 = vadd.f32 %v8257_v50, %v1684_v30  ;;  %v1855_v38 = vadd.f32 %v8257_v50, %v1854_v24  ;;  %v1346_v12 = vpop.f32.mrf.mxu0  ;;  %vm3231_vm9 = vcmp.lt.s32.totalorder %v2959_v60, 8200 }
 0x29d   : > { %2204 = vst.msk [vmem:[%s6285_s17 + $0xf8] sm:$0xf] %vm2141_vm1, %v1931_v36  ;;  %v1516_v61 = vpop.f32.mrf.mxu1  ;;  %v2617_v36 = vadd.s32 1600, %v6251_v37  ;;  %v1347_v3 = vadd.f32 %v8257_v50, %v1346_v12 }
 0x29e   : > { %2272 = vst.msk [vmem:[%s6285_s17 + $0x208] sm:$0xf] %vm2141_vm1, %v1999_v41  ;;  %v1517_v41 = vadd.f32 %v8257_v50, %v1516_v61  ;;  %v2067_v30 = vpack.c.bf16 %v1685_v1, %v1685_v1  ;;  %v8620_v24 = vsel %vm3161_vm14, %v1685_v1, 0.0  ;;  %v2135_v25 = vpack.c.bf16 %v1855_v38, %v1855_v38 }
 0x29f   : > { %10644 = vst [vmem:[#allocation221_spill] sm:$0xff] %v8620_v24  ;;  %v8623_v2 = vsel %vm3229_vm15, %v1855_v38, 0.0  ;;  %v1932_v51 = vpack.c.bf16 %v1347_v3, %v1347_v3  ;;  %v8626_v57 = vsel %vm3026_vm2, %v1347_v3, 0.0  ;;  %v2891_v15 = vadd.s32 %v6255_v39, %v2617_v36 }
 0x2a0   : > { %10645 = vst [vmem:[#allocation222_spill] sm:$0xff] %v8623_v2  ;;  %v2000_v12 = vpack.c.bf16 %v1517_v41, %v1517_v41  ;;  %v8629_v61 = vsel %vm3094_vm3, %v1517_v41, 0.0  ;;  %v2550_v38 = vadd.s32 1064, %v6251_v37  ;;  %v2618_v36 = vadd.s32 1608, %v6251_v37 }
 0x2a1   : > { %10646 = vst [vmem:[#allocation223_spill] sm:$0xff] %v8629_v61  ;;  %vm3163_vm8 = vcmp.lt.s32.totalorder %v2891_v15, 8200  ;;  %v2687_v15 = vadd.s32 2160, %v6251_v37 }
 0x2a2   : > { %2340 = vst.msk [vmem:[%s6285_s17 + $0x318] sm:$0xf] %vm2141_vm1, %v2067_v30  ;;  %v2824_v53 = vadd.s32 %v6255_v39, %v2550_v38 }
 0x2a3   : > { %2408 = vst.msk [vmem:[%s6285_s17 + $0x428] sm:$0xf] %vm2141_vm1, %v2135_v25  ;;  %v1686_v42 = vpop.f32.mrf.mxu2  ;;  %v1856_v34 = vpop.f32.mrf.mxu3 }
 0x2a4   : > { %2205 = vst.msk [vmem:[%s6285_s17 + $0xfc] sm:$0xf] %vm2141_vm1, %v1932_v51  ;;  %v1687_v7 = vadd.f32 %v8257_v50, %v1686_v42  ;;  %v1857_v58 = vadd.f32 %v8257_v50, %v1856_v34  ;;  %v1349_v1 = vpop.f32.mrf.mxu0  ;;  %v2482_v51 = vadd.s32 520, %v6251_v37  ;;  %vm3096_vm11 = vcmp.lt.s32.totalorder %v2824_v53, 8200 }
 0x2a5   : > { %2273 = vst.msk [vmem:[%s6285_s17 + $0x20c] sm:$0xf] %vm2141_vm1, %v2000_v12  ;;  %v1519_v25 = vpop.f32.mrf.mxu1  ;;  %v1350_v3 = vadd.f32 %v8257_v50, %v1349_v1 }
 0x2a6   : > { %v1520_v41 = vadd.f32 %v8257_v50, %v1519_v25  ;;  %v2068_v30 = vpack.c.bf16 %v1687_v7, %v1687_v7  ;;  %v8650_v12 = vsel %vm3162_vm4, %v1687_v7, 0.0  ;;  %v2136_v42 = vpack.c.bf16 %v1857_v58, %v1857_v58 }
 0x2a7   : > { %10647 = vst [vmem:[#allocation224_spill] sm:$0xff] %v8650_v12  ;;  %v8653_v34 = vsel %vm3230_vm5, %v1857_v58, 0.0  ;;  %v1933_v2 = vpack.c.bf16 %v1350_v3, %v1350_v3  ;;  %v8656_v24 = vsel %vm3027_vm6, %v1350_v3, 0.0  ;;  %v2756_v61 = vadd.s32 %v6255_v39, %v2482_v51 }
 0x2a8   : > { %10648 = vst [vmem:[#allocation225_spill] sm:$0xff] %v8653_v34  ;;  %v2001_v1 = vpack.c.bf16 %v1520_v41, %v1520_v41  ;;  %v8659_v25 = vsel %vm3095_vm7, %v1520_v41, 0.0  ;;  %v2551_v7 = vadd.s32 1072, %v6251_v37  ;;  %v2892_v58 = vadd.s32 %v6255_v39, %v2618_v36 }
 0x2a9   : > { %10649 = vst [vmem:[#allocation226_spill] sm:$0xff] %v8659_v25  ;;  %v2960_v51 = vadd.s32 %v6255_v39, %v2686_v63  ;;  %vm3028_vm10 = vcmp.lt.s32.totalorder %v2756_v61, 8200  ;;  %v2757_v36 = vadd.s32 %v6255_v39, %v2483_v0  ;;  %v2619_v0 = vadd.s32 1616, %v6251_v37 }
 0x2aa   : > { %2341 = vst.msk [vmem:[%s6285_s17 + $0x31c] sm:$0xf] %vm2141_vm1, %v2068_v30  ;;  %v2825_v63 = vadd.s32 %v6255_v39, %v2551_v7  ;;  %vm3164_vm12 = vcmp.lt.s32.totalorder %v2892_v58, 8200 }
 0x2ab   : > { %2409 = vst.msk [vmem:[%s6285_s17 + $0x42c] sm:$0xf] %vm2141_vm1, %v2136_v42  ;;  %v1689_v32 = vpop.f32.mrf.mxu2  ;;  %v1859_v62 = vpop.f32.mrf.mxu3  ;;  %vm3232_vm13 = vcmp.lt.s32.totalorder %v2960_v51, 8200  ;;  %vm3029_vm14 = vcmp.lt.s32.totalorder %v2757_v36, 8200  ;;  %v2620_v51 = vadd.s32 1624, %v6251_v37 }
 0x2ac   : > { %2206 = vst.msk [vmem:[%s6285_s17 + $0x100] sm:$0xf] %vm2141_vm1, %v1933_v2  ;;  %v1690_v38 = vadd.f32 %v8257_v50, %v1689_v32  ;;  %v1860_v3 = vadd.f32 %v8257_v50, %v1859_v62  ;;  %v1351_v41 = vpop.f32.mrf.mxu0  ;;  %vm3097_vm15 = vcmp.lt.s32.totalorder %v2825_v63, 8200 }
 0x2ad   : > { %2274 = vst.msk [vmem:[%s6285_s17 + $0x210] sm:$0xf] %vm2141_vm1, %v2001_v1  ;;  %v1521_v30 = vpop.f32.mrf.mxu1  ;;  %v1352_v2 = vadd.f32 %v8257_v50, %v1351_v41 }
 0x2ae   : > { %v1522_v42 = vadd.f32 %v8257_v50, %v1521_v30  ;;  %v2069_v1 = vpack.c.bf16 %v1690_v38, %v1690_v38  ;;  %v8682_v32 = vsel %vm3163_vm8, %v1690_v38, 0.0  ;;  %v2137_v62 = vpack.c.bf16 %v1860_v3, %v1860_v3 }
 0x2af   : > { %10650 = vst [vmem:[#allocation227_spill] sm:$0xff] %v8682_v32  ;;  %v8685_v61 = vsel %vm3231_vm9, %v1860_v3, 0.0  ;;  %v1934_v34 = vpack.c.bf16 %v1352_v2, %v1352_v2  ;;  %v8687_v53 = vsel %vm3028_vm10, %v1352_v2, 0.0 }
 0x2b0   : > { %10651 = vst [vmem:[#allocation228_spill] sm:$0xff] %v8685_v61  ;;  %v2002_v41 = vpack.c.bf16 %v1522_v42, %v1522_v42  ;;  %v8689_v12 = vsel %vm3096_vm11, %v1522_v42, 0.0  ;;  %v2484_v42 = vadd.s32 536, %v6251_v37  ;;  %v2961_v61 = vadd.s32 %v6255_v39, %v2687_v15 }
 0x2b1   : > { %10652 = vst [vmem:[#allocation229_spill] sm:$0xff] %v8687_v53  ;;  %v2688_v15 = vadd.s32 2168, %v6251_v37 }
 0x2b2   : > { %10653 = vst [vmem:[#allocation230_spill] sm:$0xff] %v8689_v12  ;;  %vm3233_vm3 = vcmp.lt.s32.totalorder %v2961_v61, 8200 }
 0x2b3   : > { %2342 = vst.msk [vmem:[%s6285_s17 + $0x320] sm:$0xf] %vm2141_vm1, %v2069_v1  ;;  %v1691_v60 = vpop.f32.mrf.mxu2  ;;  %v1861_v7 = vpop.f32.mrf.mxu3  ;;  %v2552_v1 = vadd.s32 1080, %v6251_v37  ;;  %v2962_v61 = vadd.s32 %v6255_v39, %v2688_v15 }
 0x2b4   : > { %2410 = vst.msk [vmem:[%s6285_s17 + $0x430] sm:$0xf] %vm2141_vm1, %v2137_v62  ;;  %v1692_v38 = vadd.f32 %v8257_v50, %v1691_v60  ;;  %v1862_v3 = vadd.f32 %v8257_v50, %v1861_v7  ;;  %v1354_v30 = vpop.f32.mrf.mxu0 }
 0x2b5   : > { %2207 = vst.msk [vmem:[%s6285_s17 + $0x104] sm:$0xf] %vm2141_vm1, %v1934_v34  ;;  %v1524_v2 = vpop.f32.mrf.mxu1  ;;  %v1355_v34 = vadd.f32 %v8257_v50, %v1354_v30  ;;  %v2826_v58 = vadd.s32 %v6255_v39, %v2552_v1  ;;  %v2894_v1 = vadd.s32 %v6255_v39, %v2620_v51  ;;  %vm3234_vm7 = vcmp.lt.s32.totalorder %v2962_v61, 8200 }
 0x2b6   : > { %2275 = vst.msk [vmem:[%s6285_s17 + $0x214] sm:$0xf] %vm2141_vm1, %v2002_v41  ;;  %v1525_v62 = vadd.f32 %v8257_v50, %v1524_v2  ;;  %v2893_v41 = vadd.s32 %v6255_v39, %v2619_v0  ;;  %v2070_v60 = vpack.c.bf16 %v1692_v38, %v1692_v38  ;;  %v8710_v7 = vsel %vm3164_vm12, %v1692_v38, 0.0 }
 0x2b7   : > { %v2138_v32 = vpack.c.bf16 %v1862_v3, %v1862_v3  ;;  %v8713_v12 = vsel %vm3232_vm13, %v1862_v3, 0.0  ;;  %v1935_v25 = vpack.c.bf16 %v1355_v34, %v1355_v34  ;;  %v8716_v53 = vsel %vm3029_vm14, %v1355_v34, 0.0 }
 0x2b8   : > { %v2003_v30 = vpack.c.bf16 %v1525_v62, %v1525_v62  ;;  %v8719_v2 = vsel %vm3097_vm15, %v1525_v62, 0.0  ;;  %2343 = vst.msk [vmem:[%s6285_s17 + $0x324] sm:$0xf] %vm2141_vm1, %v2070_v60  ;;  %v2758_v0 = vadd.s32 %v6255_v39, %v2484_v42  ;;  %vm3165_vm2 = vcmp.lt.s32.totalorder %v2893_v41, 8200 }
 0x2b9   : > { %2411 = vst.msk [vmem:[%s6285_s17 + $0x434] sm:$0xf] %vm2141_vm1, %v2138_v32  ;;  %vm3098_vm5 = vcmp.lt.s32.totalorder %v2826_v58, 8200  ;;  %vm3166_vm6 = vcmp.lt.s32.totalorder %v2894_v1, 8200 }
 0x2ba   : > { %2208 = vst.msk [vmem:[%s6285_s17 + $0x108] sm:$0xf] %vm2141_vm1, %v1935_v25  ;;  %vm3030_vm4 = vcmp.lt.s32.totalorder %v2758_v0, 8200 }
 0x2bb   : > { %2276 = vst.msk [vmem:[%s6285_s17 + $0x218] sm:$0xf] %vm2141_vm1, %v2003_v30  ;;  %v1694_v36 = vpop.f32.mrf.mxu2  ;;  %v1864_v63 = vpop.f32.mrf.mxu3 }
 0x2bc   : > { %v1695_v38 = vadd.f32 %v8257_v50, %v1694_v36  ;;  %v1865_v3 = vadd.f32 %v8257_v50, %v1864_v63  ;;  %v1356_v42 = vpop.f32.mrf.mxu0 }
 0x2bd   : > { %v1526_v32 = vpop.f32.mrf.mxu1  ;;  %v1357_v37 = vadd.f32 %v8257_v50, %v1356_v42 }
 0x2be   : > { %v1527_v25 = vadd.f32 %v8257_v50, %v1526_v32  ;;  %v2071_v34 = vpack.c.bf16 %v1695_v38, %v1695_v38  ;;  %v8739_v62 = vsel %vm3165_vm2, %v1695_v38, 0.0  ;;  %v2139_v41 = vpack.c.bf16 %v1865_v3, %v1865_v3 }
 0x2bf   : > { %v8741_v60 = vsel %vm3233_vm3, %v1865_v3, 0.0  ;;  %v1936_v30 = vpack.c.bf16 %v1357_v37, %v1357_v37  ;;  %v8743_v0 = vsel %vm3030_vm4, %v1357_v37, 0.0 }
 0x2c0   : > { %v2004_v36 = vpack.c.bf16 %v1527_v25, %v1527_v25  ;;  %v8745_v58 = vsel %vm3098_vm5, %v1527_v25, 0.0  ;;  %2344 = vst.msk [vmem:[%s6285_s17 + $0x328] sm:$0xf] %vm2141_vm1, %v2071_v34 }
 0x2c1   : > { %2412 = vst.msk [vmem:[%s6285_s17 + $0x438] sm:$0xf] %vm2141_vm1, %v2139_v41 }
 0x2c2   : > { %2209 = vst.msk [vmem:[%s6285_s17 + $0x10c] sm:$0xf] %vm2141_vm1, %v1936_v30 }
 0x2c3   : > { %2277 = vst.msk [vmem:[%s6285_s17 + $0x21c] sm:$0xf] %vm2141_vm1, %v2004_v36  ;;  %v1696_v39 = vpop.f32.mrf.mxu2  ;;  %v1866_v51 = vpop.f32.mrf.mxu3 }
 0x2c4   : > { %v1697_v15 = vadd.f32 %v8257_v50, %v1696_v39  ;;  %v1867_v63 = vadd.f32 %v8257_v50, %v1866_v51 }
 0x2c5   : > { %4054 = sbr.rel (%p5798_p13) target bundleno = 717 (0x2cd), region = 36 }
 0x2c6   : > { %v2072_v38 = vpack.c.bf16 %v1697_v15, %v1697_v15  ;;  %v8757_v3 = vsel %vm3166_vm6, %v1697_v15, 0.0  ;;  %v2140_v42 = vpack.c.bf16 %v1867_v63, %v1867_v63  ;;  %v8759_v32 = vsel %vm3234_vm7, %v1867_v63, 0.0 }
 0x2c8   : > { %2345 = vst.msk [vmem:[%s6285_s17 + $0x32c] sm:$0xf] %vm2141_vm1, %v2072_v38 }
 0x2c9   : > { %2413 = vst.msk [vmem:[%s6285_s17 + $0x43c] sm:$0xf] %vm2141_vm1, %v2140_v42 }
 0x2ca   : > { %vm4055_vm8 = vcmask 516096   ;;  %v6027_v50 = vmov 0.0  }
 0x2cb   : > { %4056 = vst.msk [vmem:[%s8766_s7] sm:$0x1] %vm4055_vm8, %v6027_v50 }
 0x2cc   : > { %4057 = vst.msk [vmem:[%s8769_s8] sm:$0x1] %vm4055_vm8, %v6027_v50 }
 0x2cd PF: > { %v4059_v37 = vsel %vm771_vm0, %v6291_v6, 0.0  ;;  %v4060_v25 = vsel %vm771_vm0, %v6327_v35, 0.0  ;;  %v4062_v1 = vsel %vm771_vm0, %v6362_v5, 0.0  ;;  %v4064_v34 = vsel %vm771_vm0, %v6403_v43, 0.0  ;;  %s5467_s11 = scalar_lea.hbm %s10204_s4, %s6013_s22  ;;  %s5469_s12 = sshll.u32 %s8766_s7, 4  ;;  %s5470_s12 = int_to_ptr.vmem [resolvable:$true] %s5469_s12 }
 0x2ce   : > { %v4061_v61 = vadd.f32 %v4060_v25, %v4059_v37  ;;  %v4066_v30 = vsel %vm771_vm0, %v6438_v18, 0.0  ;;  %v4068_v39 = vsel %vm771_vm0, %v6479_v56, 0.0  ;;  %v4070_v15 = vsel %vm771_vm0, %v6514_v48, 0.0  ;;  %s5471_s13 = sshll.u32 %s5467_s11, 4  ;;  %s5447_s15 = scalar_lea.sflag [#allocation3], %s6128_s10  ;;  %s5472_s13 = int_to_ptr.hbm [resolvable:$true] %s5471_s13 }
 0x2cf   : > { %v4612_v63 = vmul.f32 %v6291_v6, %v6291_v6  ;;  %v4613_v42 = vmul.f32 %v6327_v35, %v6327_v35  ;;  %v4614_v50 = vmul.f32 %v6362_v5, %v6362_v5  ;;  %v4072_v37 = vsel %vm771_vm0, %v6555_v27, 0.0  ;;  %s5913_s26 = sshra.s32 %s5472_s13, 4  ;;  %s5919_s21 = scalar_lea.hbm %s10204_s4, 2  ;;  %s5914_s26 = int_to_ptr.hbm [resolvable:$true] %s5913_s26 }
 0x2d0   : > { %v4063_v41 = vadd.f32 %v4062_v1, %v4061_v61  ;;  %v4615_v1 = vmul.f32 %v6403_v43, %v6403_v43  ;;  %v4074_v61 = vsel %vm771_vm0, %v6590_v47, 0.0  ;;  %v4617_v43 = vmul.f32 %v6479_v56, %v6479_v56  ;;  %s5915_s27 = scalar_lea.hbm %s5914_s26, 1  ;;  %p5920_p4 = scmp.lt.s32.totalorder %s5914_s26, %s10204_s4 }
 0x2d1   : > { %v4885_v35 = vsel %vm771_vm0, %v4613_v42, 0.0  ;;  %v4887_v5 = vsel %vm771_vm0, %v4614_v50, 0.0  ;;  %v4080_v50 = vsel %vm771_vm0, %v6707_v46, 0.0  ;;  %v4619_v56 = vmul.f32 %v6555_v27, %v6555_v27  ;;  %p5916_p0 = scmp.ne.s32.totalorder %s5914_s26, %s5915_s27  ;;  %p5921_p5 = scmp.lt.s32.totalorder %s5919_s21, %s5915_s27 }
 0x2d2   : > { %v4065_v36 = vadd.f32 %v4064_v34, %v4063_v41  ;;  %v4884_v34 = vsel %vm771_vm0, %v4612_v63, 0.0  ;;  %v4616_v41 = vmul.f32 %v6438_v18, %v6438_v18  ;;  %v4618_v18 = vmul.f32 %v6514_v48, %v6514_v48 }
 0x2d3   : > { %v4620_v48 = vmul.f32 %v6590_v47, %v6590_v47  ;;  %v4621_v27 = vmul.f32 %v6631_v54, %v6631_v54  ;;  %v4622_v47 = vmul.f32 %v6666_v16, %v6666_v16  ;;  %vm4609_vm1 = vcmask 516096   ;;  %p5917_p1 = pnand %p5916_p0, %p6107_p3  ;;  %p5922_p6 = por %p5921_p5, %p5920_p4 }
 0x2d4   : > { %v4067_v51 = vadd.f32 %v4066_v30, %v4065_v36  ;;  %v4076_v30 = vsel %vm771_vm0, %v6631_v54, 0.0  ;;  %v4886_v36 = vadd.f32 %v4885_v35, %v4884_v34  ;;  %v4891_v42 = vsel %vm771_vm0, %v4616_v41, 0.0 }
 0x2d5   : > { %v4895_v41 = vsel %vm771_vm0, %v4618_v18, 0.0  ;;  %v4084_v35 = vsel %vm771_vm0, %v6788_v11, 0.0  ;;  %v4623_v54 = vmul.f32 %v6707_v46, %v6707_v46  ;;  %v4625_v46 = vmul.f32 %v6788_v11, %v6788_v11  ;;  %p5918_p2 = pneg %p5917_p1 }
 0x2d6   : > { %v4069_v38 = vadd.f32 %v4068_v39, %v4067_v51  ;;  %v4889_v51 = vsel %vm771_vm0, %v4615_v1, 0.0  ;;  %v4888_v63 = vadd.f32 %v4887_v5, %v4886_v36  ;;  %v4893_v1 = vsel %vm771_vm0, %v4617_v43, 0.0 }
 0x2d7   : > { %v4897_v36 = vsel %vm771_vm0, %v4619_v56, 0.0  ;;  %v4903_v56 = vsel %vm771_vm0, %v4622_v47, 0.0  ;;  %v4627_v11 = vmul.f32 %v6864_v19, %v6864_v19  ;;  %p5923_p7 = pnand %p5922_p6, %p5918_p2 }
 0x2d8   : > { %v4071_v25 = vadd.f32 %v4070_v15, %v4069_v38  ;;  %v4078_v15 = vsel %vm771_vm0, %v6666_v16, 0.0  ;;  %v4624_v16 = vmul.f32 %v6742_v22, %v6742_v22 }
 0x2da   : > { %v4073_v6 = vadd.f32 %v4072_v37, %v4071_v25  ;;  %v4890_v37 = vadd.f32 %v4889_v51, %v4888_v63  ;;  %v4088_v63 = vsel %vm771_vm0, %v6864_v19, 0.0  ;;  %v4629_v19 = vmul.f32 %v6940_v31, %v6940_v31 }
 0x2dc   : > { %v4075_v39 = vadd.f32 %v4074_v61, %v4073_v6  ;;  %v4082_v61 = vsel %vm771_vm0, %v6742_v22, 0.0  ;;  %v4892_v34 = vadd.f32 %v4891_v42, %v4890_v37  ;;  %v4901_v42 = vsel %vm771_vm0, %v4621_v27, 0.0 }
 0x2dd   : > { %v4626_v22 = vmul.f32 %v6823_v49, %v6823_v49 }
 0x2de   : > { %v4077_v38 = vadd.f32 %v4076_v30, %v4075_v39  ;;  %v4894_v5 = vadd.f32 %v4893_v1, %v4892_v34  ;;  %v4086_v39 = vsel %vm771_vm0, %v6823_v49, 0.0  ;;  %v4092_v1 = vsel %vm771_vm0, %v6940_v31, 0.0 }
 0x2df   : > { %v4628_v49 = vmul.f32 %v6899_v28, %v6899_v28  ;;  %v4631_v31 = vmul.f32 %v7016_v59, %v7016_v59 }
 0x2e0   : > { %v4079_v25 = vadd.f32 %v4078_v15, %v4077_v38  ;;  %v4896_v43 = vadd.f32 %v4895_v41, %v4894_v5  ;;  %v4899_v15 = vsel %vm771_vm0, %v4620_v48, 0.0  ;;  %v4094_v48 = vsel %vm771_vm0, %v6975_v26, 0.0 }
 0x2e1   : > { %v4907_v5 = vsel %vm771_vm0, %v4624_v16, 0.0  ;;  %v4104_v16 = vsel %vm771_vm0, %v7168_v13, 0.0 }
 0x2e2   : > { %v4081_v6 = vadd.f32 %v4080_v50, %v4079_v25  ;;  %v4898_v38 = vadd.f32 %v4897_v36, %v4896_v43  ;;  %v4090_v50 = vsel %vm771_vm0, %v6899_v28, 0.0  ;;  %v4098_v43 = vsel %vm771_vm0, %v7051_v21, 0.0 }
 0x2e3   : > { %v4630_v28 = vmul.f32 %v6975_v26, %v6975_v26  ;;  %v4632_v26 = vmul.f32 %v7051_v21, %v7051_v21  ;;  %v4634_v21 = vmul.f32 %v7127_v23, %v7127_v23 }
 0x2e4   : > { %v4083_v30 = vadd.f32 %v4082_v61, %v4081_v6  ;;  %v4900_v37 = vadd.f32 %v4899_v15, %v4898_v38  ;;  %v4905_v6 = vsel %vm771_vm0, %v4623_v54, 0.0  ;;  %v4911_v15 = vsel %vm771_vm0, %v4626_v22, 0.0 }
 0x2e5   : > { %v4913_v54 = vsel %vm771_vm0, %v4627_v11, 0.0  ;;  %v4923_v11 = vsel %vm771_vm0, %v4632_v26, 0.0 }
 0x2e6   : > { %v4085_v51 = vadd.f32 %v4084_v35, %v4083_v30  ;;  %v4902_v61 = vadd.f32 %v4901_v42, %v4900_v37  ;;  %v4096_v30 = vsel %vm771_vm0, %v7016_v59, 0.0  ;;  %v4102_v42 = vsel %vm771_vm0, %v7127_v23, 0.0 }
 0x2e7   : > { %v4633_v59 = vmul.f32 %v7092_v40, %v7092_v40  ;;  %v4636_v23 = vmul.f32 %v7203_v44, %v7203_v44 }
 0x2e8   : > { %v4087_v18 = vadd.f32 %v4086_v39, %v4085_v51  ;;  %v4904_v41 = vadd.f32 %v4903_v56, %v4902_v61  ;;  %v4909_v39 = vsel %vm771_vm0, %v4625_v46, 0.0  ;;  %v4917_v61 = vsel %vm771_vm0, %v4629_v19, 0.0 }
 0x2ea   : > { %v4089_v25 = vadd.f32 %v4088_v63, %v4087_v18  ;;  %v4906_v27 = vadd.f32 %v4905_v6, %v4904_v41  ;;  %v4100_v63 = vsel %vm771_vm0, %v7092_v40, 0.0  ;;  %v4108_v41 = vsel %vm771_vm0, %v7244_v17, 0.0 }
 0x2eb   : > { %v4635_v40 = vmul.f32 %v7168_v13, %v7168_v13  ;;  %v4637_v13 = vmul.f32 %v7244_v17, %v7244_v17  ;;  %v4639_v17 = vmul.f32 %v7325_v29, %v7325_v29 }
 0x2ec   : > { %v4091_v34 = vadd.f32 %v4090_v50, %v4089_v25  ;;  %v4908_v51 = vadd.f32 %v4907_v5, %v4906_v27  ;;  %v4915_v25 = vsel %vm771_vm0, %v4628_v49, 0.0  ;;  %v4921_v5 = vsel %vm771_vm0, %v4631_v31, 0.0 }
 0x2ed   : > { %v4114_v49 = vsel %vm771_vm0, %v7360_v20, 0.0  ;;  %v4933_v31 = vsel %vm771_vm0, %v4637_v13, 0.0 }
 0x2ee   : > { %v4093_v35 = vadd.f32 %v4092_v1, %v4091_v34  ;;  %v4910_v38 = vadd.f32 %v4909_v39, %v4908_v51  ;;  %v4106_v34 = vsel %vm771_vm0, %v7203_v44, 0.0  ;;  %v4112_v39 = vsel %vm771_vm0, %v7325_v29, 0.0 }
 0x2ef   : > { %v4638_v44 = vmul.f32 %v7284_v33, %v7284_v33  ;;  %v4641_v29 = vmul.f32 %v7401_v52, %v7401_v52 }
 0x2f0   : > { %v4095_v36 = vadd.f32 %v4094_v48, %v4093_v35  ;;  %v4912_v50 = vadd.f32 %v4911_v15, %v4910_v38  ;;  %v4919_v48 = vsel %vm771_vm0, %v4630_v28, 0.0  ;;  %v4927_v38 = vsel %vm771_vm0, %v4634_v21, 0.0 }
 0x2f1   : > { %v4935_v26 = vsel %vm771_vm0, %v4638_v44, 0.0 }
 0x2f2   : > { %v4097_v47 = vadd.f32 %v4096_v30, %v4095_v36  ;;  %v4914_v56 = vadd.f32 %v4913_v54, %v4912_v50  ;;  %v4110_v30 = vsel %vm771_vm0, %v7284_v33, 0.0  ;;  %v4118_v50 = vsel %vm771_vm0, %v7436_v9, 0.0 }
 0x2f3   : > { %v4640_v33 = vmul.f32 %v7360_v20, %v7360_v20  ;;  %v4642_v20 = vmul.f32 %v7436_v9, %v7436_v9 }
 0x2f4   : > { %v4099_v18 = vadd.f32 %v4098_v43, %v4097_v47  ;;  %v4916_v46 = vadd.f32 %v4915_v25, %v4914_v56  ;;  %v4925_v47 = vsel %vm771_vm0, %v4633_v59, 0.0  ;;  %v4931_v25 = vsel %vm771_vm0, %v4636_v23, 0.0 }
 0x2f5   : > { %v4937_v59 = vsel %vm771_vm0, %v4639_v17, 0.0  ;;  %v4939_v21 = vsel %vm771_vm0, %v4640_v33, 0.0  ;;  %v4943_v23 = vsel %vm771_vm0, %v4642_v20, 0.0 }
 0x2f6   : > { %v4101_v37 = vadd.f32 %v4100_v63, %v4099_v18  ;;  %v4918_v35 = vadd.f32 %v4917_v61, %v4916_v46  ;;  %v4116_v18 = vsel %vm771_vm0, %v7401_v52, 0.0  ;;  %v10654_v61 = vld [vmem:[#allocation104_spill] sm:$0xff]  ;;  %v4643_v52 = vmul.f32 %v7477_v14, %v7477_v14 }
 0x2f7   : > { %v4644_v9 = vmul.f32 %v10654_v61, %v10654_v61 }
 0x2f8   : > { %v4103_v1 = vadd.f32 %v4102_v42, %v4101_v37  ;;  %v4920_v27 = vadd.f32 %v4919_v48, %v4918_v35  ;;  %v4929_v42 = vsel %vm771_vm0, %v4635_v40, 0.0  ;;  %v10655_v48 = vld [vmem:[#allocation108_spill] sm:$0xff]  ;;  %v4941_v40 = vsel %vm771_vm0, %v4641_v29, 0.0 }
 0x2f9   : > { %v4945_v13 = vsel %vm771_vm0, %v4643_v52, 0.0 }
 0x2fa   : > { %v4105_v6 = vadd.f32 %v4104_v16, %v4103_v1  ;;  %v4922_v43 = vadd.f32 %v4921_v5, %v4920_v27  ;;  %v4120_v16 = vsel %vm771_vm0, %v7477_v14, 0.0  ;;  %v10656_v5 = vld [vmem:[#allocation112_spill] sm:$0xff]  ;;  %v4645_v14 = vmul.f32 %v10655_v48, %v10655_v48 }
 0x2fb   : > { %v4646_v44 = vmul.f32 %v10656_v5, %v10656_v5 }
 0x2fc   : > { %v4107_v22 = vadd.f32 %v4106_v34, %v4105_v6  ;;  %v4924_v15 = vadd.f32 %v4923_v11, %v4922_v43  ;;  %v4122_v34 = vsel %vm771_vm0, %v10654_v61, 0.0  ;;  %v10657_v11 = vld [vmem:[#allocation116_spill] sm:$0xff]  ;;  %v4949_v61 = vsel %vm771_vm0, %v4645_v14, 0.0 }
 0x2fe   : > { %v4109_v36 = vadd.f32 %v4108_v41, %v4107_v22  ;;  %v4926_v19 = vadd.f32 %v4925_v47, %v4924_v15  ;;  %v4124_v41 = vsel %vm771_vm0, %v10655_v48, 0.0  ;;  %v10658_v47 = vld [vmem:[#allocation120_spill] sm:$0xff]  ;;  %v4951_v48 = vsel %vm771_vm0, %v4646_v44, 0.0 }
 0x300   : > { %v4111_v51 = vadd.f32 %v4110_v30, %v4109_v36  ;;  %v4928_v37 = vadd.f32 %v4927_v38, %v4926_v19  ;;  %v4126_v30 = vsel %vm771_vm0, %v10656_v5, 0.0  ;;  %v10659_v38 = vld [vmem:[#allocation124_spill] sm:$0xff] }
 0x302   : > { %v4113_v63 = vadd.f32 %v4112_v39, %v4111_v51  ;;  %v4930_v56 = vadd.f32 %v4929_v42, %v4928_v37  ;;  %v4128_v39 = vsel %vm771_vm0, %v10657_v11, 0.0  ;;  %v10660_v42 = vld [vmem:[#allocation128_spill] sm:$0xff] }
 0x304   : > { %v4115_v54 = vadd.f32 %v4114_v49, %v4113_v63  ;;  %v4932_v46 = vadd.f32 %v4931_v25, %v4930_v56  ;;  %v4130_v49 = vsel %vm771_vm0, %v10658_v47, 0.0  ;;  %v4947_v25 = vsel %vm771_vm0, %v4644_v9, 0.0 }
 0x306   : > { %v4117_v28 = vadd.f32 %v4116_v18, %v4115_v54  ;;  %v4934_v35 = vadd.f32 %v4933_v31, %v4932_v46  ;;  %v4132_v18 = vsel %vm771_vm0, %v10659_v38, 0.0  ;;  %v4647_v31 = vmul.f32 %v10657_v11, %v10657_v11 }
 0x308   : > { %v4119_v1 = vadd.f32 %v4118_v50, %v4117_v28  ;;  %v4936_v27 = vadd.f32 %v4935_v26, %v4934_v35  ;;  %v4134_v50 = vsel %vm771_vm0, %v10660_v42, 0.0  ;;  %v4648_v26 = vmul.f32 %v10658_v47, %v10658_v47 }
 0x309   : > { %v4953_v5 = vsel %vm771_vm0, %v4647_v31, 0.0 }
 0x30a   : > { %v4121_v6 = vadd.f32 %v4120_v16, %v4119_v1  ;;  %v4938_v43 = vadd.f32 %v4937_v59, %v4936_v27  ;;  %v10661_v16 = vld [vmem:[#allocation132_spill] sm:$0xff]  ;;  %v4649_v59 = vmul.f32 %v10659_v38, %v10659_v38  ;;  %v4955_v11 = vsel %vm771_vm0, %v4648_v26, 0.0 }
 0x30b   : > { %v4136_v56 = vsel %vm771_vm0, %v10661_v16, 0.0 }
 0x30c   : > { %v4123_v22 = vadd.f32 %v4122_v34, %v4121_v6  ;;  %v4940_v15 = vadd.f32 %v4939_v21, %v4938_v43  ;;  %v10662_v34 = vld [vmem:[#allocation136_spill] sm:$0xff]  ;;  %v4650_v21 = vmul.f32 %v10660_v42, %v10660_v42  ;;  %v4957_v47 = vsel %vm771_vm0, %v4649_v59, 0.0 }
 0x30d   : > { %v4138_v46 = vsel %vm771_vm0, %v10662_v34, 0.0 }
 0x30e   : > { %v4125_v36 = vadd.f32 %v4124_v41, %v4123_v22  ;;  %v4942_v19 = vadd.f32 %v4941_v40, %v4940_v15  ;;  %v10663_v41 = vld [vmem:[#allocation140_spill] sm:$0xff]  ;;  %v4651_v40 = vmul.f32 %v10661_v16, %v10661_v16  ;;  %v4959_v38 = vsel %vm771_vm0, %v4650_v21, 0.0 }
 0x30f   : > { %v4140_v35 = vsel %vm771_vm0, %v10663_v41, 0.0 }
 0x310   : > { %v4127_v51 = vadd.f32 %v4126_v30, %v4125_v36  ;;  %v4944_v37 = vadd.f32 %v4943_v23, %v4942_v19  ;;  %v10664_v30 = vld [vmem:[#allocation144_spill] sm:$0xff]  ;;  %v4652_v23 = vmul.f32 %v10662_v34, %v10662_v34  ;;  %v4961_v42 = vsel %vm771_vm0, %v4651_v40, 0.0 }
 0x311   : > { %v4142_v27 = vsel %vm771_vm0, %v10664_v30, 0.0 }
 0x312   : > { %v4129_v63 = vadd.f32 %v4128_v39, %v4127_v51  ;;  %v4946_v1 = vadd.f32 %v4945_v13, %v4944_v37  ;;  %v10665_v39 = vld [vmem:[#allocation148_spill] sm:$0xff]  ;;  %v4653_v13 = vmul.f32 %v10663_v41, %v10663_v41  ;;  %v4963_v16 = vsel %vm771_vm0, %v4652_v23, 0.0 }
 0x313   : > { %v4144_v43 = vsel %vm771_vm0, %v10665_v39, 0.0  ;;  %v4164_v23 = vsel %vm771_vm0, %v8306_v55, 0.0 }
 0x314   : > { %v4131_v54 = vadd.f32 %v4130_v49, %v4129_v63  ;;  %v4948_v6 = vadd.f32 %v4947_v25, %v4946_v1  ;;  %v10666_v49 = vld [vmem:[#allocation152_spill] sm:$0xff]  ;;  %v4654_v25 = vmul.f32 %v10664_v30, %v10664_v30  ;;  %v4965_v34 = vsel %vm771_vm0, %v4653_v13, 0.0 }
 0x315   : > { %v4146_v15 = vsel %vm771_vm0, %v10666_v49, 0.0 }
 0x316   : > { %v4133_v28 = vadd.f32 %v4132_v18, %v4131_v54  ;;  %v4950_v22 = vadd.f32 %v4949_v61, %v4948_v6  ;;  %v10667_v18 = vld [vmem:[#allocation156_spill] sm:$0xff]  ;;  %v4655_v61 = vmul.f32 %v10665_v39, %v10665_v39  ;;  %v4967_v41 = vsel %vm771_vm0, %v4654_v25, 0.0 }
 0x317   : > { %v4148_v19 = vsel %vm771_vm0, %v10667_v18, 0.0  ;;  %v4160_v39 = vsel %vm771_vm0, %v8237_v45, 0.0 }
 0x318   : > { %v4135_v17 = vadd.f32 %v4134_v50, %v4133_v28  ;;  %v4952_v36 = vadd.f32 %v4951_v48, %v4950_v22  ;;  %v10668_v50 = vld [vmem:[#allocation160_spill] sm:$0xff]  ;;  %v4656_v48 = vmul.f32 %v10666_v49, %v10666_v49  ;;  %v4969_v30 = vsel %vm771_vm0, %v4655_v61, 0.0 }
 0x319   : > { %v4150_v37 = vsel %vm771_vm0, %v10668_v50, 0.0  ;;  %v4658_v21 = vmul.f32 %v10668_v50, %v10668_v50  ;;  %v4662_v50 = vmul.f32 %v8201_v8, %v8201_v8 }
 0x31a   : > { %v4137_v33 = vadd.f32 %v4136_v56, %v4135_v17  ;;  %v4954_v51 = vadd.f32 %v4953_v5, %v4952_v36  ;;  %v10669_v56 = vld [vmem:[#allocation164_spill] sm:$0xff]  ;;  %v4657_v5 = vmul.f32 %v10667_v18, %v10667_v18 }
 0x31b   : > { %v4152_v1 = vsel %vm771_vm0, %v10669_v56, 0.0 }
 0x31c   : > { %v4139_v29 = vadd.f32 %v4138_v46, %v4137_v33  ;;  %v4956_v63 = vadd.f32 %v4955_v11, %v4954_v51  ;;  %v10670_v46 = vld [vmem:[#allocation168_spill] sm:$0xff]  ;;  %v4971_v11 = vsel %vm771_vm0, %v4656_v48, 0.0  ;;  %v4973_v40 = vsel %vm771_vm0, %v4657_v5, 0.0 }
 0x31d   : > { %v4154_v6 = vsel %vm771_vm0, %v10670_v46, 0.0 }
 0x31e   : > { %v4141_v20 = vadd.f32 %v4140_v35, %v4139_v29  ;;  %v4958_v54 = vadd.f32 %v4957_v47, %v4956_v63  ;;  %v10671_v35 = vld [vmem:[#allocation172_spill] sm:$0xff]  ;;  %v4162_v47 = vsel %vm771_vm0, %v8274_v4, 0.0  ;;  %v4660_v63 = vmul.f32 %v10670_v46, %v10670_v46 }
 0x31f   : > { %v4156_v22 = vsel %vm771_vm0, %v10671_v35, 0.0  ;;  %v4983_v46 = vsel %vm771_vm0, %v4662_v50, 0.0 }
 0x320   : > { %v4143_v52 = vadd.f32 %v4142_v27, %v4141_v20  ;;  %v4960_v28 = vadd.f32 %v4959_v38, %v4958_v54  ;;  %v4158_v27 = vsel %vm771_vm0, %v8201_v8, 0.0  ;;  %v4664_v8 = vmul.f32 %v8274_v4, %v8274_v4 }
 0x321   : > { %v4666_v4 = vmul.f32 %v8338_v10, %v8338_v10 }
 0x322   : > { %v4145_v9 = vadd.f32 %v4144_v43, %v4143_v52  ;;  %v4962_v17 = vadd.f32 %v4961_v42, %v4960_v28  ;;  %v4659_v52 = vmul.f32 %v10669_v56, %v10669_v56  ;;  %v10672_v28 = vld [vmem:[#allocation191_spill] sm:$0xff]  ;;  %v4663_v56 = vmul.f32 %v8237_v45, %v8237_v45 }
 0x323   : > { %v4665_v45 = vmul.f32 %v8306_v55, %v8306_v55  ;;  %v4987_v5 = vsel %vm771_vm0, %v4664_v8, 0.0  ;;  %v4667_v55 = vmul.f32 %v10672_v28, %v10672_v28 }
 0x324   : > { %v4147_v14 = vadd.f32 %v4146_v15, %v4145_v9  ;;  %v4964_v33 = vadd.f32 %v4963_v16, %v4962_v17  ;;  %v4975_v9 = vsel %vm771_vm0, %v4658_v21, 0.0  ;;  %v4977_v54 = vsel %vm771_vm0, %v4659_v52, 0.0  ;;  %v10673_v17 = vld [vmem:[#allocation195_spill] sm:$0xff] }
 0x325   : > { %v4989_v21 = vsel %vm771_vm0, %v4665_v45, 0.0  ;;  %v4991_v52 = vsel %vm771_vm0, %v4666_v4, 0.0  ;;  %v10681_v4 = vld [vmem:[#allocation8_spill] sm:$0xff] }
 0x326   : > { %v4149_v44 = vadd.f32 %v4148_v19, %v4147_v14  ;;  %v4966_v29 = vadd.f32 %v4965_v34, %v4964_v33  ;;  %v4661_v19 = vmul.f32 %v10671_v35, %v10671_v35  ;;  %v4166_v14 = vsel %vm771_vm0, %v8338_v10, 0.0  ;;  %v10675_v35 = vld [vmem:[#allocation203_spill] sm:$0xff] }
 0x327   : > { %v4668_v10 = vmul.f32 %v10673_v17, %v10673_v17 }
 0x328   : > { %v4151_v31 = vadd.f32 %v4150_v37, %v4149_v44  ;;  %v4968_v36 = vadd.f32 %v4967_v41, %v4966_v29  ;;  %v4979_v37 = vsel %vm771_vm0, %v4660_v63, 0.0  ;;  %v4168_v44 = vsel %vm771_vm0, %v10672_v28, 0.0 }
 0x329   : > { %v4985_v41 = vsel %vm771_vm0, %v4663_v56, 0.0 }
 0x32a   : > { %v4153_v26 = vadd.f32 %v4152_v1, %v4151_v31  ;;  %v4970_v43 = vadd.f32 %v4969_v30, %v4968_v36  ;;  %v4981_v1 = vsel %vm771_vm0, %v4661_v19, 0.0  ;;  %v4170_v31 = vsel %vm771_vm0, %v10673_v17, 0.0  ;;  %v10676_v30 = vld [vmem:[#allocation207_spill] sm:$0xff]  ;;  %v10680_v17 = vld [vmem:[#allocation229_spill] sm:$0xff] }
 0x32c   : > { %v4155_v59 = vadd.f32 %v4154_v6, %v4153_v26  ;;  %v4972_v49 = vadd.f32 %v4971_v11, %v4970_v43  ;;  %v10674_v6 = vld [vmem:[#allocation199_spill] sm:$0xff] }
 0x32d   : > { %v4172_v33 = vsel %vm771_vm0, %v10674_v6, 0.0  ;;  %v10677_v11 = vld [vmem:[#allocation211_spill] sm:$0xff]  ;;  %v4669_v63 = vmul.f32 %v10674_v6, %v10674_v6  ;;  %v4190_v6 = vsel %vm771_vm0, %v8716_v53, 0.0 }
 0x32e   : > { %v4157_v20 = vadd.f32 %v4156_v22, %v4155_v59  ;;  %v4974_v38 = vadd.f32 %v4973_v40, %v4972_v49  ;;  %v4174_v22 = vsel %vm771_vm0, %v10675_v35, 0.0  ;;  %v10678_v40 = vld [vmem:[#allocation215_spill] sm:$0xff]  ;;  %v4672_v56 = vmul.f32 %v10677_v11, %v10677_v11 }
 0x32f   : > { %v4997_v28 = vsel %vm771_vm0, %v4669_v63, 0.0  ;;  %v4673_v8 = vmul.f32 %v10678_v40, %v10678_v40 }
 0x330   : > { %v4159_v51 = vadd.f32 %v4158_v27, %v4157_v20  ;;  %v4976_v13 = vadd.f32 %v4975_v9, %v4974_v38  ;;  %v4176_v27 = vsel %vm771_vm0, %v10676_v30, 0.0  ;;  %v4993_v9 = vsel %vm771_vm0, %v4667_v55, 0.0  ;;  %v10682_v55 = vld [vmem:[#allocation11_spill] sm:$0xff] }
 0x331   : > { %v5003_v45 = vsel %vm771_vm0, %v4672_v56, 0.0 }
 0x332   : > { %v4161_v15 = vadd.f32 %v4160_v39, %v4159_v51  ;;  %v4978_v25 = vadd.f32 %v4977_v54, %v4976_v13  ;;  %v4178_v39 = vsel %vm771_vm0, %v10677_v11, 0.0  ;;  %v4670_v54 = vmul.f32 %v10675_v35, %v10675_v35 }
 0x333   : > { %v4184_v13 = vsel %vm771_vm0, %v8626_v57, 0.0 }
 0x334   : > { %v4163_v18 = vadd.f32 %v4162_v47, %v4161_v15  ;;  %v4980_v61 = vadd.f32 %v4979_v37, %v4978_v25  ;;  %v4180_v47 = vsel %vm771_vm0, %v10678_v40, 0.0  ;;  %v4671_v37 = vmul.f32 %v10676_v30, %v10676_v30 }
 0x336   : > { %v4165_v42 = vadd.f32 %v4164_v23, %v4163_v18  ;;  %v4982_v26 = vadd.f32 %v4981_v1, %v4980_v61  ;;  %v10679_v23 = vld [vmem:[#allocation219_spill] sm:$0xff]  ;;  %v4999_v1 = vsel %vm771_vm0, %v4670_v54, 0.0 }
 0x337   : > { %v4182_v38 = vsel %vm771_vm0, %v10679_v23, 0.0 }
 0x338   : > { %v4167_v16 = vadd.f32 %v4166_v14, %v4165_v42  ;;  %v4984_v29 = vadd.f32 %v4983_v46, %v4982_v26  ;;  %v4995_v14 = vsel %vm771_vm0, %v4668_v10, 0.0  ;;  %v5001_v46 = vsel %vm771_vm0, %v4671_v37, 0.0 }
 0x33a   : > { %v4169_v34 = vadd.f32 %v4168_v44, %v4167_v16  ;;  %v4986_v36 = vadd.f32 %v4985_v41, %v4984_v29  ;;  %v4186_v44 = vsel %vm771_vm0, %v8656_v24, 0.0  ;;  %v4192_v41 = vsel %vm771_vm0, %v8743_v0, 0.0 }
 0x33b   : > { %v4675_v29 = vmul.f32 %v8626_v57, %v8626_v57  ;;  %v4677_v57 = vmul.f32 %v10680_v17, %v10680_v17 }
 0x33c   : > { %v4171_v48 = vadd.f32 %v4170_v31, %v4169_v34  ;;  %v4988_v43 = vadd.f32 %v4987_v5, %v4986_v36  ;;  %v4188_v31 = vsel %vm771_vm0, %v10680_v17, 0.0  ;;  %v4194_v5 = vsel %vm771_vm0, %v10681_v4, 0.0 }
 0x33d   : > { %v4676_v36 = vmul.f32 %v8656_v24, %v8656_v24  ;;  %v4678_v24 = vmul.f32 %v8716_v53, %v8716_v53  ;;  %v4680_v53 = vmul.f32 %v10681_v4, %v10681_v4 }
 0x33e   : > { %v4173_v59 = vadd.f32 %v4172_v33, %v4171_v48  ;;  %v4990_v49 = vadd.f32 %v4989_v21, %v4988_v43  ;;  %v4674_v48 = vmul.f32 %v10679_v23, %v10679_v23  ;;  %v4196_v21 = vsel %vm771_vm0, %v10682_v55, 0.0 }
 0x33f   : > { %v5009_v43 = vsel %vm771_vm0, %v4675_v29, 0.0  ;;  %v4679_v23 = vmul.f32 %v8743_v0, %v8743_v0  ;;  %v4681_v0 = vmul.f32 %v10682_v55, %v10682_v55  ;;  %v10690_v29 = vld [vmem:[#allocation35_spill] sm:$0xff] }
 0x340   : > { %v4175_v20 = vadd.f32 %v4174_v22, %v4173_v59  ;;  %v4992_v18 = vadd.f32 %v4991_v52, %v4990_v49  ;;  %v5005_v59 = vsel %vm771_vm0, %v4673_v8, 0.0  ;;  %v10684_v49 = vld [vmem:[#allocation17_spill] sm:$0xff] }
 0x342   : > { %v4177_v51 = vadd.f32 %v4176_v27, %v4175_v20  ;;  %v4994_v42 = vadd.f32 %v4993_v9, %v4992_v18  ;;  %v5007_v20 = vsel %vm771_vm0, %v4674_v48, 0.0  ;;  %v10685_v18 = vld [vmem:[#allocation20_spill] sm:$0xff] }
 0x344   : > { %v4179_v15 = vadd.f32 %v4178_v39, %v4177_v51  ;;  %v4996_v25 = vadd.f32 %v4995_v14, %v4994_v42  ;;  %v10683_v51 = vld [vmem:[#allocation14_spill] sm:$0xff]  ;;  %v10686_v42 = vld [vmem:[#allocation23_spill] sm:$0xff] }
 0x345   : > { %v4198_v10 = vsel %vm771_vm0, %v10683_v51, 0.0  ;;  %v4682_v17 = vmul.f32 %v10683_v51, %v10683_v51 }
 0x346   : > { %v4181_v19 = vadd.f32 %v4180_v47, %v4179_v15  ;;  %v4998_v61 = vadd.f32 %v4997_v28, %v4996_v25  ;;  %v5011_v47 = vsel %vm771_vm0, %v4676_v36, 0.0  ;;  %v4200_v15 = vsel %vm771_vm0, %v10684_v49, 0.0  ;;  %v10687_v25 = vld [vmem:[#allocation26_spill] sm:$0xff] }
 0x347   : > { %v10691_v36 = vld [vmem:[#allocation38_spill] sm:$0xff] }
 0x348   : > { %v4183_v50 = vadd.f32 %v4182_v38, %v4181_v19  ;;  %v5000_v33 = vadd.f32 %v4999_v1, %v4998_v61  ;;  %v5013_v38 = vsel %vm771_vm0, %v4677_v57, 0.0  ;;  %v4202_v19 = vsel %vm771_vm0, %v10685_v18, 0.0  ;;  %v10688_v61 = vld [vmem:[#allocation29_spill] sm:$0xff] }
 0x349   : > { %v10692_v57 = vld [vmem:[#allocation41_spill] sm:$0xff] }
 0x34a   : > { %v4185_v16 = vadd.f32 %v4184_v13, %v4183_v50  ;;  %v5002_v35 = vadd.f32 %v5001_v46, %v5000_v33  ;;  %v5015_v13 = vsel %vm771_vm0, %v4678_v24, 0.0  ;;  %v4204_v50 = vsel %vm771_vm0, %v10686_v42, 0.0  ;;  %v10693_v24 = vld [vmem:[#allocation44_spill] sm:$0xff] }
 0x34b   : > { %v5021_v33 = vsel %vm771_vm0, %v4681_v0, 0.0  ;;  %v10696_v0 = vld [vmem:[#allocation53_spill] sm:$0xff] }
 0x34c   : > { %v4187_v34 = vadd.f32 %v4186_v44, %v4185_v16  ;;  %v5004_v30 = vadd.f32 %v5003_v45, %v5002_v35  ;;  %v5017_v44 = vsel %vm771_vm0, %v4679_v23, 0.0  ;;  %v4206_v16 = vsel %vm771_vm0, %v10687_v25, 0.0  ;;  %v10694_v23 = vld [vmem:[#allocation47_spill] sm:$0xff] }
 0x34d   : > { %v4684_v35 = vmul.f32 %v10685_v18, %v10685_v18 }
 0x34e   : > { %v4189_v26 = vadd.f32 %v4188_v31, %v4187_v34  ;;  %v5006_v11 = vadd.f32 %v5005_v59, %v5004_v30  ;;  %v5019_v31 = vsel %vm771_vm0, %v4680_v53, 0.0  ;;  %v4208_v34 = vsel %vm771_vm0, %v10688_v61, 0.0  ;;  %v10695_v53 = vld [vmem:[#allocation50_spill] sm:$0xff] }
 0x34f   : > { %v4212_v59 = vsel %vm771_vm0, %v10690_v29, 0.0  ;;  %v4685_v30 = vmul.f32 %v10686_v42, %v10686_v42 }
 0x350   : > { %v4191_v22 = vadd.f32 %v4190_v6, %v4189_v26  ;;  %v5008_v52 = vadd.f32 %v5007_v20, %v5006_v11  ;;  %v4683_v6 = vmul.f32 %v10684_v49, %v10684_v49  ;;  %v10689_v26 = vld [vmem:[#allocation32_spill] sm:$0xff]  ;;  %v4214_v20 = vsel %vm771_vm0, %v10691_v36, 0.0 }
 0x351   : > { %v4210_v48 = vsel %vm771_vm0, %v10689_v26, 0.0  ;;  %v4686_v11 = vmul.f32 %v10687_v25, %v10687_v25 }
 0x352   : > { %v4193_v27 = vadd.f32 %v4192_v41, %v4191_v22  ;;  %v5010_v63 = vadd.f32 %v5009_v43, %v5008_v52  ;;  %v5023_v22 = vsel %vm771_vm0, %v4682_v17, 0.0  ;;  %v4216_v43 = vsel %vm771_vm0, %v10692_v57, 0.0  ;;  %v10697_v17 = vld [vmem:[#allocation56_spill] sm:$0xff] }
 0x353   : > { %v4687_v52 = vmul.f32 %v10688_v61, %v10688_v61 }
 0x354   : > { %v4195_v39 = vadd.f32 %v4194_v5, %v4193_v27  ;;  %v5012_v54 = vadd.f32 %v5011_v47, %v5010_v63  ;;  %v5025_v27 = vsel %vm771_vm0, %v4683_v6, 0.0  ;;  %v4218_v47 = vsel %vm771_vm0, %v10693_v24, 0.0  ;;  %v10698_v6 = vld [vmem:[#allocation59_spill] sm:$0xff] }
 0x355   : > { %v4688_v63 = vmul.f32 %v10689_v26, %v10689_v26 }
 0x356   : > { %v4197_v40 = vadd.f32 %v4196_v21, %v4195_v39  ;;  %v5014_v37 = vadd.f32 %v5013_v38, %v5012_v54  ;;  %v5027_v39 = vsel %vm771_vm0, %v4684_v35, 0.0  ;;  %v4220_v38 = vsel %vm771_vm0, %v10694_v23, 0.0  ;;  %v10699_v35 = vld [vmem:[#allocation62_spill] sm:$0xff] }
 0x357   : > { %v4689_v54 = vmul.f32 %v10690_v29, %v10690_v29 }
 0x358   : > { %v4199_v9 = vadd.f32 %v4198_v10, %v4197_v40  ;;  %v5016_v56 = vadd.f32 %v5015_v13, %v5014_v37  ;;  %v5029_v40 = vsel %vm771_vm0, %v4685_v30, 0.0  ;;  %v4222_v13 = vsel %vm771_vm0, %v10695_v53, 0.0  ;;  %v10700_v30 = vld [vmem:[#allocation65_spill] sm:$0xff] }
 0x359   : > { %v4690_v37 = vmul.f32 %v10691_v36, %v10691_v36 }
 0x35a   : > { %v4201_v14 = vadd.f32 %v4200_v15, %v4199_v9  ;;  %v5018_v8 = vadd.f32 %v5017_v44, %v5016_v56  ;;  %v5031_v9 = vsel %vm771_vm0, %v4686_v11, 0.0  ;;  %v4224_v44 = vsel %vm771_vm0, %v10696_v0, 0.0  ;;  %v10701_v11 = vld [vmem:[#allocation68_spill] sm:$0xff] }
 0x35b   : > { %v4691_v56 = vmul.f32 %v10692_v57, %v10692_v57 }
 0x35c   : > { %v4203_v28 = vadd.f32 %v4202_v19, %v4201_v14  ;;  %v5020_v45 = vadd.f32 %v5019_v31, %v5018_v8  ;;  %v5033_v14 = vsel %vm771_vm0, %v4687_v52, 0.0  ;;  %v4226_v31 = vsel %vm771_vm0, %v10697_v17, 0.0  ;;  %v10702_v52 = vld [vmem:[#allocation71_spill] sm:$0xff] }
 0x35d   : > { %v4692_v8 = vmul.f32 %v10693_v24, %v10693_v24 }
 0x35e   : > { %v4205_v1 = vadd.f32 %v4204_v50, %v4203_v28  ;;  %v5022_v4 = vadd.f32 %v5021_v33, %v5020_v45  ;;  %v5035_v28 = vsel %vm771_vm0, %v4688_v63, 0.0  ;;  %v4228_v33 = vsel %vm771_vm0, %v10698_v6, 0.0  ;;  %v10703_v63 = vld [vmem:[#allocation74_spill] sm:$0xff] }
 0x35f   : > { %v4693_v45 = vmul.f32 %v10694_v23, %v10694_v23 }
 0x360   : > { %v4207_v46 = vadd.f32 %v4206_v16, %v4205_v1  ;;  %v5024_v55 = vadd.f32 %v5023_v22, %v5022_v4  ;;  %v5037_v1 = vsel %vm771_vm0, %v4689_v54, 0.0  ;;  %v4230_v22 = vsel %vm771_vm0, %v10699_v35, 0.0  ;;  %v10704_v54 = vld [vmem:[#allocation77_spill] sm:$0xff] }
 0x361   : > { %v4694_v4 = vmul.f32 %v10695_v53, %v10695_v53 }
 0x362   : > { %v4209_v41 = vadd.f32 %v4208_v34, %v4207_v46  ;;  %v5026_v51 = vadd.f32 %v5025_v27, %v5024_v55  ;;  %v5039_v46 = vsel %vm771_vm0, %v4690_v37, 0.0  ;;  %v4232_v27 = vsel %vm771_vm0, %v10700_v30, 0.0  ;;  %v10705_v37 = vld [vmem:[#allocation80_spill] sm:$0xff] }
 0x363   : > { %v4695_v55 = vmul.f32 %v10696_v0, %v10696_v0 }
 0x364   : > { %v4211_v5 = vadd.f32 %v4210_v48, %v4209_v41  ;;  %v5028_v49 = vadd.f32 %v5027_v39, %v5026_v51  ;;  %v5041_v41 = vsel %vm771_vm0, %v4691_v56, 0.0  ;;  %v4234_v39 = vsel %vm771_vm0, %v10701_v11, 0.0  ;;  %v10706_v56 = vld [vmem:[#allocation83_spill] sm:$0xff] }
 0x365   : > { %v4696_v51 = vmul.f32 %v10697_v17, %v10697_v17 }
 0x366   : > { %v4213_v21 = vadd.f32 %v4212_v59, %v4211_v5  ;;  %v5030_v18 = vadd.f32 %v5029_v40, %v5028_v49  ;;  %v5043_v5 = vsel %vm771_vm0, %v4692_v8, 0.0  ;;  %v4236_v40 = vsel %vm771_vm0, %v10702_v52, 0.0  ;;  %v10707_v8 = vld [vmem:[#allocation86_spill] sm:$0xff] }
 0x367   : > { %v4697_v49 = vmul.f32 %v10698_v6, %v10698_v6 }
 0x368   : > { %v4215_v10 = vadd.f32 %v4214_v20, %v4213_v21  ;;  %v5032_v42 = vadd.f32 %v5031_v9, %v5030_v18  ;;  %v5045_v21 = vsel %vm771_vm0, %v4693_v45, 0.0  ;;  %v4238_v9 = vsel %vm771_vm0, %v10703_v63, 0.0  ;;  %v10708_v45 = vld [vmem:[#allocation89_spill] sm:$0xff] }
 0x369   : > { %v4698_v18 = vmul.f32 %v10699_v35, %v10699_v35 }
 0x36a   : > { %v4217_v15 = vadd.f32 %v4216_v43, %v4215_v10  ;;  %v5034_v25 = vadd.f32 %v5033_v14, %v5032_v42  ;;  %v5047_v10 = vsel %vm771_vm0, %v4694_v4, 0.0  ;;  %v4240_v14 = vsel %vm771_vm0, %v10704_v54, 0.0  ;;  %v10709_v4 = vld [vmem:[#allocation92_spill] sm:$0xff] }
 0x36b   : > { %v4699_v42 = vmul.f32 %v10700_v30, %v10700_v30 }
 0x36c   : > { %v4219_v19 = vadd.f32 %v4218_v47, %v4217_v15  ;;  %v5036_v61 = vadd.f32 %v5035_v28, %v5034_v25  ;;  %v5049_v15 = vsel %vm771_vm0, %v4695_v55, 0.0  ;;  %v4242_v28 = vsel %vm771_vm0, %v10705_v37, 0.0  ;;  %v10710_v55 = vld [vmem:[#allocation95_spill] sm:$0xff] }
 0x36d   : > { %v4700_v25 = vmul.f32 %v10701_v11, %v10701_v11 }
 0x36e   : > { %v4221_v50 = vadd.f32 %v4220_v38, %v4219_v19  ;;  %v5038_v26 = vadd.f32 %v5037_v1, %v5036_v61  ;;  %v5051_v19 = vsel %vm771_vm0, %v4696_v51, 0.0  ;;  %v4244_v1 = vsel %vm771_vm0, %v10706_v56, 0.0  ;;  %v10711_v51 = vld [vmem:[#allocation98_spill] sm:$0xff] }
 0x36f   : > { %v4701_v61 = vmul.f32 %v10702_v52, %v10702_v52 }
 0x370   : > { %v4223_v16 = vadd.f32 %v4222_v13, %v4221_v50  ;;  %v5040_v29 = vadd.f32 %v5039_v46, %v5038_v26  ;;  %v5053_v50 = vsel %vm771_vm0, %v4697_v49, 0.0  ;;  %v4246_v46 = vsel %vm771_vm0, %v10707_v8, 0.0  ;;  %v10712_v49 = vld [vmem:[#allocation101_spill] sm:$0xff] }
 0x371   : > { %v4702_v26 = vmul.f32 %v10703_v63, %v10703_v63 }
 0x372   : > { %v4225_v34 = vadd.f32 %v4224_v44, %v4223_v16  ;;  %v5042_v36 = vadd.f32 %v5041_v41, %v5040_v29  ;;  %v5055_v16 = vsel %vm771_vm0, %v4698_v18, 0.0  ;;  %v4248_v41 = vsel %vm771_vm0, %v10708_v45, 0.0  ;;  %v10713_v18 = vld [vmem:[#allocation105_spill] sm:$0xff] }
 0x373   : > { %v4703_v29 = vmul.f32 %v10704_v54, %v10704_v54 }
 0x374   : > { %v4227_v48 = vadd.f32 %v4226_v31, %v4225_v34  ;;  %v5044_v57 = vadd.f32 %v5043_v5, %v5042_v36  ;;  %v5057_v34 = vsel %vm771_vm0, %v4699_v42, 0.0  ;;  %v4250_v5 = vsel %vm771_vm0, %v10709_v4, 0.0  ;;  %v10714_v42 = vld [vmem:[#allocation109_spill] sm:$0xff] }
 0x375   : > { %v4704_v36 = vmul.f32 %v10705_v37, %v10705_v37 }
 0x376   : > { %v4229_v59 = vadd.f32 %v4228_v33, %v4227_v48  ;;  %v5046_v24 = vadd.f32 %v5045_v21, %v5044_v57  ;;  %v5059_v48 = vsel %vm771_vm0, %v4700_v25, 0.0  ;;  %v4252_v21 = vsel %vm771_vm0, %v10710_v55, 0.0  ;;  %v10715_v25 = vld [vmem:[#allocation113_spill] sm:$0xff] }
 0x377   : > { %v4705_v57 = vmul.f32 %v10706_v56, %v10706_v56 }
 0x378   : > { %v4231_v20 = vadd.f32 %v4230_v22, %v4229_v59  ;;  %v5048_v23 = vadd.f32 %v5047_v10, %v5046_v24  ;;  %v5061_v59 = vsel %vm771_vm0, %v4701_v61, 0.0  ;;  %v4254_v10 = vsel %vm771_vm0, %v10711_v51, 0.0  ;;  %v10716_v61 = vld [vmem:[#allocation117_spill] sm:$0xff] }
 0x379   : > { %v4706_v24 = vmul.f32 %v10707_v8, %v10707_v8 }
 0x37a   : > { %v4233_v43 = vadd.f32 %v4232_v27, %v4231_v20  ;;  %v5050_v53 = vadd.f32 %v5049_v15, %v5048_v23  ;;  %v5063_v20 = vsel %vm771_vm0, %v4702_v26, 0.0  ;;  %v4256_v15 = vsel %vm771_vm0, %v10712_v49, 0.0  ;;  %v10717_v26 = vld [vmem:[#allocation121_spill] sm:$0xff] }
 0x37b   : > { %v4707_v23 = vmul.f32 %v10708_v45, %v10708_v45 }
 0x37c   : > { %v4235_v47 = vadd.f32 %v4234_v39, %v4233_v43  ;;  %v5052_v0 = vadd.f32 %v5051_v19, %v5050_v53  ;;  %v5065_v43 = vsel %vm771_vm0, %v4703_v29, 0.0  ;;  %v4258_v19 = vsel %vm771_vm0, %v10713_v18, 0.0  ;;  %v10718_v29 = vld [vmem:[#allocation125_spill] sm:$0xff] }
 0x37d   : > { %v4708_v53 = vmul.f32 %v10709_v4, %v10709_v4 }
 0x37e   : > { %v4237_v38 = vadd.f32 %v4236_v40, %v4235_v47  ;;  %v5054_v17 = vadd.f32 %v5053_v50, %v5052_v0  ;;  %v5067_v47 = vsel %vm771_vm0, %v4704_v36, 0.0  ;;  %v4260_v50 = vsel %vm771_vm0, %v10714_v42, 0.0  ;;  %v10719_v36 = vld [vmem:[#allocation129_spill] sm:$0xff] }
 0x37f   : > { %v4709_v0 = vmul.f32 %v10710_v55, %v10710_v55 }
 0x380   : > { %v4239_v13 = vadd.f32 %v4238_v9, %v4237_v38  ;;  %v5056_v6 = vadd.f32 %v5055_v16, %v5054_v17  ;;  %v5069_v38 = vsel %vm771_vm0, %v4705_v57, 0.0  ;;  %v4262_v16 = vsel %vm771_vm0, %v10715_v25, 0.0  ;;  %v10720_v57 = vld [vmem:[#allocation133_spill] sm:$0xff] }
 0x381   : > { %v4710_v17 = vmul.f32 %v10711_v51, %v10711_v51 }
 0x382   : > { %v4241_v44 = vadd.f32 %v4240_v14, %v4239_v13  ;;  %v5058_v35 = vadd.f32 %v5057_v34, %v5056_v6  ;;  %v5071_v13 = vsel %vm771_vm0, %v4706_v24, 0.0  ;;  %v4264_v34 = vsel %vm771_vm0, %v10716_v61, 0.0  ;;  %v10721_v24 = vld [vmem:[#allocation137_spill] sm:$0xff] }
 0x383   : > { %v4711_v6 = vmul.f32 %v10712_v49, %v10712_v49 }
 0x384   : > { %v4243_v31 = vadd.f32 %v4242_v28, %v4241_v44  ;;  %v5060_v30 = vadd.f32 %v5059_v48, %v5058_v35  ;;  %v5073_v44 = vsel %vm771_vm0, %v4707_v23, 0.0  ;;  %v4266_v48 = vsel %vm771_vm0, %v10717_v26, 0.0  ;;  %v10722_v23 = vld [vmem:[#allocation141_spill] sm:$0xff] }
 0x385   : > { %v4712_v35 = vmul.f32 %v10713_v18, %v10713_v18 }
 0x386   : > { %v4245_v33 = vadd.f32 %v4244_v1, %v4243_v31  ;;  %v5062_v11 = vadd.f32 %v5061_v59, %v5060_v30  ;;  %v5075_v31 = vsel %vm771_vm0, %v4708_v53, 0.0  ;;  %v4268_v59 = vsel %vm771_vm0, %v10718_v29, 0.0  ;;  %v10723_v53 = vld [vmem:[#allocation145_spill] sm:$0xff] }
 0x387   : > { %v4713_v30 = vmul.f32 %v10714_v42, %v10714_v42 }
 0x388   : > { %v4247_v22 = vadd.f32 %v4246_v46, %v4245_v33  ;;  %v5064_v52 = vadd.f32 %v5063_v20, %v5062_v11  ;;  %v5077_v33 = vsel %vm771_vm0, %v4709_v0, 0.0  ;;  %v4270_v20 = vsel %vm771_vm0, %v10719_v36, 0.0  ;;  %v10724_v0 = vld [vmem:[#allocation149_spill] sm:$0xff] }
 0x389   : > { %v4714_v11 = vmul.f32 %v10715_v25, %v10715_v25 }
 0x38a   : > { %v4249_v27 = vadd.f32 %v4248_v41, %v4247_v22  ;;  %v5066_v63 = vadd.f32 %v5065_v43, %v5064_v52  ;;  %v5079_v22 = vsel %vm771_vm0, %v4710_v17, 0.0  ;;  %v4272_v43 = vsel %vm771_vm0, %v10720_v57, 0.0  ;;  %v10725_v17 = vld [vmem:[#allocation153_spill] sm:$0xff] }
 0x38b   : > { %v4715_v52 = vmul.f32 %v10716_v61, %v10716_v61 }
 0x38c   : > { %v4251_v39 = vadd.f32 %v4250_v5, %v4249_v27  ;;  %v5068_v54 = vadd.f32 %v5067_v47, %v5066_v63  ;;  %v5081_v27 = vsel %vm771_vm0, %v4711_v6, 0.0  ;;  %v4274_v47 = vsel %vm771_vm0, %v10721_v24, 0.0  ;;  %v10726_v6 = vld [vmem:[#allocation157_spill] sm:$0xff] }
 0x38d   : > { %v4716_v63 = vmul.f32 %v10717_v26, %v10717_v26 }
 0x38e   : > { %v4253_v40 = vadd.f32 %v4252_v21, %v4251_v39  ;;  %v5070_v37 = vadd.f32 %v5069_v38, %v5068_v54  ;;  %v5083_v39 = vsel %vm771_vm0, %v4712_v35, 0.0  ;;  %v4276_v38 = vsel %vm771_vm0, %v10722_v23, 0.0  ;;  %v10727_v35 = vld [vmem:[#allocation161_spill] sm:$0xff] }
 0x38f   : > { %v4717_v54 = vmul.f32 %v10718_v29, %v10718_v29 }
 0x390   : > { %v4255_v9 = vadd.f32 %v4254_v10, %v4253_v40  ;;  %v5072_v56 = vadd.f32 %v5071_v13, %v5070_v37  ;;  %v5085_v40 = vsel %vm771_vm0, %v4713_v30, 0.0  ;;  %v4278_v13 = vsel %vm771_vm0, %v10723_v53, 0.0  ;;  %v10728_v30 = vld [vmem:[#allocation165_spill] sm:$0xff] }
 0x391   : > { %v4718_v37 = vmul.f32 %v10719_v36, %v10719_v36 }
 0x392   : > { %v4257_v14 = vadd.f32 %v4256_v15, %v4255_v9  ;;  %v5074_v8 = vadd.f32 %v5073_v44, %v5072_v56  ;;  %v5087_v9 = vsel %vm771_vm0, %v4714_v11, 0.0  ;;  %v4280_v44 = vsel %vm771_vm0, %v10724_v0, 0.0  ;;  %v10729_v11 = vld [vmem:[#allocation169_spill] sm:$0xff] }
 0x393   : > { %v4719_v56 = vmul.f32 %v10720_v57, %v10720_v57 }
 0x394   : > { %v4259_v28 = vadd.f32 %v4258_v19, %v4257_v14  ;;  %v5076_v45 = vadd.f32 %v5075_v31, %v5074_v8  ;;  %v5089_v14 = vsel %vm771_vm0, %v4715_v52, 0.0  ;;  %v4282_v31 = vsel %vm771_vm0, %v10725_v17, 0.0  ;;  %v10730_v52 = vld [vmem:[#allocation173_spill] sm:$0xff] }
 0x395   : > { %v4720_v8 = vmul.f32 %v10721_v24, %v10721_v24 }
 0x396   : > { %v4261_v1 = vadd.f32 %v4260_v50, %v4259_v28  ;;  %v5078_v4 = vadd.f32 %v5077_v33, %v5076_v45  ;;  %v5091_v28 = vsel %vm771_vm0, %v4716_v63, 0.0  ;;  %v4284_v33 = vsel %vm771_vm0, %v10726_v6, 0.0  ;;  %v10731_v63 = vld [vmem:[#allocation176_spill] sm:$0xff] }
 0x397   : > { %v4721_v45 = vmul.f32 %v10722_v23, %v10722_v23 }
 0x398   : > { %v4263_v46 = vadd.f32 %v4262_v16, %v4261_v1  ;;  %v5080_v55 = vadd.f32 %v5079_v22, %v5078_v4  ;;  %v5093_v1 = vsel %vm771_vm0, %v4717_v54, 0.0  ;;  %v4286_v22 = vsel %vm771_vm0, %v10727_v35, 0.0  ;;  %v10732_v54 = vld [vmem:[#allocation179_spill] sm:$0xff] }
 0x399   : > { %v4722_v4 = vmul.f32 %v10723_v53, %v10723_v53 }
 0x39a   : > { %v4265_v41 = vadd.f32 %v4264_v34, %v4263_v46  ;;  %v5082_v51 = vadd.f32 %v5081_v27, %v5080_v55  ;;  %v5095_v46 = vsel %vm771_vm0, %v4718_v37, 0.0  ;;  %v4288_v27 = vsel %vm771_vm0, %v10728_v30, 0.0  ;;  %v10733_v37 = vld [vmem:[#allocation182_spill] sm:$0xff] }
 0x39b   : > { %v4723_v55 = vmul.f32 %v10724_v0, %v10724_v0 }
 0x39c   : > { %v4267_v5 = vadd.f32 %v4266_v48, %v4265_v41  ;;  %v5084_v49 = vadd.f32 %v5083_v39, %v5082_v51  ;;  %v5097_v41 = vsel %vm771_vm0, %v4719_v56, 0.0  ;;  %v4290_v39 = vsel %vm771_vm0, %v10729_v11, 0.0  ;;  %v10734_v56 = vld [vmem:[#allocation185_spill] sm:$0xff] }
 0x39d   : > { %v4724_v51 = vmul.f32 %v10725_v17, %v10725_v17 }
 0x39e   : > { %v4269_v21 = vadd.f32 %v4268_v59, %v4267_v5  ;;  %v5086_v18 = vadd.f32 %v5085_v40, %v5084_v49  ;;  %v5099_v5 = vsel %vm771_vm0, %v4720_v8, 0.0  ;;  %v4292_v40 = vsel %vm771_vm0, %v10730_v52, 0.0  ;;  %v10735_v8 = vld [vmem:[#allocation188_spill] sm:$0xff] }
 0x39f   : > { %v4725_v49 = vmul.f32 %v10726_v6, %v10726_v6 }
 0x3a0   : > { %v4271_v10 = vadd.f32 %v4270_v20, %v4269_v21  ;;  %v5088_v42 = vadd.f32 %v5087_v9, %v5086_v18  ;;  %v5101_v21 = vsel %vm771_vm0, %v4721_v45, 0.0  ;;  %v4294_v9 = vsel %vm771_vm0, %v10731_v63, 0.0  ;;  %v10736_v45 = vld [vmem:[#allocation192_spill] sm:$0xff] }
 0x3a1   : > { %v4726_v18 = vmul.f32 %v10727_v35, %v10727_v35 }
 0x3a2   : > { %v4273_v15 = vadd.f32 %v4272_v43, %v4271_v10  ;;  %v5090_v25 = vadd.f32 %v5089_v14, %v5088_v42  ;;  %v5103_v10 = vsel %vm771_vm0, %v4722_v4, 0.0  ;;  %v4296_v14 = vsel %vm771_vm0, %v10732_v54, 0.0  ;;  %v10737_v4 = vld [vmem:[#allocation196_spill] sm:$0xff] }
 0x3a3   : > { %v4727_v42 = vmul.f32 %v10728_v30, %v10728_v30 }
 0x3a4   : > { %v4275_v19 = vadd.f32 %v4274_v47, %v4273_v15  ;;  %v5092_v61 = vadd.f32 %v5091_v28, %v5090_v25  ;;  %v5105_v15 = vsel %vm771_vm0, %v4723_v55, 0.0  ;;  %v4298_v28 = vsel %vm771_vm0, %v10733_v37, 0.0  ;;  %v10738_v55 = vld [vmem:[#allocation200_spill] sm:$0xff] }
 0x3a5   : > { %v4728_v25 = vmul.f32 %v10729_v11, %v10729_v11 }
 0x3a6   : > { %v4277_v50 = vadd.f32 %v4276_v38, %v4275_v19  ;;  %v5094_v26 = vadd.f32 %v5093_v1, %v5092_v61  ;;  %v5107_v19 = vsel %vm771_vm0, %v4724_v51, 0.0  ;;  %v4300_v1 = vsel %vm771_vm0, %v10734_v56, 0.0  ;;  %v10739_v51 = vld [vmem:[#allocation204_spill] sm:$0xff] }
 0x3a7   : > { %v4729_v61 = vmul.f32 %v10730_v52, %v10730_v52 }
 0x3a8   : > { %v4279_v16 = vadd.f32 %v4278_v13, %v4277_v50  ;;  %v5096_v29 = vadd.f32 %v5095_v46, %v5094_v26  ;;  %v5109_v50 = vsel %vm771_vm0, %v4725_v49, 0.0  ;;  %v4302_v46 = vsel %vm771_vm0, %v10735_v8, 0.0  ;;  %v10740_v49 = vld [vmem:[#allocation208_spill] sm:$0xff] }
 0x3a9   : > { %v4730_v26 = vmul.f32 %v10731_v63, %v10731_v63 }
 0x3aa   : > { %v4281_v34 = vadd.f32 %v4280_v44, %v4279_v16  ;;  %v5098_v36 = vadd.f32 %v5097_v41, %v5096_v29  ;;  %v5111_v16 = vsel %vm771_vm0, %v4726_v18, 0.0  ;;  %v4304_v41 = vsel %vm771_vm0, %v10736_v45, 0.0  ;;  %v10741_v18 = vld [vmem:[#allocation212_spill] sm:$0xff] }
 0x3ab   : > { %v4731_v29 = vmul.f32 %v10732_v54, %v10732_v54 }
 0x3ac   : > { %v4283_v48 = vadd.f32 %v4282_v31, %v4281_v34  ;;  %v5100_v57 = vadd.f32 %v5099_v5, %v5098_v36  ;;  %v5113_v34 = vsel %vm771_vm0, %v4727_v42, 0.0  ;;  %v4306_v5 = vsel %vm771_vm0, %v10737_v4, 0.0  ;;  %v10742_v42 = vld [vmem:[#allocation216_spill] sm:$0xff] }
 0x3ad   : > { %v4732_v36 = vmul.f32 %v10733_v37, %v10733_v37 }
 0x3ae   : > { %v4285_v59 = vadd.f32 %v4284_v33, %v4283_v48  ;;  %v5102_v24 = vadd.f32 %v5101_v21, %v5100_v57  ;;  %v5115_v48 = vsel %vm771_vm0, %v4728_v25, 0.0  ;;  %v4308_v21 = vsel %vm771_vm0, %v10738_v55, 0.0  ;;  %v10743_v25 = vld [vmem:[#allocation220_spill] sm:$0xff] }
 0x3af   : > { %v4733_v57 = vmul.f32 %v10734_v56, %v10734_v56 }
 0x3b0   : > { %v4287_v20 = vadd.f32 %v4286_v22, %v4285_v59  ;;  %v5104_v23 = vadd.f32 %v5103_v10, %v5102_v24  ;;  %v5117_v59 = vsel %vm771_vm0, %v4729_v61, 0.0  ;;  %v4310_v10 = vsel %vm771_vm0, %v10739_v51, 0.0  ;;  %v10744_v61 = vld [vmem:[#allocation223_spill] sm:$0xff] }
 0x3b1   : > { %v4734_v24 = vmul.f32 %v10735_v8, %v10735_v8 }
 0x3b2   : > { %v4289_v43 = vadd.f32 %v4288_v27, %v4287_v20  ;;  %v5106_v53 = vadd.f32 %v5105_v15, %v5104_v23  ;;  %v5119_v20 = vsel %vm771_vm0, %v4730_v26, 0.0  ;;  %v4312_v15 = vsel %vm771_vm0, %v10740_v49, 0.0  ;;  %v10745_v26 = vld [vmem:[#allocation226_spill] sm:$0xff] }
 0x3b3   : > { %v4735_v23 = vmul.f32 %v10736_v45, %v10736_v45 }
 0x3b4   : > { %v4291_v47 = vadd.f32 %v4290_v39, %v4289_v43  ;;  %v5108_v0 = vadd.f32 %v5107_v19, %v5106_v53  ;;  %v5121_v43 = vsel %vm771_vm0, %v4731_v29, 0.0  ;;  %v4314_v19 = vsel %vm771_vm0, %v10741_v18, 0.0  ;;  %v10746_v29 = vld [vmem:[#allocation230_spill] sm:$0xff] }
 0x3b5   : > { %v4736_v53 = vmul.f32 %v10737_v4, %v10737_v4 }
 0x3b6   : > { %v4293_v38 = vadd.f32 %v4292_v40, %v4291_v47  ;;  %v5110_v17 = vadd.f32 %v5109_v50, %v5108_v0  ;;  %v5123_v47 = vsel %vm771_vm0, %v4732_v36, 0.0  ;;  %v4316_v50 = vsel %vm771_vm0, %v10742_v42, 0.0 }
 0x3b7   : > { %v4737_v0 = vmul.f32 %v10738_v55, %v10738_v55  ;;  %v4326_v36 = vsel %vm771_vm0, %v8719_v2, 0.0 }
 0x3b8   : > { %v4295_v13 = vadd.f32 %v4294_v9, %v4293_v38  ;;  %v5112_v6 = vadd.f32 %v5111_v16, %v5110_v17  ;;  %v5125_v38 = vsel %vm771_vm0, %v4733_v57, 0.0  ;;  %v4318_v16 = vsel %vm771_vm0, %v10743_v25, 0.0 }
 0x3b9   : > { %v4738_v17 = vmul.f32 %v10739_v51, %v10739_v51  ;;  %v4743_v51 = vmul.f32 %v10744_v61, %v10744_v61 }
 0x3ba   : > { %v4297_v44 = vadd.f32 %v4296_v14, %v4295_v13  ;;  %v5114_v35 = vadd.f32 %v5113_v34, %v5112_v6  ;;  %v5127_v13 = vsel %vm771_vm0, %v4734_v24, 0.0  ;;  %v4320_v34 = vsel %vm771_vm0, %v10744_v61, 0.0 }
 0x3bb   : > { %v4739_v6 = vmul.f32 %v10740_v49, %v10740_v49  ;;  %v4744_v49 = vmul.f32 %v10745_v26, %v10745_v26 }
 0x3bc   : > { %v4299_v31 = vadd.f32 %v4298_v28, %v4297_v44  ;;  %v5116_v30 = vadd.f32 %v5115_v48, %v5114_v35  ;;  %v5129_v44 = vsel %vm771_vm0, %v4735_v23, 0.0  ;;  %v4322_v48 = vsel %vm771_vm0, %v10745_v26, 0.0  ;;  %v10753_v26 = vld [vmem:[#allocation27_spill] sm:$0xff] }
 0x3bd   : > { %v4740_v35 = vmul.f32 %v10741_v18, %v10741_v18  ;;  %v4745_v18 = vmul.f32 %v10746_v29, %v10746_v29 }
 0x3be   : > { %v4301_v33 = vadd.f32 %v4300_v1, %v4299_v31  ;;  %v5118_v11 = vadd.f32 %v5117_v59, %v5116_v30  ;;  %v5131_v31 = vsel %vm771_vm0, %v4736_v53, 0.0  ;;  %v4324_v59 = vsel %vm771_vm0, %v10746_v29, 0.0  ;;  %v10754_v29 = vld [vmem:[#allocation30_spill] sm:$0xff] }
 0x3bf   : > { %v4741_v30 = vmul.f32 %v10742_v42, %v10742_v42  ;;  %v4746_v42 = vmul.f32 %v8719_v2, %v8719_v2 }
 0x3c0   : > { %v4303_v22 = vadd.f32 %v4302_v46, %v4301_v33  ;;  %v5120_v52 = vadd.f32 %v5119_v20, %v5118_v11  ;;  %v5133_v33 = vsel %vm771_vm0, %v4737_v0, 0.0  ;;  %v5139_v11 = vsel %vm771_vm0, %v4740_v35, 0.0 }
 0x3c1   : > { %v5151_v61 = vsel %vm771_vm0, %v4746_v42, 0.0 }
 0x3c2   : > { %v4305_v27 = vadd.f32 %v4304_v41, %v4303_v22  ;;  %v5122_v63 = vadd.f32 %v5121_v43, %v5120_v52  ;;  %v5135_v22 = vsel %vm771_vm0, %v4738_v17, 0.0  ;;  %v10747_v52 = vld [vmem:[#allocation9_spill] sm:$0xff] }
 0x3c3   : > { %v4748_v2 = vmul.f32 %v10747_v52, %v10747_v52 }
 0x3c4   : > { %v4307_v39 = vadd.f32 %v4306_v5, %v4305_v27  ;;  %v5124_v54 = vadd.f32 %v5123_v47, %v5122_v63  ;;  %v5137_v27 = vsel %vm771_vm0, %v4739_v6, 0.0  ;;  %v10748_v63 = vld [vmem:[#allocation12_spill] sm:$0xff] }
 0x3c6   : > { %v4309_v40 = vadd.f32 %v4308_v21, %v4307_v39  ;;  %v5126_v37 = vadd.f32 %v5125_v38, %v5124_v54  ;;  %v4742_v21 = vmul.f32 %v10743_v25, %v10743_v25  ;;  %v4328_v39 = vsel %vm771_vm0, %v8745_v58, 0.0  ;;  %v10749_v54 = vld [vmem:[#allocation15_spill] sm:$0xff] }
 0x3c7   : > { %v4747_v25 = vmul.f32 %v8745_v58, %v8745_v58  ;;  %v4749_v58 = vmul.f32 %v10748_v63, %v10748_v63  ;;  %v4750_v35 = vmul.f32 %v10749_v54, %v10749_v54 }
 0x3c8   : > { %v4311_v9 = vadd.f32 %v4310_v10, %v4309_v40  ;;  %v5128_v56 = vadd.f32 %v5127_v13, %v5126_v37  ;;  %v5141_v10 = vsel %vm771_vm0, %v4741_v30, 0.0  ;;  %v4330_v40 = vsel %vm771_vm0, %v10747_v52, 0.0  ;;  %v10750_v37 = vld [vmem:[#allocation18_spill] sm:$0xff] }
 0x3c9   : > { %v4751_v30 = vmul.f32 %v10750_v37, %v10750_v37 }
 0x3ca   : > { %v4313_v14 = vadd.f32 %v4312_v15, %v4311_v9  ;;  %v5130_v8 = vadd.f32 %v5129_v44, %v5128_v56  ;;  %v5143_v15 = vsel %vm771_vm0, %v4742_v21, 0.0  ;;  %v4332_v9 = vsel %vm771_vm0, %v10748_v63, 0.0  ;;  %v10751_v56 = vld [vmem:[#allocation21_spill] sm:$0xff] }
 0x3cb   : > { %v4754_v63 = vmul.f32 %v10753_v26, %v10753_v26 }
 0x3cc   : > { %v4315_v28 = vadd.f32 %v4314_v19, %v4313_v14  ;;  %v5132_v45 = vadd.f32 %v5131_v31, %v5130_v8  ;;  %v5145_v19 = vsel %vm771_vm0, %v4743_v51, 0.0  ;;  %v4334_v14 = vsel %vm771_vm0, %v10749_v54, 0.0 }
 0x3cd   : > { %v4755_v54 = vmul.f32 %v10754_v29, %v10754_v29 }
 0x3ce   : > { %v4317_v1 = vadd.f32 %v4316_v50, %v4315_v28  ;;  %v5134_v4 = vadd.f32 %v5133_v33, %v5132_v45  ;;  %v5147_v50 = vsel %vm771_vm0, %v4744_v49, 0.0  ;;  %v4336_v28 = vsel %vm771_vm0, %v10750_v37, 0.0 }
 0x3cf   : > { %v5153_v33 = vsel %vm771_vm0, %v4747_v25, 0.0 }
 0x3d0   : > { %v4319_v46 = vadd.f32 %v4318_v16, %v4317_v1  ;;  %v5136_v20 = vadd.f32 %v5135_v22, %v5134_v4  ;;  %v5149_v16 = vsel %vm771_vm0, %v4745_v18, 0.0  ;;  %v4338_v1 = vsel %vm771_vm0, %v10751_v56, 0.0 }
 0x3d1   : > { %v5155_v22 = vsel %vm771_vm0, %v4748_v2, 0.0 }
 0x3d2   : > { %v4321_v41 = vadd.f32 %v4320_v34, %v4319_v46  ;;  %v5138_v57 = vadd.f32 %v5137_v27, %v5136_v20  ;;  %v10752_v34 = vld [vmem:[#allocation24_spill] sm:$0xff]  ;;  %v5157_v27 = vsel %vm771_vm0, %v4749_v58, 0.0 }
 0x3d3   : > { %v4340_v8 = vsel %vm771_vm0, %v10752_v34, 0.0  ;;  %v4753_v52 = vmul.f32 %v10752_v34, %v10752_v34 }
 0x3d4   : > { %v4323_v5 = vadd.f32 %v4322_v48, %v4321_v41  ;;  %v5140_v24 = vadd.f32 %v5139_v11, %v5138_v57  ;;  %v4342_v48 = vsel %vm771_vm0, %v10753_v26, 0.0  ;;  %v4752_v11 = vmul.f32 %v10751_v56, %v10751_v56  ;;  %v10756_v57 = vld [vmem:[#allocation36_spill] sm:$0xff] }
 0x3d5   : > { %v4757_v56 = vmul.f32 %v10756_v57, %v10756_v57 }
 0x3d6   : > { %v4325_v55 = vadd.f32 %v4324_v59, %v4323_v5  ;;  %v5142_v23 = vadd.f32 %v5141_v10, %v5140_v24  ;;  %v4344_v59 = vsel %vm771_vm0, %v10754_v29, 0.0  ;;  %v10757_v24 = vld [vmem:[#allocation39_spill] sm:$0xff] }
 0x3d7   : > { %v4758_v34 = vmul.f32 %v10757_v24, %v10757_v24 }
 0x3d8   : > { %v4327_v43 = vadd.f32 %v4326_v36, %v4325_v55  ;;  %v5144_v53 = vadd.f32 %v5143_v15, %v5142_v23  ;;  %v10755_v36 = vld [vmem:[#allocation33_spill] sm:$0xff]  ;;  %v10758_v23 = vld [vmem:[#allocation42_spill] sm:$0xff] }
 0x3d9   : > { %v4346_v20 = vsel %vm771_vm0, %v10755_v36, 0.0  ;;  %v4756_v37 = vmul.f32 %v10755_v36, %v10755_v36  ;;  %v4759_v26 = vmul.f32 %v10758_v23, %v10758_v23 }
 0x3da   : > { %v4329_v47 = vadd.f32 %v4328_v39, %v4327_v43  ;;  %v5146_v0 = vadd.f32 %v5145_v19, %v5144_v53  ;;  %v5159_v39 = vsel %vm771_vm0, %v4750_v35, 0.0  ;;  %v4348_v43 = vsel %vm771_vm0, %v10756_v57, 0.0  ;;  %v10759_v53 = vld [vmem:[#allocation45_spill] sm:$0xff] }
 0x3db   : > { %v4760_v29 = vmul.f32 %v10759_v53, %v10759_v53 }
 0x3dc   : > { %v4331_v38 = vadd.f32 %v4330_v40, %v4329_v47  ;;  %v5148_v17 = vadd.f32 %v5147_v50, %v5146_v0  ;;  %v5161_v40 = vsel %vm771_vm0, %v4751_v30, 0.0  ;;  %v4350_v47 = vsel %vm771_vm0, %v10757_v24, 0.0  ;;  %v10760_v0 = vld [vmem:[#allocation48_spill] sm:$0xff] }
 0x3dd   : > { %v4761_v36 = vmul.f32 %v10760_v0, %v10760_v0 }
 0x3de   : > { %v4333_v13 = vadd.f32 %v4332_v9, %v4331_v38  ;;  %v5150_v46 = vadd.f32 %v5149_v16, %v5148_v17  ;;  %v5163_v9 = vsel %vm771_vm0, %v4752_v11, 0.0  ;;  %v4352_v38 = vsel %vm771_vm0, %v10758_v23, 0.0  ;;  %v10761_v17 = vld [vmem:[#allocation51_spill] sm:$0xff] }
 0x3df   : > { %v4762_v57 = vmul.f32 %v10761_v17, %v10761_v17 }
 0x3e0   : > { %v4335_v44 = vadd.f32 %v4334_v14, %v4333_v13  ;;  %v5152_v45 = vadd.f32 %v5151_v61, %v5150_v46  ;;  %v5165_v14 = vsel %vm771_vm0, %v4753_v52, 0.0  ;;  %v4354_v13 = vsel %vm771_vm0, %v10759_v53, 0.0  ;;  %v10762_v46 = vld [vmem:[#allocation54_spill] sm:$0xff] }
 0x3e1   : > { %v4763_v24 = vmul.f32 %v10762_v46, %v10762_v46 }
 0x3e2   : > { %v4337_v31 = vadd.f32 %v4336_v28, %v4335_v44  ;;  %v5154_v4 = vadd.f32 %v5153_v33, %v5152_v45  ;;  %v5167_v28 = vsel %vm771_vm0, %v4754_v63, 0.0  ;;  %v4356_v44 = vsel %vm771_vm0, %v10760_v0, 0.0  ;;  %v10763_v45 = vld [vmem:[#allocation57_spill] sm:$0xff] }
 0x3e3   : > { %v4764_v23 = vmul.f32 %v10763_v45, %v10763_v45 }
 0x3e4   : > { %v4339_v6 = vadd.f32 %v4338_v1, %v4337_v31  ;;  %v5156_v55 = vadd.f32 %v5155_v22, %v5154_v4  ;;  %v5169_v1 = vsel %vm771_vm0, %v4755_v54, 0.0  ;;  %v4358_v31 = vsel %vm771_vm0, %v10761_v17, 0.0  ;;  %v10764_v4 = vld [vmem:[#allocation60_spill] sm:$0xff] }
 0x3e5   : > { %v4765_v53 = vmul.f32 %v10764_v4, %v10764_v4 }
 0x3e6   : > { %v4341_v41 = vadd.f32 %v4340_v8, %v4339_v6  ;;  %v5158_v51 = vadd.f32 %v5157_v27, %v5156_v55  ;;  %v5171_v8 = vsel %vm771_vm0, %v4756_v37, 0.0  ;;  %v4360_v6 = vsel %vm771_vm0, %v10762_v46, 0.0  ;;  %v10765_v55 = vld [vmem:[#allocation63_spill] sm:$0xff] }
 0x3e7   : > { %v4766_v0 = vmul.f32 %v10765_v55, %v10765_v55 }
 0x3e8   : > { %v4343_v5 = vadd.f32 %v4342_v48, %v4341_v41  ;;  %v5160_v49 = vadd.f32 %v5159_v39, %v5158_v51  ;;  %v5173_v48 = vsel %vm771_vm0, %v4757_v56, 0.0  ;;  %v4362_v41 = vsel %vm771_vm0, %v10763_v45, 0.0  ;;  %v10766_v51 = vld [vmem:[#allocation66_spill] sm:$0xff] }
 0x3e9   : > { %v4767_v17 = vmul.f32 %v10766_v51, %v10766_v51 }
 0x3ea   : > { %v4345_v21 = vadd.f32 %v4344_v59, %v4343_v5  ;;  %v5162_v18 = vadd.f32 %v5161_v40, %v5160_v49  ;;  %v5175_v59 = vsel %vm771_vm0, %v4758_v34, 0.0  ;;  %v4364_v5 = vsel %vm771_vm0, %v10764_v4, 0.0  ;;  %v10767_v49 = vld [vmem:[#allocation69_spill] sm:$0xff] }
 0x3eb   : > { %v4768_v46 = vmul.f32 %v10767_v49, %v10767_v49 }
 0x3ec   : > { %v4347_v10 = vadd.f32 %v4346_v20, %v4345_v21  ;;  %v5164_v42 = vadd.f32 %v5163_v9, %v5162_v18  ;;  %v5177_v20 = vsel %vm771_vm0, %v4759_v26, 0.0  ;;  %v4366_v21 = vsel %vm771_vm0, %v10765_v55, 0.0  ;;  %v10768_v18 = vld [vmem:[#allocation72_spill] sm:$0xff] }
 0x3ed   : > { %v4769_v45 = vmul.f32 %v10768_v18, %v10768_v18 }
 0x3ee   : > { %v4349_v15 = vadd.f32 %v4348_v43, %v4347_v10  ;;  %v5166_v25 = vadd.f32 %v5165_v14, %v5164_v42  ;;  %v5179_v43 = vsel %vm771_vm0, %v4760_v29, 0.0  ;;  %v4368_v10 = vsel %vm771_vm0, %v10766_v51, 0.0  ;;  %v10769_v42 = vld [vmem:[#allocation75_spill] sm:$0xff] }
 0x3ef   : > { %v4770_v4 = vmul.f32 %v10769_v42, %v10769_v42 }
 0x3f0   : > { %v4351_v19 = vadd.f32 %v4350_v47, %v4349_v15  ;;  %v5168_v2 = vadd.f32 %v5167_v28, %v5166_v25  ;;  %v5181_v47 = vsel %vm771_vm0, %v4761_v36, 0.0  ;;  %v4370_v15 = vsel %vm771_vm0, %v10767_v49, 0.0  ;;  %v10770_v25 = vld [vmem:[#allocation78_spill] sm:$0xff] }
 0x3f1   : > { %v4771_v55 = vmul.f32 %v10770_v25, %v10770_v25 }
 0x3f2   : > { %v4353_v50 = vadd.f32 %v4352_v38, %v4351_v19  ;;  %v5170_v58 = vadd.f32 %v5169_v1, %v5168_v2  ;;  %v5183_v38 = vsel %vm771_vm0, %v4762_v57, 0.0  ;;  %v4372_v19 = vsel %vm771_vm0, %v10768_v18, 0.0  ;;  %v10771_v2 = vld [vmem:[#allocation81_spill] sm:$0xff] }
 0x3f3   : > { %v4772_v51 = vmul.f32 %v10771_v2, %v10771_v2 }
 0x3f4   : > { %v4355_v16 = vadd.f32 %v4354_v13, %v4353_v50  ;;  %v5172_v35 = vadd.f32 %v5171_v8, %v5170_v58  ;;  %v5185_v13 = vsel %vm771_vm0, %v4763_v24, 0.0  ;;  %v4374_v50 = vsel %vm771_vm0, %v10769_v42, 0.0  ;;  %v10772_v58 = vld [vmem:[#allocation84_spill] sm:$0xff] }
 0x3f5   : > { %v4773_v49 = vmul.f32 %v10772_v58, %v10772_v58 }
 0x3f6   : > { %v4357_v61 = vadd.f32 %v4356_v44, %v4355_v16  ;;  %v5174_v30 = vadd.f32 %v5173_v48, %v5172_v35  ;;  %v5187_v44 = vsel %vm771_vm0, %v4764_v23, 0.0  ;;  %v4376_v16 = vsel %vm771_vm0, %v10770_v25, 0.0  ;;  %v10773_v35 = vld [vmem:[#allocation87_spill] sm:$0xff] }
 0x3f7   : > { %v4774_v18 = vmul.f32 %v10773_v35, %v10773_v35 }
 0x3f8   : > { %v4359_v33 = vadd.f32 %v4358_v31, %v4357_v61  ;;  %v5176_v11 = vadd.f32 %v5175_v59, %v5174_v30  ;;  %v5189_v31 = vsel %vm771_vm0, %v4765_v53, 0.0  ;;  %v4378_v61 = vsel %vm771_vm0, %v10771_v2, 0.0  ;;  %v10774_v30 = vld [vmem:[#allocation90_spill] sm:$0xff] }
 0x3f9   : > { %v4775_v42 = vmul.f32 %v10774_v30, %v10774_v30 }
 0x3fa   : > { %v4361_v22 = vadd.f32 %v4360_v6, %v4359_v33  ;;  %v5178_v52 = vadd.f32 %v5177_v20, %v5176_v11  ;;  %v5191_v6 = vsel %vm771_vm0, %v4766_v0, 0.0  ;;  %v4380_v33 = vsel %vm771_vm0, %v10772_v58, 0.0  ;;  %v10775_v11 = vld [vmem:[#allocation93_spill] sm:$0xff] }
 0x3fb   : > { %v4776_v25 = vmul.f32 %v10775_v11, %v10775_v11 }
 0x3fc   : > { %v4363_v27 = vadd.f32 %v4362_v41, %v4361_v22  ;;  %v5180_v63 = vadd.f32 %v5179_v43, %v5178_v52  ;;  %v5193_v41 = vsel %vm771_vm0, %v4767_v17, 0.0  ;;  %v4382_v22 = vsel %vm771_vm0, %v10773_v35, 0.0  ;;  %v10776_v52 = vld [vmem:[#allocation96_spill] sm:$0xff] }
 0x3fd   : > { %v4777_v2 = vmul.f32 %v10776_v52, %v10776_v52 }
 0x3fe   : > { %v4365_v39 = vadd.f32 %v4364_v5, %v4363_v27  ;;  %v5182_v54 = vadd.f32 %v5181_v47, %v5180_v63  ;;  %v5195_v5 = vsel %vm771_vm0, %v4768_v46, 0.0  ;;  %v4384_v27 = vsel %vm771_vm0, %v10774_v30, 0.0  ;;  %v10777_v63 = vld [vmem:[#allocation99_spill] sm:$0xff] }
 0x3ff   : > { %v4778_v58 = vmul.f32 %v10777_v63, %v10777_v63 }
 0x400   : > { %v4367_v40 = vadd.f32 %v4366_v21, %v4365_v39  ;;  %v5184_v37 = vadd.f32 %v5183_v38, %v5182_v54  ;;  %v5197_v21 = vsel %vm771_vm0, %v4769_v45, 0.0  ;;  %v4386_v39 = vsel %vm771_vm0, %v10775_v11, 0.0  ;;  %v10778_v54 = vld [vmem:[#allocation102_spill] sm:$0xff] }
 0x401   : > { %v4779_v35 = vmul.f32 %v10778_v54, %v10778_v54 }
 0x402   : > { %v4369_v9 = vadd.f32 %v4368_v10, %v4367_v40  ;;  %v5186_v56 = vadd.f32 %v5185_v13, %v5184_v37  ;;  %v5199_v10 = vsel %vm771_vm0, %v4770_v4, 0.0  ;;  %v4388_v40 = vsel %vm771_vm0, %v10776_v52, 0.0  ;;  %v10779_v37 = vld [vmem:[#allocation106_spill] sm:$0xff] }
 0x403   : > { %v4780_v30 = vmul.f32 %v10779_v37, %v10779_v37 }
 0x404   : > { %v4371_v14 = vadd.f32 %v4370_v15, %v4369_v9  ;;  %v5188_v34 = vadd.f32 %v5187_v44, %v5186_v56  ;;  %v5201_v15 = vsel %vm771_vm0, %v4771_v55, 0.0  ;;  %v4390_v9 = vsel %vm771_vm0, %v10777_v63, 0.0  ;;  %v10780_v56 = vld [vmem:[#allocation110_spill] sm:$0xff] }
 0x405   : > { %v4781_v11 = vmul.f32 %v10780_v56, %v10780_v56 }
 0x406   : > { %v4373_v28 = vadd.f32 %v4372_v19, %v4371_v14  ;;  %v5190_v26 = vadd.f32 %v5189_v31, %v5188_v34  ;;  %v5203_v19 = vsel %vm771_vm0, %v4772_v51, 0.0  ;;  %v4392_v14 = vsel %vm771_vm0, %v10778_v54, 0.0  ;;  %v10781_v34 = vld [vmem:[#allocation114_spill] sm:$0xff] }
 0x407   : > { %v4782_v52 = vmul.f32 %v10781_v34, %v10781_v34 }
 0x408   : > { %v4375_v1 = vadd.f32 %v4374_v50, %v4373_v28  ;;  %v5192_v29 = vadd.f32 %v5191_v6, %v5190_v26  ;;  %v5205_v50 = vsel %vm771_vm0, %v4773_v49, 0.0  ;;  %v4394_v28 = vsel %vm771_vm0, %v10779_v37, 0.0  ;;  %v10782_v26 = vld [vmem:[#allocation118_spill] sm:$0xff] }
 0x409   : > { %v4783_v63 = vmul.f32 %v10782_v26, %v10782_v26 }
 0x40a   : > { %v4377_v8 = vadd.f32 %v4376_v16, %v4375_v1  ;;  %v5194_v36 = vadd.f32 %v5193_v41, %v5192_v29  ;;  %v5207_v16 = vsel %vm771_vm0, %v4774_v18, 0.0  ;;  %v4396_v1 = vsel %vm771_vm0, %v10780_v56, 0.0  ;;  %v10783_v29 = vld [vmem:[#allocation122_spill] sm:$0xff] }
 0x40b   : > { %v4784_v54 = vmul.f32 %v10783_v29, %v10783_v29 }
 0x40c   : > { %v4379_v48 = vadd.f32 %v4378_v61, %v4377_v8  ;;  %v5196_v57 = vadd.f32 %v5195_v5, %v5194_v36  ;;  %v5209_v61 = vsel %vm771_vm0, %v4775_v42, 0.0  ;;  %v4398_v8 = vsel %vm771_vm0, %v10781_v34, 0.0  ;;  %v10784_v36 = vld [vmem:[#allocation126_spill] sm:$0xff] }
 0x40d   : > { %v4785_v37 = vmul.f32 %v10784_v36, %v10784_v36 }
 0x40e   : > { %v4381_v59 = vadd.f32 %v4380_v33, %v4379_v48  ;;  %v5198_v24 = vadd.f32 %v5197_v21, %v5196_v57  ;;  %v5211_v33 = vsel %vm771_vm0, %v4776_v25, 0.0  ;;  %v4400_v48 = vsel %vm771_vm0, %v10782_v26, 0.0  ;;  %v10785_v57 = vld [vmem:[#allocation130_spill] sm:$0xff] }
 0x40f   : > { %v4786_v56 = vmul.f32 %v10785_v57, %v10785_v57 }
 0x410   : > { %v4383_v20 = vadd.f32 %v4382_v22, %v4381_v59  ;;  %v5200_v23 = vadd.f32 %v5199_v10, %v5198_v24  ;;  %v5213_v22 = vsel %vm771_vm0, %v4777_v2, 0.0  ;;  %v4402_v59 = vsel %vm771_vm0, %v10783_v29, 0.0  ;;  %v10786_v24 = vld [vmem:[#allocation134_spill] sm:$0xff] }
 0x411   : > { %v4787_v34 = vmul.f32 %v10786_v24, %v10786_v24 }
 0x412   : > { %v4385_v43 = vadd.f32 %v4384_v27, %v4383_v20  ;;  %v5202_v53 = vadd.f32 %v5201_v15, %v5200_v23  ;;  %v5215_v27 = vsel %vm771_vm0, %v4778_v58, 0.0  ;;  %v4404_v20 = vsel %vm771_vm0, %v10784_v36, 0.0  ;;  %v10787_v23 = vld [vmem:[#allocation138_spill] sm:$0xff] }
 0x413   : > { %v4788_v26 = vmul.f32 %v10787_v23, %v10787_v23 }
 0x414   : > { %v4387_v47 = vadd.f32 %v4386_v39, %v4385_v43  ;;  %v5204_v0 = vadd.f32 %v5203_v19, %v5202_v53  ;;  %v5217_v39 = vsel %vm771_vm0, %v4779_v35, 0.0  ;;  %v4406_v43 = vsel %vm771_vm0, %v10785_v57, 0.0  ;;  %v10788_v53 = vld [vmem:[#allocation142_spill] sm:$0xff] }
 0x415   : > { %v4789_v29 = vmul.f32 %v10788_v53, %v10788_v53 }
 0x416   : > { %v4389_v38 = vadd.f32 %v4388_v40, %v4387_v47  ;;  %v5206_v17 = vadd.f32 %v5205_v50, %v5204_v0  ;;  %v5219_v40 = vsel %vm771_vm0, %v4780_v30, 0.0  ;;  %v4408_v47 = vsel %vm771_vm0, %v10786_v24, 0.0  ;;  %v10789_v0 = vld [vmem:[#allocation146_spill] sm:$0xff] }
 0x417   : > { %v4790_v36 = vmul.f32 %v10789_v0, %v10789_v0 }
 0x418   : > { %v4391_v13 = vadd.f32 %v4390_v9, %v4389_v38  ;;  %v5208_v46 = vadd.f32 %v5207_v16, %v5206_v17  ;;  %v5221_v9 = vsel %vm771_vm0, %v4781_v11, 0.0  ;;  %v4410_v38 = vsel %vm771_vm0, %v10787_v23, 0.0  ;;  %v10790_v17 = vld [vmem:[#allocation150_spill] sm:$0xff] }
 0x419   : > { %v4791_v57 = vmul.f32 %v10790_v17, %v10790_v17 }
 0x41a   : > { %v4393_v44 = vadd.f32 %v4392_v14, %v4391_v13  ;;  %v5210_v45 = vadd.f32 %v5209_v61, %v5208_v46  ;;  %v5223_v14 = vsel %vm771_vm0, %v4782_v52, 0.0  ;;  %v4412_v13 = vsel %vm771_vm0, %v10788_v53, 0.0  ;;  %v10791_v46 = vld [vmem:[#allocation154_spill] sm:$0xff] }
 0x41b   : > { %v4792_v24 = vmul.f32 %v10791_v46, %v10791_v46 }
 0x41c   : > { %v4395_v31 = vadd.f32 %v4394_v28, %v4393_v44  ;;  %v5212_v4 = vadd.f32 %v5211_v33, %v5210_v45  ;;  %v5225_v28 = vsel %vm771_vm0, %v4783_v63, 0.0  ;;  %v4414_v44 = vsel %vm771_vm0, %v10789_v0, 0.0  ;;  %v10792_v45 = vld [vmem:[#allocation158_spill] sm:$0xff] }
 0x41d   : > { %v4793_v23 = vmul.f32 %v10792_v45, %v10792_v45 }
 0x41e   : > { %v4397_v6 = vadd.f32 %v4396_v1, %v4395_v31  ;;  %v5214_v55 = vadd.f32 %v5213_v22, %v5212_v4  ;;  %v5227_v1 = vsel %vm771_vm0, %v4784_v54, 0.0  ;;  %v4416_v31 = vsel %vm771_vm0, %v10790_v17, 0.0  ;;  %v10793_v4 = vld [vmem:[#allocation162_spill] sm:$0xff] }
 0x41f   : > { %v4794_v53 = vmul.f32 %v10793_v4, %v10793_v4 }
 0x420   : > { %v4399_v41 = vadd.f32 %v4398_v8, %v4397_v6  ;;  %v5216_v51 = vadd.f32 %v5215_v27, %v5214_v55  ;;  %v5229_v8 = vsel %vm771_vm0, %v4785_v37, 0.0  ;;  %v4418_v6 = vsel %vm771_vm0, %v10791_v46, 0.0  ;;  %v10794_v55 = vld [vmem:[#allocation166_spill] sm:$0xff] }
 0x421   : > { %v4795_v0 = vmul.f32 %v10794_v55, %v10794_v55 }
 0x422   : > { %v4401_v5 = vadd.f32 %v4400_v48, %v4399_v41  ;;  %v5218_v49 = vadd.f32 %v5217_v39, %v5216_v51  ;;  %v5231_v48 = vsel %vm771_vm0, %v4786_v56, 0.0  ;;  %v4420_v41 = vsel %vm771_vm0, %v10792_v45, 0.0  ;;  %v10795_v51 = vld [vmem:[#allocation170_spill] sm:$0xff] }
 0x423   : > { %v4796_v17 = vmul.f32 %v10795_v51, %v10795_v51 }
 0x424   : > { %v4403_v21 = vadd.f32 %v4402_v59, %v4401_v5  ;;  %v5220_v18 = vadd.f32 %v5219_v40, %v5218_v49  ;;  %v5233_v59 = vsel %vm771_vm0, %v4787_v34, 0.0  ;;  %v4422_v5 = vsel %vm771_vm0, %v10793_v4, 0.0  ;;  %v10796_v49 = vld [vmem:[#allocation174_spill] sm:$0xff] }
 0x425   : > { %v4797_v46 = vmul.f32 %v10796_v49, %v10796_v49 }
 0x426   : > { %v4405_v10 = vadd.f32 %v4404_v20, %v4403_v21  ;;  %v5222_v42 = vadd.f32 %v5221_v9, %v5220_v18  ;;  %v5235_v20 = vsel %vm771_vm0, %v4788_v26, 0.0  ;;  %v4424_v21 = vsel %vm771_vm0, %v10794_v55, 0.0  ;;  %v10797_v18 = vld [vmem:[#allocation177_spill] sm:$0xff] }
 0x427   : > { %v4798_v45 = vmul.f32 %v10797_v18, %v10797_v18 }
 0x428   : > { %v4407_v15 = vadd.f32 %v4406_v43, %v4405_v10  ;;  %v5224_v25 = vadd.f32 %v5223_v14, %v5222_v42  ;;  %v5237_v43 = vsel %vm771_vm0, %v4789_v29, 0.0  ;;  %v4426_v10 = vsel %vm771_vm0, %v10795_v51, 0.0  ;;  %v10798_v42 = vld [vmem:[#allocation180_spill] sm:$0xff] }
 0x429   : > { %v4799_v4 = vmul.f32 %v10798_v42, %v10798_v42 }
 0x42a   : > { %v4409_v19 = vadd.f32 %v4408_v47, %v4407_v15  ;;  %v5226_v2 = vadd.f32 %v5225_v28, %v5224_v25  ;;  %v5239_v47 = vsel %vm771_vm0, %v4790_v36, 0.0  ;;  %v4428_v15 = vsel %vm771_vm0, %v10796_v49, 0.0  ;;  %v10799_v25 = vld [vmem:[#allocation183_spill] sm:$0xff] }
 0x42b   : > { %v4800_v55 = vmul.f32 %v10799_v25, %v10799_v25 }
 0x42c   : > { %v4411_v50 = vadd.f32 %v4410_v38, %v4409_v19  ;;  %v5228_v58 = vadd.f32 %v5227_v1, %v5226_v2  ;;  %v5241_v38 = vsel %vm771_vm0, %v4791_v57, 0.0  ;;  %v4430_v19 = vsel %vm771_vm0, %v10797_v18, 0.0  ;;  %v10800_v2 = vld [vmem:[#allocation186_spill] sm:$0xff] }
 0x42d   : > { %v4801_v51 = vmul.f32 %v10800_v2, %v10800_v2 }
 0x42e   : > { %v4413_v16 = vadd.f32 %v4412_v13, %v4411_v50  ;;  %v5230_v35 = vadd.f32 %v5229_v8, %v5228_v58  ;;  %v5243_v13 = vsel %vm771_vm0, %v4792_v24, 0.0  ;;  %v4432_v50 = vsel %vm771_vm0, %v10798_v42, 0.0  ;;  %v10801_v58 = vld [vmem:[#allocation189_spill] sm:$0xff] }
 0x42f   : > { %v4802_v49 = vmul.f32 %v10801_v58, %v10801_v58 }
 0x430   : > { %v4415_v61 = vadd.f32 %v4414_v44, %v4413_v16  ;;  %v5232_v30 = vadd.f32 %v5231_v48, %v5230_v35  ;;  %v5245_v44 = vsel %vm771_vm0, %v4793_v23, 0.0  ;;  %v4434_v16 = vsel %vm771_vm0, %v10799_v25, 0.0  ;;  %v10802_v35 = vld [vmem:[#allocation193_spill] sm:$0xff] }
 0x431   : > { %v4803_v18 = vmul.f32 %v10802_v35, %v10802_v35 }
 0x432   : > { %v4417_v33 = vadd.f32 %v4416_v31, %v4415_v61  ;;  %v5234_v11 = vadd.f32 %v5233_v59, %v5232_v30  ;;  %v5247_v31 = vsel %vm771_vm0, %v4794_v53, 0.0  ;;  %v4436_v61 = vsel %vm771_vm0, %v10800_v2, 0.0  ;;  %v10803_v30 = vld [vmem:[#allocation197_spill] sm:$0xff] }
 0x433   : > { %v4804_v42 = vmul.f32 %v10803_v30, %v10803_v30 }
 0x434   : > { %v4419_v22 = vadd.f32 %v4418_v6, %v4417_v33  ;;  %v5236_v52 = vadd.f32 %v5235_v20, %v5234_v11  ;;  %v5249_v6 = vsel %vm771_vm0, %v4795_v0, 0.0  ;;  %v4438_v33 = vsel %vm771_vm0, %v10801_v58, 0.0  ;;  %v10804_v11 = vld [vmem:[#allocation201_spill] sm:$0xff] }
 0x435   : > { %v4805_v25 = vmul.f32 %v10804_v11, %v10804_v11 }
 0x436   : > { %v4421_v27 = vadd.f32 %v4420_v41, %v4419_v22  ;;  %v5238_v63 = vadd.f32 %v5237_v43, %v5236_v52  ;;  %v5251_v41 = vsel %vm771_vm0, %v4796_v17, 0.0  ;;  %v4440_v22 = vsel %vm771_vm0, %v10802_v35, 0.0  ;;  %v10805_v52 = vld [vmem:[#allocation205_spill] sm:$0xff] }
 0x437   : > { %v4806_v2 = vmul.f32 %v10805_v52, %v10805_v52 }
 0x438   : > { %v4423_v39 = vadd.f32 %v4422_v5, %v4421_v27  ;;  %v5240_v54 = vadd.f32 %v5239_v47, %v5238_v63  ;;  %v5253_v5 = vsel %vm771_vm0, %v4797_v46, 0.0  ;;  %v4442_v27 = vsel %vm771_vm0, %v10803_v30, 0.0  ;;  %v10806_v63 = vld [vmem:[#allocation209_spill] sm:$0xff] }
 0x439   : > { %v4807_v58 = vmul.f32 %v10806_v63, %v10806_v63 }
 0x43a   : > { %v4425_v40 = vadd.f32 %v4424_v21, %v4423_v39  ;;  %v5242_v37 = vadd.f32 %v5241_v38, %v5240_v54  ;;  %v5255_v21 = vsel %vm771_vm0, %v4798_v45, 0.0  ;;  %v4444_v39 = vsel %vm771_vm0, %v10804_v11, 0.0  ;;  %v10807_v54 = vld [vmem:[#allocation213_spill] sm:$0xff] }
 0x43b   : > { %v4808_v35 = vmul.f32 %v10807_v54, %v10807_v54  ;;  %v5273_v30 = vsel %vm771_vm0, %v4807_v58, 0.0  ;;  %v4464_v11 = vsel %vm771_vm0, %v8757_v3, 0.0 }
 0x43c   : > { %v4427_v9 = vadd.f32 %v4426_v10, %v4425_v40  ;;  %v5244_v56 = vadd.f32 %v5243_v13, %v5242_v37  ;;  %v5257_v10 = vsel %vm771_vm0, %v4799_v4, 0.0  ;;  %v4446_v40 = vsel %vm771_vm0, %v10805_v52, 0.0  ;;  %v10808_v37 = vld [vmem:[#allocation217_spill] sm:$0xff] }
 0x43e   : > { %v4429_v14 = vadd.f32 %v4428_v15, %v4427_v9  ;;  %v5246_v34 = vadd.f32 %v5245_v44, %v5244_v56  ;;  %v5259_v15 = vsel %vm771_vm0, %v4800_v55, 0.0  ;;  %v4448_v9 = vsel %vm771_vm0, %v10806_v63, 0.0  ;;  %v10809_v56 = vld [vmem:[#allocation221_spill] sm:$0xff] }
 0x43f   : > { %v4810_v55 = vmul.f32 %v10809_v56, %v10809_v56 }
 0x440   : > { %v4431_v28 = vadd.f32 %v4430_v19, %v4429_v14  ;;  %v5248_v26 = vadd.f32 %v5247_v31, %v5246_v34  ;;  %v5261_v19 = vsel %vm771_vm0, %v4801_v51, 0.0  ;;  %v4450_v14 = vsel %vm771_vm0, %v10807_v54, 0.0  ;;  %v10810_v34 = vld [vmem:[#allocation224_spill] sm:$0xff] }
 0x442   : > { %v4433_v1 = vadd.f32 %v4432_v50, %v4431_v28  ;;  %v5250_v29 = vadd.f32 %v5249_v6, %v5248_v26  ;;  %v5263_v50 = vsel %vm771_vm0, %v4802_v49, 0.0  ;;  %v4452_v28 = vsel %vm771_vm0, %v10808_v37, 0.0  ;;  %v10811_v26 = vld [vmem:[#allocation227_spill] sm:$0xff] }
 0x443   : > { %v5279_v49 = vsel %vm771_vm0, %v4810_v55, 0.0  ;;  %v10821_v55 = vld [vmem:[#allocation37_spill] sm:$0xff] }
 0x444   : > { %v4435_v8 = vadd.f32 %v4434_v16, %v4433_v1  ;;  %v5252_v36 = vadd.f32 %v5251_v41, %v5250_v29  ;;  %v5265_v16 = vsel %vm771_vm0, %v4803_v18, 0.0  ;;  %v4454_v1 = vsel %vm771_vm0, %v10809_v56, 0.0 }
 0x445   : > { %v4460_v29 = vsel %vm771_vm0, %v8710_v7, 0.0 }
 0x446   : > { %v4437_v48 = vadd.f32 %v4436_v61, %v4435_v8  ;;  %v5254_v57 = vadd.f32 %v5253_v5, %v5252_v36  ;;  %v5267_v61 = vsel %vm771_vm0, %v4804_v42, 0.0  ;;  %v4456_v8 = vsel %vm771_vm0, %v10810_v34, 0.0 }
 0x447   : > { %v4809_v5 = vmul.f32 %v10808_v37, %v10808_v37 }
 0x448   : > { %v4439_v59 = vadd.f32 %v4438_v33, %v4437_v48  ;;  %v5256_v24 = vadd.f32 %v5255_v21, %v5254_v57  ;;  %v5269_v33 = vsel %vm771_vm0, %v4805_v25, 0.0  ;;  %v4458_v48 = vsel %vm771_vm0, %v10811_v26, 0.0  ;;  %v10816_v25 = vld [vmem:[#allocation22_spill] sm:$0xff] }
 0x449   : > { %v5275_v21 = vsel %vm771_vm0, %v4808_v35, 0.0  ;;  %v5277_v51 = vsel %vm771_vm0, %v4809_v5, 0.0 }
 0x44a   : > { %v4441_v20 = vadd.f32 %v4440_v22, %v4439_v59  ;;  %v5258_v23 = vadd.f32 %v5257_v10, %v5256_v24  ;;  %v5271_v22 = vsel %vm771_vm0, %v4806_v2, 0.0  ;;  %v10812_v10 = vld [vmem:[#allocation10_spill] sm:$0xff] }
 0x44b   : > { %v4466_v52 = vsel %vm771_vm0, %v10812_v10, 0.0 }
 0x44c   : > { %v4443_v43 = vadd.f32 %v4442_v27, %v4441_v20  ;;  %v5260_v53 = vadd.f32 %v5259_v15, %v5258_v23  ;;  %v4462_v27 = vsel %vm771_vm0, %v8739_v62, 0.0  ;;  %v10813_v15 = vld [vmem:[#allocation13_spill] sm:$0xff] }
 0x44d   : > { %v4468_v63 = vsel %vm771_vm0, %v10813_v15, 0.0 }
 0x44e   : > { %v4445_v47 = vadd.f32 %v4444_v39, %v4443_v43  ;;  %v5262_v0 = vadd.f32 %v5261_v19, %v5260_v53  ;;  %v4811_v43 = vmul.f32 %v10810_v34, %v10810_v34  ;;  %v10814_v19 = vld [vmem:[#allocation16_spill] sm:$0xff] }
 0x44f   : > { %v4470_v54 = vsel %vm771_vm0, %v10814_v19, 0.0 }
 0x450   : > { %v4447_v38 = vadd.f32 %v4446_v40, %v4445_v47  ;;  %v5264_v17 = vadd.f32 %v5263_v50, %v5262_v0  ;;  %v4812_v47 = vmul.f32 %v10811_v26, %v10811_v26  ;;  %v5281_v18 = vsel %vm771_vm0, %v4811_v43, 0.0  ;;  %v10815_v50 = vld [vmem:[#allocation19_spill] sm:$0xff] }
 0x451   : > { %v4472_v37 = vsel %vm771_vm0, %v10815_v50, 0.0  ;;  %v4818_v26 = vmul.f32 %v10814_v19, %v10814_v19 }
 0x452   : > { %v4449_v13 = vadd.f32 %v4448_v9, %v4447_v38  ;;  %v5266_v46 = vadd.f32 %v5265_v16, %v5264_v17  ;;  %v4813_v38 = vmul.f32 %v8710_v7, %v8710_v7  ;;  %v5283_v42 = vsel %vm771_vm0, %v4812_v47, 0.0 }
 0x453   : > { %v4815_v7 = vmul.f32 %v8757_v3, %v8757_v3  ;;  %v4474_v16 = vsel %vm771_vm0, %v10816_v25, 0.0  ;;  %v4817_v3 = vmul.f32 %v10813_v15, %v10813_v15 }
 0x454   : > { %v4451_v44 = vadd.f32 %v4450_v14, %v4449_v13  ;;  %v5268_v45 = vadd.f32 %v5267_v61, %v5266_v46  ;;  %v4814_v13 = vmul.f32 %v8739_v62, %v8739_v62  ;;  %v4816_v62 = vmul.f32 %v10812_v10, %v10812_v10  ;;  %v10818_v46 = vld [vmem:[#allocation28_spill] sm:$0xff] }
 0x456   : > { %v4453_v31 = vadd.f32 %v4452_v28, %v4451_v44  ;;  %v5270_v59 = vadd.f32 %v5269_v33, %v5268_v45  ;;  %v5285_v44 = vsel %vm771_vm0, %v4813_v38, 0.0  ;;  %v5287_v17 = vsel %vm771_vm0, %v4814_v13, 0.0  ;;  %v10819_v45 = vld [vmem:[#allocation31_spill] sm:$0xff] }
 0x458   : > { %v4455_v6 = vadd.f32 %v4454_v1, %v4453_v31  ;;  %v5272_v36 = vadd.f32 %v5271_v22, %v5270_v59  ;;  %v10817_v31 = vld [vmem:[#allocation25_spill] sm:$0xff]  ;;  %v5293_v59 = vsel %vm771_vm0, %v4817_v3, 0.0 }
 0x459   : > { %v4476_v2 = vsel %vm771_vm0, %v10817_v31, 0.0 }
 0x45a   : > { %v4457_v41 = vadd.f32 %v4456_v8, %v4455_v6  ;;  %v5274_v39 = vadd.f32 %v5273_v30, %v5272_v36  ;;  %v5289_v8 = vsel %vm771_vm0, %v4815_v7, 0.0  ;;  %v4478_v6 = vsel %vm771_vm0, %v10818_v46, 0.0 }
 0x45b   : > { %v4820_v36 = vmul.f32 %v10816_v25, %v10816_v25 }
 0x45c   : > { %v4459_v4 = vadd.f32 %v4458_v48, %v4457_v41  ;;  %v5276_v40 = vadd.f32 %v5275_v21, %v5274_v39  ;;  %v5291_v48 = vsel %vm771_vm0, %v4816_v62, 0.0  ;;  %v4480_v41 = vsel %vm771_vm0, %v10819_v45, 0.0 }
 0x45d   : > { %v4484_v21 = vsel %vm771_vm0, %v10821_v55, 0.0  ;;  %v5299_v47 = vsel %vm771_vm0, %v4820_v36, 0.0 }
 0x45e   : > { %v4461_v20 = vadd.f32 %v4460_v29, %v4459_v4  ;;  %v5278_v9 = vadd.f32 %v5277_v51, %v5276_v40  ;;  %v4819_v29 = vmul.f32 %v10815_v50, %v10815_v50  ;;  %v10820_v4 = vld [vmem:[#allocation34_spill] sm:$0xff]  ;;  %v10822_v51 = vld [vmem:[#allocation40_spill] sm:$0xff] }
 0x45f   : > { %v4482_v5 = vsel %vm771_vm0, %v10820_v4, 0.0  ;;  %v4486_v10 = vsel %vm771_vm0, %v10822_v51, 0.0 }
 0x460   : > { %v4463_v57 = vadd.f32 %v4462_v27, %v4461_v20  ;;  %v5280_v14 = vadd.f32 %v5279_v49, %v5278_v9  ;;  %v5295_v20 = vsel %vm771_vm0, %v4818_v26, 0.0  ;;  %v5297_v43 = vsel %vm771_vm0, %v4819_v29, 0.0  ;;  %v10823_v49 = vld [vmem:[#allocation43_spill] sm:$0xff] }
 0x461   : > { %v4488_v15 = vsel %vm771_vm0, %v10823_v49, 0.0 }
 0x462   : > { %v4465_v24 = vadd.f32 %v4464_v11, %v4463_v57  ;;  %v5282_v28 = vadd.f32 %v5281_v18, %v5280_v14  ;;  %v4821_v57 = vmul.f32 %v10817_v31, %v10817_v31  ;;  %v10824_v18 = vld [vmem:[#allocation46_spill] sm:$0xff] }
 0x463   : > { %v4490_v19 = vsel %vm771_vm0, %v10824_v18, 0.0 }
 0x464   : > { %v4467_v23 = vadd.f32 %v4466_v52, %v4465_v24  ;;  %v5284_v56 = vadd.f32 %v5283_v42, %v5282_v28  ;;  %v4822_v24 = vmul.f32 %v10818_v46, %v10818_v46  ;;  %v5301_v38 = vsel %vm771_vm0, %v4821_v57, 0.0  ;;  %v10825_v42 = vld [vmem:[#allocation49_spill] sm:$0xff] }
 0x465   : > { %v4492_v50 = vsel %vm771_vm0, %v10825_v42, 0.0 }
 0x466   : > { %v4469_v53 = vadd.f32 %v4468_v63, %v4467_v23  ;;  %v5286_v61 = vadd.f32 %v5285_v44, %v5284_v56  ;;  %v4823_v23 = vmul.f32 %v10819_v45, %v10819_v45  ;;  %v5303_v13 = vsel %vm771_vm0, %v4822_v24, 0.0  ;;  %v10826_v44 = vld [vmem:[#allocation52_spill] sm:$0xff] }
 0x467   : > { %v4494_v25 = vsel %vm771_vm0, %v10826_v44, 0.0 }
 0x468   : > { %v4471_v0 = vadd.f32 %v4470_v54, %v4469_v53  ;;  %v5288_v58 = vadd.f32 %v5287_v17, %v5286_v61  ;;  %v4824_v53 = vmul.f32 %v10820_v4, %v10820_v4  ;;  %v5305_v7 = vsel %vm771_vm0, %v4823_v23, 0.0  ;;  %v10827_v17 = vld [vmem:[#allocation55_spill] sm:$0xff] }
 0x469   : > { %v4496_v31 = vsel %vm771_vm0, %v10827_v17, 0.0 }
 0x46a   : > { %v4473_v1 = vadd.f32 %v4472_v37, %v4471_v0  ;;  %v5290_v35 = vadd.f32 %v5289_v8, %v5288_v58  ;;  %v4825_v0 = vmul.f32 %v10821_v55, %v10821_v55  ;;  %v5307_v62 = vsel %vm771_vm0, %v4824_v53, 0.0  ;;  %v10828_v8 = vld [vmem:[#allocation58_spill] sm:$0xff] }
 0x46b   : > { %v4498_v46 = vsel %vm771_vm0, %v10828_v8, 0.0 }
 0x46c   : > { %v4475_v34 = vadd.f32 %v4474_v16, %v4473_v1  ;;  %v5292_v30 = vadd.f32 %v5291_v48, %v5290_v35  ;;  %v4826_v1 = vmul.f32 %v10822_v51, %v10822_v51  ;;  %v5309_v3 = vsel %vm771_vm0, %v4825_v0, 0.0  ;;  %v10829_v48 = vld [vmem:[#allocation61_spill] sm:$0xff] }
 0x46d   : > { %v4500_v45 = vsel %vm771_vm0, %v10829_v48, 0.0 }
 0x46e   : > { %v4477_v33 = vadd.f32 %v4476_v2, %v4475_v34  ;;  %v5294_v11 = vadd.f32 %v5293_v59, %v5292_v30  ;;  %v4827_v34 = vmul.f32 %v10823_v49, %v10823_v49  ;;  %v5311_v26 = vsel %vm771_vm0, %v4826_v1, 0.0  ;;  %v10830_v59 = vld [vmem:[#allocation64_spill] sm:$0xff] }
 0x46f   : > { %v4502_v4 = vsel %vm771_vm0, %v10830_v59, 0.0 }
 0x470   : > { %v4479_v22 = vadd.f32 %v4478_v6, %v4477_v33  ;;  %v5296_v52 = vadd.f32 %v5295_v20, %v5294_v11  ;;  %v4828_v33 = vmul.f32 %v10824_v18, %v10824_v18  ;;  %v5313_v29 = vsel %vm771_vm0, %v4827_v34, 0.0  ;;  %v10831_v20 = vld [vmem:[#allocation67_spill] sm:$0xff] }
 0x471   : > { %v4504_v55 = vsel %vm771_vm0, %v10831_v20, 0.0 }
 0x472   : > { %v4481_v27 = vadd.f32 %v4480_v41, %v4479_v22  ;;  %v5298_v63 = vadd.f32 %v5297_v43, %v5296_v52  ;;  %v4829_v22 = vmul.f32 %v10825_v42, %v10825_v42  ;;  %v5315_v36 = vsel %vm771_vm0, %v4828_v33, 0.0  ;;  %v10832_v43 = vld [vmem:[#allocation70_spill] sm:$0xff] }
 0x473   : > { %v4506_v51 = vsel %vm771_vm0, %v10832_v43, 0.0 }
 0x474   : > { %v4483_v39 = vadd.f32 %v4482_v5, %v4481_v27  ;;  %v5300_v54 = vadd.f32 %v5299_v47, %v5298_v63  ;;  %v4830_v27 = vmul.f32 %v10826_v44, %v10826_v44  ;;  %v5317_v57 = vsel %vm771_vm0, %v4829_v22, 0.0  ;;  %v10833_v47 = vld [vmem:[#allocation73_spill] sm:$0xff] }
 0x475   : > { %v4508_v49 = vsel %vm771_vm0, %v10833_v47, 0.0 }
 0x476   : > { %v4485_v40 = vadd.f32 %v4484_v21, %v4483_v39  ;;  %v5302_v37 = vadd.f32 %v5301_v38, %v5300_v54  ;;  %v4831_v39 = vmul.f32 %v10827_v17, %v10827_v17  ;;  %v5319_v24 = vsel %vm771_vm0, %v4830_v27, 0.0  ;;  %v10834_v38 = vld [vmem:[#allocation76_spill] sm:$0xff] }
 0x477   : > { %v4510_v18 = vsel %vm771_vm0, %v10834_v38, 0.0 }
 0x478   : > { %v4487_v9 = vadd.f32 %v4486_v10, %v4485_v40  ;;  %v5304_v16 = vadd.f32 %v5303_v13, %v5302_v37  ;;  %v4832_v40 = vmul.f32 %v10828_v8, %v10828_v8  ;;  %v5321_v23 = vsel %vm771_vm0, %v4831_v39, 0.0  ;;  %v10835_v13 = vld [vmem:[#allocation79_spill] sm:$0xff] }
 0x479   : > { %v4512_v42 = vsel %vm771_vm0, %v10835_v13, 0.0 }
 0x47a   : > { %v4489_v14 = vadd.f32 %v4488_v15, %v4487_v9  ;;  %v5306_v2 = vadd.f32 %v5305_v7, %v5304_v16  ;;  %v4833_v9 = vmul.f32 %v10829_v48, %v10829_v48  ;;  %v5323_v53 = vsel %vm771_vm0, %v4832_v40, 0.0  ;;  %v10836_v7 = vld [vmem:[#allocation82_spill] sm:$0xff] }
 0x47b   : > { %v4514_v44 = vsel %vm771_vm0, %v10836_v7, 0.0 }
 0x47c   : > { %v4491_v28 = vadd.f32 %v4490_v19, %v4489_v14  ;;  %v5308_v6 = vadd.f32 %v5307_v62, %v5306_v2  ;;  %v4834_v14 = vmul.f32 %v10830_v59, %v10830_v59  ;;  %v5325_v0 = vsel %vm771_vm0, %v4833_v9, 0.0  ;;  %v10837_v62 = vld [vmem:[#allocation85_spill] sm:$0xff] }
 0x47d   : > { %v4516_v17 = vsel %vm771_vm0, %v10837_v62, 0.0 }
 0x47e   : > { %v4493_v56 = vadd.f32 %v4492_v50, %v4491_v28  ;;  %v5310_v41 = vadd.f32 %v5309_v3, %v5308_v6  ;;  %v4835_v28 = vmul.f32 %v10831_v20, %v10831_v20  ;;  %v5327_v1 = vsel %vm771_vm0, %v4834_v14, 0.0  ;;  %v10838_v3 = vld [vmem:[#allocation88_spill] sm:$0xff] }
 0x47f   : > { %v4518_v8 = vsel %vm771_vm0, %v10838_v3, 0.0 }
 0x480   : > { %v4495_v61 = vadd.f32 %v4494_v25, %v4493_v56  ;;  %v5312_v5 = vadd.f32 %v5311_v26, %v5310_v41  ;;  %v4836_v56 = vmul.f32 %v10832_v43, %v10832_v43  ;;  %v5329_v34 = vsel %vm771_vm0, %v4835_v28, 0.0  ;;  %v10839_v26 = vld [vmem:[#allocation91_spill] sm:$0xff] }
 0x481   : > { %v4520_v48 = vsel %vm771_vm0, %v10839_v26, 0.0 }
 0x482   : > { %v4497_v58 = vadd.f32 %v4496_v31, %v4495_v61  ;;  %v5314_v21 = vadd.f32 %v5313_v29, %v5312_v5  ;;  %v4837_v61 = vmul.f32 %v10833_v47, %v10833_v47  ;;  %v5331_v33 = vsel %vm771_vm0, %v4836_v56, 0.0  ;;  %v10840_v29 = vld [vmem:[#allocation94_spill] sm:$0xff] }
 0x483   : > { %v4522_v59 = vsel %vm771_vm0, %v10840_v29, 0.0 }
 0x484   : > { %v4499_v35 = vadd.f32 %v4498_v46, %v4497_v58  ;;  %v5316_v10 = vadd.f32 %v5315_v36, %v5314_v21  ;;  %v4838_v58 = vmul.f32 %v10834_v38, %v10834_v38  ;;  %v5333_v22 = vsel %vm771_vm0, %v4837_v61, 0.0  ;;  %v10841_v36 = vld [vmem:[#allocation97_spill] sm:$0xff] }
 0x485   : > { %v4524_v20 = vsel %vm771_vm0, %v10841_v36, 0.0 }
 0x486   : > { %v4501_v30 = vadd.f32 %v4500_v45, %v4499_v35  ;;  %v5318_v15 = vadd.f32 %v5317_v57, %v5316_v10  ;;  %v4839_v35 = vmul.f32 %v10835_v13, %v10835_v13  ;;  %v5335_v27 = vsel %vm771_vm0, %v4838_v58, 0.0  ;;  %v10842_v57 = vld [vmem:[#allocation100_spill] sm:$0xff] }
 0x487   : > { %v4526_v43 = vsel %vm771_vm0, %v10842_v57, 0.0 }
 0x488   : > { %v4503_v11 = vadd.f32 %v4502_v4, %v4501_v30  ;;  %v5320_v19 = vadd.f32 %v5319_v24, %v5318_v15  ;;  %v4840_v30 = vmul.f32 %v10836_v7, %v10836_v7  ;;  %v5337_v39 = vsel %vm771_vm0, %v4839_v35, 0.0  ;;  %v10843_v24 = vld [vmem:[#allocation103_spill] sm:$0xff] }
 0x489   : > { %v4528_v47 = vsel %vm771_vm0, %v10843_v24, 0.0 }
 0x48a   : > { %v4505_v52 = vadd.f32 %v4504_v55, %v4503_v11  ;;  %v5322_v50 = vadd.f32 %v5321_v23, %v5320_v19  ;;  %v4841_v11 = vmul.f32 %v10837_v62, %v10837_v62  ;;  %v5339_v40 = vsel %vm771_vm0, %v4840_v30, 0.0  ;;  %v10844_v23 = vld [vmem:[#allocation107_spill] sm:$0xff] }
 0x48b   : > { %v4530_v38 = vsel %vm771_vm0, %v10844_v23, 0.0 }
 0x48c   : > { %v4507_v63 = vadd.f32 %v4506_v51, %v4505_v52  ;;  %v5324_v25 = vadd.f32 %v5323_v53, %v5322_v50  ;;  %v4842_v52 = vmul.f32 %v10838_v3, %v10838_v3  ;;  %v5341_v9 = vsel %vm771_vm0, %v4841_v11, 0.0  ;;  %v10845_v53 = vld [vmem:[#allocation111_spill] sm:$0xff] }
 0x48d   : > { %v4532_v13 = vsel %vm771_vm0, %v10845_v53, 0.0 }
 0x48e   : > { %v4509_v54 = vadd.f32 %v4508_v49, %v4507_v63  ;;  %v5326_v31 = vadd.f32 %v5325_v0, %v5324_v25  ;;  %v4843_v63 = vmul.f32 %v10839_v26, %v10839_v26  ;;  %v5343_v14 = vsel %vm771_vm0, %v4842_v52, 0.0  ;;  %v10846_v0 = vld [vmem:[#allocation115_spill] sm:$0xff] }
 0x48f   : > { %v4534_v7 = vsel %vm771_vm0, %v10846_v0, 0.0 }
 0x490   : > { %v4511_v37 = vadd.f32 %v4510_v18, %v4509_v54  ;;  %v5328_v46 = vadd.f32 %v5327_v1, %v5326_v31  ;;  %v4844_v54 = vmul.f32 %v10840_v29, %v10840_v29  ;;  %v5345_v28 = vsel %vm771_vm0, %v4843_v63, 0.0  ;;  %v10847_v1 = vld [vmem:[#allocation119_spill] sm:$0xff] }
 0x491   : > { %v4536_v62 = vsel %vm771_vm0, %v10847_v1, 0.0 }
 0x492   : > { %v4513_v16 = vadd.f32 %v4512_v42, %v4511_v37  ;;  %v5330_v45 = vadd.f32 %v5329_v34, %v5328_v46  ;;  %v4845_v37 = vmul.f32 %v10841_v36, %v10841_v36  ;;  %v5347_v56 = vsel %vm771_vm0, %v4844_v54, 0.0  ;;  %v10848_v34 = vld [vmem:[#allocation123_spill] sm:$0xff] }
 0x493   : > { %v4538_v3 = vsel %vm771_vm0, %v10848_v34, 0.0 }
 0x494   : > { %v4515_v2 = vadd.f32 %v4514_v44, %v4513_v16  ;;  %v5332_v4 = vadd.f32 %v5331_v33, %v5330_v45  ;;  %v4846_v16 = vmul.f32 %v10842_v57, %v10842_v57  ;;  %v5349_v61 = vsel %vm771_vm0, %v4845_v37, 0.0  ;;  %v10849_v33 = vld [vmem:[#allocation127_spill] sm:$0xff] }
 0x495   : > { %v4540_v26 = vsel %vm771_vm0, %v10849_v33, 0.0 }
 0x496   : > { %v4517_v6 = vadd.f32 %v4516_v17, %v4515_v2  ;;  %v5334_v55 = vadd.f32 %v5333_v22, %v5332_v4  ;;  %v4847_v2 = vmul.f32 %v10843_v24, %v10843_v24  ;;  %v5351_v58 = vsel %vm771_vm0, %v4846_v16, 0.0  ;;  %v10850_v22 = vld [vmem:[#allocation131_spill] sm:$0xff] }
 0x497   : > { %v4542_v29 = vsel %vm771_vm0, %v10850_v22, 0.0 }
 0x498   : > { %v4519_v41 = vadd.f32 %v4518_v8, %v4517_v6  ;;  %v5336_v51 = vadd.f32 %v5335_v27, %v5334_v55  ;;  %v4848_v6 = vmul.f32 %v10844_v23, %v10844_v23  ;;  %v5353_v35 = vsel %vm771_vm0, %v4847_v2, 0.0  ;;  %v10851_v27 = vld [vmem:[#allocation135_spill] sm:$0xff] }
 0x499   : > { %v4544_v36 = vsel %vm771_vm0, %v10851_v27, 0.0 }
 0x49a   : > { %v4521_v5 = vadd.f32 %v4520_v48, %v4519_v41  ;;  %v5338_v49 = vadd.f32 %v5337_v39, %v5336_v51  ;;  %v4849_v41 = vmul.f32 %v10845_v53, %v10845_v53  ;;  %v5355_v30 = vsel %vm771_vm0, %v4848_v6, 0.0  ;;  %v10852_v39 = vld [vmem:[#allocation139_spill] sm:$0xff] }
 0x49b   : > { %v4546_v57 = vsel %vm771_vm0, %v10852_v39, 0.0 }
 0x49c   : > { %v4523_v21 = vadd.f32 %v4522_v59, %v4521_v5  ;;  %v5340_v18 = vadd.f32 %v5339_v40, %v5338_v49  ;;  %v4850_v5 = vmul.f32 %v10846_v0, %v10846_v0  ;;  %v5357_v11 = vsel %vm771_vm0, %v4849_v41, 0.0  ;;  %v10853_v40 = vld [vmem:[#allocation143_spill] sm:$0xff] }
 0x49d   : > { %v4548_v24 = vsel %vm771_vm0, %v10853_v40, 0.0 }
 0x49e   : > { %v4525_v10 = vadd.f32 %v4524_v20, %v4523_v21  ;;  %v5342_v42 = vadd.f32 %v5341_v9, %v5340_v18  ;;  %v4851_v21 = vmul.f32 %v10847_v1, %v10847_v1  ;;  %v5359_v52 = vsel %vm771_vm0, %v4850_v5, 0.0  ;;  %v10854_v9 = vld [vmem:[#allocation147_spill] sm:$0xff] }
 0x49f   : > { %v4550_v23 = vsel %vm771_vm0, %v10854_v9, 0.0 }
 0x4a0   : > { %v4527_v15 = vadd.f32 %v4526_v43, %v4525_v10  ;;  %v5344_v44 = vadd.f32 %v5343_v14, %v5342_v42  ;;  %v4852_v10 = vmul.f32 %v10848_v34, %v10848_v34  ;;  %v5361_v63 = vsel %vm771_vm0, %v4851_v21, 0.0  ;;  %v10855_v14 = vld [vmem:[#allocation151_spill] sm:$0xff] }
 0x4a1   : > { %v4552_v53 = vsel %vm771_vm0, %v10855_v14, 0.0 }
 0x4a2   : > { %v4529_v19 = vadd.f32 %v4528_v47, %v4527_v15  ;;  %v5346_v17 = vadd.f32 %v5345_v28, %v5344_v44  ;;  %v4853_v15 = vmul.f32 %v10849_v33, %v10849_v33  ;;  %v5363_v54 = vsel %vm771_vm0, %v4852_v10, 0.0  ;;  %v10856_v28 = vld [vmem:[#allocation155_spill] sm:$0xff] }
 0x4a3   : > { %v4554_v0 = vsel %vm771_vm0, %v10856_v28, 0.0 }
 0x4a4   : > { %v4531_v50 = vadd.f32 %v4530_v38, %v4529_v19  ;;  %v5348_v8 = vadd.f32 %v5347_v56, %v5346_v17  ;;  %v4854_v19 = vmul.f32 %v10850_v22, %v10850_v22  ;;  %v5365_v37 = vsel %vm771_vm0, %v4853_v15, 0.0  ;;  %v10857_v56 = vld [vmem:[#allocation159_spill] sm:$0xff] }
 0x4a5   : > { %v4556_v1 = vsel %vm771_vm0, %v10857_v56, 0.0 }
 0x4a6   : > { %v4533_v25 = vadd.f32 %v4532_v13, %v4531_v50  ;;  %v5350_v48 = vadd.f32 %v5349_v61, %v5348_v8  ;;  %v4855_v50 = vmul.f32 %v10851_v27, %v10851_v27  ;;  %v5367_v16 = vsel %vm771_vm0, %v4854_v19, 0.0  ;;  %v10858_v61 = vld [vmem:[#allocation163_spill] sm:$0xff] }
 0x4a7   : > { %v4558_v34 = vsel %vm771_vm0, %v10858_v61, 0.0 }
 0x4a8   : > { %v4535_v31 = vadd.f32 %v4534_v7, %v4533_v25  ;;  %v5352_v59 = vadd.f32 %v5351_v58, %v5350_v48  ;;  %v4856_v25 = vmul.f32 %v10852_v39, %v10852_v39  ;;  %v5369_v2 = vsel %vm771_vm0, %v4855_v50, 0.0  ;;  %v10859_v58 = vld [vmem:[#allocation167_spill] sm:$0xff] }
 0x4a9   : > { %v4560_v33 = vsel %vm771_vm0, %v10859_v58, 0.0 }
 0x4aa   : > { %v4537_v46 = vadd.f32 %v4536_v62, %v4535_v31  ;;  %v5354_v20 = vadd.f32 %v5353_v35, %v5352_v59  ;;  %v4857_v31 = vmul.f32 %v10853_v40, %v10853_v40  ;;  %v5371_v6 = vsel %vm771_vm0, %v4856_v25, 0.0  ;;  %v10860_v35 = vld [vmem:[#allocation171_spill] sm:$0xff] }
 0x4ab   : > { %v4562_v22 = vsel %vm771_vm0, %v10860_v35, 0.0 }
 0x4ac   : > { %v4539_v45 = vadd.f32 %v4538_v3, %v4537_v46  ;;  %v5356_v43 = vadd.f32 %v5355_v30, %v5354_v20  ;;  %v4858_v46 = vmul.f32 %v10854_v9, %v10854_v9  ;;  %v5373_v41 = vsel %vm771_vm0, %v4857_v31, 0.0  ;;  %v10861_v30 = vld [vmem:[#allocation175_spill] sm:$0xff] }
 0x4ad   : > { %v4564_v27 = vsel %vm771_vm0, %v10861_v30, 0.0 }
 0x4ae   : > { %v4541_v4 = vadd.f32 %v4540_v26, %v4539_v45  ;;  %v5358_v47 = vadd.f32 %v5357_v11, %v5356_v43  ;;  %v4859_v45 = vmul.f32 %v10855_v14, %v10855_v14  ;;  %v5375_v5 = vsel %vm771_vm0, %v4858_v46, 0.0  ;;  %v10862_v11 = vld [vmem:[#allocation178_spill] sm:$0xff] }
 0x4af   : > { %v4566_v39 = vsel %vm771_vm0, %v10862_v11, 0.0 }
 0x4b0   : > { %v4543_v55 = vadd.f32 %v4542_v29, %v4541_v4  ;;  %v5360_v38 = vadd.f32 %v5359_v52, %v5358_v47  ;;  %v4860_v4 = vmul.f32 %v10856_v28, %v10856_v28  ;;  %v5377_v21 = vsel %vm771_vm0, %v4859_v45, 0.0  ;;  %v10863_v52 = vld [vmem:[#allocation181_spill] sm:$0xff] }
 0x4b1   : > { %v4568_v40 = vsel %vm771_vm0, %v10863_v52, 0.0 }
 0x4b2   : > { %v4545_v51 = vadd.f32 %v4544_v36, %v4543_v55  ;;  %v5362_v13 = vadd.f32 %v5361_v63, %v5360_v38  ;;  %v4861_v55 = vmul.f32 %v10857_v56, %v10857_v56  ;;  %v5379_v10 = vsel %vm771_vm0, %v4860_v4, 0.0  ;;  %v10864_v63 = vld [vmem:[#allocation184_spill] sm:$0xff] }
 0x4b3   : > { %v4570_v9 = vsel %vm771_vm0, %v10864_v63, 0.0 }
 0x4b4   : > { %v4547_v49 = vadd.f32 %v4546_v57, %v4545_v51  ;;  %v5364_v7 = vadd.f32 %v5363_v54, %v5362_v13  ;;  %v4862_v51 = vmul.f32 %v10858_v61, %v10858_v61  ;;  %v5381_v15 = vsel %vm771_vm0, %v4861_v55, 0.0  ;;  %v10865_v54 = vld [vmem:[#allocation187_spill] sm:$0xff] }
 0x4b5   : > { %v4572_v14 = vsel %vm771_vm0, %v10865_v54, 0.0 }
 0x4b6   : > { %v4549_v18 = vadd.f32 %v4548_v24, %v4547_v49  ;;  %v5366_v62 = vadd.f32 %v5365_v37, %v5364_v7  ;;  %v4863_v49 = vmul.f32 %v10859_v58, %v10859_v58  ;;  %v5383_v19 = vsel %vm771_vm0, %v4862_v51, 0.0  ;;  %v10866_v37 = vld [vmem:[#allocation190_spill] sm:$0xff] }
 0x4b7   : > { %v4574_v28 = vsel %vm771_vm0, %v10866_v37, 0.0 }
 0x4b8   : > { %v4551_v42 = vadd.f32 %v4550_v23, %v4549_v18  ;;  %v5368_v3 = vadd.f32 %v5367_v16, %v5366_v62  ;;  %v4864_v18 = vmul.f32 %v10860_v35, %v10860_v35  ;;  %v5385_v50 = vsel %vm771_vm0, %v4863_v49, 0.0  ;;  %v10867_v16 = vld [vmem:[#allocation194_spill] sm:$0xff] }
 0x4b9   : > { %v4576_v56 = vsel %vm771_vm0, %v10867_v16, 0.0 }
 0x4ba   : > { %v4553_v44 = vadd.f32 %v4552_v53, %v4551_v42  ;;  %v5370_v26 = vadd.f32 %v5369_v2, %v5368_v3  ;;  %v4865_v42 = vmul.f32 %v10861_v30, %v10861_v30  ;;  %v5387_v25 = vsel %vm771_vm0, %v4864_v18, 0.0  ;;  %v10868_v2 = vld [vmem:[#allocation198_spill] sm:$0xff] }
 0x4bb   : > { %v4578_v61 = vsel %vm771_vm0, %v10868_v2, 0.0 }
 0x4bc   : > { %v4555_v17 = vadd.f32 %v4554_v0, %v4553_v44  ;;  %v5372_v29 = vadd.f32 %v5371_v6, %v5370_v26  ;;  %v4866_v44 = vmul.f32 %v10862_v11, %v10862_v11  ;;  %v5389_v31 = vsel %vm771_vm0, %v4865_v42, 0.0  ;;  %v10869_v6 = vld [vmem:[#allocation202_spill] sm:$0xff] }
 0x4bd   : > { %v4580_v58 = vsel %vm771_vm0, %v10869_v6, 0.0 }
 0x4be   : > { %v4557_v8 = vadd.f32 %v4556_v1, %v4555_v17  ;;  %v5374_v36 = vadd.f32 %v5373_v41, %v5372_v29  ;;  %v4867_v17 = vmul.f32 %v10863_v52, %v10863_v52  ;;  %v5391_v46 = vsel %vm771_vm0, %v4866_v44, 0.0  ;;  %v10870_v41 = vld [vmem:[#allocation206_spill] sm:$0xff] }
 0x4bf   : > { %v4582_v35 = vsel %vm771_vm0, %v10870_v41, 0.0 }
 0x4c0   : > { %v4559_v48 = vadd.f32 %v4558_v34, %v4557_v8  ;;  %v5376_v57 = vadd.f32 %v5375_v5, %v5374_v36  ;;  %v4868_v8 = vmul.f32 %v10864_v63, %v10864_v63  ;;  %v5393_v45 = vsel %vm771_vm0, %v4867_v17, 0.0  ;;  %v10871_v5 = vld [vmem:[#allocation210_spill] sm:$0xff] }
 0x4c1   : > { %v4584_v30 = vsel %vm771_vm0, %v10871_v5, 0.0  ;;  %v4598_v17 = vsel %vm771_vm0, %v8741_v60, 0.0 }
 0x4c2   : > { %v4561_v59 = vadd.f32 %v4560_v33, %v4559_v48  ;;  %v5378_v24 = vadd.f32 %v5377_v21, %v5376_v57  ;;  %v4869_v48 = vmul.f32 %v10865_v54, %v10865_v54  ;;  %v5395_v4 = vsel %vm771_vm0, %v4868_v8, 0.0  ;;  %v10872_v21 = vld [vmem:[#allocation214_spill] sm:$0xff] }
 0x4c3   : > { %v4586_v11 = vsel %vm771_vm0, %v10872_v21, 0.0 }
 0x4c4   : > { %v4563_v20 = vadd.f32 %v4562_v22, %v4561_v59  ;;  %v5380_v23 = vadd.f32 %v5379_v10, %v5378_v24  ;;  %v4870_v59 = vmul.f32 %v10866_v37, %v10866_v37  ;;  %v5397_v55 = vsel %vm771_vm0, %v4869_v48, 0.0  ;;  %v10873_v10 = vld [vmem:[#allocation218_spill] sm:$0xff] }
 0x4c5   : > { %v4588_v52 = vsel %vm771_vm0, %v10873_v10, 0.0 }
 0x4c6   : > { %v4565_v43 = vadd.f32 %v4564_v27, %v4563_v20  ;;  %v5382_v53 = vadd.f32 %v5381_v15, %v5380_v23  ;;  %v4871_v20 = vmul.f32 %v10867_v16, %v10867_v16  ;;  %v5399_v51 = vsel %vm771_vm0, %v4870_v59, 0.0  ;;  %v10874_v15 = vld [vmem:[#allocation222_spill] sm:$0xff] }
 0x4c7   : > { %v4590_v63 = vsel %vm771_vm0, %v10874_v15, 0.0 }
 0x4c8   : > { %v4567_v47 = vadd.f32 %v4566_v39, %v4565_v43  ;;  %v5384_v0 = vadd.f32 %v5383_v19, %v5382_v53  ;;  %v4872_v43 = vmul.f32 %v10868_v2, %v10868_v2  ;;  %v5401_v49 = vsel %vm771_vm0, %v4871_v20, 0.0  ;;  %v10875_v19 = vld [vmem:[#allocation225_spill] sm:$0xff] }
 0x4c9   : > { %v4592_v54 = vsel %vm771_vm0, %v10875_v19, 0.0  ;;  %v4883_v20 = vmul.f32 %v8759_v32, %v8759_v32 }
 0x4ca   : > { %v4569_v38 = vadd.f32 %v4568_v40, %v4567_v47  ;;  %v5386_v1 = vadd.f32 %v5385_v50, %v5384_v0  ;;  %v4873_v47 = vmul.f32 %v10869_v6, %v10869_v6  ;;  %v5403_v18 = vsel %vm771_vm0, %v4872_v43, 0.0  ;;  %v10876_v50 = vld [vmem:[#allocation228_spill] sm:$0xff]  ;;  %v4058_v43 = vld [vmem:[%s8766_s7] sm:$0x1] }
 0x4cb   : > { %v4594_v37 = vsel %vm771_vm0, %v10876_v50, 0.0  ;;  %v4879_v6 = vmul.f32 %v10875_v19, %v10875_v19  ;;  %v4880_v48 = vmul.f32 %v10876_v50, %v10876_v50 }
 0x4cc   : > { %v4571_v13 = vadd.f32 %v4570_v9, %v4569_v38  ;;  %v5388_v34 = vadd.f32 %v5387_v25, %v5386_v1  ;;  %v4874_v38 = vmul.f32 %v10870_v41, %v10870_v41  ;;  %v5405_v42 = vsel %vm771_vm0, %v4873_v47, 0.0 }
 0x4cd   : > { %v4596_v25 = vsel %vm771_vm0, %v8713_v12, 0.0  ;;  %v4877_v1 = vmul.f32 %v10873_v10, %v10873_v10 }
 0x4ce   : > { %v4573_v7 = vadd.f32 %v4572_v14, %v4571_v13  ;;  %v5390_v33 = vadd.f32 %v5389_v31, %v5388_v34  ;;  %v4875_v13 = vmul.f32 %v10871_v5, %v10871_v5  ;;  %v5407_v44 = vsel %vm771_vm0, %v4874_v38, 0.0 }
 0x4cf   : > { %v4882_v5 = vmul.f32 %v8741_v60, %v8741_v60 }
 0x4d0   : > { %v4575_v62 = vadd.f32 %v4574_v28, %v4573_v7  ;;  %v5392_v22 = vadd.f32 %v5391_v46, %v5390_v33  ;;  %v4876_v7 = vmul.f32 %v10872_v21, %v10872_v21 }
 0x4d2   : > { %v4577_v3 = vadd.f32 %v4576_v56, %v4575_v62  ;;  %v5394_v27 = vadd.f32 %v5393_v45, %v5392_v22  ;;  %v5409_v62 = vsel %vm771_vm0, %v4875_v13, 0.0  ;;  %v5411_v34 = vsel %vm771_vm0, %v4876_v7, 0.0 }
 0x4d3   : > { %v4881_v22 = vmul.f32 %v8713_v12, %v8713_v12 }
 0x4d4   : > { %v4579_v26 = vadd.f32 %v4578_v61, %v4577_v3  ;;  %v5396_v39 = vadd.f32 %v5395_v4, %v5394_v27  ;;  %v4878_v61 = vmul.f32 %v10874_v15, %v10874_v15  ;;  %v4600_v3 = vsel %vm771_vm0, %v8759_v32, 0.0 }
 0x4d6   : > { %v4581_v29 = vadd.f32 %v4580_v58, %v4579_v26  ;;  %v5398_v40 = vadd.f32 %v5397_v55, %v5396_v39  ;;  %v5413_v58 = vsel %vm771_vm0, %v4877_v1, 0.0  ;;  %v5415_v45 = vsel %vm771_vm0, %v4878_v61, 0.0 }
 0x4d7   : > { %v5421_v55 = vsel %vm771_vm0, %v4881_v22, 0.0 }
 0x4d8   : > { %v4583_v36 = vadd.f32 %v4582_v35, %v4581_v29  ;;  %v5400_v9 = vadd.f32 %v5399_v51, %v5398_v40  ;;  %v5417_v29 = vsel %vm771_vm0, %v4879_v6, 0.0 }
 0x4da   : > { %v4585_v57 = vadd.f32 %v4584_v30, %v4583_v36  ;;  %v5402_v14 = vadd.f32 %v5401_v49, %v5400_v9  ;;  %v5419_v30 = vsel %vm771_vm0, %v4880_v48, 0.0 }
 0x4dc   : > { %v4587_v24 = vadd.f32 %v4586_v11, %v4585_v57  ;;  %v5404_v28 = vadd.f32 %v5403_v18, %v5402_v14  ;;  %v5423_v11 = vsel %vm771_vm0, %v4882_v5, 0.0  ;;  %v5425_v57 = vsel %vm771_vm0, %v4883_v20, 0.0 }
 0x4de   : > { %v4589_v23 = vadd.f32 %v4588_v52, %v4587_v24  ;;  %v5406_v16 = vadd.f32 %v5405_v42, %v5404_v28 }
 0x4e0   : > { %v4591_v53 = vadd.f32 %v4590_v63, %v4589_v23  ;;  %v5408_v31 = vadd.f32 %v5407_v44, %v5406_v16 }
 0x4e2   : > { %v4593_v0 = vadd.f32 %v4592_v54, %v4591_v53  ;;  %v5410_v8 = vadd.f32 %v5409_v62, %v5408_v31 }
 0x4e4   : > { %v4595_v56 = vadd.f32 %v4594_v37, %v4593_v0  ;;  %v5412_v33 = vadd.f32 %v5411_v34, %v5410_v8 }
 0x4e6   : > { %v4597_v2 = vadd.f32 %v4596_v25, %v4595_v56  ;;  %v5414_v41 = vadd.f32 %v5413_v58, %v5412_v33 }
 0x4e8   : > { %v4599_v46 = vadd.f32 %v4598_v17, %v4597_v2  ;;  %v5416_v59 = vadd.f32 %v5415_v45, %v5414_v41 }
 0x4ea   : > { %v4601_v26 = vadd.f32 %v4600_v3, %v4599_v46  ;;  %v5418_v27 = vadd.f32 %v5417_v29, %v5416_v59 }
 0x4ec   : > { %v4602_v35 = vrot.slane %v4601_v26, 4  ;;  %v5420_v21 = vadd.f32 %v5419_v30, %v5418_v27 }
 0x4ee   : > { %v4603_v4 = vadd.f32 %v4602_v35, %v4601_v26  ;;  %v5422_v39 = vadd.f32 %v5421_v55, %v5420_v21 }
 0x4f0   : > { %v4604_v36 = vrot.slane %v4603_v4, 2  ;;  %v5424_v51 = vadd.f32 %v5423_v11, %v5422_v39 }
 0x4f2   : > { %v4605_v12 = vadd.f32 %v4604_v36, %v4603_v4  ;;  %v5426_v10 = vadd.f32 %v5425_v57, %v5424_v51 }
 0x4f4   : > { %v4606_v60 = vrot.slane %v4605_v12, 1  ;;  %v5427_v40 = vrot.slane %v5426_v10, 4 }
 0x4f6   : > { %v4607_v32 = vadd.f32 %v4606_v60, %v4605_v12  ;;  %v5428_v24 = vadd.f32 %v5427_v40, %v5426_v10 }
 0x4f8   : > { %v4608_v52 = vadd.f32 %v4607_v32, %v4058_v43 }
 0x4fa   : > { %4610 = vst.msk [vmem:[%s8766_s7] sm:$0x1] %vm4609_vm1, %v4608_v52 }
 0x4fb   : > { %5926 = shalt.err (!%p5923_p7)
}
 0x4fc   : > { %5817 = dma.vmem_to_hbm [thread:$0]  (%p6107_p3), %s5470_s12, 16, %s5472_s13, %s5447_s15   ;;  %v5429_v47 = vrot.slane %v5428_v24, 2  ;;  %v4611_v63 = vld [vmem:[%s8769_s8] sm:$0x1] }
 0x4fd   : > { %s5482_s16 = scalar_lea.hbm %s10205_s5, %s6013_s22  ;;  %s5484_s26 = sshll.u32 %s8769_s8, 4  ;;  %s5485_s26 = int_to_ptr.vmem [resolvable:$true] %s5484_s26 }
 0x4fe   : > { %v5430_v49 = vadd.f32 %v5429_v47, %v5428_v24  ;;  %s5486_s27 = sshll.u32 %s5482_s16, 4  ;;  %s5451_s21 = scalar_lea.sflag [#allocation5], %s6128_s10  ;;  %s5487_s27 = int_to_ptr.hbm [resolvable:$true] %s5486_s27 }
 0x4ff   : > { %s5941_s17 = sshra.s32 %s5487_s27, 4  ;;  %s5947_s15 = scalar_lea.hbm %s10205_s5, 2  ;;  %s5942_s17 = int_to_ptr.hbm [resolvable:$true] %s5941_s17 }
 0x500   : > { %v5431_v15 = vrot.slane %v5430_v49, 1  ;;  %s5943_s12 = scalar_lea.hbm %s5942_s17, 1  ;;  %p5948_p12 = scmp.lt.s32.totalorder %s5942_s17, %s10205_s5 }
 0x501   : > { %p5944_p8 = scmp.ne.s32.totalorder %s5942_s17, %s5943_s12  ;;  %p5949_p13 = scmp.lt.s32.totalorder %s5947_s15, %s5943_s12 }
 0x502   : > { %v5432_v9 = vadd.f32 %v5431_v15, %v5430_v49 }
 0x503   : > { %p5945_p10 = pnand %p5944_p8, %p6107_p3  ;;  %p5950_p0 = por %p5949_p13, %p5948_p12 }
 0x504   : > { %v5433_v23 = vadd.f32 %v5432_v9, %v4611_v63 }
 0x505   : > { %p5946_p11 = pneg %p5945_p10 }
 0x506   : > { %5434 = vst.msk [vmem:[%s8769_s8] sm:$0x1] %vm4609_vm1, %v5433_v23 }
 0x507   : > { %p5951_p1 = pnand %p5950_p0, %p5946_p11 }
 0x509   : > { %5954 = shalt.err (!%p5951_p1)
}
 0x50a   : > { %5818 = dma.vmem_to_hbm [thread:$0]  (%p6107_p3), %s5485_s26, 16, %s5487_s27, %s5451_s21  }
 0x50b PF: > { %p5828_p2 = scmp.ge.s32.totalorder %s6025_s25, 2  ;;  %s5512_s10 = sand.u32 1, %s5997_s18  }
 0x50c   : > { %s5513_s8 = scalar_lea.sflag [#allocation3], %s5512_s10 }
 0x50d   : > { %p5822_p4 = pnand %p5828_p2, %p6117_p9 }
 0x50f   : > { %p5823_p5 = pneg %p5822_p4 }
 0x511   : > { %5988 = dma.done.wait (%p5823_p5), %s5513_s8, 16  }
 0x512   : > { %5990 = vsyncadd (%p5823_p5), %s5513_s8, 4294967280  ;;  %s5522_s14 = scalar_lea.sflag [#allocation5], %s5512_s10 }
 0x513   : > { %5992 = dma.done.wait (%p5823_p5), %s5522_s14, 16  }
 0x514   : > { %5994 = vsyncadd (%p5823_p5), %s5522_s14, 4294967280  ;;  %s22_s25 = sadd.s32 1, %s6025_s25   ;;  %s10877_s18 = smov %s6001_s19 }
 0x515   : > { %p19_p6 = scmp.ge.s32.totalorder %s22_s25, 6   ;;  %s10878_s19 = smov %s6005_s20 }
 0x516   : > { %s10879_s20 = smov %s6125_s9  ;;  %s10880_s21 = smov %s6017_s23 }
 0x517   : > { %s10881_s22 = smov %s6021_s24  ;;  %s10882_s23 = smov %s10885_s28 }
 0x518   : > { %s10883_s24 = smov %s10889_s29  ;;  %21 = sbr.rel (!%p19_p6) target bundleno = 7 (0x7), region = 100 }
 0x51d   :  { %5527 = vsyncpa [#allocation3], 1 }
 0x51e   :  { %5529 = vsyncpa [#allocation3 + $0x1], 1 }
 0x51f   :  { %5530 = vsyncpa [#allocation5], 1 }
 0x520   :  { %5532 = vsyncpa [#allocation5 + $0x1], 1 }

</bundles_post_ra>
